<compile_context>
chip_gen: v7x
topology: tpu7x:2x2x1
jax: 0.10.0
libtpu: 0.0.40
codegen_flags: <defaults>
</compile_context>

<pallas_src>
import functools

import numpy as np
import jax
import jax.numpy as jnp
from jax.experimental import pallas as pl
from jax.experimental.pallas import tpu as pltpu

NEG_SLOPE = 0.01   # nn.LeakyReLU default negative_slope
NUM_LAYERS = 4
C = 256            # channel count fixed by the module


# --------------------------- static conv geometry ----------------------------

def _reflect(i, n):
    if i < 0:
        return -i
    if i >= n:
        return 2 * n - 2 - i
    return i


def _conv_out(h):
    # kernel 3, stride 2, padding 1
    return (h + 2 - 3) // 2 + 1


def _round_up(x, m):
    return (x + m - 1) // m * m


def _build_geometry(n, h, w):
    """One-hot tap-selection matrices (per layer) + pooling matrix, in numpy.

    Activations are kept flattened as (rows = N*H*W, C).  For layer l,
    T_l[k*rpad + out_row, in_row] = 1 selects (with reflection padding baked in)
    the input pixel feeding tap k of output pixel `out_row`.
    """
    taps, shapes = [], []
    for _ in range(NUM_LAYERS):
        ho, wo = _conv_out(h), _conv_out(w)
        r_in, r_out = n * h * w, n * ho * wo
        rpad = _round_up(max(r_out, 8), 8)   # sublane-aligned tap blocks
        t = np.zeros((9 * rpad, r_in), np.float32)
        for k in range(9):
            ky, kx = divmod(k, 3)
            for b in range(n):
                for oy in range(ho):
                    for ox in range(wo):
                        iy = _reflect(2 * oy + ky - 1, h)
                        ix = _reflect(2 * ox + kx - 1, w)
                        t[k * rpad + (b * ho + oy) * wo + ox,
                          (b * h + iy) * w + ix] = 1.0
        taps.append(t)
        shapes.append((r_out, rpad))
        h, w = ho, wo
    # AdaptiveAvgPool2d(1) over the final (h, w) grid, per image.
    s = h * w
    pool = np.zeros((n, n * s), np.float32)
    for b in range(n):
        pool[b, b * s:(b + 1) * s] = 1.0 / s
    return taps, shapes, pool


# -------------------------------- Pallas kernel -------------------------------

def _dis_content_kernel(shapes,
                        a_ref, t1_ref, t2_ref, t3_ref, t4_ref,
                        w_ref, b_ref, pool_ref, hw_ref, hb_ref, o_ref):
    t_refs = (t1_ref, t2_ref, t3_ref, t4_ref)

    act_bf = a_ref[...]                                     # (R0, C) bf16
    act_f32 = None
    for layer in range(NUM_LAYERS):
        r_out, rpad = shapes[layer]
        # Gather all 9 (reflection-padded, stride-2) taps with one MXU matmul.
        taps = jnp.dot(t_refs[layer][...], act_bf,
                       preferred_element_type=jnp.float32)  # (9*rpad, C) f32
        y = None
        for k in range(9):
            tap = taps[k * rpad:k * rpad + r_out, :].astype(jnp.bfloat16)
            wk = w_ref[layer * 9 + k]                       # (C, C) bf16
            d = jnp.dot(tap, wk, preferred_element_type=jnp.float32)
            y = d if y is None else y + d
        y = y + b_ref[layer]                                # (r_out, C) + (1, C)
        y = jnp.where(y >= 0.0, y, NEG_SLOPE * y)           # LeakyReLU(0.01)
        act_f32 = y
        act_bf = y.astype(jnp.bfloat16)

    # Head: AdaptiveAvgPool2d(1) (pooling matmul) + Conv2d(256, 1, k=1).
    pooled = jnp.dot(pool_ref[...], act_f32,
                     preferred_element_type=jnp.float32)    # (N, C)
    out = jnp.sum(pooled * hw_ref[...], axis=1, keepdims=True) + hb_ref[...]
    o_ref[...] = out.astype(o_ref.dtype)


def _vmem_spec(shape):
    nd = len(shape)
    return pl.BlockSpec(shape, lambda i, _nd=nd: (0,) * _nd)


# -------------------------------- forward wrapper ------------------------------

def dis_content_forward(x_nchw, params):
    n, c, h, w = x_nchw.shape
    assert c == C
    taps_np, shapes, pool_np = _build_geometry(n, h, w)

    # Flattened, lane-dense bf16 activation: rows = N*H*W, lanes = C.
    a = jnp.transpose(x_nchw, (0, 2, 3, 1)).reshape(n * h * w, c)
    a = a.astype(jnp.bfloat16)

    t_args = [jnp.asarray(t, jnp.bfloat16) for t in taps_np]
    # (36, C, C): layer-major, tap order (ky*3 + kx) matches HWIO reshape.
    w_all = jnp.concatenate(
        [wl.astype(jnp.bfloat16).reshape(9, C, C) for (wl, _) in params["convs"]],
        axis=0)
    b_all = jnp.stack(
        [bl.astype(jnp.float32).reshape(1, C) for (_, bl) in params["convs"]],
        axis=0)                                             # (4, 1, C)
    pool = jnp.asarray(pool_np, jnp.float32)                # (N, N*S)
    hw = params["head_w"].astype(jnp.float32).reshape(1, C)
    hb = params["head_b"].astype(jnp.float32).reshape(1, 1)

    args = (a, *t_args, w_all, b_all, pool, hw, hb)
    kernel = functools.partial(_dis_content_kernel, tuple(shapes))

    out = pl.pallas_call(
        kernel,
        out_shape=jax.ShapeDtypeStruct((n, 1), jnp.float32),
        grid=(1,),
        in_specs=[_vmem_spec(arg.shape) for arg in args],
        out_specs=_vmem_spec((n, 1)),
        compiler_params=pltpu.CompilerParams(
            vmem_limit_bytes=32 * 1024 * 1024),
    )(*args)
    return out.reshape(-1)


# ------------------------------ params & reference -----------------------------

def init_params(key, c=C):
    ks = jax.random.split(key, 2 * NUM_LAYERS + 2)
    convs = []
    for i in range(NUM_LAYERS):
        w = (jax.random.normal(ks[2 * i], (3, 3, c, c), jnp.float32) * 0.02)
        w = w.astype(jnp.bfloat16)        # weights stored in bf16 (perf review)
        b = jax.random.normal(ks[2 * i + 1], (c,), jnp.float32) * 0.02
        convs.append((w, b))
    head_w = jax.random.normal(ks[-2], (c, 1), jnp.float32) * 0.02
    head_b = jax.random.normal(ks[-1], (1,), jnp.float32) * 0.02
    return {"convs": convs, "head_w": head_w, "head_b": head_b}


def reference_forward(x_nchw, params):
    """Pure-JAX reference (lax.conv, f32 math, same bf16-stored weights)."""
    x = jnp.transpose(x_nchw, (0, 2, 3, 1))
    x = x.astype(jnp.bfloat16).astype(jnp.float32)   # same input rounding as kernel
    for (w, b) in params["convs"]:
        xp = jnp.pad(x, ((0, 0), (1, 1), (1, 1), (0, 0)), mode="reflect")
        y = jax.lax.conv_general_dilated(
            xp, w.astype(jnp.float32), window_strides=(2, 2), padding="VALID",
            dimension_numbers=("NHWC", "HWIO", "NHWC"),
            precision=jax.lax.Precision.HIGHEST)
        y = y + b
        x = jnp.where(y >= 0, y, NEG_SLOPE * y)
    pooled = jnp.mean(x, axis=(1, 2))                         # (N, C)
    out = pooled @ params["head_w"] + params["head_b"]        # (N, 1)
    return out.reshape(-1)


# ------------------------------------ main --------------------------------------

if __name__ == "__main__":
    key = jax.random.PRNGKey(0)
    k_x, k_p = jax.random.split(key)

    N, H, W = 2, 16, 16          # channels fixed at 256 by the module
    x = jax.random.normal(k_x, (N, C, H, W), jnp.float32)
    params = init_params(k_p)

    out = jax.block_until_ready(dis_content_forward(x, params))
    assert out.shape == (N,), out.shape

    ref = jax.block_until_ready(reference_forward(x, params))
    assert jnp.allclose(out, ref, rtol=2e-2, atol=2e-2), (out, ref)

    print("KERNEL_OK")
</pallas_src>

<mosaic_0001>
module attributes {stable_mosaic.version = 11 : i64} {
  func.func @_dis_content_kernel(%arg0: i32, %arg1: memref<512x256xbf16, #tpu.memory_space<vmem>>, %arg2: memref<1152x512xbf16, #tpu.memory_space<vmem>>, %arg3: memref<288x128xbf16, #tpu.memory_space<vmem>>, %arg4: memref<72x32xbf16, #tpu.memory_space<vmem>>, %arg5: memref<72x8xbf16, #tpu.memory_space<vmem>>, %arg6: memref<36x256x256xbf16, #tpu.memory_space<vmem>>, %arg7: memref<4x1x256xf32, #tpu.memory_space<vmem>>, %arg8: memref<2x2xf32, #tpu.memory_space<vmem>>, %arg9: memref<1x256xf32, #tpu.memory_space<vmem>>, %arg10: memref<1x1xf32, #tpu.memory_space<vmem>>, %arg11: memref<2x1xf32, #tpu.memory_space<vmem>>) attributes {dimension_semantics = [#tpu.dimension_semantics<arbitrary>], iteration_bounds = array<i64: 1>, scalar_prefetch = 0 : i64, scratch_operands = 0 : i64, tpu.core_type = #tpu.core_type<tc>, window_params = [{pipeline_mode = #tpu.pipeline_mode<synchronous>, transform_indices = @transform_0, window_bounds = array<i64: 512, 256>}, {pipeline_mode = #tpu.pipeline_mode<synchronous>, transform_indices = @transform_1, window_bounds = array<i64: 1152, 512>}, {pipeline_mode = #tpu.pipeline_mode<synchronous>, transform_indices = @transform_2, window_bounds = array<i64: 288, 128>}, {pipeline_mode = #tpu.pipeline_mode<synchronous>, transform_indices = @transform_3, window_bounds = array<i64: 72, 32>}, {pipeline_mode = #tpu.pipeline_mode<synchronous>, transform_indices = @transform_4, window_bounds = array<i64: 72, 8>}, {pipeline_mode = #tpu.pipeline_mode<synchronous>, transform_indices = @transform_5, window_bounds = array<i64: 36, 256, 256>}, {pipeline_mode = #tpu.pipeline_mode<synchronous>, transform_indices = @transform_6, window_bounds = array<i64: 4, 1, 256>}, {pipeline_mode = #tpu.pipeline_mode<synchronous>, transform_indices = @transform_7, window_bounds = array<i64: 2, 2>}, {pipeline_mode = #tpu.pipeline_mode<synchronous>, transform_indices = @transform_8, window_bounds = array<i64: 1, 256>}, {pipeline_mode = #tpu.pipeline_mode<synchronous>, transform_indices = @transform_9, window_bounds = array<i64: 1, 1>}, {pipeline_mode = #tpu.pipeline_mode<synchronous>, transform_indices = @transform_10, window_bounds = array<i64: 2, 1>}]} {
    %c0 = arith.constant 0 : index
    %c0_0 = arith.constant 0 : index
    %0 = vector.load %arg1[%c0, %c0_0] : memref<512x256xbf16, #tpu.memory_space<vmem>>, vector<512x256xbf16>
    %c0_1 = arith.constant 0 : index
    %c0_2 = arith.constant 0 : index
    %1 = vector.load %arg2[%c0_1, %c0_2] : memref<1152x512xbf16, #tpu.memory_space<vmem>>, vector<1152x512xbf16>
    %cst = arith.constant dense<0.000000e+00> : vector<1152x256xf32>
    %2 = tpu.matmul %1, %0, %cst {dimension_numbers = #tpu.dot_dimension_numbers<[1], [0], [0], [1], [0, 0, 1, 1], [], []>} : vector<1152x512xbf16>, vector<512x256xbf16>, vector<1152x256xf32> -> vector<1152x256xf32>
    %3 = vector.extract_strided_slice %2 {offsets = [0, 0], sizes = [128, 256], strides = [1, 1]} : vector<1152x256xf32> to vector<128x256xf32>
    %4 = arith.truncf %3 : vector<128x256xf32> to vector<128x256xbf16>
    %c0_3 = arith.constant 0 : index
    %c0_4 = arith.constant 0 : index
    %c0_5 = arith.constant 0 : index
    %5 = vector.load %arg6[%c0_3, %c0_4, %c0_5] : memref<36x256x256xbf16, #tpu.memory_space<vmem>>, vector<1x256x256xbf16>
    %6 = vector.shape_cast %5 : vector<1x256x256xbf16> to vector<256x256xbf16>
    %cst_6 = arith.constant dense<0.000000e+00> : vector<128x256xf32>
    %7 = tpu.matmul %4, %6, %cst_6 {dimension_numbers = #tpu.dot_dimension_numbers<[1], [0], [0], [1], [0, 0, 1, 1], [], []>} : vector<128x256xbf16>, vector<256x256xbf16>, vector<128x256xf32> -> vector<128x256xf32>
    %8 = vector.extract_strided_slice %2 {offsets = [128, 0], sizes = [128, 256], strides = [1, 1]} : vector<1152x256xf32> to vector<128x256xf32>
    %9 = arith.truncf %8 : vector<128x256xf32> to vector<128x256xbf16>
    %c1 = arith.constant 1 : index
    %c0_7 = arith.constant 0 : index
    %c0_8 = arith.constant 0 : index
    %10 = vector.load %arg6[%c1, %c0_7, %c0_8] : memref<36x256x256xbf16, #tpu.memory_space<vmem>>, vector<1x256x256xbf16>
    %11 = vector.shape_cast %10 : vector<1x256x256xbf16> to vector<256x256xbf16>
    %cst_9 = arith.constant dense<0.000000e+00> : vector<128x256xf32>
    %12 = tpu.matmul %9, %11, %cst_9 {dimension_numbers = #tpu.dot_dimension_numbers<[1], [0], [0], [1], [0, 0, 1, 1], [], []>} : vector<128x256xbf16>, vector<256x256xbf16>, vector<128x256xf32> -> vector<128x256xf32>
    %13 = arith.addf %7, %12 : vector<128x256xf32>
    %14 = vector.extract_strided_slice %2 {offsets = [256, 0], sizes = [128, 256], strides = [1, 1]} : vector<1152x256xf32> to vector<128x256xf32>
    %15 = arith.truncf %14 : vector<128x256xf32> to vector<128x256xbf16>
    %c2 = arith.constant 2 : index
    %c0_10 = arith.constant 0 : index
    %c0_11 = arith.constant 0 : index
    %16 = vector.load %arg6[%c2, %c0_10, %c0_11] : memref<36x256x256xbf16, #tpu.memory_space<vmem>>, vector<1x256x256xbf16>
    %17 = vector.shape_cast %16 : vector<1x256x256xbf16> to vector<256x256xbf16>
    %cst_12 = arith.constant dense<0.000000e+00> : vector<128x256xf32>
    %18 = tpu.matmul %15, %17, %cst_12 {dimension_numbers = #tpu.dot_dimension_numbers<[1], [0], [0], [1], [0, 0, 1, 1], [], []>} : vector<128x256xbf16>, vector<256x256xbf16>, vector<128x256xf32> -> vector<128x256xf32>
    %19 = arith.addf %13, %18 : vector<128x256xf32>
    %20 = vector.extract_strided_slice %2 {offsets = [384, 0], sizes = [128, 256], strides = [1, 1]} : vector<1152x256xf32> to vector<128x256xf32>
    %21 = arith.truncf %20 : vector<128x256xf32> to vector<128x256xbf16>
    %c3 = arith.constant 3 : index
    %c0_13 = arith.constant 0 : index
    %c0_14 = arith.constant 0 : index
    %22 = vector.load %arg6[%c3, %c0_13, %c0_14] : memref<36x256x256xbf16, #tpu.memory_space<vmem>>, vector<1x256x256xbf16>
    %23 = vector.shape_cast %22 : vector<1x256x256xbf16> to vector<256x256xbf16>
    %cst_15 = arith.constant dense<0.000000e+00> : vector<128x256xf32>
    %24 = tpu.matmul %21, %23, %cst_15 {dimension_numbers = #tpu.dot_dimension_numbers<[1], [0], [0], [1], [0, 0, 1, 1], [], []>} : vector<128x256xbf16>, vector<256x256xbf16>, vector<128x256xf32> -> vector<128x256xf32>
    %25 = arith.addf %19, %24 : vector<128x256xf32>
    %26 = vector.extract_strided_slice %2 {offsets = [512, 0], sizes = [128, 256], strides = [1, 1]} : vector<1152x256xf32> to vector<128x256xf32>
    %27 = arith.truncf %26 : vector<128x256xf32> to vector<128x256xbf16>
    %c4 = arith.constant 4 : index
    %c0_16 = arith.constant 0 : index
    %c0_17 = arith.constant 0 : index
    %28 = vector.load %arg6[%c4, %c0_16, %c0_17] : memref<36x256x256xbf16, #tpu.memory_space<vmem>>, vector<1x256x256xbf16>
    %29 = vector.shape_cast %28 : vector<1x256x256xbf16> to vector<256x256xbf16>
    %cst_18 = arith.constant dense<0.000000e+00> : vector<128x256xf32>
    %30 = tpu.matmul %27, %29, %cst_18 {dimension_numbers = #tpu.dot_dimension_numbers<[1], [0], [0], [1], [0, 0, 1, 1], [], []>} : vector<128x256xbf16>, vector<256x256xbf16>, vector<128x256xf32> -> vector<128x256xf32>
    %31 = arith.addf %25, %30 : vector<128x256xf32>
    %32 = vector.extract_strided_slice %2 {offsets = [640, 0], sizes = [128, 256], strides = [1, 1]} : vector<1152x256xf32> to vector<128x256xf32>
    %33 = arith.truncf %32 : vector<128x256xf32> to vector<128x256xbf16>
    %c5 = arith.constant 5 : index
    %c0_19 = arith.constant 0 : index
    %c0_20 = arith.constant 0 : index
    %34 = vector.load %arg6[%c5, %c0_19, %c0_20] : memref<36x256x256xbf16, #tpu.memory_space<vmem>>, vector<1x256x256xbf16>
    %35 = vector.shape_cast %34 : vector<1x256x256xbf16> to vector<256x256xbf16>
    %cst_21 = arith.constant dense<0.000000e+00> : vector<128x256xf32>
    %36 = tpu.matmul %33, %35, %cst_21 {dimension_numbers = #tpu.dot_dimension_numbers<[1], [0], [0], [1], [0, 0, 1, 1], [], []>} : vector<128x256xbf16>, vector<256x256xbf16>, vector<128x256xf32> -> vector<128x256xf32>
    %37 = arith.addf %31, %36 : vector<128x256xf32>
    %38 = vector.extract_strided_slice %2 {offsets = [768, 0], sizes = [128, 256], strides = [1, 1]} : vector<1152x256xf32> to vector<128x256xf32>
    %39 = arith.truncf %38 : vector<128x256xf32> to vector<128x256xbf16>
    %c6 = arith.constant 6 : index
    %c0_22 = arith.constant 0 : index
    %c0_23 = arith.constant 0 : index
    %40 = vector.load %arg6[%c6, %c0_22, %c0_23] : memref<36x256x256xbf16, #tpu.memory_space<vmem>>, vector<1x256x256xbf16>
    %41 = vector.shape_cast %40 : vector<1x256x256xbf16> to vector<256x256xbf16>
    %cst_24 = arith.constant dense<0.000000e+00> : vector<128x256xf32>
    %42 = tpu.matmul %39, %41, %cst_24 {dimension_numbers = #tpu.dot_dimension_numbers<[1], [0], [0], [1], [0, 0, 1, 1], [], []>} : vector<128x256xbf16>, vector<256x256xbf16>, vector<128x256xf32> -> vector<128x256xf32>
    %43 = arith.addf %37, %42 : vector<128x256xf32>
    %44 = vector.extract_strided_slice %2 {offsets = [896, 0], sizes = [128, 256], strides = [1, 1]} : vector<1152x256xf32> to vector<128x256xf32>
    %45 = arith.truncf %44 : vector<128x256xf32> to vector<128x256xbf16>
    %c7 = arith.constant 7 : index
    %c0_25 = arith.constant 0 : index
    %c0_26 = arith.constant 0 : index
    %46 = vector.load %arg6[%c7, %c0_25, %c0_26] : memref<36x256x256xbf16, #tpu.memory_space<vmem>>, vector<1x256x256xbf16>
    %47 = vector.shape_cast %46 : vector<1x256x256xbf16> to vector<256x256xbf16>
    %cst_27 = arith.constant dense<0.000000e+00> : vector<128x256xf32>
    %48 = tpu.matmul %45, %47, %cst_27 {dimension_numbers = #tpu.dot_dimension_numbers<[1], [0], [0], [1], [0, 0, 1, 1], [], []>} : vector<128x256xbf16>, vector<256x256xbf16>, vector<128x256xf32> -> vector<128x256xf32>
    %49 = arith.addf %43, %48 : vector<128x256xf32>
    %50 = vector.extract_strided_slice %2 {offsets = [1024, 0], sizes = [128, 256], strides = [1, 1]} : vector<1152x256xf32> to vector<128x256xf32>
    %51 = arith.truncf %50 : vector<128x256xf32> to vector<128x256xbf16>
    %c8 = arith.constant 8 : index
    %c0_28 = arith.constant 0 : index
    %c0_29 = arith.constant 0 : index
    %52 = vector.load %arg6[%c8, %c0_28, %c0_29] : memref<36x256x256xbf16, #tpu.memory_space<vmem>>, vector<1x256x256xbf16>
    %53 = vector.shape_cast %52 : vector<1x256x256xbf16> to vector<256x256xbf16>
    %cst_30 = arith.constant dense<0.000000e+00> : vector<128x256xf32>
    %54 = tpu.matmul %51, %53, %cst_30 {dimension_numbers = #tpu.dot_dimension_numbers<[1], [0], [0], [1], [0, 0, 1, 1], [], []>} : vector<128x256xbf16>, vector<256x256xbf16>, vector<128x256xf32> -> vector<128x256xf32>
    %55 = arith.addf %49, %54 : vector<128x256xf32>
    %c0_31 = arith.constant 0 : index
    %c0_32 = arith.constant 0 : index
    %c0_33 = arith.constant 0 : index
    %56 = vector.load %arg7[%c0_31, %c0_32, %c0_33] : memref<4x1x256xf32, #tpu.memory_space<vmem>>, vector<1x1x256xf32>
    %57 = vector.shape_cast %56 : vector<1x1x256xf32> to vector<1x256xf32>
    %58 = vector.broadcast %57 : vector<1x256xf32> to vector<128x256xf32>
    %59 = arith.addf %55, %58 : vector<128x256xf32>
    %cst_34 = arith.constant 0.000000e+00 : f32
    %60 = vector.broadcast %cst_34 : f32 to vector<128x256xf32>
    %61 = arith.cmpf oge, %59, %60 : vector<128x256xf32>
    %cst_35 = arith.constant 0.00999999977 : f32
    %62 = vector.broadcast %cst_35 : f32 to vector<128x256xf32>
    %63 = arith.mulf %62, %59 : vector<128x256xf32>
    %64 = arith.select %61, %59, %63 : vector<128x256xi1>, vector<128x256xf32>
    %65 = arith.truncf %64 : vector<128x256xf32> to vector<128x256xbf16>
    %c0_36 = arith.constant 0 : index
    %c0_37 = arith.constant 0 : index
    %66 = vector.load %arg3[%c0_36, %c0_37] : memref<288x128xbf16, #tpu.memory_space<vmem>>, vector<288x128xbf16>
    %cst_38 = arith.constant dense<0.000000e+00> : vector<288x256xf32>
    %67 = tpu.matmul %66, %65, %cst_38 {dimension_numbers = #tpu.dot_dimension_numbers<[1], [0], [0], [1], [0, 0, 1, 1], [], []>} : vector<288x128xbf16>, vector<128x256xbf16>, vector<288x256xf32> -> vector<288x256xf32>
    %68 = vector.extract_strided_slice %67 {offsets = [0, 0], sizes = [32, 256], strides = [1, 1]} : vector<288x256xf32> to vector<32x256xf32>
    %69 = arith.truncf %68 : vector<32x256xf32> to vector<32x256xbf16>
    %c9 = arith.constant 9 : index
    %c0_39 = arith.constant 0 : index
    %c0_40 = arith.constant 0 : index
    %70 = vector.load %arg6[%c9, %c0_39, %c0_40] : memref<36x256x256xbf16, #tpu.memory_space<vmem>>, vector<1x256x256xbf16>
    %71 = vector.shape_cast %70 : vector<1x256x256xbf16> to vector<256x256xbf16>
    %cst_41 = arith.constant dense<0.000000e+00> : vector<32x256xf32>
    %72 = tpu.matmul %69, %71, %cst_41 {dimension_numbers = #tpu.dot_dimension_numbers<[1], [0], [0], [1], [0, 0, 1, 1], [], []>} : vector<32x256xbf16>, vector<256x256xbf16>, vector<32x256xf32> -> vector<32x256xf32>
    %73 = vector.extract_strided_slice %67 {offsets = [32, 0], sizes = [32, 256], strides = [1, 1]} : vector<288x256xf32> to vector<32x256xf32>
    %74 = arith.truncf %73 : vector<32x256xf32> to vector<32x256xbf16>
    %c10 = arith.constant 10 : index
    %c0_42 = arith.constant 0 : index
    %c0_43 = arith.constant 0 : index
    %75 = vector.load %arg6[%c10, %c0_42, %c0_43] : memref<36x256x256xbf16, #tpu.memory_space<vmem>>, vector<1x256x256xbf16>
    %76 = vector.shape_cast %75 : vector<1x256x256xbf16> to vector<256x256xbf16>
    %cst_44 = arith.constant dense<0.000000e+00> : vector<32x256xf32>
    %77 = tpu.matmul %74, %76, %cst_44 {dimension_numbers = #tpu.dot_dimension_numbers<[1], [0], [0], [1], [0, 0, 1, 1], [], []>} : vector<32x256xbf16>, vector<256x256xbf16>, vector<32x256xf32> -> vector<32x256xf32>
    %78 = arith.addf %72, %77 : vector<32x256xf32>
    %79 = vector.extract_strided_slice %67 {offsets = [64, 0], sizes = [32, 256], strides = [1, 1]} : vector<288x256xf32> to vector<32x256xf32>
    %80 = arith.truncf %79 : vector<32x256xf32> to vector<32x256xbf16>
    %c11 = arith.constant 11 : index
    %c0_45 = arith.constant 0 : index
    %c0_46 = arith.constant 0 : index
    %81 = vector.load %arg6[%c11, %c0_45, %c0_46] : memref<36x256x256xbf16, #tpu.memory_space<vmem>>, vector<1x256x256xbf16>
    %82 = vector.shape_cast %81 : vector<1x256x256xbf16> to vector<256x256xbf16>
    %cst_47 = arith.constant dense<0.000000e+00> : vector<32x256xf32>
    %83 = tpu.matmul %80, %82, %cst_47 {dimension_numbers = #tpu.dot_dimension_numbers<[1], [0], [0], [1], [0, 0, 1, 1], [], []>} : vector<32x256xbf16>, vector<256x256xbf16>, vector<32x256xf32> -> vector<32x256xf32>
    %84 = arith.addf %78, %83 : vector<32x256xf32>
    %85 = vector.extract_strided_slice %67 {offsets = [96, 0], sizes = [32, 256], strides = [1, 1]} : vector<288x256xf32> to vector<32x256xf32>
    %86 = arith.truncf %85 : vector<32x256xf32> to vector<32x256xbf16>
    %c12 = arith.constant 12 : index
    %c0_48 = arith.constant 0 : index
    %c0_49 = arith.constant 0 : index
    %87 = vector.load %arg6[%c12, %c0_48, %c0_49] : memref<36x256x256xbf16, #tpu.memory_space<vmem>>, vector<1x256x256xbf16>
    %88 = vector.shape_cast %87 : vector<1x256x256xbf16> to vector<256x256xbf16>
    %cst_50 = arith.constant dense<0.000000e+00> : vector<32x256xf32>
    %89 = tpu.matmul %86, %88, %cst_50 {dimension_numbers = #tpu.dot_dimension_numbers<[1], [0], [0], [1], [0, 0, 1, 1], [], []>} : vector<32x256xbf16>, vector<256x256xbf16>, vector<32x256xf32> -> vector<32x256xf32>
    %90 = arith.addf %84, %89 : vector<32x256xf32>
    %91 = vector.extract_strided_slice %67 {offsets = [128, 0], sizes = [32, 256], strides = [1, 1]} : vector<288x256xf32> to vector<32x256xf32>
    %92 = arith.truncf %91 : vector<32x256xf32> to vector<32x256xbf16>
    %c13 = arith.constant 13 : index
    %c0_51 = arith.constant 0 : index
    %c0_52 = arith.constant 0 : index
    %93 = vector.load %arg6[%c13, %c0_51, %c0_52] : memref<36x256x256xbf16, #tpu.memory_space<vmem>>, vector<1x256x256xbf16>
    %94 = vector.shape_cast %93 : vector<1x256x256xbf16> to vector<256x256xbf16>
    %cst_53 = arith.constant dense<0.000000e+00> : vector<32x256xf32>
    %95 = tpu.matmul %92, %94, %cst_53 {dimension_numbers = #tpu.dot_dimension_numbers<[1], [0], [0], [1], [0, 0, 1, 1], [], []>} : vector<32x256xbf16>, vector<256x256xbf16>, vector<32x256xf32> -> vector<32x256xf32>
    %96 = arith.addf %90, %95 : vector<32x256xf32>
    %97 = vector.extract_strided_slice %67 {offsets = [160, 0], sizes = [32, 256], strides = [1, 1]} : vector<288x256xf32> to vector<32x256xf32>
    %98 = arith.truncf %97 : vector<32x256xf32> to vector<32x256xbf16>
    %c14 = arith.constant 14 : index
    %c0_54 = arith.constant 0 : index
    %c0_55 = arith.constant 0 : index
    %99 = vector.load %arg6[%c14, %c0_54, %c0_55] : memref<36x256x256xbf16, #tpu.memory_space<vmem>>, vector<1x256x256xbf16>
    %100 = vector.shape_cast %99 : vector<1x256x256xbf16> to vector<256x256xbf16>
    %cst_56 = arith.constant dense<0.000000e+00> : vector<32x256xf32>
    %101 = tpu.matmul %98, %100, %cst_56 {dimension_numbers = #tpu.dot_dimension_numbers<[1], [0], [0], [1], [0, 0, 1, 1], [], []>} : vector<32x256xbf16>, vector<256x256xbf16>, vector<32x256xf32> -> vector<32x256xf32>
    %102 = arith.addf %96, %101 : vector<32x256xf32>
    %103 = vector.extract_strided_slice %67 {offsets = [192, 0], sizes = [32, 256], strides = [1, 1]} : vector<288x256xf32> to vector<32x256xf32>
    %104 = arith.truncf %103 : vector<32x256xf32> to vector<32x256xbf16>
    %c15 = arith.constant 15 : index
    %c0_57 = arith.constant 0 : index
    %c0_58 = arith.constant 0 : index
    %105 = vector.load %arg6[%c15, %c0_57, %c0_58] : memref<36x256x256xbf16, #tpu.memory_space<vmem>>, vector<1x256x256xbf16>
    %106 = vector.shape_cast %105 : vector<1x256x256xbf16> to vector<256x256xbf16>
    %cst_59 = arith.constant dense<0.000000e+00> : vector<32x256xf32>
    %107 = tpu.matmul %104, %106, %cst_59 {dimension_numbers = #tpu.dot_dimension_numbers<[1], [0], [0], [1], [0, 0, 1, 1], [], []>} : vector<32x256xbf16>, vector<256x256xbf16>, vector<32x256xf32> -> vector<32x256xf32>
    %108 = arith.addf %102, %107 : vector<32x256xf32>
    %109 = vector.extract_strided_slice %67 {offsets = [224, 0], sizes = [32, 256], strides = [1, 1]} : vector<288x256xf32> to vector<32x256xf32>
    %110 = arith.truncf %109 : vector<32x256xf32> to vector<32x256xbf16>
    %c16 = arith.constant 16 : index
    %c0_60 = arith.constant 0 : index
    %c0_61 = arith.constant 0 : index
    %111 = vector.load %arg6[%c16, %c0_60, %c0_61] : memref<36x256x256xbf16, #tpu.memory_space<vmem>>, vector<1x256x256xbf16>
    %112 = vector.shape_cast %111 : vector<1x256x256xbf16> to vector<256x256xbf16>
    %cst_62 = arith.constant dense<0.000000e+00> : vector<32x256xf32>
    %113 = tpu.matmul %110, %112, %cst_62 {dimension_numbers = #tpu.dot_dimension_numbers<[1], [0], [0], [1], [0, 0, 1, 1], [], []>} : vector<32x256xbf16>, vector<256x256xbf16>, vector<32x256xf32> -> vector<32x256xf32>
    %114 = arith.addf %108, %113 : vector<32x256xf32>
    %115 = vector.extract_strided_slice %67 {offsets = [256, 0], sizes = [32, 256], strides = [1, 1]} : vector<288x256xf32> to vector<32x256xf32>
    %116 = arith.truncf %115 : vector<32x256xf32> to vector<32x256xbf16>
    %c17 = arith.constant 17 : index
    %c0_63 = arith.constant 0 : index
    %c0_64 = arith.constant 0 : index
    %117 = vector.load %arg6[%c17, %c0_63, %c0_64] : memref<36x256x256xbf16, #tpu.memory_space<vmem>>, vector<1x256x256xbf16>
    %118 = vector.shape_cast %117 : vector<1x256x256xbf16> to vector<256x256xbf16>
    %cst_65 = arith.constant dense<0.000000e+00> : vector<32x256xf32>
    %119 = tpu.matmul %116, %118, %cst_65 {dimension_numbers = #tpu.dot_dimension_numbers<[1], [0], [0], [1], [0, 0, 1, 1], [], []>} : vector<32x256xbf16>, vector<256x256xbf16>, vector<32x256xf32> -> vector<32x256xf32>
    %120 = arith.addf %114, %119 : vector<32x256xf32>
    %c1_66 = arith.constant 1 : index
    %c0_67 = arith.constant 0 : index
    %c0_68 = arith.constant 0 : index
    %121 = vector.load %arg7[%c1_66, %c0_67, %c0_68] : memref<4x1x256xf32, #tpu.memory_space<vmem>>, vector<1x1x256xf32>
    %122 = vector.shape_cast %121 : vector<1x1x256xf32> to vector<1x256xf32>
    %123 = vector.broadcast %122 : vector<1x256xf32> to vector<32x256xf32>
    %124 = arith.addf %120, %123 : vector<32x256xf32>
    %cst_69 = arith.constant 0.000000e+00 : f32
    %125 = vector.broadcast %cst_69 : f32 to vector<32x256xf32>
    %126 = arith.cmpf oge, %124, %125 : vector<32x256xf32>
    %cst_70 = arith.constant 0.00999999977 : f32
    %127 = vector.broadcast %cst_70 : f32 to vector<32x256xf32>
    %128 = arith.mulf %127, %124 : vector<32x256xf32>
    %129 = arith.select %126, %124, %128 : vector<32x256xi1>, vector<32x256xf32>
    %130 = arith.truncf %129 : vector<32x256xf32> to vector<32x256xbf16>
    %c0_71 = arith.constant 0 : index
    %c0_72 = arith.constant 0 : index
    %131 = vector.load %arg4[%c0_71, %c0_72] : memref<72x32xbf16, #tpu.memory_space<vmem>>, vector<72x32xbf16>
    %cst_73 = arith.constant dense<0.000000e+00> : vector<72x256xf32>
    %132 = tpu.matmul %131, %130, %cst_73 {dimension_numbers = #tpu.dot_dimension_numbers<[1], [0], [0], [1], [0, 0, 1, 1], [], []>} : vector<72x32xbf16>, vector<32x256xbf16>, vector<72x256xf32> -> vector<72x256xf32>
    %133 = vector.extract_strided_slice %132 {offsets = [0, 0], sizes = [8, 256], strides = [1, 1]} : vector<72x256xf32> to vector<8x256xf32>
    %134 = arith.truncf %133 : vector<8x256xf32> to vector<8x256xbf16>
    %c18 = arith.constant 18 : index
    %c0_74 = arith.constant 0 : index
    %c0_75 = arith.constant 0 : index
    %135 = vector.load %arg6[%c18, %c0_74, %c0_75] : memref<36x256x256xbf16, #tpu.memory_space<vmem>>, vector<1x256x256xbf16>
    %136 = vector.shape_cast %135 : vector<1x256x256xbf16> to vector<256x256xbf16>
    %cst_76 = arith.constant dense<0.000000e+00> : vector<8x256xf32>
    %137 = tpu.matmul %134, %136, %cst_76 {dimension_numbers = #tpu.dot_dimension_numbers<[1], [0], [0], [1], [0, 0, 1, 1], [], []>} : vector<8x256xbf16>, vector<256x256xbf16>, vector<8x256xf32> -> vector<8x256xf32>
    %138 = vector.extract_strided_slice %132 {offsets = [8, 0], sizes = [8, 256], strides = [1, 1]} : vector<72x256xf32> to vector<8x256xf32>
    %139 = arith.truncf %138 : vector<8x256xf32> to vector<8x256xbf16>
    %c19 = arith.constant 19 : index
    %c0_77 = arith.constant 0 : index
    %c0_78 = arith.constant 0 : index
    %140 = vector.load %arg6[%c19, %c0_77, %c0_78] : memref<36x256x256xbf16, #tpu.memory_space<vmem>>, vector<1x256x256xbf16>
    %141 = vector.shape_cast %140 : vector<1x256x256xbf16> to vector<256x256xbf16>
    %cst_79 = arith.constant dense<0.000000e+00> : vector<8x256xf32>
    %142 = tpu.matmul %139, %141, %cst_79 {dimension_numbers = #tpu.dot_dimension_numbers<[1], [0], [0], [1], [0, 0, 1, 1], [], []>} : vector<8x256xbf16>, vector<256x256xbf16>, vector<8x256xf32> -> vector<8x256xf32>
    %143 = arith.addf %137, %142 : vector<8x256xf32>
    %144 = vector.extract_strided_slice %132 {offsets = [16, 0], sizes = [8, 256], strides = [1, 1]} : vector<72x256xf32> to vector<8x256xf32>
    %145 = arith.truncf %144 : vector<8x256xf32> to vector<8x256xbf16>
    %c20 = arith.constant 20 : index
    %c0_80 = arith.constant 0 : index
    %c0_81 = arith.constant 0 : index
    %146 = vector.load %arg6[%c20, %c0_80, %c0_81] : memref<36x256x256xbf16, #tpu.memory_space<vmem>>, vector<1x256x256xbf16>
    %147 = vector.shape_cast %146 : vector<1x256x256xbf16> to vector<256x256xbf16>
    %cst_82 = arith.constant dense<0.000000e+00> : vector<8x256xf32>
    %148 = tpu.matmul %145, %147, %cst_82 {dimension_numbers = #tpu.dot_dimension_numbers<[1], [0], [0], [1], [0, 0, 1, 1], [], []>} : vector<8x256xbf16>, vector<256x256xbf16>, vector<8x256xf32> -> vector<8x256xf32>
    %149 = arith.addf %143, %148 : vector<8x256xf32>
    %150 = vector.extract_strided_slice %132 {offsets = [24, 0], sizes = [8, 256], strides = [1, 1]} : vector<72x256xf32> to vector<8x256xf32>
    %151 = arith.truncf %150 : vector<8x256xf32> to vector<8x256xbf16>
    %c21 = arith.constant 21 : index
    %c0_83 = arith.constant 0 : index
    %c0_84 = arith.constant 0 : index
    %152 = vector.load %arg6[%c21, %c0_83, %c0_84] : memref<36x256x256xbf16, #tpu.memory_space<vmem>>, vector<1x256x256xbf16>
    %153 = vector.shape_cast %152 : vector<1x256x256xbf16> to vector<256x256xbf16>
    %cst_85 = arith.constant dense<0.000000e+00> : vector<8x256xf32>
    %154 = tpu.matmul %151, %153, %cst_85 {dimension_numbers = #tpu.dot_dimension_numbers<[1], [0], [0], [1], [0, 0, 1, 1], [], []>} : vector<8x256xbf16>, vector<256x256xbf16>, vector<8x256xf32> -> vector<8x256xf32>
    %155 = arith.addf %149, %154 : vector<8x256xf32>
    %156 = vector.extract_strided_slice %132 {offsets = [32, 0], sizes = [8, 256], strides = [1, 1]} : vector<72x256xf32> to vector<8x256xf32>
    %157 = arith.truncf %156 : vector<8x256xf32> to vector<8x256xbf16>
    %c22 = arith.constant 22 : index
    %c0_86 = arith.constant 0 : index
    %c0_87 = arith.constant 0 : index
    %158 = vector.load %arg6[%c22, %c0_86, %c0_87] : memref<36x256x256xbf16, #tpu.memory_space<vmem>>, vector<1x256x256xbf16>
    %159 = vector.shape_cast %158 : vector<1x256x256xbf16> to vector<256x256xbf16>
    %cst_88 = arith.constant dense<0.000000e+00> : vector<8x256xf32>
    %160 = tpu.matmul %157, %159, %cst_88 {dimension_numbers = #tpu.dot_dimension_numbers<[1], [0], [0], [1], [0, 0, 1, 1], [], []>} : vector<8x256xbf16>, vector<256x256xbf16>, vector<8x256xf32> -> vector<8x256xf32>
    %161 = arith.addf %155, %160 : vector<8x256xf32>
    %162 = vector.extract_strided_slice %132 {offsets = [40, 0], sizes = [8, 256], strides = [1, 1]} : vector<72x256xf32> to vector<8x256xf32>
    %163 = arith.truncf %162 : vector<8x256xf32> to vector<8x256xbf16>
    %c23 = arith.constant 23 : index
    %c0_89 = arith.constant 0 : index
    %c0_90 = arith.constant 0 : index
    %164 = vector.load %arg6[%c23, %c0_89, %c0_90] : memref<36x256x256xbf16, #tpu.memory_space<vmem>>, vector<1x256x256xbf16>
    %165 = vector.shape_cast %164 : vector<1x256x256xbf16> to vector<256x256xbf16>
    %cst_91 = arith.constant dense<0.000000e+00> : vector<8x256xf32>
    %166 = tpu.matmul %163, %165, %cst_91 {dimension_numbers = #tpu.dot_dimension_numbers<[1], [0], [0], [1], [0, 0, 1, 1], [], []>} : vector<8x256xbf16>, vector<256x256xbf16>, vector<8x256xf32> -> vector<8x256xf32>
    %167 = arith.addf %161, %166 : vector<8x256xf32>
    %168 = vector.extract_strided_slice %132 {offsets = [48, 0], sizes = [8, 256], strides = [1, 1]} : vector<72x256xf32> to vector<8x256xf32>
    %169 = arith.truncf %168 : vector<8x256xf32> to vector<8x256xbf16>
    %c24 = arith.constant 24 : index
    %c0_92 = arith.constant 0 : index
    %c0_93 = arith.constant 0 : index
    %170 = vector.load %arg6[%c24, %c0_92, %c0_93] : memref<36x256x256xbf16, #tpu.memory_space<vmem>>, vector<1x256x256xbf16>
    %171 = vector.shape_cast %170 : vector<1x256x256xbf16> to vector<256x256xbf16>
    %cst_94 = arith.constant dense<0.000000e+00> : vector<8x256xf32>
    %172 = tpu.matmul %169, %171, %cst_94 {dimension_numbers = #tpu.dot_dimension_numbers<[1], [0], [0], [1], [0, 0, 1, 1], [], []>} : vector<8x256xbf16>, vector<256x256xbf16>, vector<8x256xf32> -> vector<8x256xf32>
    %173 = arith.addf %167, %172 : vector<8x256xf32>
    %174 = vector.extract_strided_slice %132 {offsets = [56, 0], sizes = [8, 256], strides = [1, 1]} : vector<72x256xf32> to vector<8x256xf32>
    %175 = arith.truncf %174 : vector<8x256xf32> to vector<8x256xbf16>
    %c25 = arith.constant 25 : index
    %c0_95 = arith.constant 0 : index
    %c0_96 = arith.constant 0 : index
    %176 = vector.load %arg6[%c25, %c0_95, %c0_96] : memref<36x256x256xbf16, #tpu.memory_space<vmem>>, vector<1x256x256xbf16>
    %177 = vector.shape_cast %176 : vector<1x256x256xbf16> to vector<256x256xbf16>
    %cst_97 = arith.constant dense<0.000000e+00> : vector<8x256xf32>
    %178 = tpu.matmul %175, %177, %cst_97 {dimension_numbers = #tpu.dot_dimension_numbers<[1], [0], [0], [1], [0, 0, 1, 1], [], []>} : vector<8x256xbf16>, vector<256x256xbf16>, vector<8x256xf32> -> vector<8x256xf32>
    %179 = arith.addf %173, %178 : vector<8x256xf32>
    %180 = vector.extract_strided_slice %132 {offsets = [64, 0], sizes = [8, 256], strides = [1, 1]} : vector<72x256xf32> to vector<8x256xf32>
    %181 = arith.truncf %180 : vector<8x256xf32> to vector<8x256xbf16>
    %c26 = arith.constant 26 : index
    %c0_98 = arith.constant 0 : index
    %c0_99 = arith.constant 0 : index
    %182 = vector.load %arg6[%c26, %c0_98, %c0_99] : memref<36x256x256xbf16, #tpu.memory_space<vmem>>, vector<1x256x256xbf16>
    %183 = vector.shape_cast %182 : vector<1x256x256xbf16> to vector<256x256xbf16>
    %cst_100 = arith.constant dense<0.000000e+00> : vector<8x256xf32>
    %184 = tpu.matmul %181, %183, %cst_100 {dimension_numbers = #tpu.dot_dimension_numbers<[1], [0], [0], [1], [0, 0, 1, 1], [], []>} : vector<8x256xbf16>, vector<256x256xbf16>, vector<8x256xf32> -> vector<8x256xf32>
    %185 = arith.addf %179, %184 : vector<8x256xf32>
    %c2_101 = arith.constant 2 : index
    %c0_102 = arith.constant 0 : index
    %c0_103 = arith.constant 0 : index
    %186 = vector.load %arg7[%c2_101, %c0_102, %c0_103] : memref<4x1x256xf32, #tpu.memory_space<vmem>>, vector<1x1x256xf32>
    %187 = vector.shape_cast %186 : vector<1x1x256xf32> to vector<1x256xf32>
    %188 = vector.broadcast %187 : vector<1x256xf32> to vector<8x256xf32>
    %189 = arith.addf %185, %188 : vector<8x256xf32>
    %cst_104 = arith.constant 0.000000e+00 : f32
    %190 = vector.broadcast %cst_104 : f32 to vector<8x256xf32>
    %191 = arith.cmpf oge, %189, %190 : vector<8x256xf32>
    %cst_105 = arith.constant 0.00999999977 : f32
    %192 = vector.broadcast %cst_105 : f32 to vector<8x256xf32>
    %193 = arith.mulf %192, %189 : vector<8x256xf32>
    %194 = arith.select %191, %189, %193 : vector<8x256xi1>, vector<8x256xf32>
    %195 = arith.truncf %194 : vector<8x256xf32> to vector<8x256xbf16>
    %c0_106 = arith.constant 0 : index
    %c0_107 = arith.constant 0 : index
    %196 = vector.load %arg5[%c0_106, %c0_107] : memref<72x8xbf16, #tpu.memory_space<vmem>>, vector<72x8xbf16>
    %cst_108 = arith.constant dense<0.000000e+00> : vector<72x256xf32>
    %197 = tpu.matmul %196, %195, %cst_108 {dimension_numbers = #tpu.dot_dimension_numbers<[1], [0], [0], [1], [0, 0, 1, 1], [], []>} : vector<72x8xbf16>, vector<8x256xbf16>, vector<72x256xf32> -> vector<72x256xf32>
    %198 = vector.extract_strided_slice %197 {offsets = [0, 0], sizes = [2, 256], strides = [1, 1]} : vector<72x256xf32> to vector<2x256xf32>
    %199 = arith.truncf %198 : vector<2x256xf32> to vector<2x256xbf16>
    %c27 = arith.constant 27 : index
    %c0_109 = arith.constant 0 : index
    %c0_110 = arith.constant 0 : index
    %200 = vector.load %arg6[%c27, %c0_109, %c0_110] : memref<36x256x256xbf16, #tpu.memory_space<vmem>>, vector<1x256x256xbf16>
    %201 = vector.shape_cast %200 : vector<1x256x256xbf16> to vector<256x256xbf16>
    %cst_111 = arith.constant dense<0.000000e+00> : vector<2x256xf32>
    %202 = tpu.matmul %199, %201, %cst_111 {dimension_numbers = #tpu.dot_dimension_numbers<[1], [0], [0], [1], [0, 0, 1, 1], [], []>} : vector<2x256xbf16>, vector<256x256xbf16>, vector<2x256xf32> -> vector<2x256xf32>
    %203 = vector.extract_strided_slice %197 {offsets = [8, 0], sizes = [2, 256], strides = [1, 1]} : vector<72x256xf32> to vector<2x256xf32>
    %204 = arith.truncf %203 : vector<2x256xf32> to vector<2x256xbf16>
    %c28 = arith.constant 28 : index
    %c0_112 = arith.constant 0 : index
    %c0_113 = arith.constant 0 : index
    %205 = vector.load %arg6[%c28, %c0_112, %c0_113] : memref<36x256x256xbf16, #tpu.memory_space<vmem>>, vector<1x256x256xbf16>
    %206 = vector.shape_cast %205 : vector<1x256x256xbf16> to vector<256x256xbf16>
    %cst_114 = arith.constant dense<0.000000e+00> : vector<2x256xf32>
    %207 = tpu.matmul %204, %206, %cst_114 {dimension_numbers = #tpu.dot_dimension_numbers<[1], [0], [0], [1], [0, 0, 1, 1], [], []>} : vector<2x256xbf16>, vector<256x256xbf16>, vector<2x256xf32> -> vector<2x256xf32>
    %208 = arith.addf %202, %207 : vector<2x256xf32>
    %209 = vector.extract_strided_slice %197 {offsets = [16, 0], sizes = [2, 256], strides = [1, 1]} : vector<72x256xf32> to vector<2x256xf32>
    %210 = arith.truncf %209 : vector<2x256xf32> to vector<2x256xbf16>
    %c29 = arith.constant 29 : index
    %c0_115 = arith.constant 0 : index
    %c0_116 = arith.constant 0 : index
    %211 = vector.load %arg6[%c29, %c0_115, %c0_116] : memref<36x256x256xbf16, #tpu.memory_space<vmem>>, vector<1x256x256xbf16>
    %212 = vector.shape_cast %211 : vector<1x256x256xbf16> to vector<256x256xbf16>
    %cst_117 = arith.constant dense<0.000000e+00> : vector<2x256xf32>
    %213 = tpu.matmul %210, %212, %cst_117 {dimension_numbers = #tpu.dot_dimension_numbers<[1], [0], [0], [1], [0, 0, 1, 1], [], []>} : vector<2x256xbf16>, vector<256x256xbf16>, vector<2x256xf32> -> vector<2x256xf32>
    %214 = arith.addf %208, %213 : vector<2x256xf32>
    %215 = vector.extract_strided_slice %197 {offsets = [24, 0], sizes = [2, 256], strides = [1, 1]} : vector<72x256xf32> to vector<2x256xf32>
    %216 = arith.truncf %215 : vector<2x256xf32> to vector<2x256xbf16>
    %c30 = arith.constant 30 : index
    %c0_118 = arith.constant 0 : index
    %c0_119 = arith.constant 0 : index
    %217 = vector.load %arg6[%c30, %c0_118, %c0_119] : memref<36x256x256xbf16, #tpu.memory_space<vmem>>, vector<1x256x256xbf16>
    %218 = vector.shape_cast %217 : vector<1x256x256xbf16> to vector<256x256xbf16>
    %cst_120 = arith.constant dense<0.000000e+00> : vector<2x256xf32>
    %219 = tpu.matmul %216, %218, %cst_120 {dimension_numbers = #tpu.dot_dimension_numbers<[1], [0], [0], [1], [0, 0, 1, 1], [], []>} : vector<2x256xbf16>, vector<256x256xbf16>, vector<2x256xf32> -> vector<2x256xf32>
    %220 = arith.addf %214, %219 : vector<2x256xf32>
    %221 = vector.extract_strided_slice %197 {offsets = [32, 0], sizes = [2, 256], strides = [1, 1]} : vector<72x256xf32> to vector<2x256xf32>
    %222 = arith.truncf %221 : vector<2x256xf32> to vector<2x256xbf16>
    %c31 = arith.constant 31 : index
    %c0_121 = arith.constant 0 : index
    %c0_122 = arith.constant 0 : index
    %223 = vector.load %arg6[%c31, %c0_121, %c0_122] : memref<36x256x256xbf16, #tpu.memory_space<vmem>>, vector<1x256x256xbf16>
    %224 = vector.shape_cast %223 : vector<1x256x256xbf16> to vector<256x256xbf16>
    %cst_123 = arith.constant dense<0.000000e+00> : vector<2x256xf32>
    %225 = tpu.matmul %222, %224, %cst_123 {dimension_numbers = #tpu.dot_dimension_numbers<[1], [0], [0], [1], [0, 0, 1, 1], [], []>} : vector<2x256xbf16>, vector<256x256xbf16>, vector<2x256xf32> -> vector<2x256xf32>
    %226 = arith.addf %220, %225 : vector<2x256xf32>
    %227 = vector.extract_strided_slice %197 {offsets = [40, 0], sizes = [2, 256], strides = [1, 1]} : vector<72x256xf32> to vector<2x256xf32>
    %228 = arith.truncf %227 : vector<2x256xf32> to vector<2x256xbf16>
    %c32 = arith.constant 32 : index
    %c0_124 = arith.constant 0 : index
    %c0_125 = arith.constant 0 : index
    %229 = vector.load %arg6[%c32, %c0_124, %c0_125] : memref<36x256x256xbf16, #tpu.memory_space<vmem>>, vector<1x256x256xbf16>
    %230 = vector.shape_cast %229 : vector<1x256x256xbf16> to vector<256x256xbf16>
    %cst_126 = arith.constant dense<0.000000e+00> : vector<2x256xf32>
    %231 = tpu.matmul %228, %230, %cst_126 {dimension_numbers = #tpu.dot_dimension_numbers<[1], [0], [0], [1], [0, 0, 1, 1], [], []>} : vector<2x256xbf16>, vector<256x256xbf16>, vector<2x256xf32> -> vector<2x256xf32>
    %232 = arith.addf %226, %231 : vector<2x256xf32>
    %233 = vector.extract_strided_slice %197 {offsets = [48, 0], sizes = [2, 256], strides = [1, 1]} : vector<72x256xf32> to vector<2x256xf32>
    %234 = arith.truncf %233 : vector<2x256xf32> to vector<2x256xbf16>
    %c33 = arith.constant 33 : index
    %c0_127 = arith.constant 0 : index
    %c0_128 = arith.constant 0 : index
    %235 = vector.load %arg6[%c33, %c0_127, %c0_128] : memref<36x256x256xbf16, #tpu.memory_space<vmem>>, vector<1x256x256xbf16>
    %236 = vector.shape_cast %235 : vector<1x256x256xbf16> to vector<256x256xbf16>
    %cst_129 = arith.constant dense<0.000000e+00> : vector<2x256xf32>
    %237 = tpu.matmul %234, %236, %cst_129 {dimension_numbers = #tpu.dot_dimension_numbers<[1], [0], [0], [1], [0, 0, 1, 1], [], []>} : vector<2x256xbf16>, vector<256x256xbf16>, vector<2x256xf32> -> vector<2x256xf32>
    %238 = arith.addf %232, %237 : vector<2x256xf32>
    %239 = vector.extract_strided_slice %197 {offsets = [56, 0], sizes = [2, 256], strides = [1, 1]} : vector<72x256xf32> to vector<2x256xf32>
    %240 = arith.truncf %239 : vector<2x256xf32> to vector<2x256xbf16>
    %c34 = arith.constant 34 : index
    %c0_130 = arith.constant 0 : index
    %c0_131 = arith.constant 0 : index
    %241 = vector.load %arg6[%c34, %c0_130, %c0_131] : memref<36x256x256xbf16, #tpu.memory_space<vmem>>, vector<1x256x256xbf16>
    %242 = vector.shape_cast %241 : vector<1x256x256xbf16> to vector<256x256xbf16>
    %cst_132 = arith.constant dense<0.000000e+00> : vector<2x256xf32>
    %243 = tpu.matmul %240, %242, %cst_132 {dimension_numbers = #tpu.dot_dimension_numbers<[1], [0], [0], [1], [0, 0, 1, 1], [], []>} : vector<2x256xbf16>, vector<256x256xbf16>, vector<2x256xf32> -> vector<2x256xf32>
    %244 = arith.addf %238, %243 : vector<2x256xf32>
    %245 = vector.extract_strided_slice %197 {offsets = [64, 0], sizes = [2, 256], strides = [1, 1]} : vector<72x256xf32> to vector<2x256xf32>
    %246 = arith.truncf %245 : vector<2x256xf32> to vector<2x256xbf16>
    %c35 = arith.constant 35 : index
    %c0_133 = arith.constant 0 : index
    %c0_134 = arith.constant 0 : index
    %247 = vector.load %arg6[%c35, %c0_133, %c0_134] : memref<36x256x256xbf16, #tpu.memory_space<vmem>>, vector<1x256x256xbf16>
    %248 = vector.shape_cast %247 : vector<1x256x256xbf16> to vector<256x256xbf16>
    %cst_135 = arith.constant dense<0.000000e+00> : vector<2x256xf32>
    %249 = tpu.matmul %246, %248, %cst_135 {dimension_numbers = #tpu.dot_dimension_numbers<[1], [0], [0], [1], [0, 0, 1, 1], [], []>} : vector<2x256xbf16>, vector<256x256xbf16>, vector<2x256xf32> -> vector<2x256xf32>
    %250 = arith.addf %244, %249 : vector<2x256xf32>
    %c3_136 = arith.constant 3 : index
    %c0_137 = arith.constant 0 : index
    %c0_138 = arith.constant 0 : index
    %251 = vector.load %arg7[%c3_136, %c0_137, %c0_138] : memref<4x1x256xf32, #tpu.memory_space<vmem>>, vector<1x1x256xf32>
    %252 = vector.shape_cast %251 : vector<1x1x256xf32> to vector<1x256xf32>
    %253 = vector.broadcast %252 : vector<1x256xf32> to vector<2x256xf32>
    %254 = arith.addf %250, %253 : vector<2x256xf32>
    %cst_139 = arith.constant 0.000000e+00 : f32
    %255 = vector.broadcast %cst_139 : f32 to vector<2x256xf32>
    %256 = arith.cmpf oge, %254, %255 : vector<2x256xf32>
    %cst_140 = arith.constant 0.00999999977 : f32
    %257 = vector.broadcast %cst_140 : f32 to vector<2x256xf32>
    %258 = arith.mulf %257, %254 : vector<2x256xf32>
    %259 = arith.select %256, %254, %258 : vector<2x256xi1>, vector<2x256xf32>
    %c0_141 = arith.constant 0 : index
    %c0_142 = arith.constant 0 : index
    %260 = vector.load %arg8[%c0_141, %c0_142] : memref<2x2xf32, #tpu.memory_space<vmem>>, vector<2x2xf32>
    %cst_143 = arith.constant dense<0.000000e+00> : vector<2x256xf32>
    %261 = tpu.matmul %260, %259, %cst_143 {dimension_numbers = #tpu.dot_dimension_numbers<[1], [0], [0], [1], [0, 0, 1, 1], [], []>} : vector<2x2xf32>, vector<2x256xf32>, vector<2x256xf32> -> vector<2x256xf32>
    %c0_144 = arith.constant 0 : index
    %c0_145 = arith.constant 0 : index
    %262 = vector.load %arg9[%c0_144, %c0_145] : memref<1x256xf32, #tpu.memory_space<vmem>>, vector<1x256xf32>
    %263 = vector.broadcast %262 : vector<1x256xf32> to vector<2x256xf32>
    %264 = arith.mulf %261, %263 : vector<2x256xf32>
    %cst_146 = arith.constant dense<0.000000e+00> : vector<2xf32>
    %265 = vector.multi_reduction <add>, %264, %cst_146 [1] : vector<2x256xf32> to vector<2xf32>
    %266 = vector.shape_cast %265 : vector<2xf32> to vector<2x1xf32>
    %c0_147 = arith.constant 0 : index
    %c0_148 = arith.constant 0 : index
    %267 = vector.load %arg10[%c0_147, %c0_148] : memref<1x1xf32, #tpu.memory_space<vmem>>, vector<1x1xf32>
    %268 = vector.broadcast %267 : vector<1x1xf32> to vector<2x1xf32>
    %269 = arith.addf %266, %268 : vector<2x1xf32>
    %c0_149 = arith.constant 0 : index
    %c0_150 = arith.constant 0 : index
    %270 = vector.load %arg11[%c0_149, %c0_150] : memref<2x1xf32, #tpu.memory_space<vmem>>, vector<2x1xf32>
    tpu.vector_store %arg11[%c0_149, %c0_150], %269 {strides = array<i32>} : memref<2x1xf32, #tpu.memory_space<vmem>>, vector<2x1xf32>,
    return
  }
  func.func @transform_0(%arg0: i32) -> (i32, i32) {
    %c0_i32 = arith.constant 0 : i32
    %c0_i32_0 = arith.constant 0 : i32
    %c0_i32_1 = arith.constant 0 : i32
    return %c0_i32, %c0_i32_0 : i32, i32
  }
  func.func @transform_1(%arg0: i32) -> (i32, i32) {
    %c0_i32 = arith.constant 0 : i32
    %c0_i32_0 = arith.constant 0 : i32
    %c0_i32_1 = arith.constant 0 : i32
    return %c0_i32, %c0_i32_0 : i32, i32
  }
  func.func @transform_2(%arg0: i32) -> (i32, i32) {
    %c0_i32 = arith.constant 0 : i32
    %c0_i32_0 = arith.constant 0 : i32
    %c0_i32_1 = arith.constant 0 : i32
    return %c0_i32, %c0_i32_0 : i32, i32
  }
  func.func @transform_3(%arg0: i32) -> (i32, i32) {
    %c0_i32 = arith.constant 0 : i32
    %c0_i32_0 = arith.constant 0 : i32
    %c0_i32_1 = arith.constant 0 : i32
    return %c0_i32, %c0_i32_0 : i32, i32
  }
  func.func @transform_4(%arg0: i32) -> (i32, i32) {
    %c0_i32 = arith.constant 0 : i32
    %c0_i32_0 = arith.constant 0 : i32
    %c0_i32_1 = arith.constant 0 : i32
    return %c0_i32, %c0_i32_0 : i32, i32
  }
  func.func @transform_5(%arg0: i32) -> (i32, i32, i32) {
    %c0_i32 = arith.constant 0 : i32
    %c0_i32_0 = arith.constant 0 : i32
    %c0_i32_1 = arith.constant 0 : i32
    %c0_i32_2 = arith.constant 0 : i32
    return %c0_i32, %c0_i32_0, %c0_i32_1 : i32, i32, i32
  }
  func.func @transform_6(%arg0: i32) -> (i32, i32, i32) {
    %c0_i32 = arith.constant 0 : i32
    %c0_i32_0 = arith.constant 0 : i32
    %c0_i32_1 = arith.constant 0 : i32
    %c0_i32_2 = arith.constant 0 : i32
    return %c0_i32, %c0_i32_0, %c0_i32_1 : i32, i32, i32
  }
  func.func @transform_7(%arg0: i32) -> (i32, i32) {
    %c0_i32 = arith.constant 0 : i32
    %c0_i32_0 = arith.constant 0 : i32
    %c0_i32_1 = arith.constant 0 : i32
    return %c0_i32, %c0_i32_0 : i32, i32
  }
  func.func @transform_8(%arg0: i32) -> (i32, i32) {
    %c0_i32 = arith.constant 0 : i32
    %c0_i32_0 = arith.constant 0 : i32
    %c0_i32_1 = arith.constant 0 : i32
    return %c0_i32, %c0_i32_0 : i32, i32
  }
  func.func @transform_9(%arg0: i32) -> (i32, i32) {
    %c0_i32 = arith.constant 0 : i32
    %c0_i32_0 = arith.constant 0 : i32
    %c0_i32_1 = arith.constant 0 : i32
    return %c0_i32, %c0_i32_0 : i32, i32
  }
  func.func @transform_10(%arg0: i32) -> (i32, i32) {
    %c0_i32 = arith.constant 0 : i32
    %c0_i32_0 = arith.constant 0 : i32
    %c0_i32_1 = arith.constant 0 : i32
    return %c0_i32, %c0_i32_0 : i32, i32
  }
}

</mosaic_0001>

<bundles_post_ra>
// kernel: tpu_custom_call.1
= control target key start
LH: loop header
LB: loop body
LE: loop exit
PB: predicated region body
PF: predicated region fallthrough
CT: control target
= control target key end

     0   :  { %s20913_s0 = inlined_call_operand.hbm [shape: bf16[512,256], index: 0, kind: input, shape index: {}]   ;;  %s20914_s1 = inlined_call_operand.hbm [shape: bf16[1152,512], index: 1, kind: input, shape index: {}]   ;;  %s20915_s2 = inlined_call_operand.hbm [shape: bf16[288,128], index: 2, kind: input, shape index: {}]   ;;  %s20916_s3 = inlined_call_operand.vmem [shape: bf16[72,32], index: 3, kind: input, shape index: {}]   ;;  %s20917_s4 = inlined_call_operand.vmem [shape: bf16[72,8], index: 4, kind: input, shape index: {}]   ;;  %s20918_s5 = inlined_call_operand.hbm [shape: bf16[36,256,256], index: 5, kind: input, shape index: {}]   ;;  %s20919_s6 = inlined_call_operand.hbm [shape: f32[4,1,256], index: 6, kind: input, shape index: {}]   ;;  %s20920_s7 = inlined_call_operand.hbm [shape: f32[2,2], index: 7, kind: input, shape index: {}]   ;;  %s20921_s8 = inlined_call_operand.hbm [shape: f32[1,256], index: 8, kind: input, shape index: {}]   ;;  %s20922_s9 = inlined_call_operand.<no memory space> [shape: f32[1,1], index: 9, kind: input, shape index: {}]   ;;  %s20923_s10 = inlined_call_operand.vmem [shape: f32[2,1], index: 10, kind: output, shape index: {}]  }
   0x1   :  { %v15_v0 = vstv %s20922_s9 }
   0x2   :  { %16 = vst [vmem:[#allocation2] sm:$0x1] %v15_v0 }
   0x3   :  { %17 = vsyncpa [#allocation4], 0 }
   0x4   :  { %18 = vsyncpa [#allocation6], 0 }
   0x5   :  { %19 = vsyncpa [#allocation9], 0 }
   0x6   :  { %20 = vsyncpa [#allocation12], 0  ;;  %s19059_s15 = smov [#allocation5]   ;;  %s18897_s19 = scalar_lea.hbm %s20914_s1, 36864 }
   0x7   :  { %s38_s16 = sshll.u32 %s19059_s15, 4  ;;  %p18898_p0 = scmp.ne.s32.totalorder %s20914_s1, %s18897_s19  ;;  %s39_s16 = int_to_ptr.vmem [resolvable:$true] %s38_s16 }
   0x8   :  { %p18901_p1 = scmp.lt.u32.totalorder %s18897_s19, %s20914_s1 }
   0xa   :  { %p18903_p2 = pnand %p18901_p1, %p18898_p0 }
   0xc   :  { %18906 = shalt.err (!%p18903_p2)
}
   0xd   :  { %s18907_s9 = scalar_lea.vmem %s39_s16, 36864  ;;  %p18912_p4 = scmp.lt.s32.totalorder %s39_s16, %s39_s16 }
   0xe   :  { %p18908_p3 = scmp.ne.s32.totalorder %s39_s16, %s18907_s9  ;;  %p18913_p5 = scmp.lt.s32.totalorder %s18907_s9, %s18907_s9 }
  0x10   :  { %p18914_p6 = por %p18913_p5, %p18912_p4 }
  0x12   :  { %p18915_p7 = pnand %p18914_p6, %p18908_p3 }
  0x14   :  { %18918 = shalt.err (!%p18915_p7)
}
  0x15   :  { %s19060_s24 = smov 256   ;;  %s19061_s25 = smov 16  }
  0x16   :  { %44 = dma.hbm_to_vmem [thread:$0]  %s20914_s1, 36864, %s39_s16, [#allocation6], %s19060_s24, %s19060_s24, %s19061_s25  }
  0x17   :  { %s19062_s28 = smov [#allocation8]   ;;  %s19063_s30 = smov [#allocation11]  }
  0x18   :  { %s66_s29 = sshll.u32 %s19062_s28, 4  ;;  %s91_s11 = sshll.u32 %s19063_s30, 4  ;;  %s67_s29 = int_to_ptr.vmem [resolvable:$true] %s66_s29  ;;  %s92_s11 = int_to_ptr.vmem [resolvable:$true] %s91_s11 }
  0x19   :  { %s18919_s14 = scalar_lea.hbm %s20918_s5, 147456 }
  0x1a   :  { %p18920_p8 = scmp.ne.s32.totalorder %s20918_s5, %s18919_s14  ;;  %p18923_p9 = scmp.lt.u32.totalorder %s18919_s14, %s20918_s5 }
  0x1c   :  { %p18925_p10 = pnand %p18923_p9, %p18920_p8 }
  0x1e   :  { %18928 = shalt.err (!%p18925_p10)
}
  0x1f   :  { %s18929_s1 = scalar_lea.vmem %s67_s29, 147456  ;;  %p18934_p12 = scmp.lt.s32.totalorder %s67_s29, %s67_s29 }
  0x20   :  { %p18930_p11 = scmp.ne.s32.totalorder %s67_s29, %s18929_s1  ;;  %p18935_p13 = scmp.lt.s32.totalorder %s18929_s1, %s18929_s1 }
  0x22   :  { %p18936_p0 = por %p18935_p13, %p18934_p12 }
  0x24   :  { %p18937_p1 = pnand %p18936_p0, %p18930_p11 }
  0x26   :  { %18940 = shalt.err (!%p18937_p1)
}
  0x27   :  { %s19064_s16 = smov 128   ;;  %s19065_s20 = smov 8  }
  0x28   :  { %72 = dma.hbm_to_vmem [thread:$0]  %s20918_s5, 147456, %s67_s29, [#allocation9], %s19064_s16, %s19064_s16, %s19065_s20  }
  0x29   :  { %s18941_s24 = scalar_lea.hbm %s20920_s7, 32 }
  0x2a   :  { %p18942_p2 = scmp.ne.s32.totalorder %s20920_s7, %s18941_s24  ;;  %p18945_p3 = scmp.lt.u32.totalorder %s18941_s24, %s20920_s7 }
  0x2c   :  { %p18947_p4 = pnand %p18945_p3, %p18942_p2 }
  0x2e   :  { %18950 = shalt.err (!%p18947_p4)
}
  0x2f   :  { %s18951_s30 = scalar_lea.vmem %s92_s11, 32  ;;  %p18956_p6 = scmp.lt.s32.totalorder %s92_s11, %s92_s11 }
  0x30   :  { %p18952_p5 = scmp.ne.s32.totalorder %s92_s11, %s18951_s30  ;;  %p18957_p7 = scmp.lt.s32.totalorder %s18951_s30, %s18951_s30 }
  0x32   :  { %p18958_p8 = por %p18957_p7, %p18956_p6 }
  0x34   :  { %p18959_p9 = pnand %p18958_p8, %p18952_p5 }
  0x36   :  { %18962 = shalt.err (!%p18959_p9)
}
  0x37   :  { %94 = dma.hbm_to_vmem [thread:$0]  %s20920_s7, 32, %s92_s11, [#allocation12]  }
  0x38   :  { %s19066_s12 = smov [#allocation3]   ;;  %s19067_s14 = smov [#allocation7]  }
  0x39   :  { %s26_s13 = sshll.u32 %s19066_s12, 4  ;;  %s50_s15 = sshll.u32 %s19067_s14, 4  ;;  %s27_s13 = int_to_ptr.vmem [resolvable:$true] %s26_s13  ;;  %s51_s15 = int_to_ptr.vmem [resolvable:$true] %s50_s15 }
  0x3a   :  { %s18963_s19 = scalar_lea.hbm %s20913_s0, 8192 }
  0x3b   :  { %p18964_p10 = scmp.ne.s32.totalorder %s20913_s0, %s18963_s19  ;;  %p18967_p11 = scmp.lt.u32.totalorder %s18963_s19, %s20913_s0 }
  0x3d   :  { %p18969_p12 = pnand %p18967_p11, %p18964_p10 }
  0x3f   :  { %18972 = shalt.err (!%p18969_p12)
}
  0x40   :  { %s18973_s7 = scalar_lea.vmem %s27_s13, 8192  ;;  %p18978_p0 = scmp.lt.s32.totalorder %s27_s13, %s27_s13 }
  0x41   :  { %p18974_p13 = scmp.ne.s32.totalorder %s27_s13, %s18973_s7  ;;  %p18979_p1 = scmp.lt.s32.totalorder %s18973_s7, %s18973_s7 }
  0x43   :  { %p18980_p2 = por %p18979_p1, %p18978_p0 }
  0x45   :  { %p18981_p3 = pnand %p18980_p2, %p18974_p13 }
  0x47   :  { %18984 = shalt.err (!%p18981_p3)
}
  0x48   :  { %32 = dma.hbm_to_vmem [thread:$0]  %s20913_s0, 8192, %s27_s13, [#allocation4], %s19064_s16, %s19064_s16, %s19065_s20  }
  0x49   :  { %s18985_s26 = scalar_lea.hbm %s20915_s2, 2304 }
  0x4a   :  { %p18986_p4 = scmp.ne.s32.totalorder %s20915_s2, %s18985_s26  ;;  %p18989_p5 = scmp.lt.u32.totalorder %s18985_s26, %s20915_s2 }
  0x4c   :  { %p18991_p6 = pnand %p18989_p5, %p18986_p4 }
  0x4e   :  { %18994 = shalt.err (!%p18991_p6)
}
  0x4f   :  { %s18995_s29 = scalar_lea.vmem %s51_s15, 2304  ;;  %p19000_p8 = scmp.lt.s32.totalorder %s51_s15, %s51_s15 }
  0x50   :  { %p18996_p7 = scmp.ne.s32.totalorder %s51_s15, %s18995_s29  ;;  %p19001_p9 = scmp.lt.s32.totalorder %s18995_s29, %s18995_s29 }
  0x52   :  { %p19002_p10 = por %p19001_p9, %p19000_p8 }
  0x54   :  { %p19003_p11 = pnand %p19002_p10, %p18996_p7 }
  0x56   :  { %19006 = shalt.err (!%p19003_p11)
}
  0x57   :  { %s19068_s0 = smov 64   ;;  %s19069_s16 = smov 4  }
  0x58   :  { %56 = dma.hbm_to_vmem [thread:$0]  %s20915_s2, 2304, %s51_s15, [#allocation6], %s19068_s0, %s19068_s0, %s19069_s16  }
  0x59   :  { %s19070_s13 = smov [#allocation10]   ;;  %s19007_s19 = scalar_lea.hbm %s20919_s6, 128 }
  0x5a   :  { %s78_s14 = sshll.u32 %s19070_s13, 4  ;;  %p19008_p12 = scmp.ne.s32.totalorder %s20919_s6, %s19007_s19  ;;  %s79_s14 = int_to_ptr.vmem [resolvable:$true] %s78_s14 }
  0x5b   :  { %p19011_p13 = scmp.lt.u32.totalorder %s19007_s19, %s20919_s6 }
  0x5d   :  { %p19013_p0 = pnand %p19011_p13, %p19008_p12 }
  0x5f   :  { %19016 = shalt.err (!%p19013_p0)
}
  0x60   :  { %s19017_s7 = scalar_lea.vmem %s79_s14, 128  ;;  %p19022_p2 = scmp.lt.s32.totalorder %s79_s14, %s79_s14 }
  0x61   :  { %p19018_p1 = scmp.ne.s32.totalorder %s79_s14, %s19017_s7  ;;  %p19023_p3 = scmp.lt.s32.totalorder %s19017_s7, %s19017_s7 }
  0x63   :  { %p19024_p4 = por %p19023_p3, %p19022_p2 }
  0x65   :  { %p19025_p5 = pnand %p19024_p4, %p19018_p1 }
  0x67   :  { %19028 = shalt.err (!%p19025_p5)
}
  0x68   :  { %s19071_s2 = smov 32   ;;  %s19072_s15 = smov 2  }
  0x69   :  { %84 = dma.hbm_to_vmem [thread:$0]  %s20919_s6, 128, %s79_s14, [#allocation9], %s19071_s2, %s19071_s2, %s19072_s15  }
  0x6a   :  { %s19073_s24 = smov [#allocation13]   ;;  %s19029_s28 = scalar_lea.hbm %s20921_s8, 32 }
  0x6b   :  { %s101_s25 = sshll.u32 %s19073_s24, 4  ;;  %p19030_p6 = scmp.ne.s32.totalorder %s20921_s8, %s19029_s28  ;;  %s102_s25 = int_to_ptr.vmem [resolvable:$true] %s101_s25 }
  0x6c   :  { %p19033_p7 = scmp.lt.u32.totalorder %s19029_s28, %s20921_s8 }
  0x6e   :  { %p19035_p8 = pnand %p19033_p7, %p19030_p6 }
  0x70   :  { %19038 = shalt.err (!%p19035_p8)
}
  0x71   :  { %s19039_s16 = scalar_lea.vmem %s102_s25, 32  ;;  %p19044_p10 = scmp.lt.s32.totalorder %s102_s25, %s102_s25 }
  0x72   :  { %p19040_p9 = scmp.ne.s32.totalorder %s102_s25, %s19039_s16  ;;  %p19045_p11 = scmp.lt.s32.totalorder %s19039_s16, %s19039_s16 }
  0x74   :  { %p19046_p12 = por %p19045_p11, %p19044_p10 }
  0x76   :  { %p19047_p13 = pnand %p19046_p12, %p19040_p9 }
  0x78   :  { %19050 = shalt.err (!%p19047_p13)
}
  0x79   :  { %104 = dma.hbm_to_vmem [thread:$0]  %s20921_s8, 32, %s102_s25, [#allocation12]  }
  0x7a   :  { %19051 = dma.done.wait [#allocation4], 8192  }
  0x7b   :  { %19052 = vsyncadd [#allocation4], 4294959104 }
  0x7c   :  { %19053 = dma.done.wait [#allocation6], 39168  }
  0x7d   :  { %19054 = vsyncadd [#allocation6], 4294928128 }
  0x7e   :  { %19055 = dma.done.wait [#allocation9], 147584  }
  0x7f   :  { %19056 = vsyncadd [#allocation9], 4294819712 }
  0x80   :  { %19057 = dma.done.wait [#allocation12], 64  }
  0x81   :  { %19058 = vsyncadd [#allocation12], 4294967232  ;;  %v16613_v1 = vld [vmem:[#allocation3 + $0x4] ss:$8 sps:$4 sm:$0xff]   ;;  %v16615_v2 = vld [vmem:[#allocation3] ss:$8 sps:$4 sm:$0xff]  }
  0x82   :  { %2241 = vmatprep.subr.bf16.mxu0 %v16613_v1  ;;  %v16616_v3 = vld [vmem:[#allocation3 + $0x14] ss:$8 sps:$4 sm:$0xff]   ;;  %v16618_v4 = vld [vmem:[#allocation3 + $0x10] ss:$8 sps:$4 sm:$0xff]   ;;  %v16619_v5 = vld [vmem:[#allocation3 + $0x24] ss:$8 sps:$4 sm:$0xff]  }
  0x83   :  { %2242 = vmatpush1.bf16.msra.mxu0 %v16615_v2  ;;  %v16621_v6 = vld [vmem:[#allocation3 + $0x20] ss:$8 sps:$4 sm:$0xff]   ;;  %v16622_v7 = vld [vmem:[#allocation3 + $0x34] ss:$8 sps:$4 sm:$0xff]   ;;  %v16624_v8 = vld [vmem:[#allocation3 + $0x30] ss:$8 sps:$4 sm:$0xff]  }
  0x84   :  { %2243 = vmatprep.subr.bf16.mxu0 %v16616_v3  ;;  %v16625_v9 = vld [vmem:[#allocation3 + $0x44] ss:$8 sps:$4 sm:$0xff]   ;;  %v16627_v10 = vld [vmem:[#allocation3 + $0x40] ss:$8 sps:$4 sm:$0xff]   ;;  %v16628_v11 = vld [vmem:[#allocation3 + $0x54] ss:$8 sps:$4 sm:$0xff]  }
  0x85   :  { %v16630_v12 = vld [vmem:[#allocation3 + $0x50] ss:$8 sps:$4 sm:$0xff]   ;;  %v16631_v13 = vld [vmem:[#allocation3 + $0x64] ss:$8 sps:$4 sm:$0xff]   ;;  %v16633_v15 = vld [vmem:[#allocation3 + $0x60] ss:$8 sps:$4 sm:$0xff]  }
  0x86   :  { %v16663_v14 = vld [vmem:[#allocation5 + $0x4] ss:$16 sps:$4 sm:$0xff]   ;;  %v16636_v17 = vld [vmem:[#allocation3 + $0x70] ss:$8 sps:$4 sm:$0xff]   ;;  %v16639_v19 = vld [vmem:[#allocation3 + $0x80] ss:$8 sps:$4 sm:$0xff]  }
  0x87   :  { %2244 = vmatpush1.bf16.msra.mxu0 %v16618_v4  ;;  %v16634_v16 = vld [vmem:[#allocation3 + $0x74] ss:$8 sps:$4 sm:$0xff]   ;;  %2273 = vmatprep.mubr.bf16.mxu0 %v16663_v14  ;;  %v16637_v18 = vld [vmem:[#allocation3 + $0x84] ss:$8 sps:$4 sm:$0xff]   ;;  %v16642_v21 = vld [vmem:[#allocation3 + $0x90] ss:$8 sps:$4 sm:$0xff]  }
  0x88   :  { %2245 = vmatprep.subr.bf16.mxu0 %v16619_v5  ;;  %v16640_v20 = vld [vmem:[#allocation3 + $0x94] ss:$8 sps:$4 sm:$0xff]   ;;  %v16643_v22 = vld [vmem:[#allocation3 + $0xa4] ss:$8 sps:$4 sm:$0xff]   ;;  %v16645_v23 = vld [vmem:[#allocation3 + $0xa0] ss:$8 sps:$4 sm:$0xff]  }
  0x89   :  { %v16646_v24 = vld [vmem:[#allocation3 + $0xb4] ss:$8 sps:$4 sm:$0xff]   ;;  %v16648_v25 = vld [vmem:[#allocation3 + $0xb0] ss:$8 sps:$4 sm:$0xff]   ;;  %v16649_v26 = vld [vmem:[#allocation3 + $0xc4] ss:$8 sps:$4 sm:$0xff]  }
  0x8a   :  { %v16651_v27 = vld [vmem:[#allocation3 + $0xc0] ss:$8 sps:$4 sm:$0xff]   ;;  %v16652_v28 = vld [vmem:[#allocation3 + $0xd4] ss:$8 sps:$4 sm:$0xff]   ;;  %v16654_v29 = vld [vmem:[#allocation3 + $0xd0] ss:$8 sps:$4 sm:$0xff]  }
  0x8b   :  { %2246 = vmatpush1.bf16.msra.mxu0 %v16621_v6  ;;  %v16655_v30 = vld [vmem:[#allocation3 + $0xe4] ss:$8 sps:$4 sm:$0xff]   ;;  %v16657_v31 = vld [vmem:[#allocation3 + $0xe0] ss:$8 sps:$4 sm:$0xff]   ;;  %v16658_v32 = vld [vmem:[#allocation3 + $0xf4] ss:$8 sps:$4 sm:$0xff]  }
  0x8c   :  { %2247 = vmatprep.subr.bf16.mxu0 %v16622_v7  ;;  %v16660_v33 = vld [vmem:[#allocation3 + $0xf0] ss:$8 sps:$4 sm:$0xff]   ;;  %v16666_v34 = vld [vmem:[#allocation3 + $0x104] ss:$8 sps:$4 sm:$0xff]   ;;  %v16664_v36 = vld [vmem:[#allocation3 + $0x100] ss:$8 sps:$4 sm:$0xff]  }
  0x8d   :  { %v16661_v35 = vld [vmem:[#allocation5] ss:$16 sps:$4 sm:$0xff]   ;;  %v16667_v37 = vld [vmem:[#allocation5 + $0x24] ss:$16 sps:$4 sm:$0xff]  }
  0x8e   :  { %v16684_v38 = vld [vmem:[#allocation3 + $0x114] ss:$8 sps:$4 sm:$0xff]   ;;  %v16682_v39 = vld [vmem:[#allocation3 + $0x110] ss:$8 sps:$4 sm:$0xff]   ;;  %v16699_v40 = vld [vmem:[#allocation3 + $0x124] ss:$8 sps:$4 sm:$0xff]  }
  0x8f   :  { %2248 = vmatpush1.bf16.msra.mxu0 %v16624_v8  ;;  %v16669_v41 = vld [vmem:[#allocation5 + $0x20] ss:$16 sps:$4 sm:$0xff]   ;;  %v16670_v42 = vld [vmem:[#allocation5 + $0x44] ss:$16 sps:$4 sm:$0xff]  }
  0x90   :  { %2249 = vmatprep.subr.bf16.mxu0 %v16625_v9  ;;  %v16697_v43 = vld [vmem:[#allocation3 + $0x120] ss:$8 sps:$4 sm:$0xff]   ;;  %v16717_v44 = vld [vmem:[#allocation3 + $0x134] ss:$8 sps:$4 sm:$0xff]   ;;  %v16715_v45 = vld [vmem:[#allocation3 + $0x130] ss:$8 sps:$4 sm:$0xff]  }
  0x91   :  { %v16672_v46 = vld [vmem:[#allocation5 + $0x40] ss:$16 sps:$4 sm:$0xff]   ;;  %v16673_v47 = vld [vmem:[#allocation5 + $0x64] ss:$16 sps:$4 sm:$0xff]  }
  0x92   :  { %v16730_v48 = vld [vmem:[#allocation3 + $0x140] ss:$8 sps:$4 sm:$0xff]   ;;  %v16732_v49 = vld [vmem:[#allocation3 + $0x144] ss:$8 sps:$4 sm:$0xff]   ;;  %v16748_v60 = vld [vmem:[#allocation3 + $0x150] ss:$8 sps:$4 sm:$0xff]  }
  0x93   :  { %2250 = vmatpush1.bf16.msra.mxu0 %v16627_v10  ;;  %v16675_v50 = vld [vmem:[#allocation5 + $0x60] ss:$16 sps:$4 sm:$0xff]   ;;  %v16676_v51 = vld [vmem:[#allocation5 + $0x84] ss:$16 sps:$4 sm:$0xff]  }
  0x94   :  { %2251 = vmatprep.subr.bf16.mxu0 %v16628_v11  ;;  %v16678_v52 = vld [vmem:[#allocation5 + $0x80] ss:$16 sps:$4 sm:$0xff]   ;;  %v16679_v53 = vld [vmem:[#allocation5 + $0xa4] ss:$16 sps:$4 sm:$0xff]  }
  0x95   :  { %v16681_v54 = vld [vmem:[#allocation5 + $0xa0] ss:$16 sps:$4 sm:$0xff]   ;;  %v16685_v55 = vld [vmem:[#allocation5 + $0xc4] ss:$16 sps:$4 sm:$0xff]  }
  0x96   :  { %v16687_v56 = vld [vmem:[#allocation5 + $0xc0] ss:$16 sps:$4 sm:$0xff]   ;;  %v16688_v57 = vld [vmem:[#allocation5 + $0xe4] ss:$16 sps:$4 sm:$0xff]  }
  0x97   :  { %2252 = vmatpush1.bf16.msra.mxu0 %v16630_v12  ;;  %v16690_v58 = vld [vmem:[#allocation5 + $0xe0] ss:$16 sps:$4 sm:$0xff]   ;;  %v16691_v59 = vld [vmem:[#allocation5 + $0x104] ss:$16 sps:$4 sm:$0xff]  }
  0x98   :  { %2253 = vmatprep.subr.bf16.mxu0 %v16631_v13  ;;  %v16750_v61 = vld [vmem:[#allocation3 + $0x154] ss:$8 sps:$4 sm:$0xff]   ;;  %v16693_v62 = vld [vmem:[#allocation5 + $0x100] ss:$16 sps:$4 sm:$0xff]   ;;  %v16765_v7 = vld [vmem:[#allocation3 + $0x164] ss:$8 sps:$4 sm:$0xff]  }
  0x99   :  { %v16694_v63 = vld [vmem:[#allocation5 + $0x124] ss:$16 sps:$4 sm:$0xff]   ;;  %v16696_v0 = vld [vmem:[#allocation5 + $0x120] ss:$16 sps:$4 sm:$0xff]  }
  0x9a   :  { %v16700_v1 = vld [vmem:[#allocation5 + $0x144] ss:$16 sps:$4 sm:$0xff]   ;;  %v16702_v2 = vld [vmem:[#allocation5 + $0x140] ss:$16 sps:$4 sm:$0xff]  }
  0x9b   :  { %2254 = vmatpush1.bf16.msra.mxu0 %v16633_v15  ;;  %v16703_v3 = vld [vmem:[#allocation5 + $0x164] ss:$16 sps:$4 sm:$0xff]   ;;  %v16705_v4 = vld [vmem:[#allocation5 + $0x160] ss:$16 sps:$4 sm:$0xff]  }
  0x9c   :  { %2255 = vmatprep.subr.bf16.mxu0 %v16634_v16  ;;  %v16706_v5 = vld [vmem:[#allocation5 + $0x184] ss:$16 sps:$4 sm:$0xff]   ;;  %v16763_v6 = vld [vmem:[#allocation3 + $0x160] ss:$8 sps:$4 sm:$0xff]  }
  0x9d   :  { %v16708_v8 = vld [vmem:[#allocation5 + $0x180] ss:$16 sps:$4 sm:$0xff]   ;;  %v16709_v9 = vld [vmem:[#allocation5 + $0x1a4] ss:$16 sps:$4 sm:$0xff]  }
  0x9e   :  { %v16711_v10 = vld [vmem:[#allocation5 + $0x1a0] ss:$16 sps:$4 sm:$0xff]   ;;  %v16712_v11 = vld [vmem:[#allocation5 + $0x1c4] ss:$16 sps:$4 sm:$0xff]  }
  0x9f   :  { %2256 = vmatpush1.bf16.msra.mxu0 %v16636_v17  ;;  %v16714_v12 = vld [vmem:[#allocation5 + $0x1c0] ss:$16 sps:$4 sm:$0xff]   ;;  %v16718_v13 = vld [vmem:[#allocation5 + $0x1e4] ss:$16 sps:$4 sm:$0xff]  }
  0xa0   :  { %2257 = vmatprep.subr.bf16.mxu0 %v16637_v18  ;;  %v16720_v14 = vld [vmem:[#allocation5 + $0x1e0] ss:$16 sps:$4 sm:$0xff]   ;;  %v16721_v15 = vld [vmem:[#allocation5 + $0x204] ss:$16 sps:$4 sm:$0xff]  }
  0xa1   :  { %v16723_v16 = vld [vmem:[#allocation5 + $0x200] ss:$16 sps:$4 sm:$0xff]   ;;  %v16724_v17 = vld [vmem:[#allocation5 + $0x224] ss:$16 sps:$4 sm:$0xff]  }
  0xa2   :  { %v16781_v18 = vld [vmem:[#allocation3 + $0x170] ss:$8 sps:$4 sm:$0xff]  }
  0xa3   :  { %2258 = vmatpush1.bf16.msra.mxu0 %v16639_v19  ;;  %v16783_v19 = vld [vmem:[#allocation3 + $0x174] ss:$8 sps:$4 sm:$0xff]  }
  0xa4   :  { %2259 = vmatprep.subr.bf16.mxu0 %v16640_v20  ;;  %v16726_v20 = vld [vmem:[#allocation5 + $0x220] ss:$16 sps:$4 sm:$0xff]  }
  0xa7   :  { %2260 = vmatpush1.bf16.msra.mxu0 %v16642_v21  ;;  %v16727_v21 = vld [vmem:[#allocation5 + $0x244] ss:$16 sps:$4 sm:$0xff]  }
  0xa8   :  { %2261 = vmatprep.subr.bf16.mxu0 %v16643_v22  ;;  %v16729_v22 = vld [vmem:[#allocation5 + $0x240] ss:$16 sps:$4 sm:$0xff]  }
  0xab   :  { %2262 = vmatpush1.bf16.msra.mxu0 %v16645_v23  ;;  %v16733_v23 = vld [vmem:[#allocation5 + $0x264] ss:$16 sps:$4 sm:$0xff]  }
  0xac   :  { %2263 = vmatprep.subr.bf16.mxu0 %v16646_v24  ;;  %v16735_v24 = vld [vmem:[#allocation5 + $0x260] ss:$16 sps:$4 sm:$0xff]  }
  0xaf   :  { %2264 = vmatpush1.bf16.msra.mxu0 %v16648_v25  ;;  %v16736_v25 = vld [vmem:[#allocation5 + $0x284] ss:$16 sps:$4 sm:$0xff]  }
  0xb0   :  { %2265 = vmatprep.subr.bf16.mxu0 %v16649_v26  ;;  %v16738_v26 = vld [vmem:[#allocation5 + $0x280] ss:$16 sps:$4 sm:$0xff]  }
  0xb3   :  { %2266 = vmatpush1.bf16.msra.mxu0 %v16651_v27  ;;  %v16739_v27 = vld [vmem:[#allocation5 + $0x2a4] ss:$16 sps:$4 sm:$0xff]  }
  0xb4   :  { %2267 = vmatprep.subr.bf16.mxu0 %v16652_v28  ;;  %v16796_v28 = vld [vmem:[#allocation3 + $0x180] ss:$8 sps:$4 sm:$0xff]  }
  0xb7   :  { %2268 = vmatpush1.bf16.msra.mxu0 %v16654_v29  ;;  %v16798_v29 = vld [vmem:[#allocation3 + $0x184] ss:$8 sps:$4 sm:$0xff]  }
  0xb8   :  { %2269 = vmatprep.subr.bf16.mxu0 %v16655_v30  ;;  %v16741_v30 = vld [vmem:[#allocation5 + $0x2a0] ss:$16 sps:$4 sm:$0xff]  }
  0xbb   :  { %2270 = vmatpush1.bf16.msra.mxu0 %v16657_v31  ;;  %v16742_v31 = vld [vmem:[#allocation5 + $0x2c4] ss:$16 sps:$4 sm:$0xff]  }
  0xbc   :  { %2271 = vmatprep.subr.bf16.mxu0 %v16658_v32  ;;  %v16744_v32 = vld [vmem:[#allocation5 + $0x2c0] ss:$16 sps:$4 sm:$0xff]  }
  0xbf   :  { %2272 = vmatpush1.bf16.msra.mxu0 %v16660_v33  ;;  %v16745_v33 = vld [vmem:[#allocation5 + $0x2e4] ss:$16 sps:$4 sm:$0xff]  }
  0xc0   :  { %2994 = vmatprep.subr.bf16.mxu0 %v16666_v34  ;;  %v16747_v34 = vld [vmem:[#allocation5 + $0x2e0] ss:$16 sps:$4 sm:$0xff]  }
  0xc2   :  { %2274 = vmatmul.mubr.bf16.vlgmr.msra.gmra.mrb[0].mxu0 %v16661_v35  ;;  %v16751_v35 = vld [vmem:[#allocation5 + $0x304] ss:$16 sps:$4 sm:$0xff]  }
  0xc3   :  { %2283 = vmatprep.mubr.bf16.mxu0 %v16667_v37  ;;  %2995 = vmatpush1.bf16.msra.mxu0 %v16664_v36  ;;  %v16753_v36 = vld [vmem:[#allocation5 + $0x300] ss:$16 sps:$4 sm:$0xff]   ;;  %v16754_v37 = vld [vmem:[#allocation5 + $0x324] ss:$16 sps:$4 sm:$0xff]  }
  0xc4   :  { %2996 = vmatprep.subr.bf16.mxu0 %v16684_v38  ;;  %v16756_v38 = vld [vmem:[#allocation5 + $0x320] ss:$16 sps:$4 sm:$0xff]  }
  0xc7   :  { %2997 = vmatpush1.bf16.msra.mxu0 %v16682_v39  ;;  %v16757_v39 = vld [vmem:[#allocation5 + $0x344] ss:$16 sps:$4 sm:$0xff]  }
  0xc8   :  { %2998 = vmatprep.subr.bf16.mxu0 %v16699_v40  ;;  %v16814_v40 = vld [vmem:[#allocation3 + $0x190] ss:$8 sps:$4 sm:$0xff]  }
  0xca   :  { %2284 = vmatmul.mubr.bf16.gmra.mrb[4].mxu0 %v16669_v41  ;;  %v16816_v41 = vld [vmem:[#allocation3 + $0x194] ss:$8 sps:$4 sm:$0xff]  }
  0xcb   :  { %2293 = vmatprep.mubr.bf16.mxu0 %v16670_v42  ;;  %2999 = vmatpush1.bf16.msra.mxu0 %v16697_v43  ;;  %v16759_v42 = vld [vmem:[#allocation5 + $0x340] ss:$16 sps:$4 sm:$0xff]   ;;  %v16760_v43 = vld [vmem:[#allocation5 + $0x364] ss:$16 sps:$4 sm:$0xff]  }
  0xcc   :  { %3000 = vmatprep.subr.bf16.mxu0 %v16717_v44  ;;  %v16762_v44 = vld [vmem:[#allocation5 + $0x360] ss:$16 sps:$4 sm:$0xff]  }
  0xcf   :  { %3001 = vmatpush1.bf16.msra.mxu0 %v16715_v45  ;;  %v16766_v45 = vld [vmem:[#allocation5 + $0x384] ss:$16 sps:$4 sm:$0xff]  }
  0xd0   :  { %3002 = vmatprep.subr.bf16.mxu0 %v16732_v49  ;;  %v16772_v49 = vld [vmem:[#allocation5 + $0x3c4] ss:$16 sps:$4 sm:$0xff]  }
  0xd2   :  { %2294 = vmatmul.mubr.bf16.gmra.mrb[8].mxu0 %v16672_v46  ;;  %v16768_v46 = vld [vmem:[#allocation5 + $0x380] ss:$16 sps:$4 sm:$0xff]  }
  0xd3   :  { %2303 = vmatprep.mubr.bf16.mxu0 %v16673_v47  ;;  %3003 = vmatpush1.bf16.msra.mxu0 %v16730_v48  ;;  %v16769_v47 = vld [vmem:[#allocation5 + $0x3a4] ss:$16 sps:$4 sm:$0xff]   ;;  %v16771_v48 = vld [vmem:[#allocation5 + $0x3a0] ss:$16 sps:$4 sm:$0xff]  }
  0xd4   :  { %3004 = vmatprep.subr.bf16.mxu0 %v16750_v61  ;;  %v16790_v61 = vld [vmem:[#allocation5 + $0x464] ss:$16 sps:$4 sm:$0xff]  }
  0xd7   :  { %3005 = vmatpush1.bf16.msra.mxu0 %v16748_v60  ;;  %v16789_v60 = vld [vmem:[#allocation5 + $0x440] ss:$16 sps:$4 sm:$0xff]  }
  0xd8   :  { %3006 = vmatprep.subr.bf16.mxu0 %v16765_v7  ;;  %v16805_v7 = vld [vmem:[#allocation5 + $0x4e4] ss:$16 sps:$4 sm:$0xff]  }
  0xda   :  { %2304 = vmatmul.mubr.bf16.gmra.mrb[12].mxu0 %v16675_v50  ;;  %v16829_v50 = vld [vmem:[#allocation3 + $0x1a0] ss:$8 sps:$4 sm:$0xff]  }
  0xdb   :  { %2313 = vmatprep.mubr.bf16.mxu0 %v16676_v51  ;;  %3007 = vmatpush1.bf16.msra.mxu0 %v16763_v6  ;;  %v16831_v51 = vld [vmem:[#allocation3 + $0x1a4] ss:$8 sps:$4 sm:$0xff]   ;;  %v16804_v6 = vld [vmem:[#allocation5 + $0x4c0] ss:$16 sps:$4 sm:$0xff]  }
  0xdc   :  { %3008 = vmatprep.subr.bf16.mxu0 %v16783_v19  ;;  %v16823_v19 = vld [vmem:[#allocation5 + $0x584] ss:$16 sps:$4 sm:$0xff]  }
  0xdf   :  { %3009 = vmatpush1.bf16.msra.mxu0 %v16781_v18  ;;  %v16822_v18 = vld [vmem:[#allocation5 + $0x560] ss:$16 sps:$4 sm:$0xff]  }
  0xe0   :  { %3010 = vmatprep.subr.bf16.mxu0 %v16798_v29  ;;  %v16838_v29 = vld [vmem:[#allocation5 + $0x604] ss:$16 sps:$4 sm:$0xff]  }
  0xe2   :  { %2314 = vmatmul.mubr.bf16.gmra.mrb[16].mxu0 %v16678_v52  ;;  %v16774_v52 = vld [vmem:[#allocation5 + $0x3c0] ss:$16 sps:$4 sm:$0xff]  }
  0xe3   :  { %2323 = vmatprep.mubr.bf16.mxu0 %v16679_v53  ;;  %3011 = vmatpush1.bf16.msra.mxu0 %v16796_v28  ;;  %v16775_v53 = vld [vmem:[#allocation5 + $0x3e4] ss:$16 sps:$4 sm:$0xff]   ;;  %v16837_v28 = vld [vmem:[#allocation5 + $0x5e0] ss:$16 sps:$4 sm:$0xff]  }
  0xe4   :  { %3012 = vmatprep.subr.bf16.mxu0 %v16816_v41  ;;  %v16856_v41 = vld [vmem:[#allocation5 + $0x6a4] ss:$16 sps:$4 sm:$0xff]  }
  0xe7   :  { %3013 = vmatpush1.bf16.msra.mxu0 %v16814_v40  ;;  %v16855_v40 = vld [vmem:[#allocation5 + $0x680] ss:$16 sps:$4 sm:$0xff]  }
  0xe8   :  { %3014 = vmatprep.subr.bf16.mxu0 %v16831_v51  ;;  %v16871_v51 = vld [vmem:[#allocation5 + $0x724] ss:$16 sps:$4 sm:$0xff]  }
  0xea   :  { %2324 = vmatmul.mubr.bf16.gmra.mrb[20].mxu0 %v16681_v54  ;;  %v16777_v54 = vld [vmem:[#allocation5 + $0x3e0] ss:$16 sps:$4 sm:$0xff]  }
  0xeb   :  { %2333 = vmatprep.mubr.bf16.mxu0 %v16685_v55  ;;  %3015 = vmatpush1.bf16.msra.mxu0 %v16829_v50  ;;  %v16778_v55 = vld [vmem:[#allocation5 + $0x404] ss:$16 sps:$4 sm:$0xff]   ;;  %v16870_v50 = vld [vmem:[#allocation5 + $0x700] ss:$16 sps:$4 sm:$0xff]  }
  0xf2   :  { %2334 = vmatmul.mubr.bf16.gmra.mrb[24].mxu0 %v16687_v56  ;;  %v16780_v56 = vld [vmem:[#allocation5 + $0x400] ss:$16 sps:$4 sm:$0xff]  }
  0xf3   :  { %2343 = vmatprep.mubr.bf16.mxu0 %v16688_v57  ;;  %v16784_v57 = vld [vmem:[#allocation5 + $0x424] ss:$16 sps:$4 sm:$0xff]  }
  0xfa   :  { %2344 = vmatmul.mubr.bf16.gmra.mrb[28].mxu0 %v16690_v58  ;;  %v16786_v58 = vld [vmem:[#allocation5 + $0x420] ss:$16 sps:$4 sm:$0xff]  }
  0xfb   :  { %2353 = vmatprep.mubr.bf16.mxu0 %v16691_v59  ;;  %v16787_v59 = vld [vmem:[#allocation5 + $0x444] ss:$16 sps:$4 sm:$0xff]  }
 0x102   :  { %2354 = vmatmul.mubr.bf16.gmra.mrb[32].mxu0 %v16693_v62  ;;  %v16847_v62 = vld [vmem:[#allocation3 + $0x1b0] ss:$8 sps:$4 sm:$0xff]  }
 0x103   :  { %2363 = vmatprep.mubr.bf16.mxu0 %v16694_v63  ;;  %v16849_v63 = vld [vmem:[#allocation3 + $0x1b4] ss:$8 sps:$4 sm:$0xff]  }
 0x104   :  { %3016 = vmatprep.subr.bf16.mxu0 %v16849_v63  ;;  %v16892_v63 = vld [vmem:[#allocation5 + $0x7e4] ss:$16 sps:$4 sm:$0xff]  }
 0x105   :  { %3017 = vmatpush1.bf16.msra.mxu0 %v16847_v62  ;;  %v16891_v62 = vld [vmem:[#allocation5 + $0x7c0] ss:$16 sps:$4 sm:$0xff]  }
 0x10a   :  { %2364 = vmatmul.mubr.bf16.gmra.mrb[36].mxu0 %v16696_v0  ;;  %v16792_v0 = vld [vmem:[#allocation5 + $0x460] ss:$16 sps:$4 sm:$0xff]  }
 0x10b   :  { %2373 = vmatprep.mubr.bf16.mxu0 %v16700_v1  ;;  %v16793_v1 = vld [vmem:[#allocation5 + $0x484] ss:$16 sps:$4 sm:$0xff]  }
 0x112   :  { %2374 = vmatmul.mubr.bf16.gmra.mrb[40].mxu0 %v16702_v2  ;;  %v16795_v2 = vld [vmem:[#allocation5 + $0x480] ss:$16 sps:$4 sm:$0xff]  }
 0x113   :  { %2383 = vmatprep.mubr.bf16.mxu0 %v16703_v3  ;;  %v16799_v3 = vld [vmem:[#allocation5 + $0x4a4] ss:$16 sps:$4 sm:$0xff]  }
 0x11a   :  { %2384 = vmatmul.mubr.bf16.gmra.mrb[44].mxu0 %v16705_v4  ;;  %v16801_v4 = vld [vmem:[#allocation5 + $0x4a0] ss:$16 sps:$4 sm:$0xff]  }
 0x11b   :  { %2393 = vmatprep.mubr.bf16.mxu0 %v16706_v5  ;;  %v16802_v5 = vld [vmem:[#allocation5 + $0x4c4] ss:$16 sps:$4 sm:$0xff]  }
 0x122   :  { %2394 = vmatmul.mubr.bf16.gmra.mrb[48].mxu0 %v16708_v8  ;;  %v16862_v8 = vld [vmem:[#allocation3 + $0x1c0] ss:$8 sps:$4 sm:$0xff]  }
 0x123   :  { %2403 = vmatprep.mubr.bf16.mxu0 %v16709_v9  ;;  %v16864_v9 = vld [vmem:[#allocation3 + $0x1c4] ss:$8 sps:$4 sm:$0xff]  }
 0x124   :  { %3018 = vmatprep.subr.bf16.mxu0 %v16864_v9 }
 0x125   :  { %3019 = vmatpush1.bf16.msra.mxu0 %v16862_v8  ;;  %v16901_v8 = vld [vmem:[#allocation5 + $0x820] ss:$16 sps:$4 sm:$0xff]  }
 0x12a   :  { %2404 = vmatmul.mubr.bf16.gmra.mrb[52].mxu0 %v16711_v10  ;;  %v16807_v10 = vld [vmem:[#allocation5 + $0x4e0] ss:$16 sps:$4 sm:$0xff]  }
 0x12b   :  { %2413 = vmatprep.mubr.bf16.mxu0 %v16712_v11  ;;  %v16808_v11 = vld [vmem:[#allocation5 + $0x504] ss:$16 sps:$4 sm:$0xff]  }
 0x132   :  { %2414 = vmatmul.mubr.bf16.gmra.mrb[56].mxu0 %v16714_v12  ;;  %v16810_v12 = vld [vmem:[#allocation5 + $0x500] ss:$16 sps:$4 sm:$0xff]  }
 0x133   :  { %2423 = vmatprep.mubr.bf16.mxu0 %v16718_v13  ;;  %v16811_v13 = vld [vmem:[#allocation5 + $0x524] ss:$16 sps:$4 sm:$0xff]  }
 0x13a   :  { %2424 = vmatmul.mubr.bf16.gmra.mrb[60].mxu0 %v16720_v14  ;;  %v16813_v14 = vld [vmem:[#allocation5 + $0x520] ss:$16 sps:$4 sm:$0xff]  }
 0x13b   :  { %2433 = vmatprep.mubr.bf16.mxu0 %v16721_v15  ;;  %v16817_v15 = vld [vmem:[#allocation5 + $0x544] ss:$16 sps:$4 sm:$0xff]  }
 0x142   :  { %2434 = vmatmul.mubr.bf16.gmra.mrb[64].mxu0 %v16723_v16  ;;  %v16819_v16 = vld [vmem:[#allocation5 + $0x540] ss:$16 sps:$4 sm:$0xff]  }
 0x143   :  { %2443 = vmatprep.mubr.bf16.mxu0 %v16724_v17  ;;  %v16820_v17 = vld [vmem:[#allocation5 + $0x564] ss:$16 sps:$4 sm:$0xff]  }
 0x14a   :  { %2444 = vmatmul.mubr.bf16.gmra.mrb[68].mxu0 %v16726_v20  ;;  %v16880_v20 = vld [vmem:[#allocation3 + $0x1d0] ss:$8 sps:$4 sm:$0xff]  }
 0x14b   :  { %2453 = vmatprep.mubr.bf16.mxu0 %v16727_v21  ;;  %v16882_v21 = vld [vmem:[#allocation3 + $0x1d4] ss:$8 sps:$4 sm:$0xff]  }
 0x14c   :  { %3020 = vmatprep.subr.bf16.mxu0 %v16882_v21 }
 0x14d   :  { %3021 = vmatpush1.bf16.msra.mxu0 %v16880_v20 }
 0x152   :  { %2454 = vmatmul.mubr.bf16.gmra.mrb[72].mxu0 %v16729_v22  ;;  %v16825_v22 = vld [vmem:[#allocation5 + $0x580] ss:$16 sps:$4 sm:$0xff]  }
 0x153   :  { %2463 = vmatprep.mubr.bf16.mxu0 %v16733_v23  ;;  %v16826_v23 = vld [vmem:[#allocation5 + $0x5a4] ss:$16 sps:$4 sm:$0xff]  }
 0x15a   :  { %2464 = vmatmul.mubr.bf16.gmra.mrb[76].mxu0 %v16735_v24  ;;  %v16828_v24 = vld [vmem:[#allocation5 + $0x5a0] ss:$16 sps:$4 sm:$0xff]  }
 0x15b   :  { %2473 = vmatprep.mubr.bf16.mxu0 %v16736_v25  ;;  %v16832_v25 = vld [vmem:[#allocation5 + $0x5c4] ss:$16 sps:$4 sm:$0xff]  }
 0x162   :  { %2474 = vmatmul.mubr.bf16.gmra.mrb[80].mxu0 %v16738_v26  ;;  %v16834_v26 = vld [vmem:[#allocation5 + $0x5c0] ss:$16 sps:$4 sm:$0xff]  }
 0x163   :  { %2483 = vmatprep.mubr.bf16.mxu0 %v16739_v27  ;;  %v16835_v27 = vld [vmem:[#allocation5 + $0x5e4] ss:$16 sps:$4 sm:$0xff]  }
 0x16a   :  { %2484 = vmatmul.mubr.bf16.gmra.mrb[84].mxu0 %v16741_v30  ;;  %v16840_v30 = vld [vmem:[#allocation5 + $0x600] ss:$16 sps:$4 sm:$0xff]  }
 0x16b   :  { %2493 = vmatprep.mubr.bf16.mxu0 %v16742_v31  ;;  %v16841_v31 = vld [vmem:[#allocation5 + $0x624] ss:$16 sps:$4 sm:$0xff]  }
 0x172   :  { %2494 = vmatmul.mubr.bf16.gmra.mrb[88].mxu0 %v16744_v32  ;;  %v16895_v32 = vld [vmem:[#allocation3 + $0x1e0] ss:$8 sps:$4 sm:$0xff]  }
 0x173   :  { %2503 = vmatprep.mubr.bf16.mxu0 %v16745_v33  ;;  %v16897_v33 = vld [vmem:[#allocation3 + $0x1e4] ss:$8 sps:$4 sm:$0xff]  }
 0x174   :  { %3022 = vmatprep.subr.bf16.mxu0 %v16897_v33 }
 0x175   :  { %3023 = vmatpush1.bf16.msra.mxu0 %v16895_v32 }
 0x17a   :  { %2504 = vmatmul.mubr.bf16.gmra.mrb[92].mxu0 %v16747_v34  ;;  %v16843_v34 = vld [vmem:[#allocation5 + $0x620] ss:$16 sps:$4 sm:$0xff]  }
 0x17b   :  { %2513 = vmatprep.mubr.bf16.mxu0 %v16751_v35  ;;  %v16844_v35 = vld [vmem:[#allocation5 + $0x644] ss:$16 sps:$4 sm:$0xff]  }
 0x182   :  { %2514 = vmatmul.mubr.bf16.gmra.mrb[96].mxu0 %v16753_v36  ;;  %v16846_v36 = vld [vmem:[#allocation5 + $0x640] ss:$16 sps:$4 sm:$0xff]  }
 0x183   :  { %2523 = vmatprep.mubr.bf16.mxu0 %v16754_v37  ;;  %v16850_v37 = vld [vmem:[#allocation5 + $0x664] ss:$16 sps:$4 sm:$0xff]  }
 0x18a   :  { %2524 = vmatmul.mubr.bf16.gmra.mrb[100].mxu0 %v16756_v38  ;;  %v16852_v38 = vld [vmem:[#allocation5 + $0x660] ss:$16 sps:$4 sm:$0xff]  }
 0x18b   :  { %2533 = vmatprep.mubr.bf16.mxu0 %v16757_v39  ;;  %v16853_v39 = vld [vmem:[#allocation5 + $0x684] ss:$16 sps:$4 sm:$0xff]  }
 0x192   :  { %2534 = vmatmul.mubr.bf16.gmra.mrb[104].mxu0 %v16759_v42  ;;  %v16913_v42 = vld [vmem:[#allocation3 + $0x1f0] ss:$8 sps:$4 sm:$0xff]  }
 0x193   :  { %2543 = vmatprep.mubr.bf16.mxu0 %v16760_v43  ;;  %v16915_v43 = vld [vmem:[#allocation3 + $0x1f4] ss:$8 sps:$4 sm:$0xff]  }
 0x194   :  { %3024 = vmatprep.subr.bf16.mxu0 %v16915_v43 }
 0x195   :  { %3025 = vmatpush1.bf16.msra.mxu0 %v16913_v42  ;;  %v16924_v42 = vld [vmem:[#allocation5 + $0x8e4] ss:$16 sps:$4 sm:$0xff]  }
 0x19a   :  { %2544 = vmatmul.mubr.bf16.gmra.mrb[108].mxu0 %v16762_v44  ;;  %v16858_v44 = vld [vmem:[#allocation5 + $0x6a0] ss:$16 sps:$4 sm:$0xff]  }
 0x19b   :  { %2553 = vmatprep.mubr.bf16.mxu0 %v16766_v45  ;;  %v16859_v45 = vld [vmem:[#allocation5 + $0x6c4] ss:$16 sps:$4 sm:$0xff]  }
 0x1a2   :  { %2554 = vmatmul.mubr.bf16.gmra.mrb[112].mxu0 %v16768_v46  ;;  %v16861_v46 = vld [vmem:[#allocation5 + $0x6c0] ss:$16 sps:$4 sm:$0xff]  }
 0x1a3   :  { %2563 = vmatprep.mubr.bf16.mxu0 %v16769_v47  ;;  %v16865_v47 = vld [vmem:[#allocation5 + $0x6e4] ss:$16 sps:$4 sm:$0xff]  }
 0x1aa   :  { %2564 = vmatmul.mubr.bf16.gmra.mrb[116].mxu0 %v16771_v48  ;;  %v16867_v48 = vld [vmem:[#allocation5 + $0x6e0] ss:$16 sps:$4 sm:$0xff]  }
 0x1ab   :  { %2573 = vmatprep.mubr.bf16.mxu0 %v16772_v49  ;;  %v16868_v49 = vld [vmem:[#allocation5 + $0x704] ss:$16 sps:$4 sm:$0xff]  }
 0x1b2   :  { %2574 = vmatmul.mubr.bf16.gmra.mrb[120].mxu0 %v16774_v52  ;;  %v16873_v52 = vld [vmem:[#allocation5 + $0x720] ss:$16 sps:$4 sm:$0xff]  }
 0x1b3   :  { %2583 = vmatprep.mubr.bf16.mxu0 %v16775_v53  ;;  %v16874_v53 = vld [vmem:[#allocation5 + $0x744] ss:$16 sps:$4 sm:$0xff]  }
 0x1ba   :  { %2584 = vmatmul.mubr.bf16.gmra.mrb[124].mxu0 %v16777_v54  ;;  %v16876_v54 = vld [vmem:[#allocation5 + $0x740] ss:$16 sps:$4 sm:$0xff]  }
 0x1bb   :  { %2593 = vmatprep.mubr.bf16.mxu0 %v16778_v55  ;;  %v16877_v55 = vld [vmem:[#allocation5 + $0x764] ss:$16 sps:$4 sm:$0xff]  }
 0x1c2   :  { %2594 = vmatmul.mubr.bf16.gmra.mrb[128].mxu0 %v16780_v56  ;;  %v16879_v56 = vld [vmem:[#allocation5 + $0x760] ss:$16 sps:$4 sm:$0xff]  }
 0x1c3   :  { %2603 = vmatprep.mubr.bf16.mxu0 %v16784_v57  ;;  %v16883_v57 = vld [vmem:[#allocation5 + $0x784] ss:$16 sps:$4 sm:$0xff]  }
 0x1ca   :  { %2604 = vmatmul.mubr.bf16.gmra.mrb[132].mxu0 %v16786_v58  ;;  %v16885_v58 = vld [vmem:[#allocation5 + $0x780] ss:$16 sps:$4 sm:$0xff]  }
 0x1cb   :  { %2613 = vmatprep.mubr.bf16.mxu0 %v16787_v59  ;;  %v16886_v59 = vld [vmem:[#allocation5 + $0x7a4] ss:$16 sps:$4 sm:$0xff]  }
 0x1d2   :  { %2614 = vmatmul.mubr.bf16.gmra.mrb[136].mxu0 %v16789_v60  ;;  %v16888_v60 = vld [vmem:[#allocation5 + $0x7a0] ss:$16 sps:$4 sm:$0xff]  }
 0x1d3   :  { %2623 = vmatprep.mubr.bf16.mxu0 %v16790_v61  ;;  %v16889_v61 = vld [vmem:[#allocation5 + $0x7c4] ss:$16 sps:$4 sm:$0xff]  }
 0x1da   :  { %2624 = vmatmul.mubr.bf16.gmra.mrb[140].mxu0 %v16792_v0  ;;  %v16894_v0 = vld [vmem:[#allocation5 + $0x7e0] ss:$16 sps:$4 sm:$0xff]  }
 0x1db   :  { %2633 = vmatprep.mubr.bf16.mxu0 %v16793_v1  ;;  %v16900_v1 = vld [vmem:[#allocation5 + $0x804] ss:$16 sps:$4 sm:$0xff]  }
 0x1e2   :  { %2634 = vmatmul.mubr.bf16.gmra.mrb[144].mxu0 %v16795_v2  ;;  %v16898_v2 = vld [vmem:[#allocation5 + $0x800] ss:$16 sps:$4 sm:$0xff]  }
 0x1e3   :  { %2643 = vmatprep.mubr.bf16.mxu0 %v16799_v3 }
 0x1ea   :  { %2644 = vmatmul.mubr.bf16.gmra.mrb[148].mxu0 %v16801_v4  ;;  %v16903_v4 = vld [vmem:[#allocation5 + $0x824] ss:$16 sps:$4 sm:$0xff]  }
 0x1eb   :  { %2653 = vmatprep.mubr.bf16.mxu0 %v16802_v5 }
 0x1f2   :  { %2654 = vmatmul.mubr.bf16.gmra.mrb[152].mxu0 %v16804_v6 }
 0x1f3   :  { %2663 = vmatprep.mubr.bf16.mxu0 %v16805_v7 }
 0x1fa   :  { %2664 = vmatmul.mubr.bf16.gmra.mrb[156].mxu0 %v16807_v10  ;;  %v16906_v10 = vld [vmem:[#allocation5 + $0x844] ss:$16 sps:$4 sm:$0xff]  }
 0x1fb   :  { %2673 = vmatprep.mubr.bf16.mxu0 %v16808_v11 }
 0x202   :  { %2674 = vmatmul.mubr.bf16.gmra.mrb[160].mxu0 %v16810_v12 }
 0x203   :  { %2683 = vmatprep.mubr.bf16.mxu0 %v16811_v13 }
 0x20a   :  { %2684 = vmatmul.mubr.bf16.gmra.mrb[164].mxu0 %v16813_v14  ;;  %v16904_v14 = vld [vmem:[#allocation5 + $0x840] ss:$16 sps:$4 sm:$0xff]  }
 0x20b   :  { %2693 = vmatprep.mubr.bf16.mxu0 %v16817_v15 }
 0x212   :  { %2694 = vmatmul.mubr.bf16.gmra.mrb[168].mxu0 %v16819_v16  ;;  %v16909_v16 = vld [vmem:[#allocation5 + $0x864] ss:$16 sps:$4 sm:$0xff]  }
 0x213   :  { %2703 = vmatprep.mubr.bf16.mxu0 %v16820_v17 }
 0x21a   :  { %2704 = vmatmul.mubr.bf16.gmra.mrb[172].mxu0 %v16822_v18 }
 0x21b   :  { %2713 = vmatprep.mubr.bf16.mxu0 %v16823_v19 }
 0x222   :  { %2714 = vmatmul.mubr.bf16.gmra.mrb[176].mxu0 %v16825_v22  ;;  %v16907_v22 = vld [vmem:[#allocation5 + $0x860] ss:$16 sps:$4 sm:$0xff]  }
 0x223   :  { %2723 = vmatprep.mubr.bf16.mxu0 %v16826_v23 }
 0x22a   :  { %2724 = vmatmul.mubr.bf16.gmra.mrb[180].mxu0 %v16828_v24  ;;  %v16912_v24 = vld [vmem:[#allocation5 + $0x884] ss:$16 sps:$4 sm:$0xff]  }
 0x22b   :  { %2733 = vmatprep.mubr.bf16.mxu0 %v16832_v25 }
 0x232   :  { %2734 = vmatmul.mubr.bf16.gmra.mrb[184].mxu0 %v16834_v26 }
 0x233   :  { %2743 = vmatprep.mubr.bf16.mxu0 %v16835_v27 }
 0x23a   :  { %2744 = vmatmul.mubr.bf16.gmra.mrb[188].mxu0 %v16837_v28  ;;  %v16910_v28 = vld [vmem:[#allocation5 + $0x880] ss:$16 sps:$4 sm:$0xff]  }
 0x23b   :  { %2753 = vmatprep.mubr.bf16.mxu0 %v16838_v29 }
 0x242   :  { %2754 = vmatmul.mubr.bf16.gmra.mrb[192].mxu0 %v16840_v30  ;;  %v16918_v30 = vld [vmem:[#allocation5 + $0x8a4] ss:$16 sps:$4 sm:$0xff]  }
 0x243   :  { %2763 = vmatprep.mubr.bf16.mxu0 %v16841_v31 }
 0x24a   :  { %2764 = vmatmul.mubr.bf16.gmra.mrb[196].mxu0 %v16843_v34  ;;  %v16916_v34 = vld [vmem:[#allocation5 + $0x8a0] ss:$16 sps:$4 sm:$0xff]  }
 0x24b   :  { %2773 = vmatprep.mubr.bf16.mxu0 %v16844_v35 }
 0x252   :  { %2774 = vmatmul.mubr.bf16.gmra.mrb[200].mxu0 %v16846_v36  ;;  %v16921_v36 = vld [vmem:[#allocation5 + $0x8c4] ss:$16 sps:$4 sm:$0xff]  }
 0x253   :  { %2783 = vmatprep.mubr.bf16.mxu0 %v16850_v37 }
 0x25a   :  { %2784 = vmatmul.mubr.bf16.gmra.mrb[204].mxu0 %v16852_v38 }
 0x25b   :  { %2793 = vmatprep.mubr.bf16.mxu0 %v16853_v39 }
 0x262   :  { %2794 = vmatmul.mubr.bf16.gmra.mrb[208].mxu0 %v16855_v40  ;;  %v16919_v40 = vld [vmem:[#allocation5 + $0x8c0] ss:$16 sps:$4 sm:$0xff]  }
 0x263   :  { %2803 = vmatprep.mubr.bf16.mxu0 %v16856_v41 }
 0x26a   :  { %2804 = vmatmul.mubr.bf16.gmra.mrb[212].mxu0 %v16858_v44 }
 0x26b   :  { %2813 = vmatprep.mubr.bf16.mxu0 %v16859_v45 }
 0x272   :  { %2814 = vmatmul.mubr.bf16.gmra.mrb[216].mxu0 %v16861_v46  ;;  %v16922_v46 = vld [vmem:[#allocation5 + $0x8e0] ss:$16 sps:$4 sm:$0xff]  }
 0x273   :  { %2823 = vmatprep.mubr.bf16.mxu0 %v16865_v47 }
 0x27a   :  { %2824 = vmatmul.mubr.bf16.gmra.mrb[220].mxu0 %v16867_v48  ;;  %v16927_v48 = vld [vmem:[#allocation5 + $0xc] ss:$16 sps:$4 sm:$0xff]  }
 0x27b   :  { %2833 = vmatprep.mubr.bf16.mxu0 %v16868_v49 }
 0x282   :  { %2834 = vmatmul.mubr.bf16.gmra.mrb[224].mxu0 %v16870_v50  ;;  %v16925_v50 = vld [vmem:[#allocation5 + $0x8] ss:$16 sps:$4 sm:$0xff]  }
 0x283   :  { %2843 = vmatprep.mubr.bf16.mxu0 %v16871_v51  ;;  %v16928_v51 = vld [vmem:[#allocation5 + $0x2c] ss:$16 sps:$4 sm:$0xff]  }
 0x28a   :  { %2844 = vmatmul.mubr.bf16.gmra.mrb[228].mxu0 %v16873_v52  ;;  %v16930_v52 = vld [vmem:[#allocation5 + $0x28] ss:$16 sps:$4 sm:$0xff]  }
 0x28b   :  { %2853 = vmatprep.mubr.bf16.mxu0 %v16874_v53  ;;  %v16931_v53 = vld [vmem:[#allocation5 + $0x4c] ss:$16 sps:$4 sm:$0xff]  }
 0x292   :  { %2854 = vmatmul.mubr.bf16.gmra.mrb[232].mxu0 %v16876_v54  ;;  %v16933_v54 = vld [vmem:[#allocation5 + $0x48] ss:$16 sps:$4 sm:$0xff]  }
 0x293   :  { %2863 = vmatprep.mubr.bf16.mxu0 %v16877_v55  ;;  %v16934_v55 = vld [vmem:[#allocation5 + $0x6c] ss:$16 sps:$4 sm:$0xff]  }
 0x29a   :  { %2864 = vmatmul.mubr.bf16.gmra.mrb[236].mxu0 %v16879_v56  ;;  %v16936_v56 = vld [vmem:[#allocation5 + $0x68] ss:$16 sps:$4 sm:$0xff]  }
 0x29b   :  { %2873 = vmatprep.mubr.bf16.mxu0 %v16883_v57  ;;  %v16937_v57 = vld [vmem:[#allocation5 + $0x8c] ss:$16 sps:$4 sm:$0xff]  }
 0x2a2   :  { %2874 = vmatmul.mubr.bf16.gmra.mrb[240].mxu0 %v16885_v58  ;;  %v16939_v58 = vld [vmem:[#allocation5 + $0x88] ss:$16 sps:$4 sm:$0xff]  }
 0x2a3   :  { %2883 = vmatprep.mubr.bf16.mxu0 %v16886_v59  ;;  %v16940_v59 = vld [vmem:[#allocation5 + $0xac] ss:$16 sps:$4 sm:$0xff]  }
 0x2aa   :  { %2884 = vmatmul.mubr.bf16.gmra.mrb[244].mxu0 %v16888_v60  ;;  %v16942_v60 = vld [vmem:[#allocation5 + $0xa8] ss:$16 sps:$4 sm:$0xff]  }
 0x2ab   :  { %2893 = vmatprep.mubr.bf16.mxu0 %v16889_v61  ;;  %v16943_v61 = vld [vmem:[#allocation5 + $0xcc] ss:$16 sps:$4 sm:$0xff]  }
 0x2b2   :  { %2894 = vmatmul.mubr.bf16.gmra.mrb[248].mxu0 %v16891_v62  ;;  %v16945_v62 = vld [vmem:[#allocation5 + $0xc8] ss:$16 sps:$4 sm:$0xff]  }
 0x2b3   :  { %2903 = vmatprep.mubr.bf16.mxu0 %v16892_v63  ;;  %v16946_v63 = vld [vmem:[#allocation5 + $0xec] ss:$16 sps:$4 sm:$0xff]  }
 0x2ba   :  { %2904 = vmatmul.mubr.bf16.gmra.mrb[252].mxu0 %v16894_v0  ;;  %v16948_v0 = vld [vmem:[#allocation5 + $0xe8] ss:$16 sps:$4 sm:$0xff]  }
 0x2bb   :  { %2913 = vmatprep.mubr.bf16.mxu0 %v16900_v1  ;;  %v16949_v1 = vld [vmem:[#allocation5 + $0x10c] ss:$16 sps:$4 sm:$0xff]  }
 0x2bd   :  { %v19224_v3 = vpop.f32.mrb[148].mxu0 }
 0x2be   :  { %v19226_v5 = vpop.f32.mrb[149].mxu0 }
 0x2bf   :  { %v19228_v6 = vpop.f32.mrb[150].mxu0 }
 0x2c0   :  { %v19230_v7 = vpop.f32.mrb[151].mxu0 }
 0x2c2   :  { %2914 = vmatmul.mubr.bf16.gmra.mrb[148].mxu0 %v16898_v2  ;;  %v16951_v2 = vld [vmem:[#allocation5 + $0x108] ss:$16 sps:$4 sm:$0xff]  }
 0x2c3   :  { %2923 = vmatprep.mubr.bf16.mxu0 %v16903_v4  ;;  %v16952_v4 = vld [vmem:[#allocation5 + $0x12c] ss:$16 sps:$4 sm:$0xff]  }
 0x2c5   :  { %v19232_v9 = vpop.f32.mrb[152].mxu0 }
 0x2c6   :  { %v19234_v11 = vpop.f32.mrb[153].mxu0 }
 0x2c7   :  { %v19236_v12 = vpop.f32.mrb[154].mxu0 }
 0x2c8   :  { %v19238_v13 = vpop.f32.mrb[155].mxu0 }
 0x2ca   :  { %2924 = vmatmul.mubr.bf16.gmra.mrb[152].mxu0 %v16901_v8  ;;  %v16954_v8 = vld [vmem:[#allocation5 + $0x128] ss:$16 sps:$4 sm:$0xff]  }
 0x2cb   :  { %2933 = vmatprep.mubr.bf16.mxu0 %v16906_v10  ;;  %v16955_v10 = vld [vmem:[#allocation5 + $0x14c] ss:$16 sps:$4 sm:$0xff]  }
 0x2cd   :  { %v19240_v15 = vpop.f32.mrb[156].mxu0 }
 0x2ce   :  { %v19242_v17 = vpop.f32.mrb[157].mxu0 }
 0x2cf   :  { %v19244_v18 = vpop.f32.mrb[158].mxu0 }
 0x2d0   :  { %v19246_v19 = vpop.f32.mrb[159].mxu0 }
 0x2d2   :  { %2934 = vmatmul.mubr.bf16.gmra.mrb[156].mxu0 %v16904_v14  ;;  %v16957_v14 = vld [vmem:[#allocation5 + $0x148] ss:$16 sps:$4 sm:$0xff]  }
 0x2d3   :  { %2943 = vmatprep.mubr.bf16.mxu0 %v16909_v16  ;;  %v16958_v16 = vld [vmem:[#allocation5 + $0x16c] ss:$16 sps:$4 sm:$0xff]  }
 0x2d5   :  { %v19248_v20 = vpop.f32.mrb[160].mxu0 }
 0x2d6   :  { %v19250_v21 = vpop.f32.mrb[161].mxu0 }
 0x2d7   :  { %20930 = vst [vmem:[#allocation18_spill] sm:$0xff] %v19250_v21  ;;  %v19252_v23 = vpop.f32.mrb[162].mxu0 }
 0x2d8   :  { %20931 = vst [vmem:[#allocation19_spill] sm:$0xff] %v19252_v23  ;;  %v19254_v25 = vpop.f32.mrb[163].mxu0 }
 0x2d9   :  { %20932 = vst [vmem:[#allocation20_spill] sm:$0xff] %v19254_v25  ;;  %v17098_v25 = vld [vmem:[#allocation5 + $0x4ac] ss:$16 sps:$4 sm:$0xff]  }
 0x2da   :  { %2944 = vmatmul.mubr.bf16.gmra.mrb[160].mxu0 %v16907_v22  ;;  %v16960_v22 = vld [vmem:[#allocation5 + $0x168] ss:$16 sps:$4 sm:$0xff]  }
 0x2db   :  { %2953 = vmatprep.mubr.bf16.mxu0 %v16912_v24  ;;  %v16961_v24 = vld [vmem:[#allocation5 + $0x18c] ss:$16 sps:$4 sm:$0xff]  }
 0x2dd   :  { %v19256_v26 = vpop.f32.mrb[164].mxu0 }
 0x2de   :  { %20933 = vst [vmem:[#allocation21_spill] sm:$0xff] %v19256_v26  ;;  %v19258_v27 = vpop.f32.mrb[165].mxu0 }
 0x2df   :  { %20934 = vst [vmem:[#allocation22_spill] sm:$0xff] %v19258_v27  ;;  %v19260_v29 = vpop.f32.mrb[166].mxu0  ;;  %v17084_v27 = vld [vmem:[#allocation8 + $0x10] ss:$8 sps:$4 sm:$0xff]  }
 0x2e0   :  { %20935 = vst [vmem:[#allocation23_spill] sm:$0xff] %v19260_v29  ;;  %v19262_v31 = vpop.f32.mrb[167].mxu0  ;;  %v17086_v29 = vld [vmem:[#allocation8 + $0x14] ss:$8 sps:$4 sm:$0xff]  }
 0x2e1   :  { %20936 = vst [vmem:[#allocation24_spill] sm:$0xff] %v19262_v31  ;;  %v17081_v31 = vld [vmem:[#allocation8] ss:$8 sps:$4 sm:$0xff]  }
 0x2e2   :  { %2954 = vmatmul.mubr.bf16.gmra.mrb[164].mxu0 %v16910_v28  ;;  %v17009_v28 = vld [vmem:[#allocation8 + $0x104] ss:$8 sps:$4 sm:$0xff]  }
 0x2e3   :  { %2963 = vmatprep.mubr.bf16.mxu0 %v16918_v30  ;;  %v17011_v30 = vld [vmem:[#allocation8 + $0x100] ss:$8 sps:$4 sm:$0xff]   ;;  %4004 = vmatprep.subr.bf16.mxu1 %v17009_v28 }
 0x2e4   :  { %4005 = vmatpush1.bf16.msra.mxu1 %v17011_v30  ;;  %v16978_v28 = vld [vmem:[#allocation5 + $0x228] ss:$16 sps:$4 sm:$0xff]   ;;  %v17057_v30 = vld [vmem:[#allocation8 + $0x1b4] ss:$8 sps:$4 sm:$0xff]  }
 0x2e5   :  { %v19264_v32 = vpop.f32.mrb[168].mxu0 }
 0x2e6   :  { %20937 = vst [vmem:[#allocation25_spill] sm:$0xff] %v19264_v32  ;;  %v19266_v33 = vpop.f32.mrb[169].mxu0 }
 0x2e7   :  { %20938 = vst [vmem:[#allocation26_spill] sm:$0xff] %v19266_v33  ;;  %v19268_v35 = vpop.f32.mrb[170].mxu0 }
 0x2e8   :  { %20939 = vst [vmem:[#allocation27_spill] sm:$0xff] %v19268_v35  ;;  %v19270_v37 = vpop.f32.mrb[171].mxu0 }
 0x2e9   :  { %20940 = vst [vmem:[#allocation28_spill] sm:$0xff] %v19270_v37  ;;  %v17087_v37 = vld [vmem:[#allocation5 + $0x48c] ss:$16 sps:$4 sm:$0xff]  }
 0x2ea   :  { %2964 = vmatmul.mubr.bf16.gmra.mrb[168].mxu0 %v16916_v34  ;;  %v16963_v34 = vld [vmem:[#allocation5 + $0x188] ss:$16 sps:$4 sm:$0xff]  }
 0x2eb   :  { %2973 = vmatprep.mubr.bf16.mxu0 %v16921_v36  ;;  %v17012_v36 = vld [vmem:[#allocation8 + $0x114] ss:$8 sps:$4 sm:$0xff]  }
 0x2ec   :  { %4006 = vmatprep.subr.bf16.mxu1 %v17012_v36  ;;  %v17061_v36 = vld [vmem:[#allocation8 + $0x1b0] ss:$8 sps:$4 sm:$0xff]  }
 0x2ed   :  { %v19272_v38 = vpop.f32.mrb[172].mxu0 }
 0x2ee   :  { %20941 = vst [vmem:[#allocation29_spill] sm:$0xff] %v19272_v38  ;;  %v19274_v39 = vpop.f32.mrb[173].mxu0 }
 0x2ef   :  { %20942 = vst [vmem:[#allocation30_spill] sm:$0xff] %v19274_v39  ;;  %v19276_v41 = vpop.f32.mrb[174].mxu0 }
 0x2f0   :  { %20943 = vst [vmem:[#allocation31_spill] sm:$0xff] %v19276_v41  ;;  %v19278_v43 = vpop.f32.mrb[175].mxu0 }
 0x2f1   :  { %20944 = vst [vmem:[#allocation32_spill] sm:$0xff] %v19278_v43  ;;  %v17077_v43 = vld [vmem:[#allocation5 + $0x46c] ss:$16 sps:$4 sm:$0xff]  }
 0x2f2   :  { %2974 = vmatmul.mubr.bf16.gmra.mrb[172].mxu0 %v16919_v40  ;;  %v16964_v40 = vld [vmem:[#allocation5 + $0x1ac] ss:$16 sps:$4 sm:$0xff]  }
 0x2f3   :  { %2983 = vmatprep.mubr.bf16.mxu0 %v16924_v42  ;;  %v17016_v42 = vld [vmem:[#allocation8 + $0x110] ss:$8 sps:$4 sm:$0xff]  }
 0x2f4   :  { %4007 = vmatpush1.bf16.msra.mxu1 %v17016_v42  ;;  %v17065_v42 = vld [vmem:[#allocation8 + $0x1c0] ss:$8 sps:$4 sm:$0xff]  }
 0x2f5   :  { %v19280_v44 = vpop.f32.mrb[176].mxu0 }
 0x2f6   :  { %20945 = vst [vmem:[#allocation33_spill] sm:$0xff] %v19280_v44  ;;  %v19282_v45 = vpop.f32.mrb[177].mxu0 }
 0x2f7   :  { %20946 = vst [vmem:[#allocation34_spill] sm:$0xff] %v19282_v45  ;;  %v19284_v47 = vpop.f32.mrb[178].mxu0 }
 0x2f8   :  { %20947 = vst [vmem:[#allocation35_spill] sm:$0xff] %v19284_v47  ;;  %v19286_v49 = vpop.f32.mrb[179].mxu0 }
 0x2f9   :  { %20948 = vst [vmem:[#allocation36_spill] sm:$0xff] %v19286_v49  ;;  %v17068_v49 = vld [vmem:[#allocation5 + $0x44c] ss:$16 sps:$4 sm:$0xff]  }
 0x2fa   :  { %2984 = vmatmul.mubr.bf16.gmra.mrb[176].mxu0 %v16922_v46  ;;  %v17018_v46 = vld [vmem:[#allocation8 + $0x124] ss:$8 sps:$4 sm:$0xff]  }
 0x2fb   :  { %3026 = vmatprep.mubr.bf16.mxu0 %v16927_v48  ;;  %v17020_v48 = vld [vmem:[#allocation8 + $0x120] ss:$8 sps:$4 sm:$0xff]   ;;  %4008 = vmatprep.subr.bf16.mxu1 %v17018_v46 }
 0x2fc   :  { %4009 = vmatpush1.bf16.msra.mxu1 %v17020_v48  ;;  %v16981_v46 = vld [vmem:[#allocation5 + $0x248] ss:$16 sps:$4 sm:$0xff]   ;;  %v17066_v48 = vld [vmem:[#allocation8 + $0x1d4] ss:$8 sps:$4 sm:$0xff]  }
 0x302   :  { %3027 = vmatmul.mubr.bf16.vlgmr.msra.gmra.mrb[0].mxu0 %v16925_v50  ;;  %v16966_v50 = vld [vmem:[#allocation5 + $0x1a8] ss:$16 sps:$4 sm:$0xff]  }
 0x303   :  { %3036 = vmatprep.mubr.bf16.mxu0 %v16928_v51  ;;  %v17021_v51 = vld [vmem:[#allocation8 + $0x134] ss:$8 sps:$4 sm:$0xff]  }
 0x304   :  { %4010 = vmatprep.subr.bf16.mxu1 %v17021_v51  ;;  %v17070_v51 = vld [vmem:[#allocation8 + $0x1d0] ss:$8 sps:$4 sm:$0xff]  }
 0x30a   :  { %3037 = vmatmul.mubr.bf16.gmra.mrb[4].mxu0 %v16930_v52  ;;  %v16967_v52 = vld [vmem:[#allocation5 + $0x1cc] ss:$16 sps:$4 sm:$0xff]  }
 0x30b   :  { %3046 = vmatprep.mubr.bf16.mxu0 %v16931_v53  ;;  %v17025_v53 = vld [vmem:[#allocation8 + $0x130] ss:$8 sps:$4 sm:$0xff]  }
 0x30c   :  { %4011 = vmatpush1.bf16.msra.mxu1 %v17025_v53  ;;  %v17074_v53 = vld [vmem:[#allocation8 + $0x1e0] ss:$8 sps:$4 sm:$0xff]  }
 0x312   :  { %3047 = vmatmul.mubr.bf16.gmra.mrb[8].mxu0 %v16933_v54  ;;  %v17027_v54 = vld [vmem:[#allocation8 + $0x144] ss:$8 sps:$4 sm:$0xff]  }
 0x313   :  { %3056 = vmatprep.mubr.bf16.mxu0 %v16934_v55  ;;  %v17029_v55 = vld [vmem:[#allocation8 + $0x140] ss:$8 sps:$4 sm:$0xff]   ;;  %4012 = vmatprep.subr.bf16.mxu1 %v17027_v54 }
 0x314   :  { %4013 = vmatpush1.bf16.msra.mxu1 %v17029_v55  ;;  %v16984_v54 = vld [vmem:[#allocation5 + $0x268] ss:$16 sps:$4 sm:$0xff]   ;;  %v17075_v55 = vld [vmem:[#allocation8 + $0x1f4] ss:$8 sps:$4 sm:$0xff]  }
 0x31a   :  { %3057 = vmatmul.mubr.bf16.gmra.mrb[12].mxu0 %v16936_v56  ;;  %v16969_v56 = vld [vmem:[#allocation5 + $0x1c8] ss:$16 sps:$4 sm:$0xff]  }
 0x31b   :  { %3066 = vmatprep.mubr.bf16.mxu0 %v16937_v57  ;;  %v17030_v57 = vld [vmem:[#allocation8 + $0x154] ss:$8 sps:$4 sm:$0xff]  }
 0x31c   :  { %4014 = vmatprep.subr.bf16.mxu1 %v17030_v57  ;;  %v17079_v57 = vld [vmem:[#allocation8 + $0x1f0] ss:$8 sps:$4 sm:$0xff]  }
 0x322   :  { %3067 = vmatmul.mubr.bf16.gmra.mrb[16].mxu0 %v16939_v58  ;;  %v16970_v58 = vld [vmem:[#allocation5 + $0x1ec] ss:$16 sps:$4 sm:$0xff]  }
 0x323   :  { %3076 = vmatprep.mubr.bf16.mxu0 %v16940_v59  ;;  %v17034_v59 = vld [vmem:[#allocation8 + $0x150] ss:$8 sps:$4 sm:$0xff]  }
 0x324   :  { %4015 = vmatpush1.bf16.msra.mxu1 %v17034_v59  ;;  %v16987_v59 = vld [vmem:[#allocation5 + $0x288] ss:$16 sps:$4 sm:$0xff]  }
 0x32a   :  { %3077 = vmatmul.mubr.bf16.gmra.mrb[20].mxu0 %v16942_v60  ;;  %v17036_v60 = vld [vmem:[#allocation8 + $0x164] ss:$8 sps:$4 sm:$0xff]  }
 0x32b   :  { %3086 = vmatprep.mubr.bf16.mxu0 %v16943_v61  ;;  %v17038_v61 = vld [vmem:[#allocation8 + $0x160] ss:$8 sps:$4 sm:$0xff]   ;;  %4016 = vmatprep.subr.bf16.mxu1 %v17036_v60  ;;  %v16988_v60 = vld [vmem:[#allocation5 + $0x2ac] ss:$16 sps:$4 sm:$0xff]  }
 0x32c   :  { %4017 = vmatpush1.bf16.msra.mxu1 %v17038_v61  ;;  %v16990_v61 = vld [vmem:[#allocation5 + $0x2a8] ss:$16 sps:$4 sm:$0xff]  }
 0x332   :  { %3087 = vmatmul.mubr.bf16.gmra.mrb[24].mxu0 %v16945_v62  ;;  %v16972_v62 = vld [vmem:[#allocation5 + $0x1e8] ss:$16 sps:$4 sm:$0xff]  }
 0x333   :  { %3096 = vmatprep.mubr.bf16.mxu0 %v16946_v63  ;;  %v17039_v63 = vld [vmem:[#allocation8 + $0x174] ss:$8 sps:$4 sm:$0xff]  }
 0x334   :  { %4018 = vmatprep.subr.bf16.mxu1 %v17039_v63  ;;  %v16993_v63 = vld [vmem:[#allocation5 + $0x2c8] ss:$16 sps:$4 sm:$0xff]  }
 0x33a   :  { %3097 = vmatmul.mubr.bf16.gmra.mrb[28].mxu0 %v16948_v0  ;;  %v16973_v0 = vld [vmem:[#allocation5 + $0x20c] ss:$16 sps:$4 sm:$0xff]  }
 0x33b   :  { %3106 = vmatprep.mubr.bf16.mxu0 %v16949_v1  ;;  %v17043_v1 = vld [vmem:[#allocation8 + $0x170] ss:$8 sps:$4 sm:$0xff]  }
 0x33c   :  { %4019 = vmatpush1.bf16.msra.mxu1 %v17043_v1  ;;  %v16996_v1 = vld [vmem:[#allocation5 + $0x2e8] ss:$16 sps:$4 sm:$0xff]  }
 0x342   :  { %3107 = vmatmul.mubr.bf16.gmra.mrb[32].mxu0 %v16951_v2  ;;  %v17045_v2 = vld [vmem:[#allocation8 + $0x184] ss:$8 sps:$4 sm:$0xff]  }
 0x343   :  { %3116 = vmatprep.mubr.bf16.mxu0 %v16952_v4  ;;  %v17047_v4 = vld [vmem:[#allocation8 + $0x180] ss:$8 sps:$4 sm:$0xff]   ;;  %4020 = vmatprep.subr.bf16.mxu1 %v17045_v2  ;;  %v16997_v2 = vld [vmem:[#allocation5 + $0x30c] ss:$16 sps:$4 sm:$0xff]  }
 0x344   :  { %4021 = vmatpush1.bf16.msra.mxu1 %v17047_v4  ;;  %v16999_v4 = vld [vmem:[#allocation5 + $0x308] ss:$16 sps:$4 sm:$0xff]  }
 0x34a   :  { %3117 = vmatmul.mubr.bf16.gmra.mrb[36].mxu0 %v16954_v8  ;;  %v16975_v8 = vld [vmem:[#allocation5 + $0x208] ss:$16 sps:$4 sm:$0xff]  }
 0x34b   :  { %3126 = vmatprep.mubr.bf16.mxu0 %v16955_v10  ;;  %v17048_v10 = vld [vmem:[#allocation8 + $0x194] ss:$8 sps:$4 sm:$0xff]  }
 0x34c   :  { %4022 = vmatprep.subr.bf16.mxu1 %v17048_v10  ;;  %v17002_v10 = vld [vmem:[#allocation5 + $0x328] ss:$16 sps:$4 sm:$0xff]  }
 0x352   :  { %3127 = vmatmul.mubr.bf16.gmra.mrb[40].mxu0 %v16957_v14  ;;  %v16976_v14 = vld [vmem:[#allocation5 + $0x22c] ss:$16 sps:$4 sm:$0xff]  }
 0x353   :  { %3136 = vmatprep.mubr.bf16.mxu0 %v16958_v16  ;;  %v17052_v16 = vld [vmem:[#allocation8 + $0x190] ss:$8 sps:$4 sm:$0xff]  }
 0x354   :  { %4023 = vmatpush1.bf16.msra.mxu1 %v17052_v16  ;;  %v17005_v16 = vld [vmem:[#allocation5 + $0x348] ss:$16 sps:$4 sm:$0xff]  }
 0x35a   :  { %3137 = vmatmul.mubr.bf16.gmra.mrb[44].mxu0 %v16960_v22  ;;  %v17054_v22 = vld [vmem:[#allocation8 + $0x1a4] ss:$8 sps:$4 sm:$0xff]  }
 0x35b   :  { %3146 = vmatprep.mubr.bf16.mxu0 %v16961_v24  ;;  %v17056_v24 = vld [vmem:[#allocation8 + $0x1a0] ss:$8 sps:$4 sm:$0xff]   ;;  %4024 = vmatprep.subr.bf16.mxu1 %v17054_v22  ;;  %v17006_v22 = vld [vmem:[#allocation5 + $0x36c] ss:$16 sps:$4 sm:$0xff]  }
 0x35c   :  { %4025 = vmatpush1.bf16.msra.mxu1 %v17056_v24 }
 0x35d   :  { %4026 = vmatprep.subr.bf16.mxu1 %v17057_v30  ;;  %v17008_v30 = vld [vmem:[#allocation5 + $0x368] ss:$16 sps:$4 sm:$0xff]  }
 0x360   :  { %4027 = vmatpush1.bf16.msra.mxu1 %v17061_v36  ;;  %v17014_v36 = vld [vmem:[#allocation5 + $0x38c] ss:$16 sps:$4 sm:$0xff]  }
 0x362   :  { %3147 = vmatmul.mubr.bf16.gmra.mrb[48].mxu0 %v16963_v34  ;;  %v16979_v34 = vld [vmem:[#allocation5 + $0x24c] ss:$16 sps:$4 sm:$0xff]  }
 0x363   :  { %3156 = vmatprep.mubr.bf16.mxu0 %v16964_v40  ;;  %v17063_v40 = vld [vmem:[#allocation8 + $0x1c4] ss:$8 sps:$4 sm:$0xff]  }
 0x364   :  { %4028 = vmatprep.subr.bf16.mxu1 %v17063_v40 }
 0x365   :  { %4029 = vmatpush1.bf16.msra.mxu1 %v17065_v42 }
 0x366   :  { %4030 = vmatprep.subr.bf16.mxu1 %v17066_v48 }
 0x369   :  { %4031 = vmatpush1.bf16.msra.mxu1 %v17070_v51  ;;  %v17017_v51 = vld [vmem:[#allocation5 + $0x388] ss:$16 sps:$4 sm:$0xff]  }
 0x36a   :  { %3157 = vmatmul.mubr.bf16.gmra.mrb[52].mxu0 %v16966_v50  ;;  %v16982_v50 = vld [vmem:[#allocation5 + $0x26c] ss:$16 sps:$4 sm:$0xff]  }
 0x36b   :  { %3166 = vmatprep.mubr.bf16.mxu0 %v16967_v52  ;;  %v17072_v52 = vld [vmem:[#allocation8 + $0x1e4] ss:$8 sps:$4 sm:$0xff]  }
 0x36c   :  { %4032 = vmatprep.subr.bf16.mxu1 %v17072_v52 }
 0x36d   :  { %4033 = vmatpush1.bf16.msra.mxu1 %v17074_v53  ;;  %v17023_v53 = vld [vmem:[#allocation5 + $0x3ac] ss:$16 sps:$4 sm:$0xff]  }
 0x36e   :  { %4034 = vmatprep.subr.bf16.mxu1 %v17075_v55 }
 0x371   :  { %4035 = vmatpush1.bf16.msra.mxu1 %v17079_v57 }
 0x372   :  { %3167 = vmatmul.mubr.bf16.gmra.mrb[56].mxu0 %v16969_v56  ;;  %v16985_v56 = vld [vmem:[#allocation5 + $0x28c] ss:$16 sps:$4 sm:$0xff]  }
 0x373   :  { %3176 = vmatprep.mubr.bf16.mxu0 %v16970_v58  ;;  %v17083_v58 = vld [vmem:[#allocation8 + $0x4] ss:$8 sps:$4 sm:$0xff]  }
 0x374   :  { %4277 = vmatprep.subr.bf16.mxu1 %v17083_v58 }
 0x37a   :  { %3177 = vmatmul.mubr.bf16.gmra.mrb[60].mxu0 %v16972_v62  ;;  %v16991_v62 = vld [vmem:[#allocation5 + $0x2cc] ss:$16 sps:$4 sm:$0xff]  }
 0x37b   :  { %3186 = vmatprep.mubr.bf16.mxu0 %v16973_v0  ;;  %v16994_v0 = vld [vmem:[#allocation5 + $0x2ec] ss:$16 sps:$4 sm:$0xff]  }
 0x382   :  { %3187 = vmatmul.mubr.bf16.gmra.mrb[64].mxu0 %v16975_v8  ;;  %v17000_v8 = vld [vmem:[#allocation5 + $0x32c] ss:$16 sps:$4 sm:$0xff]  }
 0x383   :  { %3196 = vmatprep.mubr.bf16.mxu0 %v16976_v14  ;;  %v17003_v14 = vld [vmem:[#allocation5 + $0x34c] ss:$16 sps:$4 sm:$0xff]  }
 0x38a   :  { %3197 = vmatmul.mubr.bf16.gmra.mrb[68].mxu0 %v16978_v28 }
 0x38b   :  { %3206 = vmatprep.mubr.bf16.mxu0 %v16979_v34 }
 0x392   :  { %3207 = vmatmul.mubr.bf16.gmra.mrb[72].mxu0 %v16981_v46 }
 0x393   :  { %3216 = vmatprep.mubr.bf16.mxu0 %v16982_v50 }
 0x39a   :  { %3217 = vmatmul.mubr.bf16.gmra.mrb[76].mxu0 %v16984_v54  ;;  %v17059_v54 = vld [vmem:[#allocation5 + $0x42c] ss:$16 sps:$4 sm:$0xff]  }
 0x39b   :  { %3226 = vmatprep.mubr.bf16.mxu0 %v16985_v56  ;;  %v17080_v56 = vld [vmem:[#allocation5 + $0x468] ss:$16 sps:$4 sm:$0xff]  }
 0x3a2   :  { %3227 = vmatmul.mubr.bf16.gmra.mrb[80].mxu0 %v16987_v59  ;;  %v17026_v59 = vld [vmem:[#allocation5 + $0x3a8] ss:$16 sps:$4 sm:$0xff]  }
 0x3a3   :  { %3236 = vmatprep.mubr.bf16.mxu0 %v16988_v60 }
 0x3aa   :  { %3237 = vmatmul.mubr.bf16.gmra.mrb[84].mxu0 %v16990_v61  ;;  %v17032_v61 = vld [vmem:[#allocation5 + $0x3cc] ss:$16 sps:$4 sm:$0xff]  }
 0x3ab   :  { %3246 = vmatprep.mubr.bf16.mxu0 %v16991_v62 }
 0x3b2   :  { %3247 = vmatmul.mubr.bf16.gmra.mrb[88].mxu0 %v16993_v63 }
 0x3b3   :  { %3256 = vmatprep.mubr.bf16.mxu0 %v16994_v0 }
 0x3ba   :  { %3257 = vmatmul.mubr.bf16.gmra.mrb[92].mxu0 %v16996_v1 }
 0x3bb   :  { %3266 = vmatprep.mubr.bf16.mxu0 %v16997_v2 }
 0x3c2   :  { %3267 = vmatmul.mubr.bf16.gmra.mrb[96].mxu0 %v16999_v4  ;;  %v17035_v4 = vld [vmem:[#allocation5 + $0x3c8] ss:$16 sps:$4 sm:$0xff]  }
 0x3c3   :  { %3276 = vmatprep.mubr.bf16.mxu0 %v17000_v8 }
 0x3ca   :  { %3277 = vmatmul.mubr.bf16.gmra.mrb[100].mxu0 %v17002_v10  ;;  %v17041_v10 = vld [vmem:[#allocation5 + $0x3ec] ss:$16 sps:$4 sm:$0xff]  }
 0x3cb   :  { %3286 = vmatprep.mubr.bf16.mxu0 %v17003_v14  ;;  %v17062_v14 = vld [vmem:[#allocation5 + $0x428] ss:$16 sps:$4 sm:$0xff]  }
 0x3d2   :  { %3287 = vmatmul.mubr.bf16.gmra.mrb[104].mxu0 %v17005_v16 }
 0x3d3   :  { %3296 = vmatprep.mubr.bf16.mxu0 %v17006_v22  ;;  %v17053_v22 = vld [vmem:[#allocation5 + $0x408] ss:$16 sps:$4 sm:$0xff]  }
 0x3d5   :  { %v19288_v24 = vpop.f32.mrb[0].mxu0 }
 0x3d6   :  { %v19290_v28 = vpop.f32.mrb[1].mxu0 }
 0x3d7   :  { %v19292_v34 = vpop.f32.mrb[2].mxu0 }
 0x3d8   :  { %v19296_v42 = vpop.f32.mrb[3].mxu0 }
 0x3da   :  { %3297 = vmatmul.mubr.bf16.gmra.mrb[108].mxu0 %v17008_v30 }
 0x3db   :  { %3306 = vmatprep.mubr.bf16.mxu0 %v17014_v36 }
 0x3dd   :  { %v19300_v48 = vpop.f32.mrb[4].mxu0 }
 0x3de   :  { %v19302_v50 = vpop.f32.mrb[5].mxu0 }
 0x3df   :  { %v19304_v52 = vpop.f32.mrb[6].mxu0 }
 0x3e0   :  { %v19308_v55 = vpop.f32.mrb[7].mxu0 }
 0x3e2   :  { %3307 = vmatmul.mubr.bf16.gmra.mrb[112].mxu0 %v17017_v51  ;;  %v17044_v51 = vld [vmem:[#allocation5 + $0x3e8] ss:$16 sps:$4 sm:$0xff]  }
 0x3e3   :  { %3316 = vmatprep.mubr.bf16.mxu0 %v17023_v53 }
 0x3e5   :  { %v19312_v57 = vpop.f32.mrb[8].mxu0 }
 0x3e6   :  { %v19314_v58 = vpop.f32.mrb[9].mxu0 }
 0x3e7   :  { %v19316_v60 = vpop.f32.mrb[10].mxu0 }
 0x3e8   :  { %v19320_v63 = vpop.f32.mrb[11].mxu0 }
 0x3ea   :  { %3317 = vmatmul.mubr.bf16.gmra.mrb[116].mxu0 %v17026_v59  ;;  %v17050_v59 = vld [vmem:[#allocation5 + $0x40c] ss:$16 sps:$4 sm:$0xff]  }
 0x3eb   :  { %3326 = vmatprep.mubr.bf16.mxu0 %v17032_v61  ;;  %v17071_v61 = vld [vmem:[#allocation5 + $0x448] ss:$16 sps:$4 sm:$0xff]  }
 0x3ed   :  { %v19324_v1 = vpop.f32.mrb[12].mxu0 }
 0x3ee   :  { %v19326_v2 = vpop.f32.mrb[13].mxu0 }
 0x3ef   :  { %v19328_v8 = vpop.f32.mrb[14].mxu0 }
 0x3f0   :  { %v19332_v16 = vpop.f32.mrb[15].mxu0 }
 0x3f2   :  { %3327 = vmatmul.mubr.bf16.gmra.mrb[120].mxu0 %v17035_v4 }
 0x3f3   :  { %3336 = vmatprep.mubr.bf16.mxu0 %v17041_v10 }
 0x3f5   :  { %v19336_v30 = vpop.f32.mrb[16].mxu0 }
 0x3f6   :  { %v19338_v36 = vpop.f32.mrb[17].mxu0 }
 0x3f7   :  { %v19340_v53 = vpop.f32.mrb[18].mxu0 }
 0x3f8   :  { %v19344_v62 = vpop.f32.mrb[19].mxu0 }
 0x3fa   :  { %3337 = vmatmul.mubr.bf16.gmra.mrb[124].mxu0 %v17044_v51 }
 0x3fb   :  { %3346 = vmatprep.mubr.bf16.mxu0 %v17050_v59 }
 0x3fd   :  { %v19348_v4 = vpop.f32.mrb[20].mxu0 }
 0x3fe   :  { %v19350_v10 = vpop.f32.mrb[21].mxu0 }
 0x3ff   :  { %v19352_v0 = vpop.f32.mrb[22].mxu0 }
 0x400   :  { %v19356_v40 = vpop.f32.mrb[23].mxu0 }
 0x402   :  { %3347 = vmatmul.mubr.bf16.gmra.mrb[128].mxu0 %v17053_v22 }
 0x403   :  { %3356 = vmatprep.mubr.bf16.mxu0 %v17059_v54 }
 0x405   :  { %v19360_v51 = vpop.f32.mrb[24].mxu0 }
 0x406   :  { %v19362_v59 = vpop.f32.mrb[25].mxu0 }
 0x407   :  { %v19364_v46 = vpop.f32.mrb[26].mxu0 }
 0x408   :  { %v19368_v45 = vpop.f32.mrb[27].mxu0 }
 0x40a   :  { %3357 = vmatmul.mubr.bf16.gmra.mrb[132].mxu0 %v17062_v14 }
 0x40b   :  { %3366 = vmatprep.mubr.bf16.mxu0 %v17068_v49 }
 0x40d   :  { %v19372_v22 = vpop.f32.mrb[28].mxu0 }
 0x40e   :  { %v19374_v54 = vpop.f32.mrb[29].mxu0 }
 0x40f   :  { %v19376_v44 = vpop.f32.mrb[30].mxu0 }
 0x410   :  { %v19380_v39 = vpop.f32.mrb[31].mxu0 }
 0x412   :  { %3367 = vmatmul.mubr.bf16.gmra.mrb[136].mxu0 %v17071_v61  ;;  %v17092_v61 = vld [vmem:[#allocation8 + $0x24] ss:$8 sps:$4 sm:$0xff]  }
 0x413   :  { %3376 = vmatprep.mubr.bf16.mxu0 %v17077_v43  ;;  %v17089_v43 = vld [vmem:[#allocation5 + $0x488] ss:$16 sps:$4 sm:$0xff]  }
 0x415   :  { %v3108_v14 = vpop.f32.mrb[32].mxu0 }
 0x416   :  { %v3110_v49 = vpop.f32.mrb[33].mxu0 }
 0x417   :  { %v3112_v38 = vpop.f32.mrb[34].mxu0 }
 0x418   :  { %v3795_v35 = vpack.c.bf16 %v3112_v38, %v3108_v14  ;;  %v3114_v33 = vpop.f32.mrb[35].mxu0 }
 0x419   :  { %v3796_v32 = vpack.c.bf16 %v3114_v33, %v3110_v49  ;;  %v17090_v33 = vld [vmem:[#allocation8 + $0x20] ss:$8 sps:$4 sm:$0xff]   ;;  %v17107_v49 = vld [vmem:[#allocation5 + $0x4cc] ss:$16 sps:$4 sm:$0xff]  }
 0x41a   :  { %3377 = vmatmul.mubr.bf16.gmra.mrb[140].mxu0 %v17080_v56  ;;  %v17095_v56 = vld [vmem:[#allocation8 + $0x34] ss:$8 sps:$4 sm:$0xff]  }
 0x41b   :  { %4036 = vmatprep.mubr.bf16.mxu1 %v3796_v32  ;;  %3386 = vmatprep.mubr.bf16.mxu0 %v17087_v37  ;;  %v17101_v37 = vld [vmem:[#allocation8 + $0x44] ss:$8 sps:$4 sm:$0xff]  }
 0x41c   :  { %4037 = vmatmul.mubr.bf16.vlgmr.msra.gmra.mrb[0].mxu1 %v3795_v35 }
 0x41d   :  { %v3118_v41 = vpop.f32.mrb[36].mxu0  ;;  %4278 = vmatpush1.bf16.msra.mxu1 %v17081_v31  ;;  %v17093_v31 = vld [vmem:[#allocation8 + $0x30] ss:$8 sps:$4 sm:$0xff]  }
 0x41e   :  { %v3120_v47 = vpop.f32.mrb[37].mxu0  ;;  %4279 = vmatprep.subr.bf16.mxu1 %v17086_v29  ;;  %v17096_v29 = vld [vmem:[#allocation5 + $0x4a8] ss:$16 sps:$4 sm:$0xff]  }
 0x41f   :  { %v3122_v26 = vpop.f32.mrb[38].mxu0 }
 0x420   :  { %v3797_v23 = vpack.c.bf16 %v3122_v26, %v3118_v41  ;;  %v3124_v21 = vpop.f32.mrb[39].mxu0 }
 0x421   :  { %v3798_v38 = vpack.c.bf16 %v3124_v21, %v3120_v47  ;;  %4280 = vmatpush1.bf16.msra.mxu1 %v17084_v27  ;;  %v17099_v27 = vld [vmem:[#allocation8 + $0x40] ss:$8 sps:$4 sm:$0xff]   ;;  %v17104_v47 = vld [vmem:[#allocation8 + $0x54] ss:$8 sps:$4 sm:$0xff]  }
 0x422   :  { %3387 = vmatmul.mubr.bf16.gmra.mrb[144].mxu0 %v17089_v43  ;;  %4281 = vmatprep.subr.bf16.mxu1 %v17092_v61  ;;  %v17105_v61 = vld [vmem:[#allocation5 + $0x4c8] ss:$16 sps:$4 sm:$0xff]  }
 0x423   :  { %4046 = vmatprep.mubr.bf16.mxu1 %v3798_v38  ;;  %3396 = vmatprep.mubr.bf16.mxu0 %v17098_v25  ;;  %v17102_v25 = vld [vmem:[#allocation8 + $0x50] ss:$8 sps:$4 sm:$0xff]   ;;  %v17110_v38 = vld [vmem:[#allocation8 + $0x64] ss:$8 sps:$4 sm:$0xff]  }
 0x424   :  { %4047 = vmatmul.mubr.bf16.gmra.mrb[4].mxu1 %v3797_v23 }
 0x425   :  { %v3128_v32 = vpop.f32.mrb[40].mxu0  ;;  %4282 = vmatpush1.bf16.msra.mxu1 %v17090_v33 }
 0x426   :  { %v3130_v35 = vpop.f32.mrb[41].mxu0  ;;  %4283 = vmatprep.subr.bf16.mxu1 %v17095_v56  ;;  %v17116_v56 = vld [vmem:[#allocation5 + $0x4ec] ss:$16 sps:$4 sm:$0xff]  }
 0x427   :  { %v3132_v14 = vpop.f32.mrb[42].mxu0 }
 0x428   :  { %v3799_v26 = vpack.c.bf16 %v3132_v14, %v3128_v32  ;;  %v3134_v41 = vpop.f32.mrb[43].mxu0 }
 0x429   :  { %v3800_v21 = vpack.c.bf16 %v3134_v41, %v3130_v35  ;;  %4284 = vmatpush1.bf16.msra.mxu1 %v17093_v31  ;;  %v17108_v31 = vld [vmem:[#allocation8 + $0x60] ss:$8 sps:$4 sm:$0xff]  }
 0x42a   :  { %3397 = vmatmul.mubr.bf16.gmra.mrb[0].mxu0 %v17096_v29  ;;  %4285 = vmatprep.subr.bf16.mxu1 %v17101_v37  ;;  %v17113_v29 = vld [vmem:[#allocation8 + $0x74] ss:$8 sps:$4 sm:$0xff]   ;;  %v17114_v41 = vld [vmem:[#allocation5 + $0x4e8] ss:$16 sps:$4 sm:$0xff]  }
 0x42b   :  { %4056 = vmatprep.mubr.bf16.mxu1 %v3800_v21  ;;  %3406 = vmatprep.mubr.bf16.mxu0 %v17107_v49  ;;  %v17111_v49 = vld [vmem:[#allocation8 + $0x70] ss:$8 sps:$4 sm:$0xff]   ;;  %v17119_v21 = vld [vmem:[#allocation8 + $0x84] ss:$8 sps:$4 sm:$0xff]  }
 0x42c   :  { %4057 = vmatmul.mubr.bf16.gmra.mrb[8].mxu1 %v3799_v26 }
 0x42d   :  { %v3138_v23 = vpop.f32.mrb[44].mxu0  ;;  %4286 = vmatpush1.bf16.msra.mxu1 %v17099_v27 }
 0x42e   :  { %v3140_v43 = vpop.f32.mrb[45].mxu0  ;;  %4287 = vmatprep.subr.bf16.mxu1 %v17104_v47  ;;  %v17125_v47 = vld [vmem:[#allocation5 + $0x50c] ss:$16 sps:$4 sm:$0xff]  }
 0x42f   :  { %v3142_v33 = vpop.f32.mrb[46].mxu0 }
 0x430   :  { %v3801_v32 = vpack.c.bf16 %v3142_v33, %v3138_v23  ;;  %v3144_v14 = vpop.f32.mrb[47].mxu0 }
 0x431   :  { %v3802_v35 = vpack.c.bf16 %v3144_v14, %v3140_v43  ;;  %4288 = vmatpush1.bf16.msra.mxu1 %v17102_v25  ;;  %v17117_v25 = vld [vmem:[#allocation8 + $0x80] ss:$8 sps:$4 sm:$0xff]  }
 0x432   :  { %3407 = vmatmul.mubr.bf16.gmra.mrb[4].mxu0 %v17105_v61  ;;  %4289 = vmatprep.subr.bf16.mxu1 %v17110_v38  ;;  %v17122_v61 = vld [vmem:[#allocation8 + $0x94] ss:$8 sps:$4 sm:$0xff]   ;;  %v17123_v14 = vld [vmem:[#allocation5 + $0x508] ss:$16 sps:$4 sm:$0xff]  }
 0x433   :  { %4066 = vmatprep.mubr.bf16.mxu1 %v3802_v35  ;;  %3416 = vmatprep.mubr.bf16.mxu0 %v17116_v56  ;;  %v17120_v56 = vld [vmem:[#allocation8 + $0x90] ss:$8 sps:$4 sm:$0xff]   ;;  %v17128_v35 = vld [vmem:[#allocation8 + $0xa4] ss:$8 sps:$4 sm:$0xff]  }
 0x434   :  { %4067 = vmatmul.mubr.bf16.gmra.mrb[12].mxu1 %v3801_v32 }
 0x435   :  { %v3148_v37 = vpop.f32.mrb[48].mxu0  ;;  %4290 = vmatpush1.bf16.msra.mxu1 %v17108_v31 }
 0x436   :  { %v3150_v26 = vpop.f32.mrb[49].mxu0  ;;  %4291 = vmatprep.subr.bf16.mxu1 %v17113_v29  ;;  %v17134_v29 = vld [vmem:[#allocation5 + $0x52c] ss:$16 sps:$4 sm:$0xff]  }
 0x437   :  { %v3152_v27 = vpop.f32.mrb[50].mxu0 }
 0x438   :  { %v3803_v23 = vpack.c.bf16 %v3152_v27, %v3148_v37  ;;  %v3154_v33 = vpop.f32.mrb[51].mxu0 }
 0x439   :  { %v3804_v43 = vpack.c.bf16 %v3154_v33, %v3150_v26  ;;  %4292 = vmatpush1.bf16.msra.mxu1 %v17111_v49  ;;  %v17126_v49 = vld [vmem:[#allocation8 + $0xa0] ss:$8 sps:$4 sm:$0xff]  }
 0x43a   :  { %3417 = vmatmul.mubr.bf16.gmra.mrb[8].mxu0 %v17114_v41  ;;  %4293 = vmatprep.subr.bf16.mxu1 %v17119_v21  ;;  %v17131_v41 = vld [vmem:[#allocation8 + $0xb4] ss:$8 sps:$4 sm:$0xff]   ;;  %v17132_v33 = vld [vmem:[#allocation5 + $0x528] ss:$16 sps:$4 sm:$0xff]  }
 0x43b   :  { %4076 = vmatprep.mubr.bf16.mxu1 %v3804_v43  ;;  %3426 = vmatprep.mubr.bf16.mxu0 %v17125_v47  ;;  %v17129_v47 = vld [vmem:[#allocation8 + $0xb0] ss:$8 sps:$4 sm:$0xff]   ;;  %v17137_v43 = vld [vmem:[#allocation8 + $0xc4] ss:$8 sps:$4 sm:$0xff]  }
 0x43c   :  { %4077 = vmatmul.mubr.bf16.gmra.mrb[16].mxu1 %v3803_v23 }
 0x43d   :  { %v3158_v38 = vpop.f32.mrb[52].mxu0  ;;  %4294 = vmatpush1.bf16.msra.mxu1 %v17117_v25 }
 0x43e   :  { %v3160_v32 = vpop.f32.mrb[53].mxu0  ;;  %4295 = vmatprep.subr.bf16.mxu1 %v17122_v61  ;;  %v17143_v61 = vld [vmem:[#allocation5 + $0x54c] ss:$16 sps:$4 sm:$0xff]  }
 0x43f   :  { %v3162_v31 = vpop.f32.mrb[54].mxu0 }
 0x440   :  { %v3805_v37 = vpack.c.bf16 %v3162_v31, %v3158_v38  ;;  %v3164_v27 = vpop.f32.mrb[55].mxu0 }
 0x441   :  { %v3806_v26 = vpack.c.bf16 %v3164_v27, %v3160_v32  ;;  %4296 = vmatpush1.bf16.msra.mxu1 %v17120_v56  ;;  %v17135_v56 = vld [vmem:[#allocation8 + $0xc0] ss:$8 sps:$4 sm:$0xff]  }
 0x442   :  { %3427 = vmatmul.mubr.bf16.gmra.mrb[12].mxu0 %v17123_v14  ;;  %4297 = vmatprep.subr.bf16.mxu1 %v17128_v35  ;;  %v17140_v14 = vld [vmem:[#allocation8 + $0xd4] ss:$8 sps:$4 sm:$0xff]   ;;  %v17141_v27 = vld [vmem:[#allocation5 + $0x548] ss:$16 sps:$4 sm:$0xff]  }
 0x443   :  { %4086 = vmatprep.mubr.bf16.mxu1 %v3806_v26  ;;  %3436 = vmatprep.mubr.bf16.mxu0 %v17134_v29  ;;  %v17138_v29 = vld [vmem:[#allocation8 + $0xd0] ss:$8 sps:$4 sm:$0xff]   ;;  %v17146_v26 = vld [vmem:[#allocation8 + $0xe4] ss:$8 sps:$4 sm:$0xff]  }
 0x444   :  { %4087 = vmatmul.mubr.bf16.gmra.mrb[20].mxu1 %v3805_v37 }
 0x445   :  { %v3168_v21 = vpop.f32.mrb[56].mxu0  ;;  %4298 = vmatpush1.bf16.msra.mxu1 %v17126_v49 }
 0x446   :  { %v3170_v23 = vpop.f32.mrb[57].mxu0  ;;  %4299 = vmatprep.subr.bf16.mxu1 %v17131_v41  ;;  %v17152_v41 = vld [vmem:[#allocation5 + $0x56c] ss:$16 sps:$4 sm:$0xff]  }
 0x447   :  { %v3172_v25 = vpop.f32.mrb[58].mxu0 }
 0x448   :  { %v3807_v38 = vpack.c.bf16 %v3172_v25, %v3168_v21  ;;  %v3174_v31 = vpop.f32.mrb[59].mxu0 }
 0x449   :  { %v3808_v32 = vpack.c.bf16 %v3174_v31, %v3170_v23  ;;  %4300 = vmatpush1.bf16.msra.mxu1 %v17129_v47  ;;  %v17144_v47 = vld [vmem:[#allocation8 + $0xe0] ss:$8 sps:$4 sm:$0xff]  }
 0x44a   :  { %3437 = vmatmul.mubr.bf16.gmra.mrb[16].mxu0 %v17132_v33  ;;  %4301 = vmatprep.subr.bf16.mxu1 %v17137_v43  ;;  %v17149_v33 = vld [vmem:[#allocation8 + $0xf4] ss:$8 sps:$4 sm:$0xff]  }
 0x44b   :  { %4096 = vmatprep.mubr.bf16.mxu1 %v3808_v32  ;;  %3446 = vmatprep.mubr.bf16.mxu0 %v17143_v61  ;;  %v20949_v61 = vpack.c.bf16 %v19296_v42, %v19290_v28  ;;  %v17150_v32 = vld [vmem:[#allocation5 + $0x568] ss:$16 sps:$4 sm:$0xff]   ;;  %v17158_v42 = vld [vmem:[#allocation8 + $0x214] ss:$8 sps:$4 sm:$0xff]  }
 0x44c   :  { %4097 = vmatmul.mubr.bf16.gmra.mrb[24].mxu1 %v3807_v38  ;;  %v17147_v38 = vld [vmem:[#allocation8 + $0xf0] ss:$8 sps:$4 sm:$0xff]   ;;  %v17153_v28 = vld [vmem:[#allocation8 + $0x200] ss:$8 sps:$4 sm:$0xff]  }
 0x44d   :  { %v3178_v35 = vpop.f32.mrb[60].mxu0  ;;  %4302 = vmatpush1.bf16.msra.mxu1 %v17135_v56  ;;  %v17155_v56 = vld [vmem:[#allocation8 + $0x204] ss:$8 sps:$4 sm:$0xff]  }
 0x44e   :  { %v3180_v37 = vpop.f32.mrb[61].mxu0  ;;  %4303 = vmatprep.subr.bf16.mxu1 %v17140_v14 }
 0x44f   :  { %v3182_v49 = vpop.f32.mrb[62].mxu0 }
 0x450   :  { %v3809_v21 = vpack.c.bf16 %v3182_v49, %v3178_v35  ;;  %v3184_v25 = vpop.f32.mrb[63].mxu0  ;;  %v17161_v35 = vld [vmem:[#allocation5 + $0x58c] ss:$16 sps:$4 sm:$0xff]  }
 0x451   :  { %v3810_v23 = vpack.c.bf16 %v3184_v25, %v3180_v37  ;;  %4304 = vmatpush1.bf16.msra.mxu1 %v17138_v29 }
 0x452   :  { %3447 = vmatmul.mubr.bf16.gmra.mrb[20].mxu0 %v17141_v27  ;;  %4305 = vmatprep.subr.bf16.mxu1 %v17146_v26  ;;  %v20950_v26 = vpack.c.bf16 %v19292_v34, %v19288_v24 }
 0x453   :  { %4106 = vmatprep.mubr.bf16.mxu1 %v3810_v23  ;;  %3456 = vmatprep.mubr.bf16.mxu0 %v17152_v41  ;;  %v20951_v41 = vpack.c.bf16 %v19308_v55, %v19302_v50  ;;  %v17159_v23 = vld [vmem:[#allocation5 + $0x588] ss:$16 sps:$4 sm:$0xff]   ;;  %v17167_v55 = vld [vmem:[#allocation8 + $0x234] ss:$8 sps:$4 sm:$0xff]  }
 0x454   :  { %4107 = vmatmul.mubr.bf16.gmra.mrb[28].mxu1 %v3809_v21  ;;  %v17156_v21 = vld [vmem:[#allocation8 + $0x210] ss:$8 sps:$4 sm:$0xff]   ;;  %v17162_v50 = vld [vmem:[#allocation8 + $0x220] ss:$8 sps:$4 sm:$0xff]  }
 0x455   :  { %v19384_v43 = vpop.f32.mrb[64].mxu0  ;;  %4306 = vmatpush1.bf16.msra.mxu1 %v17144_v47  ;;  %4309 = vmatprep.mubr.bf16.mxu1 %v20949_v61  ;;  %v17164_v47 = vld [vmem:[#allocation8 + $0x224] ss:$8 sps:$4 sm:$0xff]  }
 0x456   :  { %v19389_v31 = vpop.f32.mrb[65].mxu0  ;;  %4307 = vmatprep.subr.bf16.mxu1 %v17149_v33  ;;  %v17168_v61 = vld [vmem:[#allocation5 + $0x5ac] ss:$16 sps:$4 sm:$0xff]  }
 0x457   :  { %v19391_v14 = vpop.f32.mrb[66].mxu0 }
 0x458   :  { %v4390_v29 = vpack.c.bf16 %v19391_v14, %v19384_v43  ;;  %v19395_v37 = vpop.f32.mrb[67].mxu0 }
 0x459   :  { %v4391_v27 = vpack.c.bf16 %v19395_v37, %v19389_v31  ;;  %4308 = vmatpush1.bf16.msra.mxu1 %v17147_v38  ;;  %v17225_v31 = vld [vmem:[#allocation8 + $0x300] ss:$8 sps:$4 sm:$0xff]   ;;  %v17230_v37 = vld [vmem:[#allocation8 + $0x314] ss:$8 sps:$4 sm:$0xff]  }
 0x45a   :  { %3457 = vmatmul.mubr.bf16.gmra.mrb[24].mxu0 %v17150_v32  ;;  %4599 = vmatprep.subr.bf16.mxu1 %v17155_v56  ;;  %v20952_v32 = vpack.c.bf16 %v19304_v52, %v19300_v48 }
 0x45b   :  { %3466 = vmatprep.mubr.bf16.mxu0 %v17161_v35  ;;  %v20953_v35 = vpack.c.bf16 %v19320_v63, %v19314_v58  ;;  %v17171_v58 = vld [vmem:[#allocation8 + $0x240] ss:$8 sps:$4 sm:$0xff]   ;;  %v17176_v63 = vld [vmem:[#allocation8 + $0x254] ss:$8 sps:$4 sm:$0xff]  }
 0x45c   :  { %4310 = vmatmul.mubr.bf16.vlgmr.msra.gmra.mrb[0].mxu1 %v20950_v26  ;;  %v17170_v26 = vld [vmem:[#allocation5 + $0x5a8] ss:$16 sps:$4 sm:$0xff]  }
 0x45d   :  { %v19402_v49 = vpop.f32.mrb[68].mxu0  ;;  %4319 = vmatprep.mubr.bf16.mxu1 %v20951_v41  ;;  %4600 = vmatpush1.bf16.msra.mxu1 %v17153_v28  ;;  %v17165_v28 = vld [vmem:[#allocation8 + $0x230] ss:$8 sps:$4 sm:$0xff]   ;;  %v17173_v41 = vld [vmem:[#allocation8 + $0x244] ss:$8 sps:$4 sm:$0xff]  }
 0x45e   :  { %v19407_v25 = vpop.f32.mrb[69].mxu0  ;;  %4601 = vmatprep.subr.bf16.mxu1 %v17158_v42 }
 0x45f   :  { %v19409_v33 = vpop.f32.mrb[70].mxu0 }
 0x460   :  { %v4392_v24 = vpack.c.bf16 %v19409_v33, %v19402_v49  ;;  %v19413_v34 = vpop.f32.mrb[71].mxu0  ;;  %v17246_v49 = vld [vmem:[#allocation8 + $0x350] ss:$8 sps:$4 sm:$0xff]  }
 0x461   :  { %v4393_v38 = vpack.c.bf16 %v19413_v34, %v19407_v25  ;;  %4602 = vmatpush1.bf16.msra.mxu1 %v17156_v21  ;;  %v17234_v25 = vld [vmem:[#allocation8 + $0x320] ss:$8 sps:$4 sm:$0xff]   ;;  %v17239_v34 = vld [vmem:[#allocation8 + $0x334] ss:$8 sps:$4 sm:$0xff]  }
 0x462   :  { %3467 = vmatmul.mubr.bf16.gmra.mrb[28].mxu0 %v17159_v23  ;;  %4603 = vmatprep.subr.bf16.mxu1 %v17164_v47  ;;  %v17177_v23 = vld [vmem:[#allocation5 + $0x5cc] ss:$16 sps:$4 sm:$0xff]  }
 0x463   :  { %3476 = vmatprep.mubr.bf16.mxu0 %v17168_v61  ;;  %v20954_v61 = vpack.c.bf16 %v19316_v60, %v19312_v57  ;;  %v17183_v57 = vld [vmem:[#allocation8 + $0x270] ss:$8 sps:$4 sm:$0xff]  }
 0x464   :  { %4320 = vmatmul.mubr.bf16.gmra.mrb[4].mxu1 %v20952_v32  ;;  %v17174_v32 = vld [vmem:[#allocation8 + $0x250] ss:$8 sps:$4 sm:$0xff]  }
 0x465   :  { %v19420_v56 = vpop.f32.mrb[72].mxu0  ;;  %4329 = vmatprep.mubr.bf16.mxu1 %v20953_v35  ;;  %4604 = vmatpush1.bf16.msra.mxu1 %v17162_v50 }
 0x466   :  { %v19425_v42 = vpop.f32.mrb[73].mxu0  ;;  %4605 = vmatprep.subr.bf16.mxu1 %v17167_v55  ;;  %v20955_v55 = vpack.c.bf16 %v19332_v16, %v19326_v2  ;;  %v17180_v2 = vld [vmem:[#allocation8 + $0x260] ss:$8 sps:$4 sm:$0xff]   ;;  %v17185_v16 = vld [vmem:[#allocation8 + $0x274] ss:$8 sps:$4 sm:$0xff]  }
 0x467   :  { %v19427_v21 = vpop.f32.mrb[74].mxu0 }
 0x468   :  { %v19431_v52 = vpop.f32.mrb[75].mxu0 }
 0x469   :  { %v4395_v47 = vpack.c.bf16 %v19431_v52, %v19425_v42  ;;  %4606 = vmatpush1.bf16.msra.mxu1 %v17165_v28  ;;  %v17179_v28 = vld [vmem:[#allocation5 + $0x5c8] ss:$16 sps:$4 sm:$0xff]   ;;  %v17248_v52 = vld [vmem:[#allocation8 + $0x354] ss:$8 sps:$4 sm:$0xff]  }
 0x46a   :  { %3477 = vmatmul.mubr.bf16.gmra.mrb[180].mxu0 %v17170_v26  ;;  %4607 = vmatprep.subr.bf16.mxu1 %v17173_v41  ;;  %v17182_v26 = vld [vmem:[#allocation8 + $0x264] ss:$8 sps:$4 sm:$0xff]   ;;  %v17243_v42 = vld [vmem:[#allocation8 + $0x340] ss:$8 sps:$4 sm:$0xff]  }
 0x46b   :  { %3486 = vmatprep.mubr.bf16.mxu0 %v17177_v23  ;;  %v17186_v23 = vld [vmem:[#allocation5 + $0x5ec] ss:$16 sps:$4 sm:$0xff]  }
 0x46c   :  { %4330 = vmatmul.mubr.bf16.gmra.mrb[8].mxu1 %v20954_v61 }
 0x46d   :  { %v19438_v50 = vpop.f32.mrb[76].mxu0  ;;  %4339 = vmatprep.mubr.bf16.mxu1 %v20955_v55  ;;  %4608 = vmatpush1.bf16.msra.mxu1 %v17171_v58  ;;  %v20956_v58 = vpack.c.bf16 %v19328_v8, %v19324_v1  ;;  %v20957_v55 = vpack.c.bf16 %v19344_v62, %v19338_v36  ;;  %v17189_v62 = vld [vmem:[#allocation8 + $0x280] ss:$8 sps:$4 sm:$0xff]   ;;  %v17194_v36 = vld [vmem:[#allocation8 + $0x294] ss:$8 sps:$4 sm:$0xff]  }
 0x46e   :  { %v19443_v35 = vpop.f32.mrb[77].mxu0  ;;  %4609 = vmatprep.subr.bf16.mxu1 %v17176_v63  ;;  %v17192_v1 = vld [vmem:[#allocation8 + $0x290] ss:$8 sps:$4 sm:$0xff]  }
 0x46f   :  { %v19445_v41 = vpop.f32.mrb[78].mxu0 }
 0x470   :  { %v19449_v60 = vpop.f32.mrb[79].mxu0 }
 0x471   :  { %4610 = vmatpush1.bf16.msra.mxu1 %v17174_v32  ;;  %v17188_v32 = vld [vmem:[#allocation5 + $0x5e8] ss:$16 sps:$4 sm:$0xff]  }
 0x472   :  { %3487 = vmatmul.mubr.bf16.gmra.mrb[184].mxu0 %v17179_v28  ;;  %4611 = vmatprep.subr.bf16.mxu1 %v17182_v26  ;;  %v17191_v28 = vld [vmem:[#allocation8 + $0x284] ss:$8 sps:$4 sm:$0xff]  }
 0x473   :  { %3496 = vmatprep.mubr.bf16.mxu0 %v17186_v23  ;;  %v17195_v23 = vld [vmem:[#allocation5 + $0x60c] ss:$16 sps:$4 sm:$0xff]  }
 0x474   :  { %4340 = vmatmul.mubr.bf16.gmra.mrb[12].mxu1 %v20956_v58 }
 0x475   :  { %v19456_v63 = vpop.f32.mrb[80].mxu0  ;;  %4349 = vmatprep.mubr.bf16.mxu1 %v20957_v55  ;;  %4612 = vmatpush1.bf16.msra.mxu1 %v17180_v2  ;;  %v20958_v2 = vpack.c.bf16 %v19340_v53, %v19336_v30  ;;  %v20959_v55 = vpack.c.bf16 %v19356_v40, %v19350_v10  ;;  %v17198_v40 = vld [vmem:[#allocation8 + $0x2a0] ss:$8 sps:$4 sm:$0xff]   ;;  %v17203_v10 = vld [vmem:[#allocation8 + $0x2b4] ss:$8 sps:$4 sm:$0xff]  }
 0x476   :  { %v19461_v48 = vpop.f32.mrb[81].mxu0  ;;  %4613 = vmatprep.subr.bf16.mxu1 %v17185_v16  ;;  %v17201_v30 = vld [vmem:[#allocation8 + $0x2b0] ss:$8 sps:$4 sm:$0xff]  }
 0x477   :  { %v19463_v26 = vpop.f32.mrb[82].mxu0 }
 0x478   :  { %v19467_v8 = vpop.f32.mrb[83].mxu0 }
 0x479   :  { %4614 = vmatpush1.bf16.msra.mxu1 %v17183_v57  ;;  %v17197_v57 = vld [vmem:[#allocation5 + $0x608] ss:$16 sps:$4 sm:$0xff]  }
 0x47a   :  { %3497 = vmatmul.mubr.bf16.gmra.mrb[188].mxu0 %v17188_v32  ;;  %4615 = vmatprep.subr.bf16.mxu1 %v17191_v28  ;;  %v17200_v32 = vld [vmem:[#allocation8 + $0x2a4] ss:$8 sps:$4 sm:$0xff]  }
 0x47b   :  { %3506 = vmatprep.mubr.bf16.mxu0 %v17195_v23  ;;  %v17204_v23 = vld [vmem:[#allocation5 + $0x62c] ss:$16 sps:$4 sm:$0xff]  }
 0x47c   :  { %4350 = vmatmul.mubr.bf16.gmra.mrb[16].mxu1 %v20958_v2 }
 0x47d   :  { %v19474_v16 = vpop.f32.mrb[84].mxu0  ;;  %4359 = vmatprep.mubr.bf16.mxu1 %v20959_v55  ;;  %4616 = vmatpush1.bf16.msra.mxu1 %v17189_v62  ;;  %v20960_v62 = vpack.c.bf16 %v19352_v0, %v19348_v4  ;;  %v20961_v55 = vpack.c.bf16 %v19368_v45, %v19362_v59  ;;  %v17207_v45 = vld [vmem:[#allocation8 + $0x2c0] ss:$8 sps:$4 sm:$0xff]   ;;  %v17212_v59 = vld [vmem:[#allocation8 + $0x2d4] ss:$8 sps:$4 sm:$0xff]  }
 0x47e   :  { %v19479_v61 = vpop.f32.mrb[85].mxu0  ;;  %4617 = vmatprep.subr.bf16.mxu1 %v17194_v36  ;;  %v17210_v0 = vld [vmem:[#allocation8 + $0x2d0] ss:$8 sps:$4 sm:$0xff]  }
 0x47f   :  { %v19481_v28 = vpop.f32.mrb[86].mxu0 }
 0x480   :  { %v19485_v53 = vpop.f32.mrb[87].mxu0 }
 0x481   :  { %4618 = vmatpush1.bf16.msra.mxu1 %v17192_v1  ;;  %v17206_v1 = vld [vmem:[#allocation5 + $0x628] ss:$16 sps:$4 sm:$0xff]  }
 0x482   :  { %3507 = vmatmul.mubr.bf16.gmra.mrb[192].mxu0 %v17197_v57  ;;  %4619 = vmatprep.subr.bf16.mxu1 %v17200_v32  ;;  %v17209_v57 = vld [vmem:[#allocation8 + $0x2c4] ss:$8 sps:$4 sm:$0xff]  }
 0x483   :  { %3516 = vmatprep.mubr.bf16.mxu0 %v17204_v23  ;;  %v17213_v23 = vld [vmem:[#allocation5 + $0x64c] ss:$16 sps:$4 sm:$0xff]  }
 0x484   :  { %4360 = vmatmul.mubr.bf16.gmra.mrb[20].mxu1 %v20960_v62 }
 0x485   :  { %v19492_v36 = vpop.f32.mrb[88].mxu0  ;;  %4369 = vmatprep.mubr.bf16.mxu1 %v20961_v55  ;;  %4620 = vmatpush1.bf16.msra.mxu1 %v17198_v40  ;;  %v20962_v40 = vpack.c.bf16 %v19364_v46, %v19360_v51  ;;  %v20963_v55 = vpack.c.bf16 %v19380_v39, %v19374_v54  ;;  %v17216_v39 = vld [vmem:[#allocation8 + $0x2e0] ss:$8 sps:$4 sm:$0xff]   ;;  %v17221_v54 = vld [vmem:[#allocation8 + $0x2f4] ss:$8 sps:$4 sm:$0xff]  }
 0x486   :  { %v19497_v58 = vpop.f32.mrb[89].mxu0  ;;  %4621 = vmatprep.subr.bf16.mxu1 %v17203_v10 }
 0x487   :  { %v19499_v32 = vpop.f32.mrb[90].mxu0 }
 0x488   :  { %v19503_v4 = vpop.f32.mrb[91].mxu0 }
 0x489   :  { %v4403_v62 = vpack.c.bf16 %v19503_v4, %v19497_v58  ;;  %4622 = vmatpush1.bf16.msra.mxu1 %v17201_v30  ;;  %v17215_v30 = vld [vmem:[#allocation5 + $0x648] ss:$16 sps:$4 sm:$0xff]   ;;  %v17284_v4 = vld [vmem:[#allocation8 + $0x3d4] ss:$8 sps:$4 sm:$0xff]  }
 0x48a   :  { %3517 = vmatmul.mubr.bf16.gmra.mrb[196].mxu0 %v17206_v1  ;;  %4623 = vmatprep.subr.bf16.mxu1 %v17209_v57  ;;  %v17218_v1 = vld [vmem:[#allocation8 + $0x2e4] ss:$8 sps:$4 sm:$0xff]   ;;  %v17279_v58 = vld [vmem:[#allocation8 + $0x3c0] ss:$8 sps:$4 sm:$0xff]  }
 0x48b   :  { %3526 = vmatprep.mubr.bf16.mxu0 %v17213_v23  ;;  %v17222_v23 = vld [vmem:[#allocation5 + $0x66c] ss:$16 sps:$4 sm:$0xff]  }
 0x48c   :  { %4370 = vmatmul.mubr.bf16.gmra.mrb[24].mxu1 %v20962_v40 }
 0x48d   :  { %v19510_v10 = vpop.f32.mrb[92].mxu0  ;;  %4379 = vmatprep.mubr.bf16.mxu1 %v20963_v55  ;;  %4624 = vmatpush1.bf16.msra.mxu1 %v17207_v45  ;;  %v20964_v45 = vpack.c.bf16 %v19376_v44, %v19372_v22  ;;  %v17219_v55 = vld [vmem:[#allocation8 + $0x2f0] ss:$8 sps:$4 sm:$0xff]  }
 0x48e   :  { %v19515_v2 = vpop.f32.mrb[93].mxu0  ;;  %4625 = vmatprep.subr.bf16.mxu1 %v17212_v59 }
 0x48f   :  { %v19517_v57 = vpop.f32.mrb[94].mxu0 }
 0x490   :  { %v19521_v51 = vpop.f32.mrb[95].mxu0 }
 0x491   :  { %v4405_v40 = vpack.c.bf16 %v19521_v51, %v19515_v2  ;;  %4626 = vmatpush1.bf16.msra.mxu1 %v17210_v0  ;;  %v17224_v0 = vld [vmem:[#allocation5 + $0x668] ss:$16 sps:$4 sm:$0xff]   ;;  %v17293_v51 = vld [vmem:[#allocation8 + $0x3f4] ss:$8 sps:$4 sm:$0xff]  }
 0x492   :  { %3527 = vmatmul.mubr.bf16.gmra.mrb[200].mxu0 %v17215_v30  ;;  %4627 = vmatprep.subr.bf16.mxu1 %v17218_v1  ;;  %v17227_v30 = vld [vmem:[#allocation8 + $0x304] ss:$8 sps:$4 sm:$0xff]   ;;  %v17288_v2 = vld [vmem:[#allocation8 + $0x3e0] ss:$8 sps:$4 sm:$0xff]  }
 0x493   :  { %3536 = vmatprep.mubr.bf16.mxu0 %v17222_v23  ;;  %v17231_v23 = vld [vmem:[#allocation5 + $0x68c] ss:$16 sps:$4 sm:$0xff]  }
 0x494   :  { %4380 = vmatmul.mubr.bf16.gmra.mrb[28].mxu1 %v20964_v45 }
 0x495   :  { %v19528_v59 = vpop.f32.mrb[96].mxu0  ;;  %4628 = vmatpush1.bf16.msra.mxu1 %v17216_v39  ;;  %4631 = vmatprep.mubr.bf16.mxu1 %v4391_v27 }
 0x496   :  { %v19533_v46 = vpop.f32.mrb[97].mxu0  ;;  %4629 = vmatprep.subr.bf16.mxu1 %v17221_v54  ;;  %v17228_v54 = vld [vmem:[#allocation8 + $0x310] ss:$8 sps:$4 sm:$0xff]  }
 0x497   :  { %v19535_v1 = vpop.f32.mrb[98].mxu0 }
 0x498   :  { %v4744_v44 = vpack.c.bf16 %v19535_v1, %v19528_v59  ;;  %v19539_v22 = vpop.f32.mrb[99].mxu0  ;;  %v17309_v59 = vld [vmem:[#allocation8 + $0x430] ss:$8 sps:$4 sm:$0xff]  }
 0x499   :  { %v4745_v39 = vpack.c.bf16 %v19539_v22, %v19533_v46  ;;  %4630 = vmatpush1.bf16.msra.mxu1 %v17219_v55  ;;  %v17233_v55 = vld [vmem:[#allocation5 + $0x688] ss:$16 sps:$4 sm:$0xff]   ;;  %v17302_v22 = vld [vmem:[#allocation8 + $0x414] ss:$8 sps:$4 sm:$0xff]  }
 0x49a   :  { %3537 = vmatmul.mubr.bf16.gmra.mrb[204].mxu0 %v17224_v0  ;;  %4953 = vmatprep.subr.bf16.mxu1 %v17227_v30  ;;  %v17236_v0 = vld [vmem:[#allocation8 + $0x324] ss:$8 sps:$4 sm:$0xff]   ;;  %v17297_v46 = vld [vmem:[#allocation8 + $0x400] ss:$8 sps:$4 sm:$0xff]  }
 0x49b   :  { %3546 = vmatprep.mubr.bf16.mxu0 %v17231_v23  ;;  %v17240_v23 = vld [vmem:[#allocation5 + $0x6ac] ss:$16 sps:$4 sm:$0xff]  }
 0x49c   :  { %4632 = vmatmul.mubr.bf16.vlgmr.msra.gmra.mrb[0].mxu1 %v4390_v29 }
 0x49d   :  { %v19546_v27 = vpop.f32.mrb[100].mxu0  ;;  %4641 = vmatprep.mubr.bf16.mxu1 %v4393_v38  ;;  %4954 = vmatpush1.bf16.msra.mxu1 %v17225_v31  ;;  %v17237_v31 = vld [vmem:[#allocation8 + $0x330] ss:$8 sps:$4 sm:$0xff]  }
 0x49e   :  { %v19551_v45 = vpop.f32.mrb[101].mxu0  ;;  %4955 = vmatprep.subr.bf16.mxu1 %v17230_v37 }
 0x49f   :  { %v19553_v30 = vpop.f32.mrb[102].mxu0 }
 0x4a0   :  { %v19557_v14 = vpop.f32.mrb[103].mxu0 }
 0x4a1   :  { %v4747_v29 = vpack.c.bf16 %v19557_v14, %v19551_v45  ;;  %4956 = vmatpush1.bf16.msra.mxu1 %v17228_v54  ;;  %v17242_v54 = vld [vmem:[#allocation5 + $0x6a8] ss:$16 sps:$4 sm:$0xff]   ;;  %v17311_v14 = vld [vmem:[#allocation8 + $0x434] ss:$8 sps:$4 sm:$0xff]  }
 0x4a2   :  { %3547 = vmatmul.mubr.bf16.gmra.mrb[208].mxu0 %v17233_v55  ;;  %4957 = vmatprep.subr.bf16.mxu1 %v17236_v0  ;;  %v17245_v55 = vld [vmem:[#allocation8 + $0x344] ss:$8 sps:$4 sm:$0xff]   ;;  %v17306_v45 = vld [vmem:[#allocation8 + $0x420] ss:$8 sps:$4 sm:$0xff]  }
 0x4a3   :  { %3556 = vmatprep.mubr.bf16.mxu0 %v17240_v23  ;;  %v17249_v23 = vld [vmem:[#allocation5 + $0x6cc] ss:$16 sps:$4 sm:$0xff]  }
 0x4a4   :  { %4642 = vmatmul.mubr.bf16.gmra.mrb[4].mxu1 %v4392_v24 }
 0x4a5   :  { %v19564_v38 = vpop.f32.mrb[104].mxu0  ;;  %4651 = vmatprep.mubr.bf16.mxu1 %v4395_v47  ;;  %4958 = vmatpush1.bf16.msra.mxu1 %v17234_v25  ;;  %v20965_v47 = vpack.c.bf16 %v19427_v21, %v19420_v56  ;;  %v17255_v56 = vld [vmem:[#allocation8 + $0x370] ss:$8 sps:$4 sm:$0xff]  }
 0x4a6   :  { %v19569_v37 = vpop.f32.mrb[105].mxu0  ;;  %4959 = vmatprep.subr.bf16.mxu1 %v17239_v34  ;;  %v20966_v34 = vpack.c.bf16 %v19449_v60, %v19443_v35  ;;  %v17252_v35 = vld [vmem:[#allocation8 + $0x360] ss:$8 sps:$4 sm:$0xff]   ;;  %v17257_v60 = vld [vmem:[#allocation8 + $0x374] ss:$8 sps:$4 sm:$0xff]  }
 0x4a7   :  { %v19571_v0 = vpop.f32.mrb[106].mxu0 }
 0x4a8   :  { %v19575_v33 = vpop.f32.mrb[107].mxu0 }
 0x4a9   :  { %4960 = vmatpush1.bf16.msra.mxu1 %v17237_v31  ;;  %v17251_v31 = vld [vmem:[#allocation5 + $0x6c8] ss:$16 sps:$4 sm:$0xff]  }
 0x4aa   :  { %3557 = vmatmul.mubr.bf16.gmra.mrb[212].mxu0 %v17242_v54  ;;  %4961 = vmatprep.subr.bf16.mxu1 %v17245_v55  ;;  %v17254_v54 = vld [vmem:[#allocation8 + $0x364] ss:$8 sps:$4 sm:$0xff]  }
 0x4ab   :  { %3566 = vmatprep.mubr.bf16.mxu0 %v17249_v23  ;;  %v17258_v23 = vld [vmem:[#allocation5 + $0x6ec] ss:$16 sps:$4 sm:$0xff]  }
 0x4ac   :  { %4652 = vmatmul.mubr.bf16.gmra.mrb[8].mxu1 %v20965_v47 }
 0x4ad   :  { %v19582_v25 = vpop.f32.mrb[108].mxu0  ;;  %4661 = vmatprep.mubr.bf16.mxu1 %v20966_v34  ;;  %4962 = vmatpush1.bf16.msra.mxu1 %v17243_v42  ;;  %v20967_v42 = vpack.c.bf16 %v19445_v41, %v19438_v50  ;;  %v20968_v34 = vpack.c.bf16 %v19467_v8, %v19461_v48  ;;  %v17261_v48 = vld [vmem:[#allocation8 + $0x380] ss:$8 sps:$4 sm:$0xff]   ;;  %v17266_v8 = vld [vmem:[#allocation8 + $0x394] ss:$8 sps:$4 sm:$0xff]  }
 0x4ae   :  { %v19587_v43 = vpop.f32.mrb[109].mxu0  ;;  %4963 = vmatprep.subr.bf16.mxu1 %v17248_v52  ;;  %v17264_v50 = vld [vmem:[#allocation8 + $0x390] ss:$8 sps:$4 sm:$0xff]  }
 0x4af   :  { %v19589_v55 = vpop.f32.mrb[110].mxu0 }
 0x4b0   :  { %v19593_v21 = vpop.f32.mrb[111].mxu0 }
 0x4b1   :  { %4964 = vmatpush1.bf16.msra.mxu1 %v17246_v49  ;;  %v17260_v49 = vld [vmem:[#allocation5 + $0x6e8] ss:$16 sps:$4 sm:$0xff]  }
 0x4b2   :  { %3567 = vmatmul.mubr.bf16.gmra.mrb[216].mxu0 %v17251_v31  ;;  %4965 = vmatprep.subr.bf16.mxu1 %v17254_v54  ;;  %v17263_v31 = vld [vmem:[#allocation8 + $0x384] ss:$8 sps:$4 sm:$0xff]  }
 0x4b3   :  { %3576 = vmatprep.mubr.bf16.mxu0 %v17258_v23  ;;  %v17267_v23 = vld [vmem:[#allocation5 + $0x70c] ss:$16 sps:$4 sm:$0xff]  }
 0x4b4   :  { %4662 = vmatmul.mubr.bf16.gmra.mrb[12].mxu1 %v20967_v42 }
 0x4b5   :  { %v19600_v52 = vpop.f32.mrb[112].mxu0  ;;  %4671 = vmatprep.mubr.bf16.mxu1 %v20968_v34  ;;  %4966 = vmatpush1.bf16.msra.mxu1 %v17252_v35  ;;  %v20969_v35 = vpack.c.bf16 %v19463_v26, %v19456_v63  ;;  %v20970_v34 = vpack.c.bf16 %v19485_v53, %v19479_v61  ;;  %v17270_v61 = vld [vmem:[#allocation8 + $0x3a0] ss:$8 sps:$4 sm:$0xff]   ;;  %v17275_v53 = vld [vmem:[#allocation8 + $0x3b4] ss:$8 sps:$4 sm:$0xff]  }
 0x4b6   :  { %v19605_v24 = vpop.f32.mrb[113].mxu0  ;;  %4967 = vmatprep.subr.bf16.mxu1 %v17257_v60 }
 0x4b7   :  { %v19607_v54 = vpop.f32.mrb[114].mxu0 }
 0x4b8   :  { %v19611_v41 = vpop.f32.mrb[115].mxu0 }
 0x4b9   :  { %v4753_v42 = vpack.c.bf16 %v19611_v41, %v19605_v24  ;;  %4968 = vmatpush1.bf16.msra.mxu1 %v17255_v56  ;;  %v17269_v56 = vld [vmem:[#allocation5 + $0x708] ss:$16 sps:$4 sm:$0xff]   ;;  %v17338_v41 = vld [vmem:[#allocation8 + $0x494] ss:$8 sps:$4 sm:$0xff]  }
 0x4ba   :  { %3577 = vmatmul.mubr.bf16.gmra.mrb[220].mxu0 %v17260_v49  ;;  %4969 = vmatprep.subr.bf16.mxu1 %v17263_v31  ;;  %v17272_v49 = vld [vmem:[#allocation8 + $0x3a4] ss:$8 sps:$4 sm:$0xff]   ;;  %v17333_v24 = vld [vmem:[#allocation8 + $0x480] ss:$8 sps:$4 sm:$0xff]  }
 0x4bb   :  { %3586 = vmatprep.mubr.bf16.mxu0 %v17267_v23  ;;  %v17276_v23 = vld [vmem:[#allocation5 + $0x72c] ss:$16 sps:$4 sm:$0xff]  }
 0x4bc   :  { %4672 = vmatmul.mubr.bf16.gmra.mrb[16].mxu1 %v20969_v35 }
 0x4bd   :  { %v19618_v60 = vpop.f32.mrb[116].mxu0  ;;  %4681 = vmatprep.mubr.bf16.mxu1 %v20970_v34  ;;  %4970 = vmatpush1.bf16.msra.mxu1 %v17261_v48  ;;  %v20971_v48 = vpack.c.bf16 %v19481_v28, %v19474_v16  ;;  %v17273_v34 = vld [vmem:[#allocation8 + $0x3b0] ss:$8 sps:$4 sm:$0xff]  }
 0x4be   :  { %v19623_v47 = vpop.f32.mrb[117].mxu0  ;;  %4971 = vmatprep.subr.bf16.mxu1 %v17266_v8 }
 0x4bf   :  { %v19625_v31 = vpop.f32.mrb[118].mxu0 }
 0x4c0   :  { %v19629_v26 = vpop.f32.mrb[119].mxu0 }
 0x4c1   :  { %v4755_v35 = vpack.c.bf16 %v19629_v26, %v19623_v47  ;;  %4972 = vmatpush1.bf16.msra.mxu1 %v17264_v50  ;;  %v17278_v50 = vld [vmem:[#allocation5 + $0x728] ss:$16 sps:$4 sm:$0xff]  }
 0x4c2   :  { %3587 = vmatmul.mubr.bf16.gmra.mrb[224].mxu0 %v17269_v56  ;;  %4973 = vmatprep.subr.bf16.mxu1 %v17272_v49  ;;  %v17281_v56 = vld [vmem:[#allocation8 + $0x3c4] ss:$8 sps:$4 sm:$0xff]   ;;  %v17342_v26 = vld [vmem:[#allocation8 + $0x4a0] ss:$8 sps:$4 sm:$0xff]  }
 0x4c3   :  { %3596 = vmatprep.mubr.bf16.mxu0 %v17276_v23  ;;  %v17285_v23 = vld [vmem:[#allocation5 + $0x74c] ss:$16 sps:$4 sm:$0xff]  }
 0x4c4   :  { %4682 = vmatmul.mubr.bf16.gmra.mrb[20].mxu1 %v20971_v48 }
 0x4c5   :  { %v19636_v8 = vpop.f32.mrb[120].mxu0  ;;  %4691 = vmatprep.mubr.bf16.mxu1 %v4403_v62  ;;  %4974 = vmatpush1.bf16.msra.mxu1 %v17270_v61  ;;  %v20972_v62 = vpack.c.bf16 %v19499_v32, %v19492_v36 }
 0x4c6   :  { %v19641_v63 = vpop.f32.mrb[121].mxu0  ;;  %4975 = vmatprep.subr.bf16.mxu1 %v17275_v53  ;;  %v17282_v53 = vld [vmem:[#allocation8 + $0x3d0] ss:$8 sps:$4 sm:$0xff]  }
 0x4c7   :  { %v19643_v49 = vpop.f32.mrb[122].mxu0 }
 0x4c8   :  { %v19647_v28 = vpop.f32.mrb[123].mxu0 }
 0x4c9   :  { %v4757_v48 = vpack.c.bf16 %v19647_v28, %v19641_v63  ;;  %4976 = vmatpush1.bf16.msra.mxu1 %v17273_v34  ;;  %v17287_v34 = vld [vmem:[#allocation5 + $0x748] ss:$16 sps:$4 sm:$0xff]  }
 0x4ca   :  { %3597 = vmatmul.mubr.bf16.gmra.mrb[228].mxu0 %v17278_v50  ;;  %4977 = vmatprep.subr.bf16.mxu1 %v17281_v56  ;;  %v17290_v50 = vld [vmem:[#allocation8 + $0x3e4] ss:$8 sps:$4 sm:$0xff]   ;;  %v17351_v28 = vld [vmem:[#allocation8 + $0x4c0] ss:$8 sps:$4 sm:$0xff]  }
 0x4cb   :  { %3606 = vmatprep.mubr.bf16.mxu0 %v17285_v23  ;;  %v17294_v23 = vld [vmem:[#allocation5 + $0x76c] ss:$16 sps:$4 sm:$0xff]  }
 0x4cc   :  { %4692 = vmatmul.mubr.bf16.gmra.mrb[24].mxu1 %v20972_v62 }
 0x4cd   :  { %v19654_v61 = vpop.f32.mrb[124].mxu0  ;;  %4701 = vmatprep.mubr.bf16.mxu1 %v4405_v40  ;;  %4978 = vmatpush1.bf16.msra.mxu1 %v17279_v58  ;;  %v20973_v40 = vpack.c.bf16 %v19517_v57, %v19510_v10 }
 0x4ce   :  { %v19659_v16 = vpop.f32.mrb[125].mxu0  ;;  %4979 = vmatprep.subr.bf16.mxu1 %v17284_v4  ;;  %v17291_v4 = vld [vmem:[#allocation8 + $0x3f0] ss:$8 sps:$4 sm:$0xff]  }
 0x4cf   :  { %v19661_v56 = vpop.f32.mrb[126].mxu0 }
 0x4d0   :  { %v19665_v32 = vpop.f32.mrb[127].mxu0 }
 0x4d1   :  { %v4759_v62 = vpack.c.bf16 %v19665_v32, %v19659_v16  ;;  %4980 = vmatpush1.bf16.msra.mxu1 %v17282_v53  ;;  %v17296_v53 = vld [vmem:[#allocation5 + $0x768] ss:$16 sps:$4 sm:$0xff]  }
 0x4d2   :  { %3607 = vmatmul.mubr.bf16.gmra.mrb[232].mxu0 %v17287_v34  ;;  %4981 = vmatprep.subr.bf16.mxu1 %v17290_v50  ;;  %v17299_v34 = vld [vmem:[#allocation8 + $0x404] ss:$8 sps:$4 sm:$0xff]   ;;  %v17360_v32 = vld [vmem:[#allocation8 + $0x4e0] ss:$8 sps:$4 sm:$0xff]  }
 0x4d3   :  { %3616 = vmatprep.mubr.bf16.mxu0 %v17294_v23  ;;  %v17303_v23 = vld [vmem:[#allocation5 + $0x78c] ss:$16 sps:$4 sm:$0xff]  }
 0x4d4   :  { %4702 = vmatmul.mubr.bf16.gmra.mrb[28].mxu1 %v20973_v40 }
 0x4d5   :  { %v19672_v58 = vpop.f32.mrb[128].mxu0  ;;  %4982 = vmatpush1.bf16.msra.mxu1 %v17288_v2  ;;  %4985 = vmatprep.mubr.bf16.mxu1 %v4745_v39 }
 0x4d6   :  { %v19677_v36 = vpop.f32.mrb[129].mxu0  ;;  %4983 = vmatprep.subr.bf16.mxu1 %v17293_v51  ;;  %v17300_v51 = vld [vmem:[#allocation8 + $0x410] ss:$8 sps:$4 sm:$0xff]  }
 0x4d7   :  { %v19679_v50 = vpop.f32.mrb[130].mxu0 }
 0x4d8   :  { %v19683_v57 = vpop.f32.mrb[131].mxu0 }
 0x4d9   :  { %v5099_v2 = vpack.c.bf16 %v19683_v57, %v19677_v36  ;;  %4984 = vmatpush1.bf16.msra.mxu1 %v17291_v4  ;;  %v17305_v4 = vld [vmem:[#allocation5 + $0x788] ss:$16 sps:$4 sm:$0xff]  }
 0x4da   :  { %3617 = vmatmul.mubr.bf16.gmra.mrb[236].mxu0 %v17296_v53  ;;  %5307 = vmatprep.subr.bf16.mxu1 %v17299_v34  ;;  %v17308_v53 = vld [vmem:[#allocation8 + $0x424] ss:$8 sps:$4 sm:$0xff]   ;;  %v17369_v57 = vld [vmem:[#allocation8 + $0x500] ss:$8 sps:$4 sm:$0xff]  }
 0x4db   :  { %3626 = vmatprep.mubr.bf16.mxu0 %v17303_v23  ;;  %v17312_v23 = vld [vmem:[#allocation5 + $0x7ac] ss:$16 sps:$4 sm:$0xff]  }
 0x4dc   :  { %4986 = vmatmul.mubr.bf16.vlgmr.msra.gmra.mrb[0].mxu1 %v4744_v44 }
 0x4dd   :  { %v19690_v39 = vpop.f32.mrb[132].mxu0  ;;  %4995 = vmatprep.mubr.bf16.mxu1 %v4747_v29  ;;  %5308 = vmatpush1.bf16.msra.mxu1 %v17297_v46  ;;  %v20974_v29 = vpack.c.bf16 %v19553_v30, %v19546_v27  ;;  %v17318_v27 = vld [vmem:[#allocation8 + $0x450] ss:$8 sps:$4 sm:$0xff]  }
 0x4de   :  { %v19695_v40 = vpop.f32.mrb[133].mxu0  ;;  %5309 = vmatprep.subr.bf16.mxu1 %v17302_v22  ;;  %v20975_v22 = vpack.c.bf16 %v19575_v33, %v19569_v37  ;;  %v17315_v37 = vld [vmem:[#allocation8 + $0x440] ss:$8 sps:$4 sm:$0xff]   ;;  %v17320_v33 = vld [vmem:[#allocation8 + $0x454] ss:$8 sps:$4 sm:$0xff]  }
 0x4df   :  { %v19697_v34 = vpop.f32.mrb[134].mxu0 }
 0x4e0   :  { %v19701_v1 = vpop.f32.mrb[135].mxu0 }
 0x4e1   :  { %5310 = vmatpush1.bf16.msra.mxu1 %v17300_v51  ;;  %v17314_v51 = vld [vmem:[#allocation5 + $0x7a8] ss:$16 sps:$4 sm:$0xff]  }
 0x4e2   :  { %3627 = vmatmul.mubr.bf16.gmra.mrb[240].mxu0 %v17305_v4  ;;  %5311 = vmatprep.subr.bf16.mxu1 %v17308_v53  ;;  %v17317_v4 = vld [vmem:[#allocation8 + $0x444] ss:$8 sps:$4 sm:$0xff]  }
 0x4e3   :  { %3636 = vmatprep.mubr.bf16.mxu0 %v17312_v23  ;;  %v17321_v23 = vld [vmem:[#allocation5 + $0x7cc] ss:$16 sps:$4 sm:$0xff]  }
 0x4e4   :  { %4996 = vmatmul.mubr.bf16.gmra.mrb[4].mxu1 %v20974_v29 }
 0x4e5   :  { %v19708_v46 = vpop.f32.mrb[136].mxu0  ;;  %5005 = vmatprep.mubr.bf16.mxu1 %v20975_v22  ;;  %5312 = vmatpush1.bf16.msra.mxu1 %v17306_v45  ;;  %v20976_v45 = vpack.c.bf16 %v19571_v0, %v19564_v38  ;;  %v20977_v22 = vpack.c.bf16 %v19593_v21, %v19587_v43  ;;  %v17324_v43 = vld [vmem:[#allocation8 + $0x460] ss:$8 sps:$4 sm:$0xff]   ;;  %v17329_v21 = vld [vmem:[#allocation8 + $0x474] ss:$8 sps:$4 sm:$0xff]  }
 0x4e6   :  { %v19713_v10 = vpop.f32.mrb[137].mxu0  ;;  %5313 = vmatprep.subr.bf16.mxu1 %v17311_v14 }
 0x4e7   :  { %v19715_v53 = vpop.f32.mrb[138].mxu0 }
 0x4e8   :  { %v19719_v30 = vpop.f32.mrb[139].mxu0 }
 0x4e9   :  { %v5103_v29 = vpack.c.bf16 %v19719_v30, %v19713_v10  ;;  %5314 = vmatpush1.bf16.msra.mxu1 %v17309_v59  ;;  %v17323_v59 = vld [vmem:[#allocation5 + $0x7c8] ss:$16 sps:$4 sm:$0xff]   ;;  %v20996_v10 = vld [vmem:[#allocation28_spill] sm:$0xff] }
 0x4ea   :  { %3637 = vmatmul.mubr.bf16.gmra.mrb[244].mxu0 %v17314_v51  ;;  %5315 = vmatprep.subr.bf16.mxu1 %v17317_v4  ;;  %v17326_v51 = vld [vmem:[#allocation8 + $0x464] ss:$8 sps:$4 sm:$0xff]  }
 0x4eb   :  { %3646 = vmatprep.mubr.bf16.mxu0 %v17321_v23  ;;  %v17330_v23 = vld [vmem:[#allocation5 + $0x7ec] ss:$16 sps:$4 sm:$0xff]  }
 0x4ec   :  { %5006 = vmatmul.mubr.bf16.gmra.mrb[8].mxu1 %v20976_v45 }
 0x4ed   :  { %v19726_v14 = vpop.f32.mrb[140].mxu0  ;;  %5015 = vmatprep.mubr.bf16.mxu1 %v20977_v22  ;;  %5316 = vmatpush1.bf16.msra.mxu1 %v17315_v37  ;;  %v20978_v37 = vpack.c.bf16 %v19589_v55, %v19582_v25  ;;  %v17327_v22 = vld [vmem:[#allocation8 + $0x470] ss:$8 sps:$4 sm:$0xff]  }
 0x4ee   :  { %v19731_v44 = vpop.f32.mrb[141].mxu0  ;;  %5317 = vmatprep.subr.bf16.mxu1 %v17320_v33 }
 0x4ef   :  { %v19733_v4 = vpop.f32.mrb[142].mxu0 }
 0x4f0   :  { %v19737_v0 = vpop.f32.mrb[143].mxu0 }
 0x4f1   :  { %v5105_v45 = vpack.c.bf16 %v19737_v0, %v19731_v44  ;;  %5318 = vmatpush1.bf16.msra.mxu1 %v17318_v27  ;;  %v17332_v27 = vld [vmem:[#allocation5 + $0x7e8] ss:$16 sps:$4 sm:$0xff]   ;;  %v21001_v44 = vld [vmem:[#allocation32_spill] sm:$0xff] }
 0x4f2   :  { %3647 = vmatmul.mubr.bf16.gmra.mrb[248].mxu0 %v17323_v59  ;;  %5319 = vmatprep.subr.bf16.mxu1 %v17326_v51  ;;  %v17335_v59 = vld [vmem:[#allocation8 + $0x484] ss:$8 sps:$4 sm:$0xff]  }
 0x4f3   :  { %3656 = vmatprep.mubr.bf16.mxu0 %v17330_v23  ;;  %v17341_v23 = vld [vmem:[#allocation5 + $0x80c] ss:$16 sps:$4 sm:$0xff]  }
 0x4f4   :  { %5016 = vmatmul.mubr.bf16.gmra.mrb[12].mxu1 %v20978_v37 }
 0x4f5   :  { %v19744_v33 = vpop.f32.mrb[144].mxu0  ;;  %5025 = vmatprep.mubr.bf16.mxu1 %v4753_v42  ;;  %5320 = vmatpush1.bf16.msra.mxu1 %v17324_v43  ;;  %v20979_v42 = vpack.c.bf16 %v19607_v54, %v19600_v52  ;;  %v17350_v52 = vld [vmem:[#allocation5 + $0x82c] ss:$16 sps:$4 sm:$0xff]  }
 0x4f6   :  { %v19749_v38 = vpop.f32.mrb[145].mxu0  ;;  %5321 = vmatprep.subr.bf16.mxu1 %v17329_v21  ;;  %v17336_v21 = vld [vmem:[#allocation8 + $0x490] ss:$8 sps:$4 sm:$0xff]  }
 0x4f7   :  { %v19751_v51 = vpop.f32.mrb[146].mxu0 }
 0x4f8   :  { %v19755_v55 = vpop.f32.mrb[147].mxu0 }
 0x4f9   :  { %5322 = vmatpush1.bf16.msra.mxu1 %v17327_v22 }
 0x4fa   :  { %3657 = vmatmul.mubr.bf16.gmra.mrb[252].mxu0 %v17332_v27  ;;  %5323 = vmatprep.subr.bf16.mxu1 %v17335_v59  ;;  %v17339_v27 = vld [vmem:[#allocation5 + $0x808] ss:$16 sps:$4 sm:$0xff]   ;;  %v17344_v59 = vld [vmem:[#allocation8 + $0x4a4] ss:$8 sps:$4 sm:$0xff]  }
 0x4fb   :  { %3666 = vmatprep.mubr.bf16.mxu0 %v17341_v23 }
 0x4fc   :  { %5026 = vmatmul.mubr.bf16.gmra.mrb[16].mxu1 %v20979_v42 }
 0x4fd   :  { %v3398_v43 = vpop.f32.mrb[0].mxu0  ;;  %5035 = vmatprep.mubr.bf16.mxu1 %v4755_v35  ;;  %5324 = vmatpush1.bf16.msra.mxu1 %v17333_v24  ;;  %v17347_v35 = vld [vmem:[#allocation8 + $0x4b4] ss:$8 sps:$4 sm:$0xff]  }
 0x4fe   :  { %v19766_v25 = vadd.f32 %v3398_v43, %v19224_v3  ;;  %v3400_v22 = vpop.f32.mrb[1].mxu0  ;;  %5325 = vmatprep.subr.bf16.mxu1 %v17338_v41  ;;  %v17348_v43 = vld [vmem:[#allocation5 + $0x828] ss:$16 sps:$4 sm:$0xff]  }
 0x4ff   :  { %v19769_v23 = vadd.f32 %v3400_v22, %v19226_v5  ;;  %v3402_v37 = vpop.f32.mrb[2].mxu0 }
 0x500   :  { %v19772_v54 = vadd.f32 %v3402_v37, %v19228_v6  ;;  %v3404_v42 = vpop.f32.mrb[3].mxu0  ;;  %v20980_v6 = vpack.c.bf16 %v19625_v31, %v19618_v60  ;;  %v17359_v60 = vld [vmem:[#allocation5 + $0x84c] ss:$16 sps:$4 sm:$0xff]  }
 0x501   :  { %v19775_v47 = vadd.f32 %v3404_v42, %v19230_v7  ;;  %5326 = vmatpush1.bf16.msra.mxu1 %v17336_v21  ;;  %v17345_v7 = vld [vmem:[#allocation8 + $0x4b0] ss:$8 sps:$4 sm:$0xff]   ;;  %v17353_v21 = vld [vmem:[#allocation8 + $0x4c4] ss:$8 sps:$4 sm:$0xff]  }
 0x502   :  { %v5108_v3 = vpack.c.bf16 %v19772_v54, %v19766_v25  ;;  %3667 = vmatmul.mubr.bf16.gmra.mrb[148].mxu0 %v17339_v27  ;;  %5327 = vmatprep.subr.bf16.mxu1 %v17344_v59  ;;  %v17417_v54 = vld [vmem:[#allocation8 + $0x5c0] ss:$8 sps:$4 sm:$0xff]  }
 0x503   :  { %v5109_v5 = vpack.c.bf16 %v19775_v47, %v19769_v23  ;;  %3676 = vmatprep.mubr.bf16.mxu0 %v17350_v52  ;;  %v17416_v23 = vld [vmem:[#allocation8 + $0x5b4] ss:$8 sps:$4 sm:$0xff]  }
 0x504   :  { %5036 = vmatmul.mubr.bf16.gmra.mrb[20].mxu1 %v20980_v6  ;;  %v17362_v6 = vld [vmem:[#allocation8 + $0x4e4] ss:$8 sps:$4 sm:$0xff]  }
 0x505   :  { %v3408_v37 = vpop.f32.mrb[4].mxu0  ;;  %5045 = vmatprep.mubr.bf16.mxu1 %v4757_v48  ;;  %5328 = vmatpush1.bf16.msra.mxu1 %v17342_v26  ;;  %v17356_v48 = vld [vmem:[#allocation8 + $0x4d4] ss:$8 sps:$4 sm:$0xff]  }
 0x506   :  { %v19788_v24 = vadd.f32 %v3408_v37, %v19232_v9  ;;  %v3410_v41 = vpop.f32.mrb[5].mxu0  ;;  %5329 = vmatprep.subr.bf16.mxu1 %v17347_v35  ;;  %v17357_v35 = vld [vmem:[#allocation5 + $0x848] ss:$16 sps:$4 sm:$0xff]  }
 0x507   :  { %v19791_v22 = vadd.f32 %v3410_v41, %v19234_v11  ;;  %v3412_v27 = vpop.f32.mrb[6].mxu0 }
 0x508   :  { %v19794_v31 = vadd.f32 %v3412_v27, %v19236_v12  ;;  %v3414_v59 = vpop.f32.mrb[7].mxu0  ;;  %v20981_v12 = vpack.c.bf16 %v19643_v49, %v19636_v8  ;;  %v17368_v8 = vld [vmem:[#allocation5 + $0x86c] ss:$16 sps:$4 sm:$0xff]  }
 0x509   :  { %v19797_v63 = vadd.f32 %v3414_v59, %v19238_v13  ;;  %5330 = vmatpush1.bf16.msra.mxu1 %v17345_v7  ;;  %v17354_v13 = vld [vmem:[#allocation8 + $0x4d0] ss:$8 sps:$4 sm:$0xff]   ;;  %v17371_v59 = vld [vmem:[#allocation8 + $0x504] ss:$8 sps:$4 sm:$0xff]  }
 0x50a   :  { %v5110_v9 = vpack.c.bf16 %v19794_v31, %v19788_v24  ;;  %3677 = vmatmul.mubr.bf16.gmra.mrb[152].mxu0 %v17348_v43  ;;  %5331 = vmatprep.subr.bf16.mxu1 %v17353_v21  ;;  %v17423_v31 = vld [vmem:[#allocation8 + $0x5e0] ss:$8 sps:$4 sm:$0xff]  }
 0x50b   :  { %v5111_v11 = vpack.c.bf16 %v19797_v63, %v19791_v22  ;;  %3686 = vmatprep.mubr.bf16.mxu0 %v17359_v60  ;;  %v17366_v60 = vld [vmem:[#allocation5 + $0x868] ss:$16 sps:$4 sm:$0xff]  }
 0x50c   :  { %5046 = vmatmul.mubr.bf16.gmra.mrb[24].mxu1 %v20981_v12  ;;  %v17420_v63 = vld [vmem:[#allocation8 + $0x5d0] ss:$8 sps:$4 sm:$0xff]  }
 0x50d   :  { %v3418_v52 = vpop.f32.mrb[8].mxu0  ;;  %5055 = vmatprep.mubr.bf16.mxu1 %v4759_v62  ;;  %5332 = vmatpush1.bf16.msra.mxu1 %v17351_v28  ;;  %v17365_v62 = vld [vmem:[#allocation8 + $0x4f4] ss:$8 sps:$4 sm:$0xff]   ;;  %v20983_v28 = vld [vmem:[#allocation18_spill] sm:$0xff] }
 0x50e   :  { %v19810_v42 = vadd.f32 %v3418_v52, %v19240_v15  ;;  %v3420_v26 = vpop.f32.mrb[9].mxu0  ;;  %5333 = vmatprep.subr.bf16.mxu1 %v17356_v48 }
 0x50f   :  { %v19813_v37 = vadd.f32 %v3420_v26, %v19242_v17  ;;  %v3422_v7 = vpop.f32.mrb[10].mxu0  ;;  %v20985_v26 = vld [vmem:[#allocation20_spill] sm:$0xff] }
 0x510   :  { %v19816_v49 = vadd.f32 %v3422_v7, %v19244_v18  ;;  %v3424_v41 = vpop.f32.mrb[11].mxu0  ;;  %v20982_v18 = vpack.c.bf16 %v19661_v56, %v19654_v61  ;;  %v17377_v61 = vld [vmem:[#allocation5 + $0x88c] ss:$16 sps:$4 sm:$0xff]   ;;  %v20984_v56 = vld [vmem:[#allocation19_spill] sm:$0xff] }
 0x511   :  { %v19819_v16 = vadd.f32 %v3424_v41, %v19246_v19  ;;  %5334 = vmatpush1.bf16.msra.mxu1 %v17354_v13  ;;  %v17363_v19 = vld [vmem:[#allocation8 + $0x4f0] ss:$8 sps:$4 sm:$0xff]  }
 0x512   :  { %v5112_v15 = vpack.c.bf16 %v19816_v49, %v19810_v42  ;;  %3687 = vmatmul.mubr.bf16.gmra.mrb[156].mxu0 %v17357_v35  ;;  %5335 = vmatprep.subr.bf16.mxu1 %v17362_v6  ;;  %v20986_v6 = vpack.c.bf16 %v19679_v50, %v19672_v58  ;;  %v17372_v41 = vld [vmem:[#allocation8 + $0x510] ss:$8 sps:$4 sm:$0xff]   ;;  %v17386_v58 = vld [vmem:[#allocation5 + $0x8ac] ss:$16 sps:$4 sm:$0xff]   ;;  %v17429_v49 = vld [vmem:[#allocation8 + $0x600] ss:$8 sps:$4 sm:$0xff]  }
 0x513   :  { %v5113_v17 = vpack.c.bf16 %v19819_v16, %v19813_v37  ;;  %3696 = vmatprep.mubr.bf16.mxu0 %v17368_v8  ;;  %v20987_v8 = vpack.c.bf16 %v19701_v1, %v19695_v40  ;;  %v20990_v50 = vld [vmem:[#allocation23_spill] sm:$0xff]  ;;  %v20991_v40 = vld [vmem:[#allocation24_spill] sm:$0xff] }
 0x514   :  { %5056 = vmatmul.mubr.bf16.gmra.mrb[28].mxu1 %v20982_v18  ;;  %v17426_v16 = vld [vmem:[#allocation8 + $0x5f0] ss:$8 sps:$4 sm:$0xff]  }
 0x515   :  { %v3428_v43 = vpop.f32.mrb[12].mxu0  ;;  %5336 = vmatpush1.bf16.msra.mxu1 %v17360_v32  ;;  %5339 = vmatprep.mubr.bf16.mxu1 %v5099_v2  ;;  %v17374_v2 = vld [vmem:[#allocation8 + $0x514] ss:$8 sps:$4 sm:$0xff]   ;;  %v20988_v32 = vld [vmem:[#allocation21_spill] sm:$0xff] }
 0x516   :  { %v19832_v21 = vadd.f32 %v3428_v43, %v19248_v20  ;;  %v3430_v27 = vpop.f32.mrb[13].mxu0  ;;  %5337 = vmatprep.subr.bf16.mxu1 %v17365_v62  ;;  %v17375_v43 = vld [vmem:[#allocation5 + $0x888] ss:$16 sps:$4 sm:$0xff]  }
 0x517   :  { %v19835_v48 = vadd.f32 %v3430_v27, %v20983_v28  ;;  %v3432_v12 = vpop.f32.mrb[14].mxu0  ;;  %v20989_v27 = vld [vmem:[#allocation22_spill] sm:$0xff] }
 0x518   :  { %v19838_v52 = vadd.f32 %v3432_v12, %v20984_v56  ;;  %v3434_v13 = vpop.f32.mrb[15].mxu0 }
 0x519   :  { %v19841_v36 = vadd.f32 %v3434_v13, %v20985_v26  ;;  %5338 = vmatpush1.bf16.msra.mxu1 %v17363_v19  ;;  %v17380_v19 = vld [vmem:[#allocation8 + $0x524] ss:$8 sps:$4 sm:$0xff]   ;;  %v17383_v13 = vld [vmem:[#allocation8 + $0x534] ss:$8 sps:$4 sm:$0xff]  }
 0x51a   :  { %v5452_v20 = vpack.c.bf16 %v19838_v52, %v19832_v21  ;;  %3697 = vmatmul.mubr.bf16.gmra.mrb[160].mxu0 %v17366_v60  ;;  %5661 = vmatprep.subr.bf16.mxu1 %v17371_v59  ;;  %v17435_v52 = vld [vmem:[#allocation8 + $0x620] ss:$8 sps:$4 sm:$0xff]  }
 0x51b   :  { %v5453_v35 = vpack.c.bf16 %v19841_v36, %v19835_v48  ;;  %3706 = vmatprep.mubr.bf16.mxu0 %v17377_v61  ;;  %v17378_v61 = vld [vmem:[#allocation8 + $0x520] ss:$8 sps:$4 sm:$0xff]   ;;  %v17432_v36 = vld [vmem:[#allocation8 + $0x610] ss:$8 sps:$4 sm:$0xff]  }
 0x51c   :  { %5340 = vmatmul.mubr.bf16.vlgmr.msra.gmra.mrb[0].mxu1 %v20986_v6  ;;  %v17381_v6 = vld [vmem:[#allocation8 + $0x530] ss:$8 sps:$4 sm:$0xff]  }
 0x51d   :  { %v3438_v7 = vpop.f32.mrb[16].mxu0  ;;  %5349 = vmatprep.mubr.bf16.mxu1 %v20987_v8  ;;  %5662 = vmatpush1.bf16.msra.mxu1 %v17369_v57  ;;  %v20992_v57 = vpack.c.bf16 %v19697_v34, %v19690_v39  ;;  %v17395_v39 = vld [vmem:[#allocation5 + $0x8cc] ss:$16 sps:$4 sm:$0xff]   ;;  %v20995_v34 = vld [vmem:[#allocation27_spill] sm:$0xff] }
 0x51e   :  { %v19854_v62 = vadd.f32 %v3438_v7, %v20988_v32  ;;  %v3440_v18 = vpop.f32.mrb[17].mxu0  ;;  %5663 = vmatprep.subr.bf16.mxu1 %v17374_v2  ;;  %v20993_v7 = vld [vmem:[#allocation25_spill] sm:$0xff] }
 0x51f   :  { %v19857_v60 = vadd.f32 %v3440_v18, %v20989_v27  ;;  %v3442_v59 = vpop.f32.mrb[18].mxu0  ;;  %v17384_v32 = vld [vmem:[#allocation5 + $0x8a8] ss:$16 sps:$4 sm:$0xff]   ;;  %v17389_v18 = vld [vmem:[#allocation8 + $0x544] ss:$8 sps:$4 sm:$0xff]  }
 0x520   :  { %v19860_v28 = vadd.f32 %v3442_v59, %v20990_v50  ;;  %v3444_v12 = vpop.f32.mrb[19].mxu0 }
 0x521   :  { %v19863_v1 = vadd.f32 %v3444_v12, %v20991_v40  ;;  %5664 = vmatpush1.bf16.msra.mxu1 %v17372_v41  ;;  %v17392_v12 = vld [vmem:[#allocation8 + $0x554] ss:$8 sps:$4 sm:$0xff]  }
 0x522   :  { %v5454_v56 = vpack.c.bf16 %v19860_v28, %v19854_v62  ;;  %3707 = vmatmul.mubr.bf16.gmra.mrb[164].mxu0 %v17375_v43  ;;  %5665 = vmatprep.subr.bf16.mxu1 %v17380_v19  ;;  %v20994_v43 = vld [vmem:[#allocation26_spill] sm:$0xff]  ;;  %v17441_v28 = vld [vmem:[#allocation8 + $0x640] ss:$8 sps:$4 sm:$0xff]  }
 0x523   :  { %v5455_v26 = vpack.c.bf16 %v19863_v1, %v19857_v60  ;;  %3716 = vmatprep.mubr.bf16.mxu0 %v17386_v58  ;;  %v17438_v1 = vld [vmem:[#allocation8 + $0x630] ss:$8 sps:$4 sm:$0xff]  }
 0x524   :  { %5350 = vmatmul.mubr.bf16.gmra.mrb[4].mxu1 %v20992_v57  ;;  %v17390_v57 = vld [vmem:[#allocation8 + $0x550] ss:$8 sps:$4 sm:$0xff]  }
 0x525   :  { %v3448_v2 = vpop.f32.mrb[20].mxu0  ;;  %5359 = vmatprep.mubr.bf16.mxu1 %v5103_v29  ;;  %5666 = vmatpush1.bf16.msra.mxu1 %v17378_v61  ;;  %v17387_v29 = vld [vmem:[#allocation8 + $0x540] ss:$8 sps:$4 sm:$0xff]   ;;  %v20997_v61 = vpack.c.bf16 %v19715_v53, %v19708_v46  ;;  %v17404_v46 = vld [vmem:[#allocation5 + $0x8ec] ss:$16 sps:$4 sm:$0xff]   ;;  %v21000_v53 = vld [vmem:[#allocation31_spill] sm:$0xff] }
 0x526   :  { %v19876_v8 = vadd.f32 %v3448_v2, %v20993_v7  ;;  %v3450_v41 = vpop.f32.mrb[21].mxu0  ;;  %5667 = vmatprep.subr.bf16.mxu1 %v17383_v13  ;;  %v20998_v2 = vld [vmem:[#allocation29_spill] sm:$0xff] }
 0x527   :  { %v19879_v19 = vadd.f32 %v3450_v41, %v20994_v43  ;;  %v3452_v27 = vpop.f32.mrb[22].mxu0  ;;  %v17393_v41 = vld [vmem:[#allocation5 + $0x8c8] ss:$16 sps:$4 sm:$0xff]  }
 0x528   :  { %v19882_v59 = vadd.f32 %v3452_v27, %v20995_v34  ;;  %v3454_v58 = vpop.f32.mrb[23].mxu0 }
 0x529   :  { %v19885_v30 = vadd.f32 %v3454_v58, %v20996_v10  ;;  %5668 = vmatpush1.bf16.msra.mxu1 %v17381_v6  ;;  %v17401_v10 = vld [vmem:[#allocation8 + $0x574] ss:$8 sps:$4 sm:$0xff]  }
 0x52a   :  { %v5456_v50 = vpack.c.bf16 %v19882_v59, %v19876_v8  ;;  %3717 = vmatmul.mubr.bf16.gmra.mrb[168].mxu0 %v17384_v32  ;;  %5669 = vmatprep.subr.bf16.mxu1 %v17389_v18  ;;  %v17398_v32 = vld [vmem:[#allocation8 + $0x564] ss:$8 sps:$4 sm:$0xff]   ;;  %v17447_v59 = vld [vmem:[#allocation8 + $0x660] ss:$8 sps:$4 sm:$0xff]  }
 0x52b   :  { %v5457_v40 = vpack.c.bf16 %v19885_v30, %v19879_v19  ;;  %3726 = vmatprep.mubr.bf16.mxu0 %v17395_v39  ;;  %v20999_v18 = vld [vmem:[#allocation30_spill] sm:$0xff] }
 0x52c   :  { %5360 = vmatmul.mubr.bf16.gmra.mrb[8].mxu1 %v20997_v61  ;;  %v17444_v30 = vld [vmem:[#allocation8 + $0x650] ss:$8 sps:$4 sm:$0xff]  }
 0x52d   :  { %v3458_v13 = vpop.f32.mrb[24].mxu0  ;;  %5369 = vmatprep.mubr.bf16.mxu1 %v5105_v45  ;;  %5670 = vmatpush1.bf16.msra.mxu1 %v17387_v29  ;;  %v17396_v45 = vld [vmem:[#allocation8 + $0x560] ss:$8 sps:$4 sm:$0xff]  }
 0x52e   :  { %v19898_v6 = vadd.f32 %v3458_v13, %v20998_v2  ;;  %v3460_v7 = vpop.f32.mrb[25].mxu0  ;;  %5671 = vmatprep.subr.bf16.mxu1 %v17392_v12  ;;  %v21002_v12 = vpack.c.bf16 %v19733_v4, %v19726_v14  ;;  %v21003_v13 = vpack.c.bf16 %v19755_v55, %v19749_v38  ;;  %v21004_v2 = vld [vmem:[#allocation33_spill] sm:$0xff]  ;;  %v21006_v14 = vld [vmem:[#allocation35_spill] sm:$0xff] }
 0x52f   :  { %v19901_v43 = vadd.f32 %v3460_v7, %v20999_v18  ;;  %v3462_v27 = vpop.f32.mrb[26].mxu0  ;;  %v17407_v18 = vld [vmem:[#allocation8 + $0x584] ss:$8 sps:$4 sm:$0xff]   ;;  %v17405_v55 = vld [vmem:[#allocation8 + $0x580] ss:$8 sps:$4 sm:$0xff]  }
 0x530   :  { %v19904_v39 = vadd.f32 %v3462_v27, %v21000_v53  ;;  %v3464_v34 = vpop.f32.mrb[27].mxu0  ;;  %v21005_v27 = vld [vmem:[#allocation34_spill] sm:$0xff] }
 0x531   :  { %v19907_v0 = vadd.f32 %v3464_v34, %v21001_v44  ;;  %5672 = vmatpush1.bf16.msra.mxu1 %v17390_v57  ;;  %v17399_v57 = vld [vmem:[#allocation8 + $0x570] ss:$8 sps:$4 sm:$0xff]   ;;  %v21007_v44 = vld [vmem:[#allocation36_spill] sm:$0xff] }
 0x532   :  { %v5458_v58 = vpack.c.bf16 %v19904_v39, %v19898_v6  ;;  %3727 = vmatmul.mubr.bf16.gmra.mrb[172].mxu0 %v17393_v41  ;;  %5673 = vmatprep.subr.bf16.mxu1 %v17398_v32  ;;  %v17402_v32 = vld [vmem:[#allocation5 + $0x8e8] ss:$16 sps:$4 sm:$0xff]  }
 0x533   :  { %v5459_v29 = vpack.c.bf16 %v19907_v0, %v19901_v43  ;;  %3736 = vmatprep.mubr.bf16.mxu0 %v17404_v46  ;;  %v17450_v0 = vld [vmem:[#allocation8 + $0x670] ss:$8 sps:$4 sm:$0xff]   ;;  %v17453_v39 = vld [vmem:[#allocation8 + $0x680] ss:$8 sps:$4 sm:$0xff]  }
 0x534   :  { %5370 = vmatmul.mubr.bf16.gmra.mrb[12].mxu1 %v21002_v12 }
 0x535   :  { %v3468_v61 = vpop.f32.mrb[28].mxu0  ;;  %5379 = vmatprep.mubr.bf16.mxu1 %v21003_v13  ;;  %5674 = vmatpush1.bf16.msra.mxu1 %v17396_v45 }
 0x536   :  { %v19920_v7 = vadd.f32 %v3468_v61, %v21004_v2  ;;  %v3470_v41 = vpop.f32.mrb[29].mxu0  ;;  %5675 = vmatprep.subr.bf16.mxu1 %v17401_v10  ;;  %v17410_v10 = vld [vmem:[#allocation8 + $0x594] ss:$8 sps:$4 sm:$0xff]   ;;  %v21008_v61 = vpack.c.bf16 %v19751_v51, %v19744_v33  ;;  %v17411_v51 = vld [vmem:[#allocation8 + $0x5a0] ss:$8 sps:$4 sm:$0xff]  }
 0x537   :  { %v19923_v46 = vadd.f32 %v3470_v41, %v21005_v27  ;;  %v3472_v53 = vpop.f32.mrb[30].mxu0  ;;  %v17413_v41 = vld [vmem:[#allocation8 + $0x5a4] ss:$8 sps:$4 sm:$0xff]  }
 0x538   :  { %v19926_v4 = vadd.f32 %v3472_v53, %v21006_v14  ;;  %v3474_v34 = vpop.f32.mrb[31].mxu0  ;;  %v17419_v14 = vld [vmem:[#allocation8 + $0x5c4] ss:$8 sps:$4 sm:$0xff]  }
 0x539   :  { %v19929_v38 = vadd.f32 %v3474_v34, %v21007_v44  ;;  %5676 = vmatpush1.bf16.msra.mxu1 %v17399_v57  ;;  %v17408_v57 = vld [vmem:[#allocation8 + $0x590] ss:$8 sps:$4 sm:$0xff]  }
 0x53a   :  { %v5460_v45 = vpack.c.bf16 %v19926_v4, %v19920_v7  ;;  %3737 = vmatmul.mubr.bf16.gmra.mrb[176].mxu0 %v17402_v32  ;;  %5677 = vmatprep.subr.bf16.mxu1 %v17407_v18  ;;  %v17459_v4 = vld [vmem:[#allocation8 + $0x6a0] ss:$8 sps:$4 sm:$0xff]  }
 0x53b   :  { %v5461_v12 = vpack.c.bf16 %v19929_v38, %v19923_v46  ;;  %v17456_v38 = vld [vmem:[#allocation8 + $0x690] ss:$8 sps:$4 sm:$0xff]  }
 0x53c   :  { %5380 = vmatmul.mubr.bf16.gmra.mrb[16].mxu1 %v21008_v61 }
 0x53d   :  { %v19938_v13 = vpop.f32.mrb[180].mxu0  ;;  %5389 = vmatprep.mubr.bf16.mxu1 %v5109_v5  ;;  %5678 = vmatpush1.bf16.msra.mxu1 %v17405_v55  ;;  %v17414_v5 = vld [vmem:[#allocation8 + $0x5b0] ss:$8 sps:$4 sm:$0xff]  }
 0x53e   :  { %v19943_v2 = vpop.f32.mrb[181].mxu0  ;;  %5679 = vmatprep.subr.bf16.mxu1 %v17410_v10  ;;  %v17425_v10 = vld [vmem:[#allocation8 + $0x5e4] ss:$8 sps:$4 sm:$0xff]  }
 0x53f   :  { %v19945_v32 = vpop.f32.mrb[182].mxu0 }
 0x540   :  { %v5462_v18 = vpack.c.bf16 %v19945_v32, %v19938_v13  ;;  %v19949_v27 = vpop.f32.mrb[183].mxu0  ;;  %v17465_v32 = vld [vmem:[#allocation8 + $0x6c0] ss:$8 sps:$4 sm:$0xff]  }
 0x541   :  { %v5463_v33 = vpack.c.bf16 %v19949_v27, %v19943_v2  ;;  %5680 = vmatpush1.bf16.msra.mxu1 %v17408_v57  ;;  %v17462_v27 = vld [vmem:[#allocation8 + $0x6b0] ss:$8 sps:$4 sm:$0xff]  }
 0x542   :  { %5681 = vmatprep.subr.bf16.mxu1 %v17413_v41 }
 0x544   :  { %5390 = vmatmul.mubr.bf16.gmra.mrb[20].mxu1 %v5108_v3  ;;  %v17422_v3 = vld [vmem:[#allocation8 + $0x5d4] ss:$8 sps:$4 sm:$0xff]  }
 0x545   :  { %v19956_v47 = vpop.f32.mrb[184].mxu0  ;;  %5399 = vmatprep.mubr.bf16.mxu1 %v5111_v11  ;;  %5682 = vmatpush1.bf16.msra.mxu1 %v17411_v51  ;;  %v17431_v51 = vld [vmem:[#allocation8 + $0x604] ss:$8 sps:$4 sm:$0xff]  }
 0x546   :  { %v19961_v53 = vpop.f32.mrb[185].mxu0  ;;  %5683 = vmatprep.subr.bf16.mxu1 %v17416_v23 }
 0x547   :  { %v19963_v34 = vpop.f32.mrb[186].mxu0 }
 0x548   :  { %v5464_v44 = vpack.c.bf16 %v19963_v34, %v19956_v47  ;;  %v19967_v55 = vpop.f32.mrb[187].mxu0  ;;  %v17471_v34 = vld [vmem:[#allocation8 + $0x6e0] ss:$8 sps:$4 sm:$0xff]  }
 0x549   :  { %v5465_v25 = vpack.c.bf16 %v19967_v55, %v19961_v53  ;;  %5684 = vmatpush1.bf16.msra.mxu1 %v17414_v5  ;;  %v17468_v55 = vld [vmem:[#allocation8 + $0x6d0] ss:$8 sps:$4 sm:$0xff]  }
 0x54a   :  { %5685 = vmatprep.subr.bf16.mxu1 %v17419_v14 }
 0x54c   :  { %5400 = vmatmul.mubr.bf16.gmra.mrb[24].mxu1 %v5110_v9  ;;  %v17428_v9 = vld [vmem:[#allocation8 + $0x5f4] ss:$8 sps:$4 sm:$0xff]  }
 0x54d   :  { %v19974_v22 = vpop.f32.mrb[188].mxu0  ;;  %5409 = vmatprep.mubr.bf16.mxu1 %v5113_v17  ;;  %5686 = vmatpush1.bf16.msra.mxu1 %v17417_v54  ;;  %v17437_v54 = vld [vmem:[#allocation8 + $0x624] ss:$8 sps:$4 sm:$0xff]  }
 0x54e   :  { %v19979_v11 = vpop.f32.mrb[189].mxu0  ;;  %5687 = vmatprep.subr.bf16.mxu1 %v17422_v3 }
 0x54f   :  { %v19981_v61 = vpop.f32.mrb[190].mxu0 }
 0x550   :  { %v5466_v57 = vpack.c.bf16 %v19981_v61, %v19974_v22  ;;  %v19985_v41 = vpop.f32.mrb[191].mxu0  ;;  %v17477_v61 = vld [vmem:[#allocation8 + $0x700] ss:$8 sps:$4 sm:$0xff]  }
 0x551   :  { %v5467_v24 = vpack.c.bf16 %v19985_v41, %v19979_v11  ;;  %5688 = vmatpush1.bf16.msra.mxu1 %v17420_v63  ;;  %v17474_v41 = vld [vmem:[#allocation8 + $0x6f0] ss:$8 sps:$4 sm:$0xff]  }
 0x552   :  { %5689 = vmatprep.subr.bf16.mxu1 %v17425_v10 }
 0x554   :  { %5410 = vmatmul.mubr.bf16.gmra.mrb[28].mxu1 %v5112_v15  ;;  %v17434_v15 = vld [vmem:[#allocation8 + $0x614] ss:$8 sps:$4 sm:$0xff]  }
 0x555   :  { %v19992_v37 = vpop.f32.mrb[192].mxu0  ;;  %5690 = vmatpush1.bf16.msra.mxu1 %v17423_v31  ;;  %5693 = vmatprep.mubr.bf16.mxu1 %v5453_v35  ;;  %v17443_v31 = vld [vmem:[#allocation8 + $0x644] ss:$8 sps:$4 sm:$0xff]  }
 0x556   :  { %v19997_v17 = vpop.f32.mrb[193].mxu0  ;;  %5691 = vmatprep.subr.bf16.mxu1 %v17428_v9 }
 0x557   :  { %v19999_v23 = vpop.f32.mrb[194].mxu0 }
 0x558   :  { %v5806_v5 = vpack.c.bf16 %v19999_v23, %v19992_v37  ;;  %v20003_v14 = vpop.f32.mrb[195].mxu0  ;;  %v17483_v23 = vld [vmem:[#allocation8 + $0x720] ss:$8 sps:$4 sm:$0xff]  }
 0x559   :  { %v5807_v42 = vpack.c.bf16 %v20003_v14, %v19997_v17  ;;  %5692 = vmatpush1.bf16.msra.mxu1 %v17426_v16  ;;  %v17480_v14 = vld [vmem:[#allocation8 + $0x710] ss:$8 sps:$4 sm:$0xff]  }
 0x55a   :  { %6015 = vmatprep.subr.bf16.mxu1 %v17431_v51 }
 0x55c   :  { %5694 = vmatmul.mubr.bf16.vlgmr.msra.gmra.mrb[0].mxu1 %v5452_v20  ;;  %v17440_v20 = vld [vmem:[#allocation8 + $0x634] ss:$8 sps:$4 sm:$0xff]  }
 0x55d   :  { %v20010_v48 = vpop.f32.mrb[196].mxu0  ;;  %5703 = vmatprep.mubr.bf16.mxu1 %v5455_v26  ;;  %6016 = vmatpush1.bf16.msra.mxu1 %v17429_v49  ;;  %v17449_v49 = vld [vmem:[#allocation8 + $0x664] ss:$8 sps:$4 sm:$0xff]  }
 0x55e   :  { %v20015_v35 = vpop.f32.mrb[197].mxu0  ;;  %6017 = vmatprep.subr.bf16.mxu1 %v17434_v15 }
 0x55f   :  { %v20017_v3 = vpop.f32.mrb[198].mxu0 }
 0x560   :  { %v5808_v63 = vpack.c.bf16 %v20017_v3, %v20010_v48  ;;  %v20021_v10 = vpop.f32.mrb[199].mxu0  ;;  %v17489_v3 = vld [vmem:[#allocation8 + $0x740] ss:$8 sps:$4 sm:$0xff]  }
 0x561   :  { %v5809_v21 = vpack.c.bf16 %v20021_v10, %v20015_v35  ;;  %6018 = vmatpush1.bf16.msra.mxu1 %v17432_v36  ;;  %v17486_v10 = vld [vmem:[#allocation8 + $0x730] ss:$8 sps:$4 sm:$0xff]  }
 0x562   :  { %6019 = vmatprep.subr.bf16.mxu1 %v17437_v54 }
 0x564   :  { %5704 = vmatmul.mubr.bf16.gmra.mrb[4].mxu1 %v5454_v56  ;;  %v17446_v56 = vld [vmem:[#allocation8 + $0x654] ss:$8 sps:$4 sm:$0xff]  }
 0x565   :  { %v20028_v60 = vpop.f32.mrb[200].mxu0  ;;  %5713 = vmatprep.mubr.bf16.mxu1 %v5457_v40  ;;  %6020 = vmatpush1.bf16.msra.mxu1 %v17435_v52  ;;  %v17455_v52 = vld [vmem:[#allocation8 + $0x684] ss:$8 sps:$4 sm:$0xff]  }
 0x566   :  { %v20033_v26 = vpop.f32.mrb[201].mxu0  ;;  %6021 = vmatprep.subr.bf16.mxu1 %v17440_v20 }
 0x567   :  { %v20035_v9 = vpop.f32.mrb[202].mxu0 }
 0x568   :  { %v5810_v16 = vpack.c.bf16 %v20035_v9, %v20028_v60  ;;  %v20039_v51 = vpop.f32.mrb[203].mxu0  ;;  %v17495_v9 = vld [vmem:[#allocation8 + $0x760] ss:$8 sps:$4 sm:$0xff]  }
 0x569   :  { %v5811_v62 = vpack.c.bf16 %v20039_v51, %v20033_v26  ;;  %6022 = vmatpush1.bf16.msra.mxu1 %v17438_v1  ;;  %v17492_v51 = vld [vmem:[#allocation8 + $0x750] ss:$8 sps:$4 sm:$0xff]  }
 0x56a   :  { %6023 = vmatprep.subr.bf16.mxu1 %v17443_v31 }
 0x56c   :  { %5714 = vmatmul.mubr.bf16.gmra.mrb[8].mxu1 %v5456_v50  ;;  %v17452_v50 = vld [vmem:[#allocation8 + $0x674] ss:$8 sps:$4 sm:$0xff]  }
 0x56d   :  { %v20046_v19 = vpop.f32.mrb[204].mxu0  ;;  %5723 = vmatprep.mubr.bf16.mxu1 %v5459_v29  ;;  %6024 = vmatpush1.bf16.msra.mxu1 %v17441_v28  ;;  %v17461_v28 = vld [vmem:[#allocation8 + $0x6a4] ss:$8 sps:$4 sm:$0xff]  }
 0x56e   :  { %v20051_v40 = vpop.f32.mrb[205].mxu0  ;;  %6025 = vmatprep.subr.bf16.mxu1 %v17446_v56 }
 0x56f   :  { %v20053_v15 = vpop.f32.mrb[206].mxu0 }
 0x570   :  { %v5812_v36 = vpack.c.bf16 %v20053_v15, %v20046_v19  ;;  %v20057_v54 = vpop.f32.mrb[207].mxu0  ;;  %v17501_v15 = vld [vmem:[#allocation8 + $0x780] ss:$8 sps:$4 sm:$0xff]  }
 0x571   :  { %v5813_v8 = vpack.c.bf16 %v20057_v54, %v20051_v40  ;;  %6026 = vmatpush1.bf16.msra.mxu1 %v17444_v30  ;;  %v17498_v54 = vld [vmem:[#allocation8 + $0x770] ss:$8 sps:$4 sm:$0xff]  }
 0x572   :  { %6027 = vmatprep.subr.bf16.mxu1 %v17449_v49 }
 0x574   :  { %5724 = vmatmul.mubr.bf16.gmra.mrb[12].mxu1 %v5458_v58  ;;  %v17458_v58 = vld [vmem:[#allocation8 + $0x694] ss:$8 sps:$4 sm:$0xff]  }
 0x575   :  { %v20064_v43 = vpop.f32.mrb[208].mxu0  ;;  %5733 = vmatprep.mubr.bf16.mxu1 %v5461_v12  ;;  %6028 = vmatpush1.bf16.msra.mxu1 %v17447_v59  ;;  %v17467_v59 = vld [vmem:[#allocation8 + $0x6c4] ss:$8 sps:$4 sm:$0xff]  }
 0x576   :  { %v20069_v29 = vpop.f32.mrb[209].mxu0  ;;  %6029 = vmatprep.subr.bf16.mxu1 %v17452_v50 }
 0x577   :  { %v20071_v20 = vpop.f32.mrb[210].mxu0 }
 0x578   :  { %v5814_v1 = vpack.c.bf16 %v20071_v20, %v20064_v43  ;;  %v20075_v31 = vpop.f32.mrb[211].mxu0  ;;  %v17507_v20 = vld [vmem:[#allocation8 + $0x7a0] ss:$8 sps:$4 sm:$0xff]  }
 0x579   :  { %v5815_v6 = vpack.c.bf16 %v20075_v31, %v20069_v29  ;;  %6030 = vmatpush1.bf16.msra.mxu1 %v17450_v0  ;;  %v17504_v31 = vld [vmem:[#allocation8 + $0x790] ss:$8 sps:$4 sm:$0xff]  }
 0x57a   :  { %6031 = vmatprep.subr.bf16.mxu1 %v17455_v52 }
 0x57c   :  { %5734 = vmatmul.mubr.bf16.gmra.mrb[16].mxu1 %v5460_v45  ;;  %v17464_v45 = vld [vmem:[#allocation8 + $0x6b4] ss:$8 sps:$4 sm:$0xff]  }
 0x57d   :  { %v20082_v46 = vpop.f32.mrb[212].mxu0  ;;  %5743 = vmatprep.mubr.bf16.mxu1 %v5463_v33  ;;  %6032 = vmatpush1.bf16.msra.mxu1 %v17453_v39  ;;  %v17473_v39 = vld [vmem:[#allocation8 + $0x6e4] ss:$8 sps:$4 sm:$0xff]  }
 0x57e   :  { %v20087_v12 = vpop.f32.mrb[213].mxu0  ;;  %6033 = vmatprep.subr.bf16.mxu1 %v17458_v58 }
 0x57f   :  { %v20089_v56 = vpop.f32.mrb[214].mxu0 }
 0x580   :  { %v5816_v30 = vpack.c.bf16 %v20089_v56, %v20082_v46  ;;  %v20093_v49 = vpop.f32.mrb[215].mxu0  ;;  %v17513_v56 = vld [vmem:[#allocation8 + $0x7c0] ss:$8 sps:$4 sm:$0xff]  }
 0x581   :  { %v5817_v7 = vpack.c.bf16 %v20093_v49, %v20087_v12  ;;  %6034 = vmatpush1.bf16.msra.mxu1 %v17456_v38  ;;  %v17510_v49 = vld [vmem:[#allocation8 + $0x7b0] ss:$8 sps:$4 sm:$0xff]  }
 0x582   :  { %6035 = vmatprep.subr.bf16.mxu1 %v17461_v28 }
 0x584   :  { %5744 = vmatmul.mubr.bf16.gmra.mrb[20].mxu1 %v5462_v18  ;;  %v17470_v18 = vld [vmem:[#allocation8 + $0x6d4] ss:$8 sps:$4 sm:$0xff]  }
 0x585   :  { %v20100_v2 = vpop.f32.mrb[216].mxu0  ;;  %5753 = vmatprep.mubr.bf16.mxu1 %v5465_v25  ;;  %6036 = vmatpush1.bf16.msra.mxu1 %v17459_v4  ;;  %v17479_v4 = vld [vmem:[#allocation8 + $0x704] ss:$8 sps:$4 sm:$0xff]  }
 0x586   :  { %v20105_v33 = vpop.f32.mrb[217].mxu0  ;;  %6037 = vmatprep.subr.bf16.mxu1 %v17464_v45 }
 0x587   :  { %v20107_v50 = vpop.f32.mrb[218].mxu0 }
 0x588   :  { %v5818_v0 = vpack.c.bf16 %v20107_v50, %v20100_v2  ;;  %v20111_v52 = vpop.f32.mrb[219].mxu0  ;;  %v17519_v50 = vld [vmem:[#allocation8 + $0x7e0] ss:$8 sps:$4 sm:$0xff]  }
 0x589   :  { %v5819_v13 = vpack.c.bf16 %v20111_v52, %v20105_v33  ;;  %6038 = vmatpush1.bf16.msra.mxu1 %v17462_v27  ;;  %v17516_v52 = vld [vmem:[#allocation8 + $0x7d0] ss:$8 sps:$4 sm:$0xff]  }
 0x58a   :  { %6039 = vmatprep.subr.bf16.mxu1 %v17467_v59 }
 0x58c   :  { %5754 = vmatmul.mubr.bf16.gmra.mrb[24].mxu1 %v5464_v44  ;;  %v17476_v44 = vld [vmem:[#allocation8 + $0x6f4] ss:$8 sps:$4 sm:$0xff]  }
 0x58d   :  { %v20118_v53 = vpop.f32.mrb[220].mxu0  ;;  %5763 = vmatprep.mubr.bf16.mxu1 %v5467_v24  ;;  %6040 = vmatpush1.bf16.msra.mxu1 %v17465_v32  ;;  %v17485_v32 = vld [vmem:[#allocation8 + $0x724] ss:$8 sps:$4 sm:$0xff]  }
 0x58e   :  { %v20123_v25 = vpop.f32.mrb[221].mxu0  ;;  %6041 = vmatprep.subr.bf16.mxu1 %v17470_v18 }
 0x58f   :  { %v20125_v58 = vpop.f32.mrb[222].mxu0 }
 0x590   :  { %v5820_v38 = vpack.c.bf16 %v20125_v58, %v20118_v53  ;;  %v20129_v28 = vpop.f32.mrb[223].mxu0  ;;  %v17525_v58 = vld [vmem:[#allocation8 + $0x800] ss:$8 sps:$4 sm:$0xff]  }
 0x591   :  { %v5821_v47 = vpack.c.bf16 %v20129_v28, %v20123_v25  ;;  %6042 = vmatpush1.bf16.msra.mxu1 %v17468_v55  ;;  %v17522_v28 = vld [vmem:[#allocation8 + $0x7f0] ss:$8 sps:$4 sm:$0xff]  }
 0x592   :  { %6043 = vmatprep.subr.bf16.mxu1 %v17473_v39 }
 0x594   :  { %5764 = vmatmul.mubr.bf16.gmra.mrb[28].mxu1 %v5466_v57  ;;  %v17482_v57 = vld [vmem:[#allocation8 + $0x714] ss:$8 sps:$4 sm:$0xff]  }
 0x595   :  { %v20136_v11 = vpop.f32.mrb[224].mxu0  ;;  %6044 = vmatpush1.bf16.msra.mxu1 %v17471_v34  ;;  %6047 = vmatprep.mubr.bf16.mxu1 %v5807_v42  ;;  %v17491_v34 = vld [vmem:[#allocation8 + $0x744] ss:$8 sps:$4 sm:$0xff]  }
 0x596   :  { %v20141_v24 = vpop.f32.mrb[225].mxu0  ;;  %6045 = vmatprep.subr.bf16.mxu1 %v17476_v44 }
 0x597   :  { %v20143_v45 = vpop.f32.mrb[226].mxu0 }
 0x598   :  { %v6160_v27 = vpack.c.bf16 %v20143_v45, %v20136_v11  ;;  %v20147_v59 = vpop.f32.mrb[227].mxu0  ;;  %v17531_v45 = vld [vmem:[#allocation8 + $0x820] ss:$8 sps:$4 sm:$0xff]  }
 0x599   :  { %v6161_v22 = vpack.c.bf16 %v20147_v59, %v20141_v24  ;;  %6046 = vmatpush1.bf16.msra.mxu1 %v17474_v41  ;;  %v17528_v59 = vld [vmem:[#allocation8 + $0x810] ss:$8 sps:$4 sm:$0xff]  }
 0x59a   :  { %6369 = vmatprep.subr.bf16.mxu1 %v17479_v4 }
 0x59c   :  { %6048 = vmatmul.mubr.bf16.vlgmr.msra.gmra.mrb[0].mxu1 %v5806_v5  ;;  %v17488_v5 = vld [vmem:[#allocation8 + $0x734] ss:$8 sps:$4 sm:$0xff]  }
 0x59d   :  { %v20154_v17 = vpop.f32.mrb[228].mxu0  ;;  %6057 = vmatprep.mubr.bf16.mxu1 %v5809_v21  ;;  %6370 = vmatpush1.bf16.msra.mxu1 %v17477_v61  ;;  %v17497_v61 = vld [vmem:[#allocation8 + $0x764] ss:$8 sps:$4 sm:$0xff]  }
 0x59e   :  { %v20159_v42 = vpop.f32.mrb[229].mxu0  ;;  %6371 = vmatprep.subr.bf16.mxu1 %v17482_v57 }
 0x59f   :  { %v20161_v18 = vpop.f32.mrb[230].mxu0 }
 0x5a0   :  { %v6162_v55 = vpack.c.bf16 %v20161_v18, %v20154_v17  ;;  %v20165_v39 = vpop.f32.mrb[231].mxu0  ;;  %v17537_v18 = vld [vmem:[#allocation8 + $0x840] ss:$8 sps:$4 sm:$0xff]  }
 0x5a1   :  { %v6163_v37 = vpack.c.bf16 %v20165_v39, %v20159_v42  ;;  %6372 = vmatpush1.bf16.msra.mxu1 %v17480_v14  ;;  %v17534_v39 = vld [vmem:[#allocation8 + $0x830] ss:$8 sps:$4 sm:$0xff]  }
 0x5a2   :  { %6373 = vmatprep.subr.bf16.mxu1 %v17485_v32 }
 0x5a4   :  { %6058 = vmatmul.mubr.bf16.gmra.mrb[4].mxu1 %v5808_v63  ;;  %v17494_v63 = vld [vmem:[#allocation8 + $0x754] ss:$8 sps:$4 sm:$0xff]  }
 0x5a5   :  { %v20172_v35 = vpop.f32.mrb[232].mxu0  ;;  %6067 = vmatprep.mubr.bf16.mxu1 %v5811_v62  ;;  %6374 = vmatpush1.bf16.msra.mxu1 %v17483_v23  ;;  %v17503_v23 = vld [vmem:[#allocation8 + $0x784] ss:$8 sps:$4 sm:$0xff]  }
 0x5a6   :  { %v20177_v21 = vpop.f32.mrb[233].mxu0  ;;  %6375 = vmatprep.subr.bf16.mxu1 %v17488_v5 }
 0x5a7   :  { %v20179_v44 = vpop.f32.mrb[234].mxu0 }
 0x5a8   :  { %v6164_v41 = vpack.c.bf16 %v20179_v44, %v20172_v35  ;;  %v20183_v4 = vpop.f32.mrb[235].mxu0  ;;  %v17543_v44 = vld [vmem:[#allocation8 + $0x860] ss:$8 sps:$4 sm:$0xff]  }
 0x5a9   :  { %v6165_v48 = vpack.c.bf16 %v20183_v4, %v20177_v21  ;;  %6376 = vmatpush1.bf16.msra.mxu1 %v17486_v10  ;;  %v17540_v4 = vld [vmem:[#allocation8 + $0x850] ss:$8 sps:$4 sm:$0xff]  }
 0x5aa   :  { %6377 = vmatprep.subr.bf16.mxu1 %v17491_v34 }
 0x5ac   :  { %6068 = vmatmul.mubr.bf16.gmra.mrb[8].mxu1 %v5810_v16  ;;  %v17500_v16 = vld [vmem:[#allocation8 + $0x774] ss:$8 sps:$4 sm:$0xff]  }
 0x5ad   :  { %v20190_v26 = vpop.f32.mrb[236].mxu0  ;;  %6077 = vmatprep.mubr.bf16.mxu1 %v5813_v8  ;;  %6378 = vmatpush1.bf16.msra.mxu1 %v17489_v3  ;;  %v17509_v3 = vld [vmem:[#allocation8 + $0x7a4] ss:$8 sps:$4 sm:$0xff]  }
 0x5ae   :  { %v20195_v62 = vpop.f32.mrb[237].mxu0  ;;  %6379 = vmatprep.subr.bf16.mxu1 %v17494_v63 }
 0x5af   :  { %v20197_v57 = vpop.f32.mrb[238].mxu0 }
 0x5b0   :  { %v6166_v14 = vpack.c.bf16 %v20197_v57, %v20190_v26  ;;  %v20201_v32 = vpop.f32.mrb[239].mxu0  ;;  %v17549_v57 = vld [vmem:[#allocation8 + $0x880] ss:$8 sps:$4 sm:$0xff]  }
 0x5b1   :  { %v6167_v60 = vpack.c.bf16 %v20201_v32, %v20195_v62  ;;  %6380 = vmatpush1.bf16.msra.mxu1 %v17492_v51  ;;  %v17546_v32 = vld [vmem:[#allocation8 + $0x870] ss:$8 sps:$4 sm:$0xff]  }
 0x5b2   :  { %6381 = vmatprep.subr.bf16.mxu1 %v17497_v61 }
 0x5b4   :  { %6078 = vmatmul.mubr.bf16.gmra.mrb[12].mxu1 %v5812_v36  ;;  %v17506_v36 = vld [vmem:[#allocation8 + $0x794] ss:$8 sps:$4 sm:$0xff]  }
 0x5b5   :  { %v20208_v40 = vpop.f32.mrb[240].mxu0  ;;  %6087 = vmatprep.mubr.bf16.mxu1 %v5815_v6  ;;  %6382 = vmatpush1.bf16.msra.mxu1 %v17495_v9  ;;  %v17515_v9 = vld [vmem:[#allocation8 + $0x7c4] ss:$8 sps:$4 sm:$0xff]  }
 0x5b6   :  { %v20213_v8 = vpop.f32.mrb[241].mxu0  ;;  %6383 = vmatprep.subr.bf16.mxu1 %v17500_v16 }
 0x5b7   :  { %v20215_v5 = vpop.f32.mrb[242].mxu0 }
 0x5b8   :  { %v6168_v10 = vpack.c.bf16 %v20215_v5, %v20208_v40  ;;  %v20219_v34 = vpop.f32.mrb[243].mxu0  ;;  %v17560_v40 = vld [vmem:[#allocation8 + $0x8b4] ss:$8 sps:$4 sm:$0xff]  }
 0x5b9   :  { %v6169_v19 = vpack.c.bf16 %v20219_v34, %v20213_v8  ;;  %6384 = vmatpush1.bf16.msra.mxu1 %v17498_v54  ;;  %v17552_v34 = vld [vmem:[#allocation8 + $0x890] ss:$8 sps:$4 sm:$0xff]  }
 0x5ba   :  { %6385 = vmatprep.subr.bf16.mxu1 %v17503_v23 }
 0x5bc   :  { %6088 = vmatmul.mubr.bf16.gmra.mrb[16].mxu1 %v5814_v1  ;;  %v17512_v1 = vld [vmem:[#allocation8 + $0x7b4] ss:$8 sps:$4 sm:$0xff]  }
 0x5bd   :  { %v20226_v29 = vpop.f32.mrb[244].mxu0  ;;  %6097 = vmatprep.mubr.bf16.mxu1 %v5817_v7  ;;  %6386 = vmatpush1.bf16.msra.mxu1 %v17501_v15  ;;  %v17521_v15 = vld [vmem:[#allocation8 + $0x7e4] ss:$8 sps:$4 sm:$0xff]  }
 0x5be   :  { %v20231_v6 = vpop.f32.mrb[245].mxu0  ;;  %6387 = vmatprep.subr.bf16.mxu1 %v17506_v36 }
 0x5bf   :  { %v20233_v63 = vpop.f32.mrb[246].mxu0 }
 0x5c0   :  { %v6170_v51 = vpack.c.bf16 %v20233_v63, %v20226_v29  ;;  %v20237_v61 = vpop.f32.mrb[247].mxu0  ;;  %v17564_v63 = vld [vmem:[#allocation8 + $0x8d0] ss:$8 sps:$4 sm:$0xff]  }
 0x5c1   :  { %v6171_v43 = vpack.c.bf16 %v20237_v61, %v20231_v6  ;;  %6388 = vmatpush1.bf16.msra.mxu1 %v17504_v31  ;;  %v17563_v61 = vld [vmem:[#allocation8 + $0x8c4] ss:$8 sps:$4 sm:$0xff]  }
 0x5c2   :  { %6389 = vmatprep.subr.bf16.mxu1 %v17509_v3 }
 0x5c4   :  { %6098 = vmatmul.mubr.bf16.gmra.mrb[20].mxu1 %v5816_v30  ;;  %v17518_v30 = vld [vmem:[#allocation8 + $0x7d4] ss:$8 sps:$4 sm:$0xff]  }
 0x5c5   :  { %v20244_v12 = vpop.f32.mrb[248].mxu0  ;;  %6107 = vmatprep.mubr.bf16.mxu1 %v5819_v13  ;;  %6390 = vmatpush1.bf16.msra.mxu1 %v17507_v20  ;;  %v17527_v20 = vld [vmem:[#allocation8 + $0x804] ss:$8 sps:$4 sm:$0xff]  }
 0x5c6   :  { %v20249_v7 = vpop.f32.mrb[249].mxu0  ;;  %6391 = vmatprep.subr.bf16.mxu1 %v17512_v1 }
 0x5c7   :  { %v20251_v16 = vpop.f32.mrb[250].mxu0 }
 0x5c8   :  { %v6172_v54 = vpack.c.bf16 %v20251_v16, %v20244_v12  ;;  %v20255_v23 = vpop.f32.mrb[251].mxu0  ;;  %v17570_v12 = vld [vmem:[#allocation8 + $0x8f0] ss:$8 sps:$4 sm:$0xff]   ;;  %v20924_v16 = vmov 0  }
 0x5c9   :  { %v6173_v46 = vpack.c.bf16 %v20255_v23, %v20249_v7  ;;  %6392 = vmatpush1.bf16.msra.mxu1 %v17510_v49  ;;  %v17569_v7 = vld [vmem:[#allocation8 + $0x8e4] ss:$8 sps:$4 sm:$0xff]  }
 0x5ca   :  { %6393 = vmatprep.subr.bf16.mxu1 %v17515_v9 }
 0x5cc   :  { %6108 = vmatmul.mubr.bf16.gmra.mrb[24].mxu1 %v5818_v0  ;;  %v17524_v0 = vld [vmem:[#allocation8 + $0x7f4] ss:$8 sps:$4 sm:$0xff]  }
 0x5cd   :  { %v20262_v33 = vpop.f32.mrb[252].mxu0  ;;  %6117 = vmatprep.mubr.bf16.mxu1 %v5821_v47  ;;  %6394 = vmatpush1.bf16.msra.mxu1 %v17513_v56  ;;  %v17533_v56 = vld [vmem:[#allocation8 + $0x824] ss:$8 sps:$4 sm:$0xff]  }
 0x5ce   :  { %v20267_v13 = vpop.f32.mrb[253].mxu0  ;;  %6395 = vmatprep.subr.bf16.mxu1 %v17518_v30 }
 0x5cf   :  { %v20269_v36 = vpop.f32.mrb[254].mxu0 }
 0x5d0   :  { %v6174_v31 = vpack.c.bf16 %v20269_v36, %v20262_v33  ;;  %v20273_v3 = vpop.f32.mrb[255].mxu0  ;;  %v6868_v36 = vld [vmem:[#allocation10] sm:$0x3] }
 0x5d1   :  { %v6175_v2 = vpack.c.bf16 %v20273_v3, %v20267_v13  ;;  %6396 = vmatpush1.bf16.msra.mxu1 %v17516_v52 }
 0x5d2   :  { %6397 = vmatprep.subr.bf16.mxu1 %v17521_v15 }
 0x5d4   :  { %6118 = vmatmul.mubr.bf16.gmra.mrb[28].mxu1 %v5820_v38  ;;  %v17530_v38 = vld [vmem:[#allocation8 + $0x814] ss:$8 sps:$4 sm:$0xff]  }
 0x5d5   :  { %v20280_v25 = vpop.f32.mrb[148].mxu0  ;;  %6398 = vmatpush1.bf16.msra.mxu1 %v17519_v50  ;;  %6401 = vmatprep.mubr.bf16.mxu1 %v6161_v22  ;;  %v17539_v50 = vld [vmem:[#allocation8 + $0x844] ss:$8 sps:$4 sm:$0xff]  }
 0x5d6   :  { %v20285_v47 = vpop.f32.mrb[149].mxu0  ;;  %6399 = vmatprep.subr.bf16.mxu1 %v17524_v0 }
 0x5d7   :  { %v20287_v1 = vpop.f32.mrb[150].mxu0 }
 0x5d8   :  { %v6514_v49 = vpack.c.bf16 %v20287_v1, %v20280_v25  ;;  %v20291_v9 = vpop.f32.mrb[151].mxu0 }
 0x5d9   :  { %v6515_v53 = vpack.c.bf16 %v20291_v9, %v20285_v47  ;;  %6400 = vmatpush1.bf16.msra.mxu1 %v17522_v28 }
 0x5da   :  { %6723 = vmatprep.subr.bf16.mxu1 %v17527_v20 }
 0x5dc   :  { %6402 = vmatmul.mubr.bf16.vlgmr.msra.gmra.mrb[0].mxu1 %v6160_v27  ;;  %v17536_v27 = vld [vmem:[#allocation8 + $0x834] ss:$8 sps:$4 sm:$0xff]  }
 0x5dd   :  { %v20298_v24 = vpop.f32.mrb[152].mxu0  ;;  %6411 = vmatprep.mubr.bf16.mxu1 %v6163_v37  ;;  %6724 = vmatpush1.bf16.msra.mxu1 %v17525_v58  ;;  %v17545_v58 = vld [vmem:[#allocation8 + $0x864] ss:$8 sps:$4 sm:$0xff]  }
 0x5de   :  { %v20303_v22 = vpop.f32.mrb[153].mxu0  ;;  %6725 = vmatprep.subr.bf16.mxu1 %v17530_v38 }
 0x5df   :  { %v20305_v30 = vpop.f32.mrb[154].mxu0 }
 0x5e0   :  { %v6516_v52 = vpack.c.bf16 %v20305_v30, %v20298_v24  ;;  %v20309_v15 = vpop.f32.mrb[155].mxu0 }
 0x5e1   :  { %v6517_v11 = vpack.c.bf16 %v20309_v15, %v20303_v22  ;;  %6726 = vmatpush1.bf16.msra.mxu1 %v17528_v59 }
 0x5e2   :  { %6727 = vmatprep.subr.bf16.mxu1 %v17533_v56 }
 0x5e4   :  { %6412 = vmatmul.mubr.bf16.gmra.mrb[4].mxu1 %v6162_v55  ;;  %v17542_v55 = vld [vmem:[#allocation8 + $0x854] ss:$8 sps:$4 sm:$0xff]  }
 0x5e5   :  { %v20316_v42 = vpop.f32.mrb[156].mxu0  ;;  %6421 = vmatprep.mubr.bf16.mxu1 %v6165_v48  ;;  %6728 = vmatpush1.bf16.msra.mxu1 %v17531_v45  ;;  %v17551_v45 = vld [vmem:[#allocation8 + $0x884] ss:$8 sps:$4 sm:$0xff]  }
 0x5e6   :  { %v20321_v37 = vpop.f32.mrb[157].mxu0  ;;  %6729 = vmatprep.subr.bf16.mxu1 %v17536_v27 }
 0x5e7   :  { %v20323_v0 = vpop.f32.mrb[158].mxu0 }
 0x5e8   :  { %v6518_v28 = vpack.c.bf16 %v20323_v0, %v20316_v42  ;;  %v20327_v20 = vpop.f32.mrb[159].mxu0 }
 0x5e9   :  { %v6519_v17 = vpack.c.bf16 %v20327_v20, %v20321_v37  ;;  %6730 = vmatpush1.bf16.msra.mxu1 %v17534_v39 }
 0x5ea   :  { %6731 = vmatprep.subr.bf16.mxu1 %v17539_v50 }
 0x5ec   :  { %6422 = vmatmul.mubr.bf16.gmra.mrb[8].mxu1 %v6164_v41  ;;  %v17548_v41 = vld [vmem:[#allocation8 + $0x874] ss:$8 sps:$4 sm:$0xff]  }
 0x5ed   :  { %v20334_v21 = vpop.f32.mrb[160].mxu0  ;;  %6431 = vmatprep.mubr.bf16.mxu1 %v6167_v60  ;;  %6732 = vmatpush1.bf16.msra.mxu1 %v17537_v18  ;;  %v17557_v18 = vld [vmem:[#allocation8 + $0x8a4] ss:$8 sps:$4 sm:$0xff]  }
 0x5ee   :  { %v20339_v48 = vpop.f32.mrb[161].mxu0  ;;  %6733 = vmatprep.subr.bf16.mxu1 %v17542_v55 }
 0x5ef   :  { %v20341_v38 = vpop.f32.mrb[162].mxu0 }
 0x5f0   :  { %v6520_v59 = vpack.c.bf16 %v20341_v38, %v20334_v21  ;;  %v20345_v56 = vpop.f32.mrb[163].mxu0 }
 0x5f1   :  { %v6521_v35 = vpack.c.bf16 %v20345_v56, %v20339_v48  ;;  %6734 = vmatpush1.bf16.msra.mxu1 %v17540_v4 }
 0x5f2   :  { %6735 = vmatprep.subr.bf16.mxu1 %v17545_v58 }
 0x5f4   :  { %6432 = vmatmul.mubr.bf16.gmra.mrb[12].mxu1 %v6166_v14  ;;  %v17554_v14 = vld [vmem:[#allocation8 + $0x894] ss:$8 sps:$4 sm:$0xff]  }
 0x5f5   :  { %v20352_v62 = vpop.f32.mrb[164].mxu0  ;;  %6441 = vmatprep.mubr.bf16.mxu1 %v6169_v19  ;;  %6736 = vmatpush1.bf16.msra.mxu1 %v17543_v44 }
 0x5f6   :  { %v20357_v60 = vpop.f32.mrb[165].mxu0  ;;  %6737 = vmatprep.subr.bf16.mxu1 %v17548_v41  ;;  %v17555_v41 = vld [vmem:[#allocation8 + $0x8a0] ss:$8 sps:$4 sm:$0xff]  }
 0x5f7   :  { %v20359_v27 = vpop.f32.mrb[166].mxu0 }
 0x5f8   :  { %v6522_v39 = vpack.c.bf16 %v20359_v27, %v20352_v62  ;;  %v20363_v50 = vpop.f32.mrb[167].mxu0 }
 0x5f9   :  { %v6523_v26 = vpack.c.bf16 %v20363_v50, %v20357_v60  ;;  %6738 = vmatpush1.bf16.msra.mxu1 %v17546_v32 }
 0x5fa   :  { %6739 = vmatprep.subr.bf16.mxu1 %v17551_v45 }
 0x5fc   :  { %6442 = vmatmul.mubr.bf16.gmra.mrb[16].mxu1 %v6168_v10  ;;  %v17558_v10 = vld [vmem:[#allocation8 + $0x8b0] ss:$8 sps:$4 sm:$0xff]  }
 0x5fd   :  { %v20370_v8 = vpop.f32.mrb[168].mxu0  ;;  %6451 = vmatprep.mubr.bf16.mxu1 %v6171_v43  ;;  %6740 = vmatpush1.bf16.msra.mxu1 %v17549_v57 }
 0x5fe   :  { %v3720_v19 = vpop.f32.mrb[169].mxu0  ;;  %6741 = vmatprep.subr.bf16.mxu1 %v17554_v14  ;;  %v17561_v14 = vld [vmem:[#allocation8 + $0x8c0] ss:$8 sps:$4 sm:$0xff]  }
 0x5ff   :  { %v3722_v55 = vpop.f32.mrb[170].mxu0 }
 0x600   :  { %v6524_v4 = vpack.c.bf16 %v3722_v55, %v20370_v8  ;;  %v3724_v58 = vpop.f32.mrb[171].mxu0  ;;  %v17566_v8 = vld [vmem:[#allocation8 + $0x8d4] ss:$8 sps:$4 sm:$0xff]  }
 0x601   :  { %v6525_v44 = vpack.c.bf16 %v3724_v58, %v3720_v19  ;;  %6742 = vmatpush1.bf16.msra.mxu1 %v17552_v34  ;;  %v17572_v55 = vld [vmem:[#allocation8 + $0x8f4] ss:$8 sps:$4 sm:$0xff]  }
 0x602   :  { %6743 = vmatprep.subr.bf16.mxu1 %v17557_v18  ;;  %v17567_v18 = vld [vmem:[#allocation8 + $0x8e0] ss:$8 sps:$4 sm:$0xff]  }
 0x604   :  { %6452 = vmatmul.mubr.bf16.gmra.mrb[20].mxu1 %v6170_v51 }
 0x605   :  { %v3728_v5 = vpop.f32.mrb[172].mxu0  ;;  %6461 = vmatprep.mubr.bf16.mxu1 %v6173_v46  ;;  %6744 = vmatpush1.bf16.msra.mxu1 %v17555_v41 }
 0x606   :  { %v3730_v6 = vpop.f32.mrb[173].mxu0  ;;  %6745 = vmatprep.subr.bf16.mxu1 %v17560_v40 }
 0x607   :  { %v3732_v43 = vpop.f32.mrb[174].mxu0 }
 0x608   :  { %v6526_v32 = vpack.c.bf16 %v3732_v43, %v3728_v5  ;;  %v3734_v45 = vpop.f32.mrb[175].mxu0 }
 0x609   :  { %v6527_v57 = vpack.c.bf16 %v3734_v45, %v3730_v6  ;;  %6746 = vmatpush1.bf16.msra.mxu1 %v17558_v10 }
 0x60a   :  { %6747 = vmatprep.subr.bf16.mxu1 %v17563_v61 }
 0x60c   :  { %6462 = vmatmul.mubr.bf16.gmra.mrb[24].mxu1 %v6172_v54  ;;  %v6870_v54 = vlaneseq }
 0x60d   :  { %v3738_v29 = vpop.f32.mrb[176].mxu0  ;;  %6471 = vmatprep.mubr.bf16.mxu1 %v6175_v2  ;;  %6748 = vmatpush1.bf16.msra.mxu1 %v17561_v14 }
 0x60e   :  { %v3740_v51 = vpop.f32.mrb[177].mxu0  ;;  %6749 = vmatprep.subr.bf16.mxu1 %v17566_v8  ;;  %v6871_v33 = vshrl.u32 %v6870_v54, 7 }
 0x60f   :  { %v3742_v23 = vpop.f32.mrb[178].mxu0 }
 0x610   :  { %v6528_v46 = vpack.c.bf16 %v3742_v23, %v3738_v29  ;;  %v3744_v34 = vpop.f32.mrb[179].mxu0  ;;  %v20422_v13 = vsub.s32 0, %v6871_v33 }
 0x611   :  { %v6529_v19 = vpack.c.bf16 %v3744_v34, %v3740_v51  ;;  %6750 = vmatpush1.bf16.msra.mxu1 %v17564_v63 }
 0x612   :  { %6751 = vmatprep.subr.bf16.mxu1 %v17569_v7  ;;  %21009 = vst [vmem:[#allocation18_spill] sm:$0xff] %v20422_v13  ;;  %v20427_v3 = vrot.slane %v6868_v36, %v20422_v13  ;;  %v17740_v13 = vld [vmem:[#allocation8 + $0xc14] ss:$8 sps:$4 sm:$0xff]  }
 0x614   :  { %6472 = vmatmul.mubr.bf16.gmra.mrb[28].mxu1 %v6174_v31  ;;  %v20424_v31 = vsub.s32 1, %v6871_v33 }
 0x615   :  { %6752 = vmatpush1.bf16.msra.mxu1 %v17567_v18  ;;  %6755 = vmatprep.mubr.bf16.mxu1 %v6515_v53 }
 0x616   :  { %6753 = vmatprep.subr.bf16.mxu1 %v17572_v55  ;;  %21010 = vst [vmem:[#allocation19_spill] sm:$0xff] %v20424_v31  ;;  %v20430_v2 = vrot.slane %v6868_v36, %v20424_v31  ;;  %v17735_v31 = vld [vmem:[#allocation8 + $0xc00] ss:$8 sps:$4 sm:$0xff]  }
 0x619   :  { %6754 = vmatpush1.bf16.msra.mxu1 %v17570_v12 }
 0x61c   :  { %6756 = vmatmul.mubr.bf16.vlgmr.msra.gmra.mrb[0].mxu1 %v6514_v49 }
 0x61d   :  { %6765 = vmatprep.mubr.bf16.mxu1 %v6517_v11 }
 0x624   :  { %6766 = vmatmul.mubr.bf16.gmra.mrb[4].mxu1 %v6516_v52 }
 0x625   :  { %6775 = vmatprep.mubr.bf16.mxu1 %v6519_v17 }
 0x62c   :  { %6776 = vmatmul.mubr.bf16.gmra.mrb[8].mxu1 %v6518_v28 }
 0x62d   :  { %6785 = vmatprep.mubr.bf16.mxu1 %v6521_v35 }
 0x634   :  { %6786 = vmatmul.mubr.bf16.gmra.mrb[12].mxu1 %v6520_v59 }
 0x635   :  { %6795 = vmatprep.mubr.bf16.mxu1 %v6523_v26 }
 0x63c   :  { %6796 = vmatmul.mubr.bf16.gmra.mrb[16].mxu1 %v6522_v39 }
 0x63d   :  { %6805 = vmatprep.mubr.bf16.mxu1 %v6525_v44 }
 0x644   :  { %6806 = vmatmul.mubr.bf16.gmra.mrb[20].mxu1 %v6524_v4 }
 0x645   :  { %6815 = vmatprep.mubr.bf16.mxu1 %v6527_v57 }
 0x64c   :  { %6816 = vmatmul.mubr.bf16.gmra.mrb[24].mxu1 %v6526_v32 }
 0x64d   :  { %6825 = vmatprep.mubr.bf16.mxu1 %v6529_v19 }
 0x654   :  { %6826 = vmatmul.mubr.bf16.gmra.mrb[28].mxu1 %v6528_v46 }
 0x655   :  { %7200 = vmatprep.mubr.bf16.mxu1 %v20924_v16 }
 0x6ef   :  { %v6757_v25 = vpop.f32.mrb[0].mxu1 }
 0x6f0   :  { %v6880_v47 = vadd.f32 %v20427_v3, %v6757_v25  ;;  %v6759_v1 = vpop.f32.mrb[1].mxu1 }
 0x6f1   :  { %v6881_v49 = vadd.f32 %v20430_v2, %v6759_v1  ;;  %v6761_v9 = vpop.f32.mrb[2].mxu1 }
 0x6f2   :  { %v6944_v53 = vmul.f32 0.01, %v6880_v47  ;;  %v6882_v24 = vadd.f32 %v20427_v3, %v6761_v9  ;;  %v6763_v22 = vpop.f32.mrb[3].mxu1  ;;  %vm6912_vm0 = vcmp.ge.f32.partialorder %v6880_v47, 0.0 }
 0x6f3   :  { %v6945_v30 = vmul.f32 0.01, %v6881_v49  ;;  %v6883_v52 = vadd.f32 %v20430_v2, %v6763_v22  ;;  %vm6913_vm1 = vcmp.ge.f32.partialorder %v6881_v49, 0.0 }
 0x6f4   :  { %vm6914_vm2 = vcmp.ge.f32.partialorder %v6882_v24, 0.0  ;;  %v6946_v15 = vmul.f32 0.01, %v6882_v24  ;;  %v6976_v42 = vsel %vm6912_vm0, %v6880_v47, %v6944_v53 }
 0x6f5   :  { %vm6915_vm3 = vcmp.ge.f32.partialorder %v6883_v52, 0.0  ;;  %v6947_v11 = vmul.f32 0.01, %v6883_v52  ;;  %v6977_v20 = vsel %vm6913_vm1, %v6881_v49, %v6945_v30 }
 0x6f6   :  { %v6978_v37 = vsel %vm6914_vm2, %v6882_v24, %v6946_v15 }
 0x6f7   :  { %v7008_v0 = vpack.c.bf16 %v6978_v37, %v6976_v42  ;;  %v6767_v28 = vpop.f32.mrb[4].mxu1  ;;  %v6979_v17 = vsel %vm6915_vm3, %v6883_v52, %v6947_v11 }
 0x6f8   :  { %v6884_v21 = vadd.f32 %v20427_v3, %v6767_v28  ;;  %v6769_v48 = vpop.f32.mrb[5].mxu1  ;;  %v7009_v38 = vpack.c.bf16 %v6979_v17, %v6977_v20 }
 0x6f9   :  { %v6885_v59 = vadd.f32 %v20430_v2, %v6769_v48  ;;  %v6771_v56 = vpop.f32.mrb[6].mxu1 }
 0x6fa   :  { %v6948_v35 = vmul.f32 0.01, %v6884_v21  ;;  %v6886_v62 = vadd.f32 %v20427_v3, %v6771_v56  ;;  %v6773_v60 = vpop.f32.mrb[7].mxu1  ;;  %7168 = vmatprep.subr.bf16.mxu1 %v7009_v38  ;;  %vm6916_vm4 = vcmp.ge.f32.partialorder %v6884_v21, 0.0 }
 0x6fb   :  { %v6949_v27 = vmul.f32 0.01, %v6885_v59  ;;  %v6887_v39 = vadd.f32 %v20430_v2, %v6773_v60  ;;  %7169 = vmatpush1.bf16.msra.mxu1 %v7008_v0  ;;  %vm6917_vm5 = vcmp.ge.f32.partialorder %v6885_v59, 0.0 }
 0x6fc   :  { %vm6918_vm6 = vcmp.ge.f32.partialorder %v6886_v62, 0.0  ;;  %v6950_v50 = vmul.f32 0.01, %v6886_v62  ;;  %v6980_v4 = vsel %vm6916_vm4, %v6884_v21, %v6948_v35 }
 0x6fd   :  { %vm6919_vm7 = vcmp.ge.f32.partialorder %v6887_v39, 0.0  ;;  %v6951_v26 = vmul.f32 0.01, %v6887_v39  ;;  %v6981_v40 = vsel %vm6917_vm5, %v6885_v59, %v6949_v27 }
 0x6fe   :  { %v6982_v58 = vsel %vm6918_vm6, %v6886_v62, %v6950_v50 }
 0x6ff   :  { %v7010_v44 = vpack.c.bf16 %v6982_v58, %v6980_v4  ;;  %v6777_v41 = vpop.f32.mrb[8].mxu1  ;;  %v6983_v5 = vsel %vm6919_vm7, %v6887_v39, %v6951_v26 }
 0x700   :  { %v6888_v10 = vadd.f32 %v20427_v3, %v6777_v41  ;;  %v6779_v6 = vpop.f32.mrb[9].mxu1  ;;  %v7011_v61 = vpack.c.bf16 %v6983_v5, %v6981_v40 }
 0x701   :  { %v6889_v43 = vadd.f32 %v20430_v2, %v6779_v6  ;;  %v6781_v32 = vpop.f32.mrb[10].mxu1 }
 0x702   :  { %v6952_v45 = vmul.f32 0.01, %v6888_v10  ;;  %v6890_v57 = vadd.f32 %v20427_v3, %v6781_v32  ;;  %v6783_v14 = vpop.f32.mrb[11].mxu1  ;;  %7170 = vmatprep.subr.bf16.mxu1 %v7011_v61  ;;  %vm6920_vm8 = vcmp.ge.f32.partialorder %v6888_v10, 0.0 }
 0x703   :  { %v6953_v8 = vmul.f32 0.01, %v6889_v43  ;;  %v6891_v29 = vadd.f32 %v20430_v2, %v6783_v14  ;;  %7171 = vmatpush1.bf16.msra.mxu1 %v7010_v44  ;;  %vm6921_vm9 = vcmp.ge.f32.partialorder %v6889_v43, 0.0 }
 0x704   :  { %vm6922_vm10 = vcmp.ge.f32.partialorder %v6890_v57, 0.0  ;;  %v6954_v63 = vmul.f32 0.01, %v6890_v57  ;;  %v6984_v7 = vsel %vm6920_vm8, %v6888_v10, %v6952_v45 }
 0x705   :  { %vm6923_vm11 = vcmp.ge.f32.partialorder %v6891_v29, 0.0  ;;  %v6955_v51 = vmul.f32 0.01, %v6891_v29  ;;  %v6985_v19 = vsel %vm6921_vm9, %v6889_v43, %v6953_v8 }
 0x706   :  { %v6986_v23 = vsel %vm6922_vm10, %v6890_v57, %v6954_v63 }
 0x707   :  { %v7012_v46 = vpack.c.bf16 %v6986_v23, %v6984_v7  ;;  %v6787_v34 = vpop.f32.mrb[12].mxu1  ;;  %v6987_v18 = vsel %vm6923_vm11, %v6891_v29, %v6955_v51 }
 0x708   :  { %v6892_v55 = vadd.f32 %v20427_v3, %v6787_v34  ;;  %v6789_v12 = vpop.f32.mrb[13].mxu1  ;;  %v7013_v54 = vpack.c.bf16 %v6987_v18, %v6985_v19 }
 0x709   :  { %v6893_v33 = vadd.f32 %v20430_v2, %v6789_v12  ;;  %v6791_v36 = vpop.f32.mrb[14].mxu1 }
 0x70a   :  { %v6956_v25 = vmul.f32 0.01, %v6892_v55  ;;  %v6894_v47 = vadd.f32 %v20427_v3, %v6791_v36  ;;  %v6793_v1 = vpop.f32.mrb[15].mxu1  ;;  %7172 = vmatprep.subr.bf16.mxu1 %v7013_v54  ;;  %vm6924_vm12 = vcmp.ge.f32.partialorder %v6892_v55, 0.0 }
 0x70b   :  { %v6957_v49 = vmul.f32 0.01, %v6893_v33  ;;  %v6895_v9 = vadd.f32 %v20430_v2, %v6793_v1  ;;  %7173 = vmatpush1.bf16.msra.mxu1 %v7012_v46  ;;  %vm6925_vm13 = vcmp.ge.f32.partialorder %v6893_v33, 0.0 }
 0x70c   :  { %vm6926_vm14 = vcmp.ge.f32.partialorder %v6894_v47, 0.0  ;;  %v6958_v53 = vmul.f32 0.01, %v6894_v47  ;;  %v6988_v22 = vsel %vm6924_vm12, %v6892_v55, %v6956_v25 }
 0x70d   :  { %vm6927_vm15 = vcmp.ge.f32.partialorder %v6895_v9, 0.0  ;;  %v6959_v24 = vmul.f32 0.01, %v6895_v9  ;;  %v6989_v11 = vsel %vm6925_vm13, %v6893_v33, %v6957_v49 }
 0x70e   :  { %v6990_v30 = vsel %vm6926_vm14, %v6894_v47, %v6958_v53 }
 0x70f   :  { %v7014_v52 = vpack.c.bf16 %v6990_v30, %v6988_v22  ;;  %v6797_v15 = vpop.f32.mrb[16].mxu1  ;;  %v6991_v42 = vsel %vm6927_vm15, %v6895_v9, %v6959_v24 }
 0x710   :  { %v6896_v37 = vadd.f32 %v20427_v3, %v6797_v15  ;;  %v6799_v0 = vpop.f32.mrb[17].mxu1  ;;  %v7015_v28 = vpack.c.bf16 %v6991_v42, %v6989_v11 }
 0x711   :  { %v6897_v20 = vadd.f32 %v20430_v2, %v6799_v0  ;;  %v6801_v17 = vpop.f32.mrb[18].mxu1 }
 0x712   :  { %v6960_v21 = vmul.f32 0.01, %v6896_v37  ;;  %v6898_v48 = vadd.f32 %v20427_v3, %v6801_v17  ;;  %v6803_v38 = vpop.f32.mrb[19].mxu1  ;;  %7174 = vmatprep.subr.bf16.mxu1 %v7015_v28  ;;  %vm6928_vm0 = vcmp.ge.f32.partialorder %v6896_v37, 0.0 }
 0x713   :  { %v6961_v59 = vmul.f32 0.01, %v6897_v20  ;;  %v6899_v56 = vadd.f32 %v20430_v2, %v6803_v38  ;;  %7175 = vmatpush1.bf16.msra.mxu1 %v7014_v52  ;;  %vm6929_vm1 = vcmp.ge.f32.partialorder %v6897_v20, 0.0 }
 0x714   :  { %vm6930_vm2 = vcmp.ge.f32.partialorder %v6898_v48, 0.0  ;;  %v6962_v35 = vmul.f32 0.01, %v6898_v48  ;;  %v6992_v60 = vsel %vm6928_vm0, %v6896_v37, %v6960_v21 }
 0x715   :  { %vm6931_vm3 = vcmp.ge.f32.partialorder %v6899_v56, 0.0  ;;  %v6963_v62 = vmul.f32 0.01, %v6899_v56  ;;  %v6993_v26 = vsel %vm6929_vm1, %v6897_v20, %v6961_v59 }
 0x716   :  { %v6994_v27 = vsel %vm6930_vm2, %v6898_v48, %v6962_v35 }
 0x717   :  { %v7016_v39 = vpack.c.bf16 %v6994_v27, %v6992_v60  ;;  %v6807_v50 = vpop.f32.mrb[20].mxu1  ;;  %v6995_v4 = vsel %vm6931_vm3, %v6899_v56, %v6963_v62  ;;  %v17579_v27 = vld [vmem:[#allocation8 + $0xa04] ss:$8 sps:$4 sm:$0xff]  }
 0x718   :  { %v6900_v58 = vadd.f32 %v20427_v3, %v6807_v50  ;;  %v6809_v44 = vpop.f32.mrb[21].mxu1  ;;  %v7017_v41 = vpack.c.bf16 %v6995_v4, %v6993_v26  ;;  %v17582_v50 = vld [vmem:[#allocation8 + $0xa14] ss:$8 sps:$4 sm:$0xff]   ;;  %v17585_v26 = vld [vmem:[#allocation8 + $0xa24] ss:$8 sps:$4 sm:$0xff]  }
 0x719   :  { %v6901_v40 = vadd.f32 %v20430_v2, %v6809_v44  ;;  %v6811_v5 = vpop.f32.mrb[22].mxu1  ;;  %v17574_v4 = vld [vmem:[#allocation7 + $0x8] sm:$0xff]  }
 0x71a   :  { %v6964_v10 = vmul.f32 0.01, %v6900_v58  ;;  %v6902_v6 = vadd.f32 %v20427_v3, %v6811_v5  ;;  %v6813_v61 = vpop.f32.mrb[23].mxu1  ;;  %7176 = vmatprep.subr.bf16.mxu1 %v7017_v41  ;;  %vm6932_vm4 = vcmp.ge.f32.partialorder %v6900_v58, 0.0  ;;  %v17589_v44 = vld [vmem:[#allocation8 + $0xa34] ss:$8 sps:$4 sm:$0xff]  }
 0x71b   :  { %v6965_v43 = vmul.f32 0.01, %v6901_v40  ;;  %v6903_v32 = vadd.f32 %v20430_v2, %v6813_v61  ;;  %7177 = vmatpush1.bf16.msra.mxu1 %v7016_v39  ;;  %vm6933_vm5 = vcmp.ge.f32.partialorder %v6901_v40, 0.0  ;;  %v17577_v39 = vld [vmem:[#allocation8 + $0xa00] ss:$8 sps:$4 sm:$0xff]  }
 0x71c   :  { %vm6934_vm6 = vcmp.ge.f32.partialorder %v6902_v6, 0.0  ;;  %v6966_v45 = vmul.f32 0.01, %v6902_v6  ;;  %v6996_v14 = vsel %vm6932_vm4, %v6900_v58, %v6964_v10  ;;  %v17583_v58 = vld [vmem:[#allocation8 + $0xa20] ss:$8 sps:$4 sm:$0xff]  }
 0x71d   :  { %vm6935_vm7 = vcmp.ge.f32.partialorder %v6903_v32, 0.0  ;;  %v6967_v57 = vmul.f32 0.01, %v6903_v32  ;;  %v6997_v51 = vsel %vm6933_vm5, %v6901_v40, %v6965_v43  ;;  %v17587_v41 = vld [vmem:[#allocation8 + $0xa30] ss:$8 sps:$4 sm:$0xff]   ;;  %v17575_v5 = vld [vmem:[#allocation7 + $0x10] sm:$0xff]  }
 0x71e   :  { %v6998_v8 = vsel %vm6934_vm6, %v6902_v6, %v6966_v45  ;;  %v17593_v40 = vld [vmem:[#allocation8 + $0xa44] ss:$8 sps:$4 sm:$0xff]   ;;  %v17591_v10 = vld [vmem:[#allocation8 + $0xa40] ss:$8 sps:$4 sm:$0xff]   ;;  %v17597_v6 = vld [vmem:[#allocation8 + $0xa54] ss:$8 sps:$4 sm:$0xff]  }
 0x71f   :  { %v7018_v29 = vpack.c.bf16 %v6998_v8, %v6996_v14  ;;  %v6817_v63 = vpop.f32.mrb[24].mxu1  ;;  %v6999_v7 = vsel %vm6935_vm7, %v6903_v32, %v6967_v57  ;;  %v17595_v61 = vld [vmem:[#allocation8 + $0xa50] ss:$8 sps:$4 sm:$0xff]   ;;  %v17601_v43 = vld [vmem:[#allocation8 + $0xa64] ss:$8 sps:$4 sm:$0xff]  }
 0x720   :  { %v6904_v23 = vadd.f32 %v20427_v3, %v6817_v63  ;;  %v6819_v46 = vpop.f32.mrb[25].mxu1  ;;  %v7019_v34 = vpack.c.bf16 %v6999_v7, %v6997_v51  ;;  %v17576_v32 = vld [vmem:[#allocation7 + $0x18] sm:$0xff]   ;;  %v17606_v57 = vld [vmem:[#allocation8 + $0xa74] ss:$8 sps:$4 sm:$0xff]   ;;  %v17604_v14 = vld [vmem:[#allocation8 + $0xa70] ss:$8 sps:$4 sm:$0xff]  }
 0x721   :  { %v6905_v19 = vadd.f32 %v20430_v2, %v6819_v46  ;;  %v6821_v18 = vpop.f32.mrb[26].mxu1  ;;  %v17599_v45 = vld [vmem:[#allocation8 + $0xa60] ss:$8 sps:$4 sm:$0xff]   ;;  %v17610_v8 = vld [vmem:[#allocation8 + $0xa84] ss:$8 sps:$4 sm:$0xff]   ;;  %v17590_v46 = vld [vmem:[#allocation7 + $0x28] sm:$0xff]  }
 0x722   :  { %v6968_v55 = vmul.f32 0.01, %v6904_v23  ;;  %v6906_v12 = vadd.f32 %v20427_v3, %v6821_v18  ;;  %v6823_v54 = vpop.f32.mrb[27].mxu1  ;;  %7178 = vmatprep.subr.bf16.mxu1 %v7019_v34  ;;  %vm6936_vm8 = vcmp.ge.f32.partialorder %v6904_v23, 0.0  ;;  %v17608_v63 = vld [vmem:[#allocation8 + $0xa80] ss:$8 sps:$4 sm:$0xff]  }
 0x723   :  { %v6969_v33 = vmul.f32 0.01, %v6905_v19  ;;  %v6907_v36 = vadd.f32 %v20430_v2, %v6823_v54  ;;  %7179 = vmatpush1.bf16.msra.mxu1 %v7018_v29  ;;  %vm6937_vm9 = vcmp.ge.f32.partialorder %v6905_v19, 0.0  ;;  %v17586_v29 = vld [vmem:[#allocation7 + $0x20] sm:$0xff]   ;;  %v17616_v34 = vld [vmem:[#allocation8 + $0xaa0] ss:$8 sps:$4 sm:$0xff]  }
 0x724   :  { %vm6938_vm10 = vcmp.ge.f32.partialorder %v6906_v12, 0.0  ;;  %v6970_v25 = vmul.f32 0.01, %v6906_v12  ;;  %v7000_v1 = vsel %vm6936_vm8, %v6904_v23, %v6968_v55  ;;  %v17614_v51 = vld [vmem:[#allocation8 + $0xa94] ss:$8 sps:$4 sm:$0xff]   ;;  %vm9768_vm8 = vcmask 261120  }
 0x725   :  { %vm6939_vm11 = vcmp.ge.f32.partialorder %v6907_v36, 0.0  ;;  %v6971_v47 = vmul.f32 0.01, %v6907_v36  ;;  %v7001_v24 = vsel %vm6937_vm9, %v6905_v19, %v6969_v33  ;;  %v17612_v7 = vld [vmem:[#allocation8 + $0xa90] ss:$8 sps:$4 sm:$0xff]   ;;  %v17598_v33 = vld [vmem:[#allocation7 + $0x38] sm:$0xff]  }
 0x726   :  { %v7002_v49 = vsel %vm6938_vm10, %v6906_v12, %v6970_v25  ;;  %v17618_v23 = vld [vmem:[#allocation8 + $0xaa4] ss:$8 sps:$4 sm:$0xff]   ;;  %v17622_v19 = vld [vmem:[#allocation8 + $0xab4] ss:$8 sps:$4 sm:$0xff]   ;;  %v17620_v18 = vld [vmem:[#allocation8 + $0xab0] ss:$8 sps:$4 sm:$0xff]  }
 0x727   :  { %v7020_v9 = vpack.c.bf16 %v7002_v49, %v7000_v1  ;;  %v6827_v53 = vpop.f32.mrb[28].mxu1  ;;  %v7003_v22 = vsel %vm6939_vm11, %v6907_v36, %v6971_v47  ;;  %v17626_v55 = vld [vmem:[#allocation8 + $0xac4] ss:$8 sps:$4 sm:$0xff]   ;;  %v17624_v54 = vld [vmem:[#allocation8 + $0xac0] ss:$8 sps:$4 sm:$0xff]   ;;  %v17602_v36 = vld [vmem:[#allocation7 + $0x40] sm:$0xff]  }
 0x728   :  { %v6908_v30 = vadd.f32 %v20427_v3, %v6827_v53  ;;  %v6829_v52 = vpop.f32.mrb[29].mxu1  ;;  %v7021_v15 = vpack.c.bf16 %v7003_v22, %v7001_v24  ;;  %v17594_v12 = vld [vmem:[#allocation7 + $0x30] sm:$0xff]   ;;  %v17603_v25 = vld [vmem:[#allocation7 + $0x48] sm:$0xff]   ;;  %v17611_v1 = vld [vmem:[#allocation7 + $0x58] sm:$0xff]   ;;  %vm12074_vm11 = vcmask 1043456  }
 0x729   :  { %v6909_v11 = vadd.f32 %v20430_v2, %v6829_v52  ;;  %v6831_v42 = vpop.f32.mrb[30].mxu1  ;;  %v17607_v47 = vld [vmem:[#allocation7 + $0x50] sm:$0xff]   ;;  %v17628_v49 = vld [vmem:[#allocation8 + $0xad0] ss:$8 sps:$4 sm:$0xff]  }
 0x72a   :  { %v6972_v37 = vmul.f32 0.01, %v6908_v30  ;;  %v6910_v0 = vadd.f32 %v20427_v3, %v6831_v42  ;;  %v6833_v28 = vpop.f32.mrb[31].mxu1  ;;  %7180 = vmatprep.subr.bf16.mxu1 %v7021_v15  ;;  %vm6940_vm12 = vcmp.ge.f32.partialorder %v6908_v30, 0.0  ;;  %v17573_v3 = vld [vmem:[#allocation7] sm:$0xff]   ;;  %v17619_v52 = vld [vmem:[#allocation7 + $0x68] sm:$0xff]  }
 0x72b   :  { %v6973_v20 = vmul.f32 0.01, %v6909_v11  ;;  %v6911_v17 = vadd.f32 %v20430_v2, %v6833_v28  ;;  %7181 = vmatpush1.bf16.msra.mxu1 %v7020_v9  ;;  %vm6941_vm13 = vcmp.ge.f32.partialorder %v6909_v11, 0.0  ;;  %v17580_v2 = vld [vmem:[#allocation8 + $0xa10] ss:$8 sps:$4 sm:$0xff]   ;;  %v17623_v42 = vld [vmem:[#allocation7 + $0x70] sm:$0xff]  }
 0x72c   :  { %vm6942_vm14 = vcmp.ge.f32.partialorder %v6910_v0, 0.0  ;;  %v6974_v21 = vmul.f32 0.01, %v6910_v0  ;;  %v7004_v38 = vsel %vm6940_vm12, %v6908_v30, %v6972_v37  ;;  %v17630_v9 = vld [vmem:[#allocation8 + $0xad4] ss:$8 sps:$4 sm:$0xff]   ;;  %v17627_v37 = vld [vmem:[#allocation7 + $0x78] sm:$0xff]  }
 0x72d   :  { %vm6943_vm15 = vcmp.ge.f32.partialorder %v6911_v17, 0.0  ;;  %v6975_v48 = vmul.f32 0.01, %v6911_v17  ;;  %v7005_v35 = vsel %vm6941_vm13, %v6909_v11, %v6973_v20  ;;  %v17615_v53 = vld [vmem:[#allocation7 + $0x60] sm:$0xff]   ;;  %v17632_v24 = vld [vmem:[#allocation8 + $0xae0] ss:$8 sps:$4 sm:$0xff]  }
 0x72e   :  { %v7006_v59 = vsel %vm6942_vm14, %v6910_v0, %v6974_v21  ;;  %v17634_v22 = vld [vmem:[#allocation8 + $0xae4] ss:$8 sps:$4 sm:$0xff]   ;;  %v17638_v30 = vld [vmem:[#allocation8 + $0xaf4] ss:$8 sps:$4 sm:$0xff]   ;;  %v17636_v15 = vld [vmem:[#allocation8 + $0xaf0] ss:$8 sps:$4 sm:$0xff]  }
 0x72f   :  { %v7022_v56 = vpack.c.bf16 %v7006_v59, %v7004_v38  ;;  %v7007_v62 = vsel %vm6943_vm15, %v6911_v17, %v6975_v48  ;;  %v17641_v11 = vld [vmem:[#allocation8 + $0x904] ss:$8 sps:$4 sm:$0xff]   ;;  %v17631_v0 = vld [vmem:[#allocation7 + $0x80] sm:$0xff]   ;;  %v17635_v28 = vld [vmem:[#allocation7 + $0x88] sm:$0xff]   ;;  %vm12058_vm12 = vcmask 64512   ;;  %vm14326_vm15 = vcmask 1041408  }
 0x730   :  { %v7023_v60 = vpack.c.bf16 %v7007_v62, %v7005_v35 }
 0x732   :  { %7182 = vmatprep.subr.bf16.mxu1 %v7023_v60 }
 0x733   :  { %7183 = vmatpush1.bf16.msra.mxu1 %v7022_v56 }
 0x734   :  { %7615 = vmatprep.subr.bf16.mxu1 %v17579_v27 }
 0x736   :  { %7201 = vmatmul.mubr.bf16.vlgmr.msra.gmra.mrb[32].mxu1 %v17573_v3 }
 0x737   :  { %7210 = vmatprep.mubr.bf16.mxu1 %v20924_v16  ;;  %7616 = vmatpush1.bf16.msra.mxu1 %v17577_v39 }
 0x738   :  { %7617 = vmatprep.subr.bf16.mxu1 %v17582_v50 }
 0x73b   :  { %7618 = vmatpush1.bf16.msra.mxu1 %v17580_v2 }
 0x73c   :  { %7619 = vmatprep.subr.bf16.mxu1 %v17585_v26 }
 0x73e   :  { %7211 = vmatmul.mubr.bf16.gmra.mrb[36].mxu1 %v17574_v4 }
 0x73f   :  { %7220 = vmatprep.mubr.bf16.mxu1 %v20924_v16  ;;  %7620 = vmatpush1.bf16.msra.mxu1 %v17583_v58 }
 0x740   :  { %7621 = vmatprep.subr.bf16.mxu1 %v17589_v44  ;;  %v17639_v44 = vld [vmem:[#allocation8 + $0x900] ss:$8 sps:$4 sm:$0xff]  }
 0x743   :  { %7622 = vmatpush1.bf16.msra.mxu1 %v17587_v41  ;;  %v17644_v41 = vld [vmem:[#allocation8 + $0x914] ss:$8 sps:$4 sm:$0xff]  }
 0x744   :  { %7623 = vmatprep.subr.bf16.mxu1 %v17593_v40 }
 0x746   :  { %7221 = vmatmul.mubr.bf16.gmra.mrb[40].mxu1 %v17575_v5  ;;  %v17642_v5 = vld [vmem:[#allocation8 + $0x910] ss:$8 sps:$4 sm:$0xff]  }
 0x747   :  { %7230 = vmatprep.mubr.bf16.mxu1 %v20924_v16  ;;  %7624 = vmatpush1.bf16.msra.mxu1 %v17591_v10 }
 0x748   :  { %7625 = vmatprep.subr.bf16.mxu1 %v17597_v6  ;;  %v17647_v6 = vld [vmem:[#allocation8 + $0x924] ss:$8 sps:$4 sm:$0xff]  }
 0x74b   :  { %7626 = vmatpush1.bf16.msra.mxu1 %v17595_v61 }
 0x74c   :  { %7627 = vmatprep.subr.bf16.mxu1 %v17601_v43 }
 0x74e   :  { %7231 = vmatmul.mubr.bf16.gmra.mrb[44].mxu1 %v17576_v32 }
 0x74f   :  { %7240 = vmatprep.mubr.bf16.mxu1 %v20924_v16  ;;  %7628 = vmatpush1.bf16.msra.mxu1 %v17599_v45 }
 0x750   :  { %7629 = vmatprep.subr.bf16.mxu1 %v17606_v57  ;;  %v17645_v57 = vld [vmem:[#allocation8 + $0x920] ss:$8 sps:$4 sm:$0xff]  }
 0x753   :  { %7630 = vmatpush1.bf16.msra.mxu1 %v17604_v14  ;;  %v17650_v14 = vld [vmem:[#allocation8 + $0x934] ss:$8 sps:$4 sm:$0xff]  }
 0x754   :  { %7631 = vmatprep.subr.bf16.mxu1 %v17610_v8  ;;  %v17648_v8 = vld [vmem:[#allocation8 + $0x930] ss:$8 sps:$4 sm:$0xff]  }
 0x756   :  { %7241 = vmatmul.mubr.bf16.gmra.mrb[48].mxu1 %v17586_v29 }
 0x757   :  { %7250 = vmatprep.mubr.bf16.mxu1 %v20924_v16  ;;  %7632 = vmatpush1.bf16.msra.mxu1 %v17608_v63  ;;  %v17653_v63 = vld [vmem:[#allocation8 + $0x944] ss:$8 sps:$4 sm:$0xff]  }
 0x758   :  { %7633 = vmatprep.subr.bf16.mxu1 %v17614_v51 }
 0x75b   :  { %7634 = vmatpush1.bf16.msra.mxu1 %v17612_v7 }
 0x75c   :  { %7635 = vmatprep.subr.bf16.mxu1 %v17618_v23  ;;  %v17729_v23 = vld [vmem:[#allocation8 + $0xbe0] ss:$8 sps:$4 sm:$0xff]  }
 0x75e   :  { %7251 = vmatmul.mubr.bf16.gmra.mrb[52].mxu1 %v17590_v46 }
 0x75f   :  { %7260 = vmatprep.mubr.bf16.mxu1 %v20924_v16  ;;  %7636 = vmatpush1.bf16.msra.mxu1 %v17616_v34  ;;  %v17651_v34 = vld [vmem:[#allocation8 + $0x940] ss:$8 sps:$4 sm:$0xff]  }
 0x760   :  { %7637 = vmatprep.subr.bf16.mxu1 %v17622_v19 }
 0x763   :  { %7638 = vmatpush1.bf16.msra.mxu1 %v17620_v18  ;;  %v17656_v18 = vld [vmem:[#allocation8 + $0x954] ss:$8 sps:$4 sm:$0xff]  }
 0x764   :  { %7639 = vmatprep.subr.bf16.mxu1 %v17626_v55  ;;  %v17654_v55 = vld [vmem:[#allocation8 + $0x950] ss:$8 sps:$4 sm:$0xff]  }
 0x766   :  { %7261 = vmatmul.mubr.bf16.gmra.mrb[56].mxu1 %v17594_v12 }
 0x767   :  { %7270 = vmatprep.mubr.bf16.mxu1 %v20924_v16  ;;  %7640 = vmatpush1.bf16.msra.mxu1 %v17624_v54  ;;  %v17659_v54 = vld [vmem:[#allocation8 + $0x964] ss:$8 sps:$4 sm:$0xff]  }
 0x768   :  { %7641 = vmatprep.subr.bf16.mxu1 %v17630_v9  ;;  %v17662_v9 = vld [vmem:[#allocation8 + $0x974] ss:$8 sps:$4 sm:$0xff]  }
 0x76b   :  { %7642 = vmatpush1.bf16.msra.mxu1 %v17628_v49 }
 0x76c   :  { %7643 = vmatprep.subr.bf16.mxu1 %v17634_v22  ;;  %v17665_v22 = vld [vmem:[#allocation8 + $0x984] ss:$8 sps:$4 sm:$0xff]  }
 0x76e   :  { %7271 = vmatmul.mubr.bf16.gmra.mrb[60].mxu1 %v17598_v33 }
 0x76f   :  { %7280 = vmatprep.mubr.bf16.mxu1 %v20924_v16  ;;  %7644 = vmatpush1.bf16.msra.mxu1 %v17632_v24 }
 0x770   :  { %7645 = vmatprep.subr.bf16.mxu1 %v17638_v30 }
 0x773   :  { %7646 = vmatpush1.bf16.msra.mxu1 %v17636_v15  ;;  %v17723_v15 = vld [vmem:[#allocation8 + $0xbc0] ss:$8 sps:$4 sm:$0xff]  }
 0x774   :  { %7828 = vmatprep.subr.bf16.mxu1 %v17641_v11 }
 0x776   :  { %7281 = vmatmul.mubr.bf16.gmra.mrb[64].mxu1 %v17602_v36 }
 0x777   :  { %7290 = vmatprep.mubr.bf16.mxu1 %v20924_v16 }
 0x77e   :  { %7291 = vmatmul.mubr.bf16.gmra.mrb[68].mxu1 %v17603_v25 }
 0x77f   :  { %7300 = vmatprep.mubr.bf16.mxu1 %v20924_v16 }
 0x786   :  { %7301 = vmatmul.mubr.bf16.gmra.mrb[72].mxu1 %v17607_v47 }
 0x787   :  { %7310 = vmatprep.mubr.bf16.mxu1 %v20924_v16 }
 0x78e   :  { %7311 = vmatmul.mubr.bf16.gmra.mrb[76].mxu1 %v17611_v1  ;;  %v17657_v1 = vld [vmem:[#allocation8 + $0x960] ss:$8 sps:$4 sm:$0xff]  }
 0x78f   :  { %7320 = vmatprep.mubr.bf16.mxu1 %v20924_v16 }
 0x796   :  { %7321 = vmatmul.mubr.bf16.gmra.mrb[80].mxu1 %v17615_v53  ;;  %v17660_v53 = vld [vmem:[#allocation8 + $0x970] ss:$8 sps:$4 sm:$0xff]  }
 0x797   :  { %7330 = vmatprep.mubr.bf16.mxu1 %v20924_v16 }
 0x79e   :  { %7331 = vmatmul.mubr.bf16.gmra.mrb[84].mxu1 %v17619_v52 }
 0x79f   :  { %7340 = vmatprep.mubr.bf16.mxu1 %v20924_v16 }
 0x7a6   :  { %7341 = vmatmul.mubr.bf16.gmra.mrb[88].mxu1 %v17623_v42  ;;  %v17663_v42 = vld [vmem:[#allocation8 + $0x980] ss:$8 sps:$4 sm:$0xff]  }
 0x7a7   :  { %7350 = vmatprep.mubr.bf16.mxu1 %v20924_v16 }
 0x7ae   :  { %7351 = vmatmul.mubr.bf16.gmra.mrb[92].mxu1 %v17627_v37  ;;  %v17731_v37 = vld [vmem:[#allocation8 + $0xbe4] ss:$8 sps:$4 sm:$0xff]  }
 0x7af   :  { %7360 = vmatprep.mubr.bf16.mxu1 %v20924_v16 }
 0x7b6   :  { %7361 = vmatmul.mubr.bf16.gmra.mrb[96].mxu1 %v17631_v0  ;;  %v17668_v0 = vld [vmem:[#allocation8 + $0x994] ss:$8 sps:$4 sm:$0xff]  }
 0x7b7   :  { %7370 = vmatprep.mubr.bf16.mxu1 %v20924_v16  ;;  %v17705_v16 = vld [vmem:[#allocation8 + $0xb60] ss:$8 sps:$4 sm:$0xff]  }
 0x7be   :  { %7371 = vmatmul.mubr.bf16.gmra.mrb[100].mxu1 %v17635_v28  ;;  %v17666_v28 = vld [vmem:[#allocation8 + $0x990] ss:$8 sps:$4 sm:$0xff]  }
 0x809   :  { %v20481_v20 = vpop.f32.mrb[32].mxu1 }
 0x80a   :  { %v7204_v17 = vpop.f32.mrb[33].mxu1 }
 0x80b   :  { %v20483_v21 = vpop.f32.mrb[34].mxu1 }
 0x80c   :  { %v7381_v48 = vpack.c.bf16 %v20483_v21, %v20481_v20  ;;  %v7208_v38 = vpop.f32.mrb[35].mxu1  ;;  %v17693_v20 = vld [vmem:[#allocation8 + $0xb20] ss:$8 sps:$4 sm:$0xff]  }
 0x80d   :  { %v7382_v59 = vpack.c.bf16 %v7208_v38, %v7204_v17  ;;  %v17671_v38 = vld [vmem:[#allocation8 + $0x9a4] ss:$8 sps:$4 sm:$0xff]  }
 0x811   :  { %v20487_v56 = vpop.f32.mrb[36].mxu1 }
 0x812   :  { %v20489_v35 = vpop.f32.mrb[37].mxu1 }
 0x813   :  { %v20491_v62 = vpop.f32.mrb[38].mxu1 }
 0x814   :  { %v7383_v60 = vpack.c.bf16 %v20491_v62, %v20487_v56  ;;  %v20495_v27 = vpop.f32.mrb[39].mxu1  ;;  %v17699_v56 = vld [vmem:[#allocation8 + $0xb40] ss:$8 sps:$4 sm:$0xff]   ;;  %v17713_v62 = vld [vmem:[#allocation8 + $0xb84] ss:$8 sps:$4 sm:$0xff]  }
 0x815   :  { %v7384_v3 = vpack.c.bf16 %v20495_v27, %v20489_v35  ;;  %v17696_v35 = vld [vmem:[#allocation8 + $0xb30] ss:$8 sps:$4 sm:$0xff]  }
 0x819   :  { %v7222_v39 = vpop.f32.mrb[40].mxu1 }
 0x81a   :  { %v7224_v50 = vpop.f32.mrb[41].mxu1 }
 0x81b   :  { %v7226_v2 = vpop.f32.mrb[42].mxu1 }
 0x81c   :  { %v7418_v26 = vpack.c.bf16 %v7226_v2, %v7222_v39  ;;  %v7228_v4 = vpop.f32.mrb[43].mxu1 }
 0x81d   :  { %v7419_v58 = vpack.c.bf16 %v7228_v4, %v7224_v50 }
 0x81f   :  { %7647 = vmatprep.mubr.bf16.mxu1 %v7419_v58  ;;  %v17674_v58 = vld [vmem:[#allocation8 + $0x9b4] ss:$8 sps:$4 sm:$0xff]  }
 0x820   :  { %7648 = vmatmul.mubr.bf16.vlgmr.msra.gmra.mrb[104].mxu1 %v7418_v26  ;;  %v17669_v26 = vld [vmem:[#allocation8 + $0x9a0] ss:$8 sps:$4 sm:$0xff]  }
 0x821   :  { %7829 = vmatpush1.bf16.msra.mxu1 %v17639_v44  ;;  %v7232_v40 = vpop.f32.mrb[44].mxu1  ;;  %v17672_v44 = vld [vmem:[#allocation8 + $0x9b0] ss:$8 sps:$4 sm:$0xff]  }
 0x822   :  { %v7234_v10 = vpop.f32.mrb[45].mxu1  ;;  %7830 = vmatprep.subr.bf16.mxu1 %v17644_v41 }
 0x823   :  { %v7236_v61 = vpop.f32.mrb[46].mxu1 }
 0x824   :  { %v7420_v43 = vpack.c.bf16 %v7236_v61, %v7232_v40  ;;  %v7238_v32 = vpop.f32.mrb[47].mxu1  ;;  %v17677_v40 = vld [vmem:[#allocation8 + $0x9c4] ss:$8 sps:$4 sm:$0xff]  }
 0x825   :  { %v7421_v45 = vpack.c.bf16 %v7238_v32, %v7234_v10  ;;  %7831 = vmatpush1.bf16.msra.mxu1 %v17642_v5  ;;  %v17725_v32 = vld [vmem:[#allocation8 + $0xbc4] ss:$8 sps:$4 sm:$0xff]  }
 0x826   :  { %7832 = vmatprep.subr.bf16.mxu1 %v17647_v6  ;;  %v17717_v6 = vld [vmem:[#allocation8 + $0xba0] ss:$8 sps:$4 sm:$0xff]  }
 0x827   :  { %7657 = vmatprep.mubr.bf16.mxu1 %v7421_v45  ;;  %v17680_v45 = vld [vmem:[#allocation8 + $0x9d4] ss:$8 sps:$4 sm:$0xff]  }
 0x828   :  { %7658 = vmatmul.mubr.bf16.gmra.mrb[108].mxu1 %v7420_v43  ;;  %v17675_v43 = vld [vmem:[#allocation8 + $0x9c0] ss:$8 sps:$4 sm:$0xff]  }
 0x829   :  { %7833 = vmatpush1.bf16.msra.mxu1 %v17645_v57  ;;  %7860 = vmatprep.mubr.bf16.mxu1 %v7382_v59  ;;  %v20499_v29 = vpop.f32.mrb[48].mxu1  ;;  %v17678_v57 = vld [vmem:[#allocation8 + $0x9d0] ss:$8 sps:$4 sm:$0xff]  }
 0x82a   :  { %7834 = vmatprep.subr.bf16.mxu1 %v17650_v14  ;;  %v20501_v51 = vpop.f32.mrb[49].mxu1 }
 0x82b   :  { %v20503_v7 = vpop.f32.mrb[50].mxu1 }
 0x82c   :  { %v20507_v46 = vpop.f32.mrb[51].mxu1 }
 0x82d   :  { %7835 = vmatpush1.bf16.msra.mxu1 %v17648_v8  ;;  %v7882_v19 = vpack.c.bf16 %v20507_v46, %v20501_v51  ;;  %v17683_v8 = vld [vmem:[#allocation8 + $0x9e4] ss:$8 sps:$4 sm:$0xff]   ;;  %v17702_v51 = vld [vmem:[#allocation8 + $0xb50] ss:$8 sps:$4 sm:$0xff]  }
 0x82e   :  { %7836 = vmatprep.subr.bf16.mxu1 %v17653_v63 }
 0x831   :  { %7837 = vmatpush1.bf16.msra.mxu1 %v17651_v34  ;;  %v20511_v12 = vpop.f32.mrb[52].mxu1 }
 0x832   :  { %7838 = vmatprep.subr.bf16.mxu1 %v17656_v18  ;;  %v20513_v33 = vpop.f32.mrb[53].mxu1 }
 0x833   :  { %v20515_v36 = vpop.f32.mrb[54].mxu1 }
 0x834   :  { %v20519_v47 = vpop.f32.mrb[55].mxu1 }
 0x835   :  { %7839 = vmatpush1.bf16.msra.mxu1 %v17654_v55 }
 0x836   :  { %7840 = vmatprep.subr.bf16.mxu1 %v17659_v54  ;;  %v17681_v54 = vld [vmem:[#allocation8 + $0x9e0] ss:$8 sps:$4 sm:$0xff]  }
 0x839   :  { %7841 = vmatpush1.bf16.msra.mxu1 %v17657_v1  ;;  %v20523_v24 = vpop.f32.mrb[56].mxu1 }
 0x83a   :  { %7842 = vmatprep.subr.bf16.mxu1 %v17662_v9  ;;  %v20525_v30 = vpop.f32.mrb[57].mxu1  ;;  %v17686_v9 = vld [vmem:[#allocation8 + $0x9f4] ss:$8 sps:$4 sm:$0xff]  }
 0x83b   :  { %v20527_v52 = vpop.f32.mrb[58].mxu1 }
 0x83c   :  { %v20531_v11 = vpop.f32.mrb[59].mxu1 }
 0x83d   :  { %7843 = vmatpush1.bf16.msra.mxu1 %v17660_v53  ;;  %v17684_v53 = vld [vmem:[#allocation8 + $0x9f0] ss:$8 sps:$4 sm:$0xff]  }
 0x83e   :  { %7844 = vmatprep.subr.bf16.mxu1 %v17665_v22 }
 0x841   :  { %7845 = vmatpush1.bf16.msra.mxu1 %v17663_v42  ;;  %v20535_v17 = vpop.f32.mrb[60].mxu1  ;;  %v17689_v42 = vld [vmem:[#allocation8 + $0xb04] ss:$8 sps:$4 sm:$0xff]  }
 0x842   :  { %7846 = vmatprep.subr.bf16.mxu1 %v17668_v0  ;;  %v20537_v59 = vpop.f32.mrb[61].mxu1 }
 0x843   :  { %v20539_v39 = vpop.f32.mrb[62].mxu1 }
 0x844   :  { %v20543_v2 = vpop.f32.mrb[63].mxu1 }
 0x845   :  { %7847 = vmatpush1.bf16.msra.mxu1 %v17666_v28 }
 0x846   :  { %7848 = vmatprep.subr.bf16.mxu1 %v17671_v38  ;;  %v17711_v38 = vld [vmem:[#allocation8 + $0xb80] ss:$8 sps:$4 sm:$0xff]  }
 0x849   :  { %7849 = vmatpush1.bf16.msra.mxu1 %v17669_v26  ;;  %v20547_v41 = vpop.f32.mrb[64].mxu1 }
 0x84a   :  { %7850 = vmatprep.subr.bf16.mxu1 %v17674_v58  ;;  %v20549_v5 = vpop.f32.mrb[65].mxu1  ;;  %v17687_v58 = vld [vmem:[#allocation8 + $0xb00] ss:$8 sps:$4 sm:$0xff]  }
 0x84b   :  { %v20551_v10 = vpop.f32.mrb[66].mxu1 }
 0x84c   :  { %v20555_v61 = vpop.f32.mrb[67].mxu1 }
 0x84d   :  { %7851 = vmatpush1.bf16.msra.mxu1 %v17672_v44  ;;  %v17719_v44 = vld [vmem:[#allocation8 + $0xba4] ss:$8 sps:$4 sm:$0xff]  }
 0x84e   :  { %7852 = vmatprep.subr.bf16.mxu1 %v17677_v40  ;;  %v17692_v40 = vld [vmem:[#allocation8 + $0xb14] ss:$8 sps:$4 sm:$0xff]  }
 0x851   :  { %7853 = vmatpush1.bf16.msra.mxu1 %v17675_v43  ;;  %v20559_v14 = vpop.f32.mrb[68].mxu1  ;;  %v17690_v43 = vld [vmem:[#allocation8 + $0xb10] ss:$8 sps:$4 sm:$0xff]  }
 0x852   :  { %7854 = vmatprep.subr.bf16.mxu1 %v17680_v45  ;;  %v20561_v63 = vpop.f32.mrb[69].mxu1 }
 0x853   :  { %v20563_v34 = vpop.f32.mrb[70].mxu1 }
 0x854   :  { %v20567_v55 = vpop.f32.mrb[71].mxu1 }
 0x855   :  { %7855 = vmatpush1.bf16.msra.mxu1 %v17678_v57  ;;  %v17695_v57 = vld [vmem:[#allocation8 + $0xb24] ss:$8 sps:$4 sm:$0xff]  }
 0x856   :  { %7856 = vmatprep.subr.bf16.mxu1 %v17683_v8 }
 0x859   :  { %7857 = vmatpush1.bf16.msra.mxu1 %v17681_v54  ;;  %v20571_v22 = vpop.f32.mrb[72].mxu1 }
 0x85a   :  { %7858 = vmatprep.subr.bf16.mxu1 %v17686_v9  ;;  %v20573_v0 = vpop.f32.mrb[73].mxu1 }
 0x85b   :  { %v20575_v28 = vpop.f32.mrb[74].mxu1 }
 0x85c   :  { %v20579_v26 = vpop.f32.mrb[75].mxu1 }
 0x85d   :  { %7859 = vmatpush1.bf16.msra.mxu1 %v17684_v53 }
 0x85e   :  { %8078 = vmatprep.subr.bf16.mxu1 %v17689_v42 }
 0x860   :  { %7861 = vmatmul.mubr.bf16.vlgmr.msra.gmra.mrb[104].mxu1 %v7381_v48  ;;  %v17698_v48 = vld [vmem:[#allocation8 + $0xb34] ss:$8 sps:$4 sm:$0xff]  }
 0x861   :  { %7870 = vmatprep.mubr.bf16.mxu1 %v7384_v3  ;;  %8079 = vmatpush1.bf16.msra.mxu1 %v17687_v58  ;;  %v20589_v45 = vpop.f32.mrb[76].mxu1  ;;  %v17701_v3 = vld [vmem:[#allocation8 + $0xb44] ss:$8 sps:$4 sm:$0xff]  }
 0x862   :  { %8080 = vmatprep.subr.bf16.mxu1 %v17692_v40  ;;  %v20591_v8 = vpop.f32.mrb[77].mxu1  ;;  %v17708_v40 = vld [vmem:[#allocation8 + $0xb70] ss:$8 sps:$4 sm:$0xff]  }
 0x863   :  { %v20593_v54 = vpop.f32.mrb[78].mxu1 }
 0x864   :  { %v20597_v53 = vpop.f32.mrb[79].mxu1 }
 0x865   :  { %8081 = vmatpush1.bf16.msra.mxu1 %v17690_v43 }
 0x866   :  { %8082 = vmatprep.subr.bf16.mxu1 %v17695_v57 }
 0x868   :  { %7871 = vmatmul.mubr.bf16.gmra.mrb[108].mxu1 %v7383_v60  ;;  %v17704_v60 = vld [vmem:[#allocation8 + $0xb54] ss:$8 sps:$4 sm:$0xff]  }
 0x869   :  { %8083 = vmatpush1.bf16.msra.mxu1 %v17693_v20  ;;  %8110 = vmatprep.mubr.bf16.mxu1 %v7882_v19  ;;  %v20607_v27 = vpop.f32.mrb[80].mxu1  ;;  %v17707_v19 = vld [vmem:[#allocation8 + $0xb64] ss:$8 sps:$4 sm:$0xff]  }
 0x86a   :  { %8084 = vmatprep.subr.bf16.mxu1 %v17698_v48  ;;  %v20609_v42 = vpop.f32.mrb[81].mxu1  ;;  %v21011_v48 = vpack.c.bf16 %v20503_v7, %v20499_v29  ;;  %v21014_v29 = vpack.c.bf16 %v20531_v11, %v20525_v30  ;;  %v17744_v7 = vld [vmem:[#allocation8 + $0xc30] ss:$8 sps:$4 sm:$0xff]   ;;  %v17761_v30 = vld [vmem:[#allocation8 + $0xc84] ss:$8 sps:$4 sm:$0xff]  }
 0x86b   :  { %v20611_v58 = vpop.f32.mrb[82].mxu1  ;;  %v17759_v11 = vld [vmem:[#allocation8 + $0xc80] ss:$8 sps:$4 sm:$0xff]  }
 0x86c   :  { %v20615_v43 = vpop.f32.mrb[83].mxu1 }
 0x86d   :  { %8085 = vmatpush1.bf16.msra.mxu1 %v17696_v35 }
 0x86e   :  { %8086 = vmatprep.subr.bf16.mxu1 %v17701_v3  ;;  %v17714_v3 = vld [vmem:[#allocation8 + $0xb90] ss:$8 sps:$4 sm:$0xff]  }
 0x871   :  { %8087 = vmatpush1.bf16.msra.mxu1 %v17699_v56  ;;  %v20619_v46 = vpop.f32.mrb[84].mxu1  ;;  %v17710_v56 = vld [vmem:[#allocation8 + $0xb74] ss:$8 sps:$4 sm:$0xff]  }
 0x872   :  { %8088 = vmatprep.subr.bf16.mxu1 %v17704_v60  ;;  %v20621_v57 = vpop.f32.mrb[85].mxu1 }
 0x873   :  { %v20623_v20 = vpop.f32.mrb[86].mxu1 }
 0x874   :  { %v20627_v35 = vpop.f32.mrb[87].mxu1 }
 0x875   :  { %8089 = vmatpush1.bf16.msra.mxu1 %v17702_v51 }
 0x876   :  { %8090 = vmatprep.subr.bf16.mxu1 %v17707_v19  ;;  %v17720_v19 = vld [vmem:[#allocation8 + $0xbb0] ss:$8 sps:$4 sm:$0xff]  }
 0x879   :  { %8091 = vmatpush1.bf16.msra.mxu1 %v17705_v16  ;;  %v20631_v60 = vpop.f32.mrb[88].mxu1  ;;  %v17716_v16 = vld [vmem:[#allocation8 + $0xb94] ss:$8 sps:$4 sm:$0xff]  }
 0x87a   :  { %8092 = vmatprep.subr.bf16.mxu1 %v17710_v56  ;;  %v20633_v9 = vpop.f32.mrb[89].mxu1 }
 0x87b   :  { %v20635_v21 = vpop.f32.mrb[90].mxu1 }
 0x87c   :  { %v20639_v51 = vpop.f32.mrb[91].mxu1 }
 0x87d   :  { %8093 = vmatpush1.bf16.msra.mxu1 %v17708_v40 }
 0x87e   :  { %8094 = vmatprep.subr.bf16.mxu1 %v17713_v62  ;;  %v17726_v62 = vld [vmem:[#allocation8 + $0xbd0] ss:$8 sps:$4 sm:$0xff]  }
 0x881   :  { %8095 = vmatpush1.bf16.msra.mxu1 %v17711_v38  ;;  %v20643_v56 = vpop.f32.mrb[92].mxu1  ;;  %v17722_v38 = vld [vmem:[#allocation8 + $0xbb4] ss:$8 sps:$4 sm:$0xff]  }
 0x882   :  { %8096 = vmatprep.subr.bf16.mxu1 %v17716_v16  ;;  %v20645_v18 = vpop.f32.mrb[93].mxu1 }
 0x883   :  { %v20647_v1 = vpop.f32.mrb[94].mxu1 }
 0x884   :  { %v20651_v40 = vpop.f32.mrb[95].mxu1 }
 0x885   :  { %8097 = vmatpush1.bf16.msra.mxu1 %v17714_v3 }
 0x886   :  { %8098 = vmatprep.subr.bf16.mxu1 %v17719_v44  ;;  %v17732_v44 = vld [vmem:[#allocation8 + $0xbf0] ss:$8 sps:$4 sm:$0xff]  }
 0x889   :  { %8099 = vmatpush1.bf16.msra.mxu1 %v17717_v6  ;;  %v20655_v16 = vpop.f32.mrb[96].mxu1  ;;  %v17728_v6 = vld [vmem:[#allocation8 + $0xbd4] ss:$8 sps:$4 sm:$0xff]  }
 0x88a   :  { %8100 = vmatprep.subr.bf16.mxu1 %v17722_v38  ;;  %v20657_v50 = vpop.f32.mrb[97].mxu1 }
 0x88b   :  { %v20659_v4 = vpop.f32.mrb[98].mxu1 }
 0x88c   :  { %v20663_v3 = vpop.f32.mrb[99].mxu1 }
 0x88d   :  { %8101 = vmatpush1.bf16.msra.mxu1 %v17720_v19 }
 0x88e   :  { %8102 = vmatprep.subr.bf16.mxu1 %v17725_v32  ;;  %v17738_v32 = vld [vmem:[#allocation8 + $0xc10] ss:$8 sps:$4 sm:$0xff]  }
 0x891   :  { %8103 = vmatpush1.bf16.msra.mxu1 %v17723_v15  ;;  %v20667_v38 = vpop.f32.mrb[100].mxu1  ;;  %v17734_v15 = vld [vmem:[#allocation8 + $0xbf4] ss:$8 sps:$4 sm:$0xff]  }
 0x892   :  { %8104 = vmatprep.subr.bf16.mxu1 %v17728_v6  ;;  %v20669_v25 = vpop.f32.mrb[101].mxu1  ;;  %v17737_v6 = vld [vmem:[#allocation8 + $0xc04] ss:$8 sps:$4 sm:$0xff]  }
 0x893   :  { %v20671_v49 = vpop.f32.mrb[102].mxu1 }
 0x894   :  { %v20675_v19 = vpop.f32.mrb[103].mxu1 }
 0x895   :  { %8105 = vmatpush1.bf16.msra.mxu1 %v17726_v62  ;;  %v21012_v62 = vpack.c.bf16 %v20519_v47, %v20513_v33  ;;  %v17749_v33 = vld [vmem:[#allocation8 + $0xc44] ss:$8 sps:$4 sm:$0xff]   ;;  %v17750_v47 = vld [vmem:[#allocation8 + $0xc50] ss:$8 sps:$4 sm:$0xff]  }
 0x896   :  { %8106 = vmatprep.subr.bf16.mxu1 %v17731_v37  ;;  %v17743_v37 = vld [vmem:[#allocation8 + $0xc24] ss:$8 sps:$4 sm:$0xff]  }
 0x899   :  { %8107 = vmatpush1.bf16.msra.mxu1 %v17729_v23  ;;  %v17741_v23 = vld [vmem:[#allocation8 + $0xc20] ss:$8 sps:$4 sm:$0xff]  }
 0x89a   :  { %8108 = vmatprep.subr.bf16.mxu1 %v17734_v15  ;;  %v17746_v15 = vld [vmem:[#allocation8 + $0xc34] ss:$8 sps:$4 sm:$0xff]  }
 0x89d   :  { %8109 = vmatpush1.bf16.msra.mxu1 %v17732_v44  ;;  %v21013_v44 = vpack.c.bf16 %v20515_v36, %v20511_v12  ;;  %v17758_v12 = vld [vmem:[#allocation8 + $0xc74] ss:$8 sps:$4 sm:$0xff]   ;;  %v17756_v36 = vld [vmem:[#allocation8 + $0xc70] ss:$8 sps:$4 sm:$0xff]  }
 0x89e   :  { %8336 = vmatprep.subr.bf16.mxu1 %v17737_v6  ;;  %v17764_v6 = vld [vmem:[#allocation8 + $0xc94] ss:$8 sps:$4 sm:$0xff]  }
 0x8a0   :  { %8111 = vmatmul.mubr.bf16.vlgmr.msra.gmra.mrb[104].mxu1 %v21011_v48  ;;  %v17755_v48 = vld [vmem:[#allocation8 + $0xc64] ss:$8 sps:$4 sm:$0xff]  }
 0x8a1   :  { %8120 = vmatprep.mubr.bf16.mxu1 %v21012_v62  ;;  %8337 = vmatpush1.bf16.msra.mxu1 %v17735_v31  ;;  %v17747_v31 = vld [vmem:[#allocation8 + $0xc40] ss:$8 sps:$4 sm:$0xff]   ;;  %v17762_v62 = vld [vmem:[#allocation8 + $0xc90] ss:$8 sps:$4 sm:$0xff]  }
 0x8a2   :  { %8338 = vmatprep.subr.bf16.mxu1 %v17740_v13  ;;  %v17752_v13 = vld [vmem:[#allocation8 + $0xc54] ss:$8 sps:$4 sm:$0xff]  }
 0x8a5   :  { %8339 = vmatpush1.bf16.msra.mxu1 %v17738_v32  ;;  %v17753_v32 = vld [vmem:[#allocation8 + $0xc60] ss:$8 sps:$4 sm:$0xff]  }
 0x8a6   :  { %8340 = vmatprep.subr.bf16.mxu1 %v17743_v37  ;;  %v17767_v37 = vld [vmem:[#allocation8 + $0xca4] ss:$8 sps:$4 sm:$0xff]  }
 0x8a8   :  { %8121 = vmatmul.mubr.bf16.gmra.mrb[108].mxu1 %v21013_v44  ;;  %v17768_v44 = vld [vmem:[#allocation8 + $0xcb0] ss:$8 sps:$4 sm:$0xff]  }
 0x8a9   :  { %8341 = vmatpush1.bf16.msra.mxu1 %v17741_v23  ;;  %8368 = vmatprep.mubr.bf16.mxu1 %v21014_v29  ;;  %v17765_v23 = vld [vmem:[#allocation8 + $0xca0] ss:$8 sps:$4 sm:$0xff]   ;;  %v17773_v29 = vld [vmem:[#allocation8 + $0xcc4] ss:$8 sps:$4 sm:$0xff]  }
 0x8aa   :  { %8342 = vmatprep.subr.bf16.mxu1 %v17746_v15  ;;  %v17770_v15 = vld [vmem:[#allocation8 + $0xcb4] ss:$8 sps:$4 sm:$0xff]  }
 0x8ad   :  { %8343 = vmatpush1.bf16.msra.mxu1 %v17744_v7  ;;  %v17771_v7 = vld [vmem:[#allocation8 + $0xcc0] ss:$8 sps:$4 sm:$0xff]  }
 0x8ae   :  { %8344 = vmatprep.subr.bf16.mxu1 %v17749_v33  ;;  %v17776_v33 = vld [vmem:[#allocation8 + $0xcd4] ss:$8 sps:$4 sm:$0xff]  }
 0x8b1   :  { %8345 = vmatpush1.bf16.msra.mxu1 %v17747_v31  ;;  %v17774_v31 = vld [vmem:[#allocation8 + $0xcd0] ss:$8 sps:$4 sm:$0xff]  }
 0x8b2   :  { %8346 = vmatprep.subr.bf16.mxu1 %v17752_v13  ;;  %v17779_v13 = vld [vmem:[#allocation8 + $0xce4] ss:$8 sps:$4 sm:$0xff]  }
 0x8b5   :  { %8347 = vmatpush1.bf16.msra.mxu1 %v17750_v47  ;;  %v17777_v47 = vld [vmem:[#allocation8 + $0xce0] ss:$8 sps:$4 sm:$0xff]  }
 0x8b6   :  { %8348 = vmatprep.subr.bf16.mxu1 %v17755_v48  ;;  %v17782_v48 = vld [vmem:[#allocation8 + $0xcf4] ss:$8 sps:$4 sm:$0xff]  }
 0x8b9   :  { %8349 = vmatpush1.bf16.msra.mxu1 %v17753_v32  ;;  %v17780_v32 = vld [vmem:[#allocation8 + $0xcf0] ss:$8 sps:$4 sm:$0xff]  }
 0x8ba   :  { %8350 = vmatprep.subr.bf16.mxu1 %v17758_v12  ;;  %v17785_v12 = vld [vmem:[#allocation8 + $0xd04] ss:$8 sps:$4 sm:$0xff]  }
 0x8bd   :  { %8351 = vmatpush1.bf16.msra.mxu1 %v17756_v36  ;;  %v17783_v36 = vld [vmem:[#allocation8 + $0xd00] ss:$8 sps:$4 sm:$0xff]  }
 0x8be   :  { %8352 = vmatprep.subr.bf16.mxu1 %v17761_v30  ;;  %v17788_v30 = vld [vmem:[#allocation8 + $0xd14] ss:$8 sps:$4 sm:$0xff]  }
 0x8c1   :  { %8353 = vmatpush1.bf16.msra.mxu1 %v17759_v11  ;;  %v21015_v11 = vpack.c.bf16 %v20527_v52, %v20523_v24  ;;  %v21018_v24 = vpack.c.bf16 %v20555_v61, %v20549_v5  ;;  %v17792_v52 = vld [vmem:[#allocation8 + $0xd30] ss:$8 sps:$4 sm:$0xff]   ;;  %v17809_v5 = vld [vmem:[#allocation8 + $0xd84] ss:$8 sps:$4 sm:$0xff]   ;;  %v17807_v61 = vld [vmem:[#allocation8 + $0xd80] ss:$8 sps:$4 sm:$0xff]  }
 0x8c2   :  { %8354 = vmatprep.subr.bf16.mxu1 %v17764_v6  ;;  %v21016_v6 = vpack.c.bf16 %v20543_v2, %v20537_v59  ;;  %v17797_v59 = vld [vmem:[#allocation8 + $0xd44] ss:$8 sps:$4 sm:$0xff]   ;;  %v17795_v2 = vld [vmem:[#allocation8 + $0xd40] ss:$8 sps:$4 sm:$0xff]  }
 0x8c5   :  { %8355 = vmatpush1.bf16.msra.mxu1 %v17762_v62  ;;  %v17786_v62 = vld [vmem:[#allocation8 + $0xd10] ss:$8 sps:$4 sm:$0xff]  }
 0x8c6   :  { %8356 = vmatprep.subr.bf16.mxu1 %v17767_v37  ;;  %v17791_v37 = vld [vmem:[#allocation8 + $0xd24] ss:$8 sps:$4 sm:$0xff]  }
 0x8c9   :  { %8357 = vmatpush1.bf16.msra.mxu1 %v17765_v23  ;;  %v17789_v23 = vld [vmem:[#allocation8 + $0xd20] ss:$8 sps:$4 sm:$0xff]  }
 0x8ca   :  { %8358 = vmatprep.subr.bf16.mxu1 %v17770_v15  ;;  %v17794_v15 = vld [vmem:[#allocation8 + $0xd34] ss:$8 sps:$4 sm:$0xff]  }
 0x8cd   :  { %8359 = vmatpush1.bf16.msra.mxu1 %v17768_v44  ;;  %v21017_v44 = vpack.c.bf16 %v20539_v39, %v20535_v17  ;;  %v17806_v17 = vld [vmem:[#allocation8 + $0xd74] ss:$8 sps:$4 sm:$0xff]   ;;  %v17804_v39 = vld [vmem:[#allocation8 + $0xd70] ss:$8 sps:$4 sm:$0xff]  }
 0x8ce   :  { %8360 = vmatprep.subr.bf16.mxu1 %v17773_v29  ;;  %v17800_v29 = vld [vmem:[#allocation8 + $0xd54] ss:$8 sps:$4 sm:$0xff]  }
 0x8d1   :  { %8361 = vmatpush1.bf16.msra.mxu1 %v17771_v7  ;;  %v17798_v7 = vld [vmem:[#allocation8 + $0xd50] ss:$8 sps:$4 sm:$0xff]  }
 0x8d2   :  { %8362 = vmatprep.subr.bf16.mxu1 %v17776_v33  ;;  %v17803_v33 = vld [vmem:[#allocation8 + $0xd64] ss:$8 sps:$4 sm:$0xff]  }
 0x8d5   :  { %8363 = vmatpush1.bf16.msra.mxu1 %v17774_v31  ;;  %v17801_v31 = vld [vmem:[#allocation8 + $0xd60] ss:$8 sps:$4 sm:$0xff]  }
 0x8d6   :  { %8364 = vmatprep.subr.bf16.mxu1 %v17779_v13  ;;  %v17812_v13 = vld [vmem:[#allocation8 + $0xd94] ss:$8 sps:$4 sm:$0xff]  }
 0x8d9   :  { %8365 = vmatpush1.bf16.msra.mxu1 %v17777_v47  ;;  %v17810_v47 = vld [vmem:[#allocation8 + $0xd90] ss:$8 sps:$4 sm:$0xff]  }
 0x8da   :  { %8366 = vmatprep.subr.bf16.mxu1 %v17782_v48  ;;  %v17815_v48 = vld [vmem:[#allocation8 + $0xda4] ss:$8 sps:$4 sm:$0xff]  }
 0x8dd   :  { %8367 = vmatpush1.bf16.msra.mxu1 %v17780_v32  ;;  %v17813_v32 = vld [vmem:[#allocation8 + $0xda0] ss:$8 sps:$4 sm:$0xff]  }
 0x8de   :  { %8594 = vmatprep.subr.bf16.mxu1 %v17785_v12  ;;  %v17818_v12 = vld [vmem:[#allocation8 + $0xdb4] ss:$8 sps:$4 sm:$0xff]  }
 0x8e0   :  { %8369 = vmatmul.mubr.bf16.vlgmr.msra.gmra.mrb[104].mxu1 %v21015_v11  ;;  %v17819_v11 = vld [vmem:[#allocation8 + $0xdc0] ss:$8 sps:$4 sm:$0xff]  }
 0x8e1   :  { %8378 = vmatprep.mubr.bf16.mxu1 %v21016_v6  ;;  %8595 = vmatpush1.bf16.msra.mxu1 %v17783_v36  ;;  %v17816_v36 = vld [vmem:[#allocation8 + $0xdb0] ss:$8 sps:$4 sm:$0xff]   ;;  %v17824_v6 = vld [vmem:[#allocation8 + $0xdd4] ss:$8 sps:$4 sm:$0xff]  }
 0x8e2   :  { %8596 = vmatprep.subr.bf16.mxu1 %v17788_v30  ;;  %v17821_v30 = vld [vmem:[#allocation8 + $0xdc4] ss:$8 sps:$4 sm:$0xff]  }
 0x8e5   :  { %8597 = vmatpush1.bf16.msra.mxu1 %v17786_v62  ;;  %v17822_v62 = vld [vmem:[#allocation8 + $0xdd0] ss:$8 sps:$4 sm:$0xff]  }
 0x8e6   :  { %8598 = vmatprep.subr.bf16.mxu1 %v17791_v37  ;;  %v17827_v37 = vld [vmem:[#allocation8 + $0xde4] ss:$8 sps:$4 sm:$0xff]  }
 0x8e8   :  { %8379 = vmatmul.mubr.bf16.gmra.mrb[108].mxu1 %v21017_v44  ;;  %v17828_v44 = vld [vmem:[#allocation8 + $0xdf0] ss:$8 sps:$4 sm:$0xff]  }
 0x8e9   :  { %8599 = vmatpush1.bf16.msra.mxu1 %v17789_v23  ;;  %8626 = vmatprep.mubr.bf16.mxu1 %v21018_v24  ;;  %v17825_v23 = vld [vmem:[#allocation8 + $0xde0] ss:$8 sps:$4 sm:$0xff]   ;;  %v17833_v24 = vld [vmem:[#allocation8 + $0xe04] ss:$8 sps:$4 sm:$0xff]  }
 0x8ea   :  { %8600 = vmatprep.subr.bf16.mxu1 %v17794_v15  ;;  %v17830_v15 = vld [vmem:[#allocation8 + $0xdf4] ss:$8 sps:$4 sm:$0xff]  }
 0x8ed   :  { %8601 = vmatpush1.bf16.msra.mxu1 %v17792_v52  ;;  %v17831_v52 = vld [vmem:[#allocation8 + $0xe00] ss:$8 sps:$4 sm:$0xff]  }
 0x8ee   :  { %8602 = vmatprep.subr.bf16.mxu1 %v17797_v59  ;;  %v17836_v59 = vld [vmem:[#allocation8 + $0xe14] ss:$8 sps:$4 sm:$0xff]  }
 0x8f1   :  { %8603 = vmatpush1.bf16.msra.mxu1 %v17795_v2  ;;  %v21019_v2 = vpack.c.bf16 %v20551_v10, %v20547_v41  ;;  %v21022_v41 = vpack.c.bf16 %v20579_v26, %v20573_v0  ;;  %v17840_v10 = vld [vmem:[#allocation8 + $0xe30] ss:$8 sps:$4 sm:$0xff]   ;;  %v17854_v0 = vld [vmem:[#allocation8 + $0xe74] ss:$8 sps:$4 sm:$0xff]  }
 0x8f2   :  { %8604 = vmatprep.subr.bf16.mxu1 %v17800_v29  ;;  %v21020_v29 = vpack.c.bf16 %v20567_v55, %v20561_v63  ;;  %v17936_v63 = vld [vmem:[#allocation8 + $0x1300] ss:$8 sps:$4 sm:$0xff]   ;;  %v17938_v55 = vld [vmem:[#allocation8 + $0x1304] ss:$8 sps:$4 sm:$0xff]   ;;  %v17852_v26 = vld [vmem:[#allocation8 + $0xe70] ss:$8 sps:$4 sm:$0xff]  }
 0x8f3   :  { %10095 = vmatprep.subr.bf16.mxu0 %v17938_v55  ;;  %v17885_v55 = vld [vmem:[#allocation8 + $0xf20] ss:$8 sps:$4 sm:$0xff]  }
 0x8f4   :  { %10096 = vmatpush1.bf16.msra.mxu0 %v17936_v63  ;;  %v17887_v63 = vld [vmem:[#allocation8 + $0xf24] ss:$8 sps:$4 sm:$0xff]  }
 0x8f5   :  { %8605 = vmatpush1.bf16.msra.mxu1 %v17798_v7  ;;  %v17834_v7 = vld [vmem:[#allocation8 + $0xe10] ss:$8 sps:$4 sm:$0xff]  }
 0x8f6   :  { %8606 = vmatprep.subr.bf16.mxu1 %v17803_v33  ;;  %v17839_v33 = vld [vmem:[#allocation8 + $0xe24] ss:$8 sps:$4 sm:$0xff]  }
 0x8f9   :  { %8607 = vmatpush1.bf16.msra.mxu1 %v17801_v31  ;;  %v17837_v31 = vld [vmem:[#allocation8 + $0xe20] ss:$8 sps:$4 sm:$0xff]  }
 0x8fa   :  { %8608 = vmatprep.subr.bf16.mxu1 %v17806_v17  ;;  %v17842_v17 = vld [vmem:[#allocation8 + $0xe34] ss:$8 sps:$4 sm:$0xff]  }
 0x8fd   :  { %8609 = vmatpush1.bf16.msra.mxu1 %v17804_v39  ;;  %v21021_v39 = vpack.c.bf16 %v20563_v34, %v20559_v14  ;;  %v17851_v14 = vld [vmem:[#allocation8 + $0xe64] ss:$8 sps:$4 sm:$0xff]   ;;  %v17849_v34 = vld [vmem:[#allocation8 + $0xe60] ss:$8 sps:$4 sm:$0xff]  }
 0x8fe   :  { %8610 = vmatprep.subr.bf16.mxu1 %v17809_v5  ;;  %v17845_v5 = vld [vmem:[#allocation8 + $0xe44] ss:$8 sps:$4 sm:$0xff]  }
 0x901   :  { %8611 = vmatpush1.bf16.msra.mxu1 %v17807_v61  ;;  %v17843_v61 = vld [vmem:[#allocation8 + $0xe40] ss:$8 sps:$4 sm:$0xff]  }
 0x902   :  { %8612 = vmatprep.subr.bf16.mxu1 %v17812_v13  ;;  %v17848_v13 = vld [vmem:[#allocation8 + $0xe54] ss:$8 sps:$4 sm:$0xff]  }
 0x905   :  { %8613 = vmatpush1.bf16.msra.mxu1 %v17810_v47  ;;  %v17846_v47 = vld [vmem:[#allocation8 + $0xe50] ss:$8 sps:$4 sm:$0xff]  }
 0x906   :  { %8614 = vmatprep.subr.bf16.mxu1 %v17815_v48  ;;  %v17857_v48 = vld [vmem:[#allocation8 + $0xe84] ss:$8 sps:$4 sm:$0xff]  }
 0x909   :  { %8615 = vmatpush1.bf16.msra.mxu1 %v17813_v32  ;;  %v17855_v32 = vld [vmem:[#allocation8 + $0xe80] ss:$8 sps:$4 sm:$0xff]  }
 0x90a   :  { %8616 = vmatprep.subr.bf16.mxu1 %v17818_v12  ;;  %v17860_v12 = vld [vmem:[#allocation8 + $0xe94] ss:$8 sps:$4 sm:$0xff]  }
 0x90d   :  { %8617 = vmatpush1.bf16.msra.mxu1 %v17816_v36  ;;  %v17858_v36 = vld [vmem:[#allocation8 + $0xe90] ss:$8 sps:$4 sm:$0xff]  }
 0x90e   :  { %8618 = vmatprep.subr.bf16.mxu1 %v17821_v30  ;;  %v17863_v30 = vld [vmem:[#allocation8 + $0xea4] ss:$8 sps:$4 sm:$0xff]  }
 0x911   :  { %8619 = vmatpush1.bf16.msra.mxu1 %v17819_v11  ;;  %v17861_v11 = vld [vmem:[#allocation8 + $0xea0] ss:$8 sps:$4 sm:$0xff]  }
 0x912   :  { %8620 = vmatprep.subr.bf16.mxu1 %v17824_v6  ;;  %v17866_v6 = vld [vmem:[#allocation8 + $0xeb4] ss:$8 sps:$4 sm:$0xff]  }
 0x915   :  { %8621 = vmatpush1.bf16.msra.mxu1 %v17822_v62  ;;  %v17864_v62 = vld [vmem:[#allocation8 + $0xeb0] ss:$8 sps:$4 sm:$0xff]  }
 0x916   :  { %8622 = vmatprep.subr.bf16.mxu1 %v17827_v37  ;;  %v17869_v37 = vld [vmem:[#allocation8 + $0xec4] ss:$8 sps:$4 sm:$0xff]  }
 0x919   :  { %8623 = vmatpush1.bf16.msra.mxu1 %v17825_v23  ;;  %v17867_v23 = vld [vmem:[#allocation8 + $0xec0] ss:$8 sps:$4 sm:$0xff]  }
 0x91a   :  { %8624 = vmatprep.subr.bf16.mxu1 %v17830_v15  ;;  %v17966_v15 = vld [vmem:[#allocation8 + $0x1310] ss:$8 sps:$4 sm:$0xff]  }
 0x91d   :  { %8625 = vmatpush1.bf16.msra.mxu1 %v17828_v44  ;;  %v17968_v44 = vld [vmem:[#allocation8 + $0x1314] ss:$8 sps:$4 sm:$0xff]  }
 0x91e   :  { %8852 = vmatprep.subr.bf16.mxu1 %v17833_v24  ;;  %v17872_v24 = vld [vmem:[#allocation8 + $0xed4] ss:$8 sps:$4 sm:$0xff]   ;;  %10097 = vmatprep.subr.bf16.mxu0 %v17968_v44  ;;  %v17921_v44 = vld [vmem:[#allocation8 + $0xfe0] ss:$8 sps:$4 sm:$0xff]  }
 0x91f   :  { %10098 = vmatpush1.bf16.msra.mxu0 %v17966_v15  ;;  %v17923_v15 = vld [vmem:[#allocation8 + $0xfe4] ss:$8 sps:$4 sm:$0xff]  }
 0x920   :  { %8627 = vmatmul.mubr.bf16.vlgmr.msra.gmra.mrb[104].mxu1 %v21019_v2  ;;  %v17873_v2 = vld [vmem:[#allocation8 + $0xee0] ss:$8 sps:$4 sm:$0xff]  }
 0x921   :  { %8636 = vmatprep.mubr.bf16.mxu1 %v21020_v29  ;;  %8853 = vmatpush1.bf16.msra.mxu1 %v17831_v52  ;;  %v17870_v52 = vld [vmem:[#allocation8 + $0xed0] ss:$8 sps:$4 sm:$0xff]   ;;  %v17878_v29 = vld [vmem:[#allocation8 + $0xef4] ss:$8 sps:$4 sm:$0xff]  }
 0x922   :  { %8854 = vmatprep.subr.bf16.mxu1 %v17836_v59  ;;  %v17875_v59 = vld [vmem:[#allocation8 + $0xee4] ss:$8 sps:$4 sm:$0xff]  }
 0x925   :  { %8855 = vmatpush1.bf16.msra.mxu1 %v17834_v7  ;;  %v17876_v7 = vld [vmem:[#allocation8 + $0xef0] ss:$8 sps:$4 sm:$0xff]  }
 0x926   :  { %8856 = vmatprep.subr.bf16.mxu1 %v17839_v33  ;;  %v17881_v33 = vld [vmem:[#allocation8 + $0xf04] ss:$8 sps:$4 sm:$0xff]  }
 0x928   :  { %8637 = vmatmul.mubr.bf16.gmra.mrb[108].mxu1 %v21021_v39  ;;  %v21023_v39 = vpack.c.bf16 %v20575_v28, %v20571_v22  ;;  %v21026_v22 = vpack.c.bf16 %v20615_v43, %v20609_v42  ;;  %v17888_v28 = vld [vmem:[#allocation8 + $0xf30] ss:$8 sps:$4 sm:$0xff]   ;;  %v17905_v43 = vld [vmem:[#allocation8 + $0xf84] ss:$8 sps:$4 sm:$0xff]  }
 0x929   :  { %8857 = vmatpush1.bf16.msra.mxu1 %v17837_v31  ;;  %8884 = vmatprep.mubr.bf16.mxu1 %v21022_v41  ;;  %v17879_v31 = vld [vmem:[#allocation8 + $0xf00] ss:$8 sps:$4 sm:$0xff]   ;;  %v21024_v41 = vpack.c.bf16 %v20597_v53, %v20591_v8  ;;  %v17893_v8 = vld [vmem:[#allocation8 + $0xf44] ss:$8 sps:$4 sm:$0xff]   ;;  %v17900_v42 = vld [vmem:[#allocation8 + $0xf70] ss:$8 sps:$4 sm:$0xff]  }
 0x92a   :  { %8858 = vmatprep.subr.bf16.mxu1 %v17842_v17  ;;  %v17884_v17 = vld [vmem:[#allocation8 + $0xf14] ss:$8 sps:$4 sm:$0xff]   ;;  %v17891_v53 = vld [vmem:[#allocation8 + $0xf40] ss:$8 sps:$4 sm:$0xff]  }
 0x92d   :  { %8859 = vmatpush1.bf16.msra.mxu1 %v17840_v10  ;;  %v17882_v10 = vld [vmem:[#allocation8 + $0xf10] ss:$8 sps:$4 sm:$0xff]  }
 0x92e   :  { %8860 = vmatprep.subr.bf16.mxu1 %v17845_v5  ;;  %v17890_v5 = vld [vmem:[#allocation8 + $0xf34] ss:$8 sps:$4 sm:$0xff]  }
 0x931   :  { %8861 = vmatpush1.bf16.msra.mxu1 %v17843_v61  ;;  %v21025_v61 = vpack.c.bf16 %v20593_v54, %v20589_v45  ;;  %v17897_v45 = vld [vmem:[#allocation8 + $0xf60] ss:$8 sps:$4 sm:$0xff]   ;;  %v17902_v54 = vld [vmem:[#allocation8 + $0xf74] ss:$8 sps:$4 sm:$0xff]  }
 0x932   :  { %8862 = vmatprep.subr.bf16.mxu1 %v17848_v13  ;;  %v17896_v13 = vld [vmem:[#allocation8 + $0xf54] ss:$8 sps:$4 sm:$0xff]  }
 0x935   :  { %8863 = vmatpush1.bf16.msra.mxu1 %v17846_v47  ;;  %v17894_v47 = vld [vmem:[#allocation8 + $0xf50] ss:$8 sps:$4 sm:$0xff]  }
 0x936   :  { %8864 = vmatprep.subr.bf16.mxu1 %v17851_v14  ;;  %v17996_v14 = vld [vmem:[#allocation8 + $0x1320] ss:$8 sps:$4 sm:$0xff]  }
 0x939   :  { %8865 = vmatpush1.bf16.msra.mxu1 %v17849_v34  ;;  %v17998_v34 = vld [vmem:[#allocation8 + $0x1324] ss:$8 sps:$4 sm:$0xff]  }
 0x93a   :  { %8866 = vmatprep.subr.bf16.mxu1 %v17854_v0  ;;  %v17899_v0 = vld [vmem:[#allocation8 + $0xf64] ss:$8 sps:$4 sm:$0xff]   ;;  %10099 = vmatprep.subr.bf16.mxu0 %v17998_v34  ;;  %v17953_v34 = vld [vmem:[#allocation8 + $0x1074] ss:$8 sps:$4 sm:$0xff]  }
 0x93b   :  { %10100 = vmatpush1.bf16.msra.mxu0 %v17996_v14  ;;  %v17948_v14 = vld [vmem:[#allocation8 + $0x1060] ss:$8 sps:$4 sm:$0xff]  }
 0x93d   :  { %8867 = vmatpush1.bf16.msra.mxu1 %v17852_v26  ;;  %v17903_v26 = vld [vmem:[#allocation8 + $0xf80] ss:$8 sps:$4 sm:$0xff]  }
 0x93e   :  { %8868 = vmatprep.subr.bf16.mxu1 %v17857_v48  ;;  %v17908_v48 = vld [vmem:[#allocation8 + $0xf94] ss:$8 sps:$4 sm:$0xff]  }
 0x941   :  { %8869 = vmatpush1.bf16.msra.mxu1 %v17855_v32  ;;  %v17906_v32 = vld [vmem:[#allocation8 + $0xf90] ss:$8 sps:$4 sm:$0xff]  }
 0x942   :  { %8870 = vmatprep.subr.bf16.mxu1 %v17860_v12  ;;  %v17911_v12 = vld [vmem:[#allocation8 + $0xfa4] ss:$8 sps:$4 sm:$0xff]  }
 0x945   :  { %8871 = vmatpush1.bf16.msra.mxu1 %v17858_v36  ;;  %v17909_v36 = vld [vmem:[#allocation8 + $0xfa0] ss:$8 sps:$4 sm:$0xff]  }
 0x946   :  { %8872 = vmatprep.subr.bf16.mxu1 %v17863_v30  ;;  %v17914_v30 = vld [vmem:[#allocation8 + $0xfb4] ss:$8 sps:$4 sm:$0xff]  }
 0x949   :  { %8873 = vmatpush1.bf16.msra.mxu1 %v17861_v11  ;;  %v17912_v11 = vld [vmem:[#allocation8 + $0xfb0] ss:$8 sps:$4 sm:$0xff]  }
 0x94a   :  { %8874 = vmatprep.subr.bf16.mxu1 %v17866_v6  ;;  %v17917_v6 = vld [vmem:[#allocation8 + $0xfc4] ss:$8 sps:$4 sm:$0xff]  }
 0x94d   :  { %8875 = vmatpush1.bf16.msra.mxu1 %v17864_v62  ;;  %v17915_v62 = vld [vmem:[#allocation8 + $0xfc0] ss:$8 sps:$4 sm:$0xff]  }
 0x94e   :  { %8876 = vmatprep.subr.bf16.mxu1 %v17869_v37  ;;  %v17920_v37 = vld [vmem:[#allocation8 + $0xfd4] ss:$8 sps:$4 sm:$0xff]  }
 0x951   :  { %8877 = vmatpush1.bf16.msra.mxu1 %v17867_v23  ;;  %v17918_v23 = vld [vmem:[#allocation8 + $0xfd0] ss:$8 sps:$4 sm:$0xff]  }
 0x952   :  { %8878 = vmatprep.subr.bf16.mxu1 %v17872_v24  ;;  %v18026_v24 = vld [vmem:[#allocation8 + $0x1330] ss:$8 sps:$4 sm:$0xff]  }
 0x955   :  { %8879 = vmatpush1.bf16.msra.mxu1 %v17870_v52  ;;  %v18028_v52 = vld [vmem:[#allocation8 + $0x1334] ss:$8 sps:$4 sm:$0xff]  }
 0x956   :  { %8880 = vmatprep.subr.bf16.mxu1 %v17875_v59  ;;  %v17926_v59 = vld [vmem:[#allocation8 + $0xff4] ss:$8 sps:$4 sm:$0xff]   ;;  %10101 = vmatprep.subr.bf16.mxu0 %v18028_v52  ;;  %v17978_v52 = vld [vmem:[#allocation8 + $0x10f0] ss:$8 sps:$4 sm:$0xff]  }
 0x957   :  { %10102 = vmatpush1.bf16.msra.mxu0 %v18026_v24  ;;  %v17980_v24 = vld [vmem:[#allocation8 + $0x10f4] ss:$8 sps:$4 sm:$0xff]  }
 0x959   :  { %8881 = vmatpush1.bf16.msra.mxu1 %v17873_v2  ;;  %v17924_v2 = vld [vmem:[#allocation8 + $0xff0] ss:$8 sps:$4 sm:$0xff]  }
 0x95a   :  { %8882 = vmatprep.subr.bf16.mxu1 %v17878_v29  ;;  %v17929_v29 = vld [vmem:[#allocation8 + $0x1004] ss:$8 sps:$4 sm:$0xff]  }
 0x95d   :  { %8883 = vmatpush1.bf16.msra.mxu1 %v17876_v7  ;;  %v17927_v7 = vld [vmem:[#allocation8 + $0x1000] ss:$8 sps:$4 sm:$0xff]  }
 0x95e   :  { %9110 = vmatprep.subr.bf16.mxu1 %v17881_v33  ;;  %v17932_v33 = vld [vmem:[#allocation8 + $0x1014] ss:$8 sps:$4 sm:$0xff]  }
 0x960   :  { %8885 = vmatmul.mubr.bf16.vlgmr.msra.gmra.mrb[104].mxu1 %v21023_v39  ;;  %v17930_v39 = vld [vmem:[#allocation8 + $0x1010] ss:$8 sps:$4 sm:$0xff]  }
 0x961   :  { %8894 = vmatprep.mubr.bf16.mxu1 %v21024_v41  ;;  %9111 = vmatpush1.bf16.msra.mxu1 %v17879_v31  ;;  %v21027_v31 = vpack.c.bf16 %v20611_v58, %v20607_v27  ;;  %v17935_v41 = vld [vmem:[#allocation8 + $0x1024] ss:$8 sps:$4 sm:$0xff]   ;;  %v21030_v27 = vpack.c.bf16 %v20639_v51, %v20633_v9  ;;  %v17939_v58 = vld [vmem:[#allocation8 + $0x1030] ss:$8 sps:$4 sm:$0xff]  }
 0x962   :  { %9112 = vmatprep.subr.bf16.mxu1 %v17884_v17  ;;  %v21028_v17 = vpack.c.bf16 %v20627_v35, %v20621_v57  ;;  %v18040_v57 = vld [vmem:[#allocation8 + $0x1354] ss:$8 sps:$4 sm:$0xff]   ;;  %v17944_v35 = vld [vmem:[#allocation8 + $0x1044] ss:$8 sps:$4 sm:$0xff]   ;;  %v17945_v9 = vld [vmem:[#allocation8 + $0x1050] ss:$8 sps:$4 sm:$0xff]  }
 0x963   :  { %v17950_v51 = vld [vmem:[#allocation8 + $0x1064] ss:$8 sps:$4 sm:$0xff]  }
 0x965   :  { %9113 = vmatpush1.bf16.msra.mxu1 %v17882_v10  ;;  %v17933_v10 = vld [vmem:[#allocation8 + $0x1020] ss:$8 sps:$4 sm:$0xff]  }
 0x966   :  { %9114 = vmatprep.subr.bf16.mxu1 %v17887_v63  ;;  %v17941_v63 = vld [vmem:[#allocation8 + $0x1034] ss:$8 sps:$4 sm:$0xff]  }
 0x968   :  { %8895 = vmatmul.mubr.bf16.gmra.mrb[108].mxu1 %v21025_v61  ;;  %v18037_v61 = vld [vmem:[#allocation8 + $0x1344] ss:$8 sps:$4 sm:$0xff]  }
 0x969   :  { %9115 = vmatpush1.bf16.msra.mxu1 %v17885_v55  ;;  %9142 = vmatprep.mubr.bf16.mxu1 %v21026_v22  ;;  %v21029_v55 = vpack.c.bf16 %v20623_v20, %v20619_v46  ;;  %v18038_v22 = vld [vmem:[#allocation8 + $0x1350] ss:$8 sps:$4 sm:$0xff]   ;;  %v17947_v46 = vld [vmem:[#allocation8 + $0x1054] ss:$8 sps:$4 sm:$0xff]   ;;  %v18041_v20 = vld [vmem:[#allocation8 + $0x1360] ss:$8 sps:$4 sm:$0xff]  }
 0x96a   :  { %9116 = vmatprep.subr.bf16.mxu1 %v17890_v5  ;;  %v18035_v5 = vld [vmem:[#allocation8 + $0x1340] ss:$8 sps:$4 sm:$0xff]   ;;  %10103 = vmatprep.subr.bf16.mxu0 %v18037_v61 }
 0x96b   :  { %10104 = vmatpush1.bf16.msra.mxu0 %v18035_v5  ;;  %v18004_v5 = vld [vmem:[#allocation8 + $0x1164] ss:$8 sps:$4 sm:$0xff]   ;;  %v18002_v61 = vld [vmem:[#allocation8 + $0x1160] ss:$8 sps:$4 sm:$0xff]  }
 0x96c   :  { %10105 = vmatprep.subr.bf16.mxu0 %v18040_v57  ;;  %v18016_v57 = vld [vmem:[#allocation8 + $0x11a4] ss:$8 sps:$4 sm:$0xff]  }
 0x96d   :  { %9117 = vmatpush1.bf16.msra.mxu1 %v17888_v28  ;;  %v18043_v28 = vld [vmem:[#allocation8 + $0x1364] ss:$8 sps:$4 sm:$0xff]  }
 0x96e   :  { %9118 = vmatprep.subr.bf16.mxu1 %v17893_v8  ;;  %v17942_v8 = vld [vmem:[#allocation8 + $0x1040] ss:$8 sps:$4 sm:$0xff]  }
 0x96f   :  { %10106 = vmatpush1.bf16.msra.mxu0 %v18038_v22  ;;  %v18019_v22 = vld [vmem:[#allocation8 + $0x11b4] ss:$8 sps:$4 sm:$0xff]  }
 0x970   :  { %10107 = vmatprep.subr.bf16.mxu0 %v18043_v28  ;;  %v18017_v28 = vld [vmem:[#allocation8 + $0x11b0] ss:$8 sps:$4 sm:$0xff]  }
 0x971   :  { %9119 = vmatpush1.bf16.msra.mxu1 %v17891_v53  ;;  %v18046_v53 = vld [vmem:[#allocation8 + $0x1374] ss:$8 sps:$4 sm:$0xff]  }
 0x972   :  { %9120 = vmatprep.subr.bf16.mxu1 %v17896_v13  ;;  %v18044_v13 = vld [vmem:[#allocation8 + $0x1370] ss:$8 sps:$4 sm:$0xff]  }
 0x973   :  { %10108 = vmatpush1.bf16.msra.mxu0 %v18041_v20  ;;  %v18025_v20 = vld [vmem:[#allocation8 + $0x11d4] ss:$8 sps:$4 sm:$0xff]  }
 0x974   :  { %10109 = vmatprep.subr.bf16.mxu0 %v18046_v53  ;;  %v18023_v53 = vld [vmem:[#allocation8 + $0x11d0] ss:$8 sps:$4 sm:$0xff]  }
 0x975   :  { %9121 = vmatpush1.bf16.msra.mxu1 %v17894_v47  ;;  %v18049_v47 = vld [vmem:[#allocation8 + $0x1384] ss:$8 sps:$4 sm:$0xff]  }
 0x976   :  { %9122 = vmatprep.subr.bf16.mxu1 %v17899_v0  ;;  %v18047_v0 = vld [vmem:[#allocation8 + $0x1380] ss:$8 sps:$4 sm:$0xff]  }
 0x977   :  { %10110 = vmatpush1.bf16.msra.mxu0 %v18044_v13  ;;  %v18034_v13 = vld [vmem:[#allocation8 + $0x11f4] ss:$8 sps:$4 sm:$0xff]  }
 0x978   :  { %10111 = vmatprep.subr.bf16.mxu0 %v18049_v47  ;;  %v18032_v47 = vld [vmem:[#allocation8 + $0x11f0] ss:$8 sps:$4 sm:$0xff]  }
 0x979   :  { %9123 = vmatpush1.bf16.msra.mxu1 %v17897_v45  ;;  %v18052_v45 = vld [vmem:[#allocation8 + $0x1394] ss:$8 sps:$4 sm:$0xff]  }
 0x97a   :  { %9124 = vmatprep.subr.bf16.mxu1 %v17902_v54  ;;  %v17951_v54 = vld [vmem:[#allocation8 + $0x1070] ss:$8 sps:$4 sm:$0xff]  }
 0x97b   :  { %10112 = vmatpush1.bf16.msra.mxu0 %v18047_v0  ;;  %v21037_v0 = vpack.c.bf16 %v20671_v49, %v20667_v38  ;;  %v18068_v49 = vld [vmem:[#allocation8 + $0x13e0] ss:$8 sps:$4 sm:$0xff]   ;;  %v18070_v38 = vld [vmem:[#allocation8 + $0x13e4] ss:$8 sps:$4 sm:$0xff]  }
 0x97c   :  { %10113 = vmatprep.subr.bf16.mxu0 %v18052_v45  ;;  %v21038_v45 = vmov 0  }
 0x97d   :  { %9125 = vmatpush1.bf16.msra.mxu1 %v17900_v42  ;;  %v17956_v42 = vld [vmem:[#allocation8 + $0x1084] ss:$8 sps:$4 sm:$0xff]  }
 0x97e   :  { %9126 = vmatprep.subr.bf16.mxu1 %v17905_v43  ;;  %v18050_v43 = vld [vmem:[#allocation8 + $0x1390] ss:$8 sps:$4 sm:$0xff]  }
 0x97f   :  { %10114 = vmatpush1.bf16.msra.mxu0 %v18050_v43  ;;  %v18059_v43 = vld [vmem:[#allocation8 + $0x13b4] ss:$8 sps:$4 sm:$0xff]  }
 0x981   :  { %9127 = vmatpush1.bf16.msra.mxu1 %v17903_v26  ;;  %v17954_v26 = vld [vmem:[#allocation8 + $0x1080] ss:$8 sps:$4 sm:$0xff]  }
 0x982   :  { %9128 = vmatprep.subr.bf16.mxu1 %v17908_v48  ;;  %v17959_v48 = vld [vmem:[#allocation8 + $0x1094] ss:$8 sps:$4 sm:$0xff]  }
 0x985   :  { %9129 = vmatpush1.bf16.msra.mxu1 %v17906_v32  ;;  %v17957_v32 = vld [vmem:[#allocation8 + $0x1090] ss:$8 sps:$4 sm:$0xff]  }
 0x986   :  { %9130 = vmatprep.subr.bf16.mxu1 %v17911_v12  ;;  %v17962_v12 = vld [vmem:[#allocation8 + $0x10a4] ss:$8 sps:$4 sm:$0xff]  }
 0x989   :  { %9131 = vmatpush1.bf16.msra.mxu1 %v17909_v36  ;;  %v17960_v36 = vld [vmem:[#allocation8 + $0x10a0] ss:$8 sps:$4 sm:$0xff]  }
 0x98a   :  { %9132 = vmatprep.subr.bf16.mxu1 %v17914_v30  ;;  %v17965_v30 = vld [vmem:[#allocation8 + $0x10b4] ss:$8 sps:$4 sm:$0xff]  }
 0x98d   :  { %9133 = vmatpush1.bf16.msra.mxu1 %v17912_v11  ;;  %v17963_v11 = vld [vmem:[#allocation8 + $0x10b0] ss:$8 sps:$4 sm:$0xff]  }
 0x98e   :  { %9134 = vmatprep.subr.bf16.mxu1 %v17917_v6  ;;  %v17971_v6 = vld [vmem:[#allocation8 + $0x10c4] ss:$8 sps:$4 sm:$0xff]  }
 0x991   :  { %9135 = vmatpush1.bf16.msra.mxu1 %v17915_v62  ;;  %v17969_v62 = vld [vmem:[#allocation8 + $0x10c0] ss:$8 sps:$4 sm:$0xff]  }
 0x992   :  { %9136 = vmatprep.subr.bf16.mxu1 %v17920_v37  ;;  %v17974_v37 = vld [vmem:[#allocation8 + $0x10d4] ss:$8 sps:$4 sm:$0xff]  }
 0x995   :  { %9137 = vmatpush1.bf16.msra.mxu1 %v17918_v23  ;;  %v17972_v23 = vld [vmem:[#allocation8 + $0x10d0] ss:$8 sps:$4 sm:$0xff]  }
 0x996   :  { %9138 = vmatprep.subr.bf16.mxu1 %v17923_v15  ;;  %v17977_v15 = vld [vmem:[#allocation8 + $0x10e4] ss:$8 sps:$4 sm:$0xff]  }
 0x999   :  { %9139 = vmatpush1.bf16.msra.mxu1 %v17921_v44  ;;  %v17975_v44 = vld [vmem:[#allocation8 + $0x10e0] ss:$8 sps:$4 sm:$0xff]  }
 0x99a   :  { %9140 = vmatprep.subr.bf16.mxu1 %v17926_v59  ;;  %v17983_v59 = vld [vmem:[#allocation8 + $0x1104] ss:$8 sps:$4 sm:$0xff]  }
 0x99d   :  { %9141 = vmatpush1.bf16.msra.mxu1 %v17924_v2  ;;  %v17981_v2 = vld [vmem:[#allocation8 + $0x1100] ss:$8 sps:$4 sm:$0xff]  }
 0x99e   :  { %9368 = vmatprep.subr.bf16.mxu1 %v17929_v29  ;;  %v17986_v29 = vld [vmem:[#allocation8 + $0x1114] ss:$8 sps:$4 sm:$0xff]  }
 0x9a0   :  { %9143 = vmatmul.mubr.bf16.vlgmr.msra.gmra.mrb[104].mxu1 %v21027_v31  ;;  %v17984_v31 = vld [vmem:[#allocation8 + $0x1110] ss:$8 sps:$4 sm:$0xff]  }
 0x9a1   :  { %9152 = vmatprep.mubr.bf16.mxu1 %v21028_v17  ;;  %9369 = vmatpush1.bf16.msra.mxu1 %v17927_v7  ;;  %v21031_v7 = vpack.c.bf16 %v20635_v21, %v20631_v60  ;;  %v17989_v17 = vld [vmem:[#allocation8 + $0x1124] ss:$8 sps:$4 sm:$0xff]   ;;  %v21034_v21 = vpack.c.bf16 %v20663_v3, %v20657_v50  ;;  %v17990_v60 = vld [vmem:[#allocation8 + $0x1130] ss:$8 sps:$4 sm:$0xff]   ;;  %v18008_v3 = vld [vmem:[#allocation8 + $0x1180] ss:$8 sps:$4 sm:$0xff]  }
 0x9a2   :  { %9370 = vmatprep.subr.bf16.mxu1 %v17932_v33  ;;  %v21032_v33 = vpack.c.bf16 %v20651_v40, %v20645_v18  ;;  %v17995_v18 = vld [vmem:[#allocation8 + $0x1144] ss:$8 sps:$4 sm:$0xff]   ;;  %v17993_v40 = vld [vmem:[#allocation8 + $0x1140] ss:$8 sps:$4 sm:$0xff]  }
 0x9a3   :  { %v18010_v50 = vld [vmem:[#allocation8 + $0x1184] ss:$8 sps:$4 sm:$0xff]  }
 0x9a5   :  { %9371 = vmatpush1.bf16.msra.mxu1 %v17930_v39  ;;  %v17987_v39 = vld [vmem:[#allocation8 + $0x1120] ss:$8 sps:$4 sm:$0xff]  }
 0x9a6   :  { %9372 = vmatprep.subr.bf16.mxu1 %v17935_v41  ;;  %v17992_v41 = vld [vmem:[#allocation8 + $0x1134] ss:$8 sps:$4 sm:$0xff]  }
 0x9a8   :  { %9153 = vmatmul.mubr.bf16.gmra.mrb[108].mxu1 %v21029_v55  ;;  %v17999_v55 = vld [vmem:[#allocation8 + $0x1150] ss:$8 sps:$4 sm:$0xff]  }
 0x9a9   :  { %9373 = vmatpush1.bf16.msra.mxu1 %v17933_v10  ;;  %9400 = vmatprep.mubr.bf16.mxu1 %v21030_v27  ;;  %v21033_v10 = vpack.c.bf16 %v20647_v1, %v20643_v56  ;;  %v18007_v1 = vld [vmem:[#allocation8 + $0x1174] ss:$8 sps:$4 sm:$0xff]   ;;  %v18005_v56 = vld [vmem:[#allocation8 + $0x1170] ss:$8 sps:$4 sm:$0xff]  }
 0x9aa   :  { %9374 = vmatprep.subr.bf16.mxu1 %v17941_v63  ;;  %v18001_v63 = vld [vmem:[#allocation8 + $0x1154] ss:$8 sps:$4 sm:$0xff]  }
 0x9ab   :  { %v18013_v27 = vld [vmem:[#allocation8 + $0x1194] ss:$8 sps:$4 sm:$0xff]  }
 0x9ad   :  { %9375 = vmatpush1.bf16.msra.mxu1 %v17939_v58  ;;  %v18011_v58 = vld [vmem:[#allocation8 + $0x1190] ss:$8 sps:$4 sm:$0xff]  }
 0x9ae   :  { %9376 = vmatprep.subr.bf16.mxu1 %v17944_v35  ;;  %v18014_v35 = vld [vmem:[#allocation8 + $0x11a0] ss:$8 sps:$4 sm:$0xff]  }
 0x9b1   :  { %9377 = vmatpush1.bf16.msra.mxu1 %v17942_v8  ;;  %v18022_v8 = vld [vmem:[#allocation8 + $0x11c4] ss:$8 sps:$4 sm:$0xff]  }
 0x9b2   :  { %9378 = vmatprep.subr.bf16.mxu1 %v17947_v46  ;;  %v18020_v46 = vld [vmem:[#allocation8 + $0x11c0] ss:$8 sps:$4 sm:$0xff]  }
 0x9b5   :  { %9379 = vmatpush1.bf16.msra.mxu1 %v17945_v9  ;;  %v18031_v9 = vld [vmem:[#allocation8 + $0x11e4] ss:$8 sps:$4 sm:$0xff]  }
 0x9b6   :  { %9380 = vmatprep.subr.bf16.mxu1 %v17950_v51  ;;  %v18029_v51 = vld [vmem:[#allocation8 + $0x11e0] ss:$8 sps:$4 sm:$0xff]  }
 0x9b9   :  { %9381 = vmatpush1.bf16.msra.mxu1 %v17948_v14  ;;  %v21035_v14 = vpack.c.bf16 %v20659_v4, %v20655_v16  ;;  %v18061_v4 = vld [vmem:[#allocation8 + $0x13c0] ss:$8 sps:$4 sm:$0xff]   ;;  %v18063_v16 = vld [vmem:[#allocation8 + $0x13c4] ss:$8 sps:$4 sm:$0xff]  }
 0x9ba   :  { %9382 = vmatprep.subr.bf16.mxu1 %v17953_v34  ;;  %v21036_v34 = vpack.c.bf16 %v20675_v19, %v20669_v25  ;;  %v18064_v25 = vld [vmem:[#allocation8 + $0x13d0] ss:$8 sps:$4 sm:$0xff]   ;;  %v18073_v19 = vld [vmem:[#allocation8 + $0x13f4] ss:$8 sps:$4 sm:$0xff]  }
 0x9bd   :  { %9383 = vmatpush1.bf16.msra.mxu1 %v17951_v54  ;;  %v18054_v54 = vld [vmem:[#allocation8 + $0x13a0] ss:$8 sps:$4 sm:$0xff]  }
 0x9be   :  { %9384 = vmatprep.subr.bf16.mxu1 %v17956_v42  ;;  %v18056_v42 = vld [vmem:[#allocation8 + $0x13a4] ss:$8 sps:$4 sm:$0xff]  }
 0x9bf   :  { %10115 = vmatprep.subr.bf16.mxu0 %v18056_v42  ;;  %v18095_v42 = vld [vmem:[#allocation8 + $0x1434] ss:$8 sps:$4 sm:$0xff]  }
 0x9c0   :  { %10116 = vmatpush1.bf16.msra.mxu0 %v18054_v54  ;;  %v18087_v54 = vld [vmem:[#allocation8 + $0x1420] ss:$8 sps:$4 sm:$0xff]  }
 0x9c1   :  { %9385 = vmatpush1.bf16.msra.mxu1 %v17954_v26  ;;  %v18057_v26 = vld [vmem:[#allocation8 + $0x13b0] ss:$8 sps:$4 sm:$0xff]   ;;  %10117 = vmatprep.subr.bf16.mxu0 %v18059_v43 }
 0x9c2   :  { %9386 = vmatprep.subr.bf16.mxu1 %v17959_v48  ;;  %v18066_v48 = vld [vmem:[#allocation8 + $0x13d4] ss:$8 sps:$4 sm:$0xff]   ;;  %v18093_v43 = vld [vmem:[#allocation8 + $0x1430] ss:$8 sps:$4 sm:$0xff]  }
 0x9c4   :  { %10118 = vmatpush1.bf16.msra.mxu0 %v18057_v26  ;;  %v18101_v26 = vld [vmem:[#allocation8 + $0x1444] ss:$8 sps:$4 sm:$0xff]  }
 0x9c5   :  { %9387 = vmatpush1.bf16.msra.mxu1 %v17957_v32  ;;  %10119 = vmatprep.subr.bf16.mxu0 %v18063_v16  ;;  %v18071_v32 = vld [vmem:[#allocation8 + $0x13f0] ss:$8 sps:$4 sm:$0xff]   ;;  %v18107_v16 = vld [vmem:[#allocation8 + $0x1454] ss:$8 sps:$4 sm:$0xff]  }
 0x9c6   :  { %9388 = vmatprep.subr.bf16.mxu1 %v17962_v12  ;;  %v9688_v12 = vld [vmem:[#allocation10 + $0x2] sm:$0x3] }
 0x9c8   :  { %10120 = vmatpush1.bf16.msra.mxu0 %v18061_v4  ;;  %v18099_v4 = vld [vmem:[#allocation8 + $0x1440] ss:$8 sps:$4 sm:$0xff]  }
 0x9c9   :  { %9389 = vmatpush1.bf16.msra.mxu1 %v17960_v36  ;;  %10121 = vmatprep.subr.bf16.mxu0 %v18066_v48  ;;  %v21039_v36 = vld [vmem:[#allocation18_spill] sm:$0xff] }
 0x9ca   :  { %9390 = vmatprep.subr.bf16.mxu1 %v17965_v30  ;;  %v9693_v30 = vrot.slane %v9688_v12, %v21039_v36  ;;  %v18105_v48 = vld [vmem:[#allocation8 + $0x1450] ss:$8 sps:$4 sm:$0xff]  }
 0x9cc   :  { %10122 = vmatpush1.bf16.msra.mxu0 %v18064_v25  ;;  %v18113_v25 = vld [vmem:[#allocation8 + $0x1464] ss:$8 sps:$4 sm:$0xff]  }
 0x9cd   :  { %9391 = vmatpush1.bf16.msra.mxu1 %v17963_v11  ;;  %10123 = vmatprep.subr.bf16.mxu0 %v18070_v38  ;;  %v21040_v11 = vld [vmem:[#allocation19_spill] sm:$0xff] }
 0x9ce   :  { %9392 = vmatprep.subr.bf16.mxu1 %v17971_v6  ;;  %v9697_v6 = vrot.slane %v9688_v12, %v21040_v11  ;;  %v18119_v38 = vld [vmem:[#allocation8 + $0x1474] ss:$8 sps:$4 sm:$0xff]   ;;  %v18123_v12 = vld [vmem:[#allocation8 + $0x1480] ss:$8 sps:$4 sm:$0xff]  }
 0x9d0   :  { %10124 = vmatpush1.bf16.msra.mxu0 %v18068_v49  ;;  %v18111_v49 = vld [vmem:[#allocation8 + $0x1460] ss:$8 sps:$4 sm:$0xff]  }
 0x9d1   :  { %9393 = vmatpush1.bf16.msra.mxu1 %v17969_v62  ;;  %10125 = vmatprep.subr.bf16.mxu0 %v18073_v19  ;;  %v18117_v19 = vld [vmem:[#allocation8 + $0x1470] ss:$8 sps:$4 sm:$0xff]  }
 0x9d2   :  { %9394 = vmatprep.subr.bf16.mxu1 %v17974_v37 }
 0x9d4   :  { %10126 = vmatpush1.bf16.msra.mxu0 %v18071_v32  ;;  %v18125_v32 = vld [vmem:[#allocation8 + $0x1484] ss:$8 sps:$4 sm:$0xff]  }
 0x9d5   :  { %9395 = vmatpush1.bf16.msra.mxu1 %v17972_v23 }
 0x9d6   :  { %9396 = vmatprep.subr.bf16.mxu1 %v17977_v15 }
 0x9d9   :  { %9397 = vmatpush1.bf16.msra.mxu1 %v17975_v44 }
 0x9da   :  { %9398 = vmatprep.subr.bf16.mxu1 %v17980_v24 }
 0x9dd   :  { %9399 = vmatpush1.bf16.msra.mxu1 %v17978_v52 }
 0x9de   :  { %9626 = vmatprep.subr.bf16.mxu1 %v17983_v59 }
 0x9e0   :  { %9401 = vmatmul.mubr.bf16.vlgmr.msra.gmra.mrb[104].mxu1 %v21031_v7 }
 0x9e1   :  { %9410 = vmatprep.mubr.bf16.mxu1 %v21032_v33  ;;  %9627 = vmatpush1.bf16.msra.mxu1 %v17981_v2 }
 0x9e2   :  { %9628 = vmatprep.subr.bf16.mxu1 %v17986_v29 }
 0x9e5   :  { %9629 = vmatpush1.bf16.msra.mxu1 %v17984_v31 }
 0x9e6   :  { %9630 = vmatprep.subr.bf16.mxu1 %v17989_v17 }
 0x9e8   :  { %9411 = vmatmul.mubr.bf16.gmra.mrb[108].mxu1 %v21033_v10 }
 0x9e9   :  { %9631 = vmatpush1.bf16.msra.mxu1 %v17987_v39  ;;  %9658 = vmatprep.mubr.bf16.mxu1 %v21034_v21 }
 0x9ea   :  { %9632 = vmatprep.subr.bf16.mxu1 %v17992_v41 }
 0x9ed   :  { %9633 = vmatpush1.bf16.msra.mxu1 %v17990_v60 }
 0x9ee   :  { %9634 = vmatprep.subr.bf16.mxu1 %v17995_v18 }
 0x9f1   :  { %9635 = vmatpush1.bf16.msra.mxu1 %v17993_v40 }
 0x9f2   :  { %9636 = vmatprep.subr.bf16.mxu1 %v18001_v63 }
 0x9f5   :  { %9637 = vmatpush1.bf16.msra.mxu1 %v17999_v55 }
 0x9f6   :  { %9638 = vmatprep.subr.bf16.mxu1 %v18004_v5 }
 0x9f9   :  { %9639 = vmatpush1.bf16.msra.mxu1 %v18002_v61 }
 0x9fa   :  { %9640 = vmatprep.subr.bf16.mxu1 %v18007_v1 }
 0x9fd   :  { %9641 = vmatpush1.bf16.msra.mxu1 %v18005_v56 }
 0x9fe   :  { %9642 = vmatprep.subr.bf16.mxu1 %v18010_v50 }
 0xa01   :  { %9643 = vmatpush1.bf16.msra.mxu1 %v18008_v3 }
 0xa02   :  { %9644 = vmatprep.subr.bf16.mxu1 %v18013_v27 }
 0xa05   :  { %9645 = vmatpush1.bf16.msra.mxu1 %v18011_v58 }
 0xa06   :  { %9646 = vmatprep.subr.bf16.mxu1 %v18016_v57 }
 0xa09   :  { %9647 = vmatpush1.bf16.msra.mxu1 %v18014_v35 }
 0xa0a   :  { %9648 = vmatprep.subr.bf16.mxu1 %v18019_v22 }
 0xa0d   :  { %9649 = vmatpush1.bf16.msra.mxu1 %v18017_v28 }
 0xa0e   :  { %9650 = vmatprep.subr.bf16.mxu1 %v18022_v8 }
 0xa11   :  { %9651 = vmatpush1.bf16.msra.mxu1 %v18020_v46  ;;  %v18053_v46 = vld [vmem:[%s20916_s3] sm:$0xff]  }
 0xa12   :  { %9652 = vmatprep.subr.bf16.mxu1 %v18025_v20  ;;  %v18060_v20 = vld [vmem:[%s20916_s3 + $0x8] sm:$0xff]  }
 0xa15   :  { %9653 = vmatpush1.bf16.msra.mxu1 %v18023_v53  ;;  %v18067_v53 = vld [vmem:[%s20916_s3 + $0x10] sm:$0xff]  }
 0xa16   :  { %9654 = vmatprep.subr.bf16.mxu1 %v18031_v9  ;;  %v18074_v9 = vld [vmem:[%s20916_s3 + $0x18] sm:$0xff]  }
 0xa19   :  { %9655 = vmatpush1.bf16.msra.mxu1 %v18029_v51  ;;  %v18077_v51 = vld [vmem:[#allocation8 + $0x1404] ss:$8 sps:$4 sm:$0xff]  }
 0xa1a   :  { %9656 = vmatprep.subr.bf16.mxu1 %v18034_v13  ;;  %v18075_v13 = vld [vmem:[#allocation8 + $0x1400] ss:$8 sps:$4 sm:$0xff]  }
 0xa1d   :  { %9657 = vmatpush1.bf16.msra.mxu1 %v18032_v47  ;;  %v18080_v47 = vld [vmem:[#allocation8 + $0x1204] ss:$8 sps:$4 sm:$0xff]  }
 0xa1e   :  { %10296 = vmatprep.subr.bf16.mxu0 %v18080_v47 }
 0xa20   :  { %9659 = vmatmul.mubr.bf16.vlgmr.msra.gmra.mrb[104].mxu1 %v21035_v14  ;;  %v18083_v14 = vld [vmem:[#allocation8 + $0x1414] ss:$8 sps:$4 sm:$0xff]  }
 0xa21   :  { %9668 = vmatprep.mubr.bf16.mxu1 %v21036_v34  ;;  %v18081_v34 = vld [vmem:[#allocation8 + $0x1410] ss:$8 sps:$4 sm:$0xff]  }
 0xa28   :  { %9669 = vmatmul.mubr.bf16.gmra.mrb[108].mxu1 %v21037_v0  ;;  %v18089_v0 = vld [vmem:[#allocation8 + $0x1424] ss:$8 sps:$4 sm:$0xff]  }
 0xa29   :  { %9816 = vmatprep.mubr.bf16.mxu1 %v21038_v45 }
 0xaf3   :  { %v9660_v62 = vpop.f32.mrb[104].mxu1 }
 0xaf4   :  { %v9700_v37 = vadd.f32 %v9693_v30, %v9660_v62  ;;  %v9662_v23 = vpop.f32.mrb[105].mxu1  ;;  %v18135_v62 = vld [vmem:[%s20916_s3 + $0x20] ss:$0 sps:$4 sm:$0xff]  }
 0xaf5   :  { %v9701_v15 = vadd.f32 %v9697_v6, %v9662_v23  ;;  %v9664_v44 = vpop.f32.mrb[106].mxu1  ;;  %v18136_v23 = vld [vmem:[#allocation8 + $0x14a0] ss:$8 sps:$4 sm:$0xff]  }
 0xaf6   :  { %v9716_v24 = vmul.f32 0.01, %v9700_v37  ;;  %v9702_v52 = vadd.f32 %v9693_v30, %v9664_v44  ;;  %v9666_v59 = vpop.f32.mrb[107].mxu1  ;;  %vm9708_vm0 = vcmp.ge.f32.partialorder %v9700_v37, 0.0  ;;  %v18142_v44 = vld [vmem:[#allocation8 + $0x14b0] ss:$8 sps:$4 sm:$0xff]  }
 0xaf7   :  { %v9717_v2 = vmul.f32 0.01, %v9701_v15  ;;  %v9703_v29 = vadd.f32 %v9697_v6, %v9666_v59  ;;  %vm9709_vm1 = vcmp.ge.f32.partialorder %v9701_v15, 0.0  ;;  %v18156_v59 = vld [vmem:[#allocation8 + $0x14d4] ss:$8 sps:$4 sm:$0xff]  }
 0xaf8   :  { %vm9710_vm2 = vcmp.ge.f32.partialorder %v9702_v52, 0.0  ;;  %v9718_v7 = vmul.f32 0.01, %v9702_v52  ;;  %v9724_v31 = vsel %vm9708_vm0, %v9700_v37, %v9716_v24  ;;  %v18138_v37 = vld [vmem:[#allocation8 + $0x14a4] ss:$8 sps:$4 sm:$0xff]   ;;  %vm14322_vm0 = vcmask 15360  }
 0xaf9   :  { %vm9711_vm3 = vcmp.ge.f32.partialorder %v9703_v29, 0.0  ;;  %v9719_v33 = vmul.f32 0.01, %v9703_v29  ;;  %v9725_v10 = vsel %vm9709_vm1, %v9701_v15, %v9717_v2  ;;  %v18144_v15 = vld [vmem:[#allocation8 + $0x14b4] ss:$8 sps:$4 sm:$0xff]   ;;  %vm14431_vm1 = vcmask 1024  }
 0xafa   :  { %v9726_v17 = vsel %vm9710_vm2, %v9702_v52, %v9718_v7  ;;  %v18150_v24 = vld [vmem:[#allocation8 + $0x14c4] ss:$8 sps:$4 sm:$0xff]   ;;  %v18148_v52 = vld [vmem:[#allocation8 + $0x14c0] ss:$8 sps:$4 sm:$0xff]   ;;  %v18154_v2 = vld [vmem:[#allocation8 + $0x14d0] ss:$8 sps:$4 sm:$0xff]  }
 0xafb   :  { %v9732_v39 = vpack.c.bf16 %v9726_v17, %v9724_v31  ;;  %v9670_v41 = vpop.f32.mrb[108].mxu1  ;;  %v9727_v21 = vsel %vm9711_vm3, %v9703_v29, %v9719_v33  ;;  %v18162_v29 = vld [vmem:[#allocation8 + $0x14e4] ss:$8 sps:$4 sm:$0xff]   ;;  %v18160_v7 = vld [vmem:[#allocation8 + $0x14e0] ss:$8 sps:$4 sm:$0xff]  }
 0xafc   :  { %v9704_v60 = vadd.f32 %v9693_v30, %v9670_v41  ;;  %v9672_v18 = vpop.f32.mrb[109].mxu1  ;;  %v9733_v40 = vpack.c.bf16 %v9727_v21, %v9725_v10  ;;  %v18168_v33 = vld [vmem:[#allocation8 + $0x14f4] ss:$8 sps:$4 sm:$0xff]   ;;  %v18166_v31 = vld [vmem:[#allocation8 + $0x14f0] ss:$8 sps:$4 sm:$0xff]  }
 0xafd   :  { %v9705_v63 = vadd.f32 %v9697_v6, %v9672_v18  ;;  %v9674_v55 = vpop.f32.mrb[110].mxu1  ;;  %v18174_v17 = vld [vmem:[#allocation8 + $0x1604] ss:$8 sps:$4 sm:$0xff]   ;;  %v18078_v18 = vld [vmem:[#allocation8 + $0x1200] ss:$8 sps:$4 sm:$0xff]  }
 0xafe   :  { %v9720_v5 = vmul.f32 0.01, %v9704_v60  ;;  %v9706_v61 = vadd.f32 %v9693_v30, %v9674_v55  ;;  %v9676_v1 = vpop.f32.mrb[111].mxu1  ;;  %9784 = vmatprep.subr.bf16.mxu1 %v9733_v40  ;;  %vm9712_vm4 = vcmp.ge.f32.partialorder %v9704_v60, 0.0  ;;  %v18131_v30 = vld [vmem:[#allocation8 + $0x1494] ss:$8 sps:$4 sm:$0xff]  }
 0xaff   :  { %v9721_v56 = vmul.f32 0.01, %v9705_v63  ;;  %v9707_v50 = vadd.f32 %v9697_v6, %v9676_v1  ;;  %9785 = vmatpush1.bf16.msra.mxu1 %v9732_v39  ;;  %vm9713_vm5 = vcmp.ge.f32.partialorder %v9705_v63, 0.0  ;;  %v18129_v6 = vld [vmem:[#allocation8 + $0x1490] ss:$8 sps:$4 sm:$0xff]  }
 0xb00   :  { %vm9714_vm6 = vcmp.ge.f32.partialorder %v9706_v61, 0.0  ;;  %v9722_v3 = vmul.f32 0.01, %v9706_v61  ;;  %v9728_v58 = vsel %vm9712_vm4, %v9704_v60, %v9720_v5  ;;  %v18084_v5 = vld [vmem:[#allocation8 + $0x1210] ss:$8 sps:$4 sm:$0xff]  }
 0xb01   :  { %vm9715_vm7 = vcmp.ge.f32.partialorder %v9707_v50, 0.0  ;;  %v9723_v27 = vmul.f32 0.01, %v9707_v50  ;;  %v9729_v22 = vsel %vm9713_vm5, %v9705_v63, %v9721_v56  ;;  %v18086_v63 = vld [vmem:[#allocation8 + $0x1214] ss:$8 sps:$4 sm:$0xff]  }
 0xb02   :  { %v9730_v57 = vsel %vm9714_vm6, %v9706_v61, %v9722_v3  ;;  %v18092_v1 = vld [vmem:[#allocation8 + $0x1224] ss:$8 sps:$4 sm:$0xff]  }
 0xb03   :  { %v9734_v35 = vpack.c.bf16 %v9730_v57, %v9728_v58  ;;  %v9731_v28 = vsel %vm9715_vm7, %v9707_v50, %v9723_v27  ;;  %v18172_v58 = vld [vmem:[#allocation8 + $0x1600] ss:$8 sps:$4 sm:$0xff]  }
 0xb04   :  { %v9735_v8 = vpack.c.bf16 %v9731_v28, %v9729_v22  ;;  %v18090_v22 = vld [vmem:[#allocation8 + $0x1220] ss:$8 sps:$4 sm:$0xff]   ;;  %v18098_v28 = vld [vmem:[#allocation8 + $0x1234] ss:$8 sps:$4 sm:$0xff]  }
 0xb06   :  { %9786 = vmatprep.subr.bf16.mxu1 %v9735_v8  ;;  %v18178_v8 = vld [vmem:[#allocation8 + $0x1610] ss:$8 sps:$4 sm:$0xff]  }
 0xb07   :  { %9787 = vmatpush1.bf16.msra.mxu1 %v9734_v35  ;;  %v18180_v35 = vld [vmem:[#allocation8 + $0x1614] ss:$8 sps:$4 sm:$0xff]  }
 0xb08   :  { %10532 = vmatprep.subr.bf16.mxu1 %v18077_v51 }
 0xb0a   :  { %15392 = vmatmul.mubr.msk.bf16.vlgmr.msra.gmra.mrb[112].mxu1 %vm9768_vm8, %v18053_v46  ;;  %v18186_v46 = vld [vmem:[#allocation8 + $0x1624] ss:$8 sps:$4 sm:$0xff]  }
 0xb0b   :  { %9826 = vmatprep.mubr.bf16.mxu1 %v21038_v45  ;;  %10533 = vmatpush1.bf16.msra.mxu1 %v18075_v13  ;;  %v18184_v13 = vld [vmem:[#allocation8 + $0x1620] ss:$8 sps:$4 sm:$0xff]  }
 0xb0c   :  { %10534 = vmatprep.subr.bf16.mxu1 %v18083_v14 }
 0xb0f   :  { %10535 = vmatpush1.bf16.msra.mxu1 %v18081_v34  ;;  %v18192_v34 = vld [vmem:[#allocation8 + $0x1634] ss:$8 sps:$4 sm:$0xff]  }
 0xb10   :  { %10536 = vmatprep.subr.bf16.mxu1 %v18089_v0 }
 0xb12   :  { %15393 = vmatmul.mubr.msk.bf16.gmra.mrb[116].mxu1 %vm9768_vm8, %v18060_v20  ;;  %v18096_v20 = vld [vmem:[#allocation8 + $0x1230] ss:$8 sps:$4 sm:$0xff]  }
 0xb13   :  { %9836 = vmatprep.mubr.bf16.mxu1 %v21038_v45  ;;  %10537 = vmatpush1.bf16.msra.mxu1 %v18087_v54  ;;  %v18102_v54 = vld [vmem:[#allocation8 + $0x1240] ss:$8 sps:$4 sm:$0xff]  }
 0xb14   :  { %10538 = vmatprep.subr.bf16.mxu1 %v18095_v42  ;;  %v18110_v42 = vld [vmem:[#allocation8 + $0x1254] ss:$8 sps:$4 sm:$0xff]  }
 0xb17   :  { %10539 = vmatpush1.bf16.msra.mxu1 %v18093_v43  ;;  %v18190_v43 = vld [vmem:[#allocation8 + $0x1630] ss:$8 sps:$4 sm:$0xff]  }
 0xb18   :  { %10540 = vmatprep.subr.bf16.mxu1 %v18101_v26  ;;  %v18198_v26 = vld [vmem:[#allocation8 + $0x1644] ss:$8 sps:$4 sm:$0xff]  }
 0xb1a   :  { %15394 = vmatmul.mubr.msk.bf16.gmra.mrb[120].mxu1 %vm9768_vm8, %v18067_v53 }
 0xb1b   :  { %9846 = vmatprep.mubr.bf16.mxu1 %v21038_v45  ;;  %10541 = vmatpush1.bf16.msra.mxu1 %v18099_v4  ;;  %v18108_v4 = vld [vmem:[#allocation8 + $0x1250] ss:$8 sps:$4 sm:$0xff]  }
 0xb1c   :  { %10542 = vmatprep.subr.bf16.mxu1 %v18107_v16  ;;  %v18116_v16 = vld [vmem:[#allocation8 + $0x1264] ss:$8 sps:$4 sm:$0xff]  }
 0xb1f   :  { %10543 = vmatpush1.bf16.msra.mxu1 %v18105_v48  ;;  %v18196_v48 = vld [vmem:[#allocation8 + $0x1640] ss:$8 sps:$4 sm:$0xff]  }
 0xb20   :  { %10544 = vmatprep.subr.bf16.mxu1 %v18113_v25  ;;  %v18204_v25 = vld [vmem:[#allocation8 + $0x1654] ss:$8 sps:$4 sm:$0xff]  }
 0xb22   :  { %15395 = vmatmul.mubr.msk.bf16.gmra.mrb[124].mxu1 %vm9768_vm8, %v18074_v9  ;;  %v18104_v9 = vld [vmem:[#allocation8 + $0x1244] ss:$8 sps:$4 sm:$0xff]  }
 0xb23   :  { %9856 = vmatprep.mubr.bf16.mxu1 %v21038_v45  ;;  %10545 = vmatpush1.bf16.msra.mxu1 %v18111_v49  ;;  %v18114_v49 = vld [vmem:[#allocation8 + $0x1260] ss:$8 sps:$4 sm:$0xff]  }
 0xb24   :  { %10546 = vmatprep.subr.bf16.mxu1 %v18119_v38  ;;  %v18122_v38 = vld [vmem:[#allocation8 + $0x1274] ss:$8 sps:$4 sm:$0xff]  }
 0xb27   :  { %10547 = vmatpush1.bf16.msra.mxu1 %v18117_v19  ;;  %v18202_v19 = vld [vmem:[#allocation8 + $0x1650] ss:$8 sps:$4 sm:$0xff]  }
 0xb28   :  { %10548 = vmatprep.subr.bf16.mxu1 %v18125_v32  ;;  %v18210_v32 = vld [vmem:[#allocation8 + $0x1664] ss:$8 sps:$4 sm:$0xff]  }
 0xb2a   :  { %15396 = vmatmul.mubr.msk.bf16.gmra.mrb[128].mxu1 %vm9768_vm8, %v18135_v62  ;;  %v18216_v62 = vld [vmem:[#allocation8 + $0x1674] ss:$8 sps:$4 sm:$0xff]  }
 0xb2b   :  { %10549 = vmatpush1.bf16.msra.mxu1 %v18123_v12  ;;  %v18120_v12 = vld [vmem:[#allocation8 + $0x1270] ss:$8 sps:$4 sm:$0xff]  }
 0xb2c   :  { %10550 = vmatprep.subr.bf16.mxu1 %v18131_v30  ;;  %v18128_v30 = vld [vmem:[#allocation8 + $0x1284] ss:$8 sps:$4 sm:$0xff]  }
 0xb2f   :  { %10551 = vmatpush1.bf16.msra.mxu1 %v18129_v6  ;;  %v18208_v6 = vld [vmem:[#allocation8 + $0x1660] ss:$8 sps:$4 sm:$0xff]  }
 0xb30   :  { %10552 = vmatprep.subr.bf16.mxu1 %v18138_v37  ;;  %v18126_v37 = vld [vmem:[#allocation8 + $0x1280] ss:$8 sps:$4 sm:$0xff]  }
 0xb33   :  { %10553 = vmatpush1.bf16.msra.mxu1 %v18136_v23  ;;  %v18134_v23 = vld [vmem:[#allocation8 + $0x1294] ss:$8 sps:$4 sm:$0xff]  }
 0xb34   :  { %10554 = vmatprep.subr.bf16.mxu1 %v18144_v15  ;;  %v18214_v15 = vld [vmem:[#allocation8 + $0x1670] ss:$8 sps:$4 sm:$0xff]  }
 0xb37   :  { %10555 = vmatpush1.bf16.msra.mxu1 %v18142_v44  ;;  %v18222_v44 = vld [vmem:[#allocation8 + $0x1684] ss:$8 sps:$4 sm:$0xff]  }
 0xb38   :  { %10556 = vmatprep.subr.bf16.mxu1 %v18150_v24  ;;  %v18132_v24 = vld [vmem:[#allocation8 + $0x1290] ss:$8 sps:$4 sm:$0xff]  }
 0xb3b   :  { %10557 = vmatpush1.bf16.msra.mxu1 %v18148_v52  ;;  %v18141_v52 = vld [vmem:[#allocation8 + $0x12a4] ss:$8 sps:$4 sm:$0xff]  }
 0xb3c   :  { %10558 = vmatprep.subr.bf16.mxu1 %v18156_v59  ;;  %v18220_v59 = vld [vmem:[#allocation8 + $0x1680] ss:$8 sps:$4 sm:$0xff]  }
 0xb3f   :  { %10559 = vmatpush1.bf16.msra.mxu1 %v18154_v2  ;;  %v18228_v2 = vld [vmem:[#allocation8 + $0x1694] ss:$8 sps:$4 sm:$0xff]  }
 0xb40   :  { %10560 = vmatprep.subr.bf16.mxu1 %v18162_v29  ;;  %v18139_v29 = vld [vmem:[#allocation8 + $0x12a0] ss:$8 sps:$4 sm:$0xff]  }
 0xb43   :  { %10561 = vmatpush1.bf16.msra.mxu1 %v18160_v7  ;;  %v18147_v7 = vld [vmem:[#allocation8 + $0x12b4] ss:$8 sps:$4 sm:$0xff]  }
 0xb44   :  { %10562 = vmatprep.subr.bf16.mxu1 %v18168_v33  ;;  %v18226_v33 = vld [vmem:[#allocation8 + $0x1690] ss:$8 sps:$4 sm:$0xff]  }
 0xb47   :  { %10563 = vmatpush1.bf16.msra.mxu1 %v18166_v31  ;;  %v18234_v31 = vld [vmem:[#allocation8 + $0x16a4] ss:$8 sps:$4 sm:$0xff]  }
 0xb48   :  { %11008 = vmatprep.subr.bf16.mxu1 %v18174_v17  ;;  %v18145_v17 = vld [vmem:[#allocation8 + $0x12b0] ss:$8 sps:$4 sm:$0xff]  }
 0xbdd   :  { %v20787_v39 = vpop.f32.mrb[112].mxu1 }
 0xbde   :  { %v9820_v41 = vpop.f32.mrb[113].mxu1 }
 0xbdf   :  { %v9822_v10 = vpop.f32.mrb[114].mxu1  ;;  %v9866_v55 = vpack.c.bf16 %v9820_v41, %v9820_v41  ;;  %v18153_v41 = vld [vmem:[#allocation8 + $0x12c4] ss:$8 sps:$4 sm:$0xff]  }
 0xbe0   :  { %v9824_v21 = vpop.f32.mrb[115].mxu1  ;;  %v9900_v40 = vpack.c.bf16 %v9822_v10, %v9822_v10  ;;  %v18232_v10 = vld [vmem:[#allocation8 + $0x16a0] ss:$8 sps:$4 sm:$0xff]  }
 0xbe1   :  { %v9901_v60 = vpack.c.bf16 %v9824_v21, %v9824_v21  ;;  %v18240_v21 = vld [vmem:[#allocation8 + $0x16b4] ss:$8 sps:$4 sm:$0xff]  }
 0xbe3   :  { %10127 = vmatprep.mubr.bf16.mxu0 %v9901_v60  ;;  %v18151_v60 = vld [vmem:[#allocation8 + $0x12c0] ss:$8 sps:$4 sm:$0xff]  }
 0xbe4   :  { %10128 = vmatmul.mubr.bf16.vlgmr.msra.gmra.mrb[32].mxu0 %v9900_v40  ;;  %v18238_v40 = vld [vmem:[#allocation8 + $0x16b0] ss:$8 sps:$4 sm:$0xff]  }
 0xbe5   :  { %10297 = vmatpush1.bf16.msra.mxu0 %v18078_v18  ;;  %10328 = vmatprep.mubr.bf16.mxu0 %v9866_v55  ;;  %v9828_v61 = vpop.f32.mrb[116].mxu1  ;;  %v18159_v18 = vld [vmem:[#allocation8 + $0x12d4] ss:$8 sps:$4 sm:$0xff]   ;;  %v18157_v55 = vld [vmem:[#allocation8 + $0x12d0] ss:$8 sps:$4 sm:$0xff]  }
 0xbe6   :  { %10298 = vmatprep.subr.bf16.mxu0 %v18086_v63  ;;  %v10337_v56 = vpack.c.bf16 %v9828_v61, %v9828_v61  ;;  %v9830_v50 = vpop.f32.mrb[117].mxu1  ;;  %v18246_v63 = vld [vmem:[#allocation8 + $0x16c4] ss:$8 sps:$4 sm:$0xff]   ;;  %v18244_v61 = vld [vmem:[#allocation8 + $0x16c0] ss:$8 sps:$4 sm:$0xff]  }
 0xbe7   :  { %v10338_v3 = vpack.c.bf16 %v9830_v50, %v9830_v50  ;;  %v20789_v27 = vpop.f32.mrb[118].mxu1  ;;  %v18171_v50 = vld [vmem:[#allocation8 + $0x12f4] ss:$8 sps:$4 sm:$0xff]  }
 0xbe8   :  { %v20791_v57 = vpop.f32.mrb[119].mxu1 }
 0xbe9   :  { %10299 = vmatpush1.bf16.msra.mxu0 %v18084_v5  ;;  %10564 = vmatprep.mubr.bf16.mxu1 %v10338_v3  ;;  %v18165_v5 = vld [vmem:[#allocation8 + $0x12e4] ss:$8 sps:$4 sm:$0xff]  }
 0xbea   :  { %10300 = vmatprep.subr.bf16.mxu0 %v18092_v1  ;;  %10565 = vmatmul.mubr.bf16.vlgmr.msra.gmra.mrb[132].mxu1 %v10337_v56  ;;  %v18252_v1 = vld [vmem:[#allocation8 + $0x16d4] ss:$8 sps:$4 sm:$0xff]   ;;  %v18163_v56 = vld [vmem:[#allocation8 + $0x12e0] ss:$8 sps:$4 sm:$0xff]  }
 0xbeb   :  { %11009 = vmatpush1.bf16.msra.mxu1 %v18172_v58  ;;  %v18250_v58 = vld [vmem:[#allocation8 + $0x16d0] ss:$8 sps:$4 sm:$0xff]  }
 0xbec   :  { %11010 = vmatprep.subr.bf16.mxu1 %v18180_v35  ;;  %v18258_v35 = vld [vmem:[#allocation8 + $0x16e4] ss:$8 sps:$4 sm:$0xff]  }
 0xbed   :  { %10301 = vmatpush1.bf16.msra.mxu0 %v18090_v22  ;;  %v20793_v53 = vpop.f32.mrb[120].mxu1  ;;  %v18169_v22 = vld [vmem:[#allocation8 + $0x12f0] ss:$8 sps:$4 sm:$0xff]  }
 0xbee   :  { %10302 = vmatprep.subr.bf16.mxu0 %v18098_v28  ;;  %v9840_v51 = vpop.f32.mrb[121].mxu1 }
 0xbef   :  { %11011 = vmatpush1.bf16.msra.mxu1 %v18178_v8  ;;  %v10814_v47 = vpack.c.bf16 %v9840_v51, %v9840_v51  ;;  %v20795_v14 = vpop.f32.mrb[122].mxu1  ;;  %v18177_v8 = vld [vmem:[#allocation8 + $0x1504] ss:$8 sps:$4 sm:$0xff]   ;;  %v10576_v51 = vpack.c.bf16 %v20791_v57, %v20791_v57  ;;  %v10813_v57 = vpack.c.bf16 %v20793_v53, %v20793_v53  ;;  %v18280_v53 = vld [vmem:[#allocation8 + $0x1820] ss:$8 sps:$4 sm:$0xff]  }
 0xbf0   :  { %11012 = vmatprep.subr.bf16.mxu1 %v18186_v46  ;;  %v20797_v0 = vpop.f32.mrb[123].mxu1 }
 0xbf1   :  { %10303 = vmatpush1.bf16.msra.mxu0 %v18096_v20  ;;  %11040 = vmatprep.mubr.bf16.mxu1 %v10814_v47  ;;  %v18256_v20 = vld [vmem:[#allocation8 + $0x16e0] ss:$8 sps:$4 sm:$0xff]  }
 0xbf2   :  { %10304 = vmatprep.subr.bf16.mxu0 %v18104_v9  ;;  %v18264_v9 = vld [vmem:[#allocation8 + $0x16f4] ss:$8 sps:$4 sm:$0xff]  }
 0xbf3   :  { %11013 = vmatpush1.bf16.msra.mxu1 %v18184_v13  ;;  %v18175_v13 = vld [vmem:[#allocation8 + $0x1500] ss:$8 sps:$4 sm:$0xff]  }
 0xbf4   :  { %11014 = vmatprep.subr.bf16.mxu1 %v18192_v34  ;;  %v9865_v34 = vpack.c.bf16 %v20787_v39, %v20787_v39  ;;  %v18276_v39 = vld [vmem:[#allocation8 + $0x1814] ss:$8 sps:$4 sm:$0xff]  }
 0xbf5   :  { %10305 = vmatpush1.bf16.msra.mxu0 %v18102_v54  ;;  %v20799_v3 = vpop.f32.mrb[124].mxu1  ;;  %v18183_v54 = vld [vmem:[#allocation8 + $0x1514] ss:$8 sps:$4 sm:$0xff]  }
 0xbf6   :  { %10306 = vmatprep.subr.bf16.mxu0 %v18110_v42  ;;  %v9850_v28 = vpop.f32.mrb[125].mxu1  ;;  %v18262_v42 = vld [vmem:[#allocation8 + $0x16f0] ss:$8 sps:$4 sm:$0xff]  }
 0xbf7   :  { %11015 = vmatpush1.bf16.msra.mxu1 %v18190_v43  ;;  %v20801_v46 = vpop.f32.mrb[126].mxu1  ;;  %v18270_v43 = vld [vmem:[#allocation8 + $0x1804] ss:$8 sps:$4 sm:$0xff]  }
 0xbf8   :  { %11016 = vmatprep.subr.bf16.mxu1 %v18198_v26  ;;  %v20805_v47 = vpop.f32.mrb[127].mxu1  ;;  %v18181_v26 = vld [vmem:[#allocation8 + $0x1510] ss:$8 sps:$4 sm:$0xff]  }
 0xbf9   :  { %10307 = vmatpush1.bf16.msra.mxu0 %v18108_v4  ;;  %v18189_v4 = vld [vmem:[#allocation8 + $0x1524] ss:$8 sps:$4 sm:$0xff]  }
 0xbfa   :  { %10308 = vmatprep.subr.bf16.mxu0 %v18116_v16  ;;  %v18268_v16 = vld [vmem:[#allocation8 + $0x1800] ss:$8 sps:$4 sm:$0xff]  }
 0xbfb   :  { %11017 = vmatpush1.bf16.msra.mxu1 %v18196_v48  ;;  %v11290_v48 = vpack.c.bf16 %v9850_v28, %v9850_v28  ;;  %v18336_v28 = vld [vmem:[#allocation8 + $0x18b4] ss:$8 sps:$4 sm:$0xff]  }
 0xbfc   :  { %11018 = vmatprep.subr.bf16.mxu1 %v18204_v25  ;;  %v18187_v25 = vld [vmem:[#allocation8 + $0x1520] ss:$8 sps:$4 sm:$0xff]  }
 0xbfd   :  { %10309 = vmatpush1.bf16.msra.mxu0 %v18114_v49  ;;  %v18195_v49 = vld [vmem:[#allocation8 + $0x1534] ss:$8 sps:$4 sm:$0xff]  }
 0xbfe   :  { %10310 = vmatprep.subr.bf16.mxu0 %v18122_v38  ;;  %v18274_v38 = vld [vmem:[#allocation8 + $0x1810] ss:$8 sps:$4 sm:$0xff]  }
 0xbff   :  { %11019 = vmatpush1.bf16.msra.mxu1 %v18202_v19  ;;  %v18282_v19 = vld [vmem:[#allocation8 + $0x1824] ss:$8 sps:$4 sm:$0xff]  }
 0xc00   :  { %11020 = vmatprep.subr.bf16.mxu1 %v18210_v32  ;;  %v18193_v32 = vld [vmem:[#allocation8 + $0x1530] ss:$8 sps:$4 sm:$0xff]  }
 0xc01   :  { %10311 = vmatpush1.bf16.msra.mxu0 %v18120_v12  ;;  %v18201_v12 = vld [vmem:[#allocation8 + $0x1544] ss:$8 sps:$4 sm:$0xff]  }
 0xc02   :  { %10312 = vmatprep.subr.bf16.mxu0 %v18128_v30  ;;  %v18288_v30 = vld [vmem:[#allocation8 + $0x1834] ss:$8 sps:$4 sm:$0xff]  }
 0xc03   :  { %11021 = vmatpush1.bf16.msra.mxu1 %v18208_v6  ;;  %v18199_v6 = vld [vmem:[#allocation8 + $0x1540] ss:$8 sps:$4 sm:$0xff]  }
 0xc04   :  { %11022 = vmatprep.subr.bf16.mxu1 %v18216_v62  ;;  %v18207_v62 = vld [vmem:[#allocation8 + $0x1554] ss:$8 sps:$4 sm:$0xff]  }
 0xc05   :  { %10313 = vmatpush1.bf16.msra.mxu0 %v18126_v37  ;;  %v18286_v37 = vld [vmem:[#allocation8 + $0x1830] ss:$8 sps:$4 sm:$0xff]  }
 0xc06   :  { %10314 = vmatprep.subr.bf16.mxu0 %v18134_v23  ;;  %v18294_v23 = vld [vmem:[#allocation8 + $0x1844] ss:$8 sps:$4 sm:$0xff]  }
 0xc07   :  { %11023 = vmatpush1.bf16.msra.mxu1 %v18214_v15  ;;  %v18205_v15 = vld [vmem:[#allocation8 + $0x1550] ss:$8 sps:$4 sm:$0xff]  }
 0xc08   :  { %11024 = vmatprep.subr.bf16.mxu1 %v18222_v44  ;;  %v18213_v44 = vld [vmem:[#allocation8 + $0x1564] ss:$8 sps:$4 sm:$0xff]  }
 0xc09   :  { %10315 = vmatpush1.bf16.msra.mxu0 %v18132_v24  ;;  %v18292_v24 = vld [vmem:[#allocation8 + $0x1840] ss:$8 sps:$4 sm:$0xff]  }
 0xc0a   :  { %10316 = vmatprep.subr.bf16.mxu0 %v18141_v52  ;;  %v18300_v52 = vld [vmem:[#allocation8 + $0x1854] ss:$8 sps:$4 sm:$0xff]  }
 0xc0b   :  { %11025 = vmatpush1.bf16.msra.mxu1 %v18220_v59  ;;  %v18211_v59 = vld [vmem:[#allocation8 + $0x1560] ss:$8 sps:$4 sm:$0xff]  }
 0xc0c   :  { %11026 = vmatprep.subr.bf16.mxu1 %v18228_v2  ;;  %v18219_v2 = vld [vmem:[#allocation8 + $0x1574] ss:$8 sps:$4 sm:$0xff]  }
 0xc0d   :  { %10317 = vmatpush1.bf16.msra.mxu0 %v18139_v29  ;;  %v18298_v29 = vld [vmem:[#allocation8 + $0x1850] ss:$8 sps:$4 sm:$0xff]  }
 0xc0e   :  { %10318 = vmatprep.subr.bf16.mxu0 %v18147_v7  ;;  %v18306_v7 = vld [vmem:[#allocation8 + $0x1864] ss:$8 sps:$4 sm:$0xff]  }
 0xc0f   :  { %11027 = vmatpush1.bf16.msra.mxu1 %v18226_v33  ;;  %v18217_v33 = vld [vmem:[#allocation8 + $0x1570] ss:$8 sps:$4 sm:$0xff]  }
 0xc10   :  { %11028 = vmatprep.subr.bf16.mxu1 %v18234_v31  ;;  %v18225_v31 = vld [vmem:[#allocation8 + $0x1584] ss:$8 sps:$4 sm:$0xff]  }
 0xc11   :  { %10319 = vmatpush1.bf16.msra.mxu0 %v18145_v17  ;;  %v18304_v17 = vld [vmem:[#allocation8 + $0x1860] ss:$8 sps:$4 sm:$0xff]  }
 0xc12   :  { %10320 = vmatprep.subr.bf16.mxu0 %v18153_v41  ;;  %v18312_v41 = vld [vmem:[#allocation8 + $0x1874] ss:$8 sps:$4 sm:$0xff]  }
 0xc13   :  { %11029 = vmatpush1.bf16.msra.mxu1 %v18232_v10  ;;  %v18223_v10 = vld [vmem:[#allocation8 + $0x1580] ss:$8 sps:$4 sm:$0xff]  }
 0xc14   :  { %11030 = vmatprep.subr.bf16.mxu1 %v18240_v21  ;;  %v18231_v21 = vld [vmem:[#allocation8 + $0x1594] ss:$8 sps:$4 sm:$0xff]  }
 0xc15   :  { %10321 = vmatpush1.bf16.msra.mxu0 %v18151_v60  ;;  %v18310_v60 = vld [vmem:[#allocation8 + $0x1870] ss:$8 sps:$4 sm:$0xff]  }
 0xc16   :  { %10322 = vmatprep.subr.bf16.mxu0 %v18159_v18  ;;  %v18318_v18 = vld [vmem:[#allocation8 + $0x1884] ss:$8 sps:$4 sm:$0xff]  }
 0xc17   :  { %11031 = vmatpush1.bf16.msra.mxu1 %v18238_v40  ;;  %v18229_v40 = vld [vmem:[#allocation8 + $0x1590] ss:$8 sps:$4 sm:$0xff]  }
 0xc18   :  { %11032 = vmatprep.subr.bf16.mxu1 %v18246_v63  ;;  %v18237_v63 = vld [vmem:[#allocation8 + $0x15a4] ss:$8 sps:$4 sm:$0xff]  }
 0xc19   :  { %10323 = vmatpush1.bf16.msra.mxu0 %v18157_v55  ;;  %v18316_v55 = vld [vmem:[#allocation8 + $0x1880] ss:$8 sps:$4 sm:$0xff]  }
 0xc1a   :  { %10324 = vmatprep.subr.bf16.mxu0 %v18165_v5  ;;  %v18324_v5 = vld [vmem:[#allocation8 + $0x1894] ss:$8 sps:$4 sm:$0xff]  }
 0xc1b   :  { %11033 = vmatpush1.bf16.msra.mxu1 %v18244_v61  ;;  %v18235_v61 = vld [vmem:[#allocation8 + $0x15a0] ss:$8 sps:$4 sm:$0xff]  }
 0xc1c   :  { %11034 = vmatprep.subr.bf16.mxu1 %v18252_v1  ;;  %v18243_v1 = vld [vmem:[#allocation8 + $0x15b4] ss:$8 sps:$4 sm:$0xff]  }
 0xc1d   :  { %10325 = vmatpush1.bf16.msra.mxu0 %v18163_v56  ;;  %v18322_v56 = vld [vmem:[#allocation8 + $0x1890] ss:$8 sps:$4 sm:$0xff]  }
 0xc1e   :  { %10326 = vmatprep.subr.bf16.mxu0 %v18171_v50  ;;  %v18330_v50 = vld [vmem:[#allocation8 + $0x18a4] ss:$8 sps:$4 sm:$0xff]  }
 0xc1f   :  { %11035 = vmatpush1.bf16.msra.mxu1 %v18250_v58  ;;  %v18241_v58 = vld [vmem:[#allocation8 + $0x15b0] ss:$8 sps:$4 sm:$0xff]  }
 0xc20   :  { %11036 = vmatprep.subr.bf16.mxu1 %v18258_v35  ;;  %v18249_v35 = vld [vmem:[#allocation8 + $0x15c4] ss:$8 sps:$4 sm:$0xff]  }
 0xc21   :  { %10327 = vmatpush1.bf16.msra.mxu0 %v18169_v22  ;;  %v18328_v22 = vld [vmem:[#allocation8 + $0x18a0] ss:$8 sps:$4 sm:$0xff]  }
 0xc22   :  { %10770 = vmatprep.subr.bf16.mxu0 %v18177_v8  ;;  %v18247_v8 = vld [vmem:[#allocation8 + $0x15c0] ss:$8 sps:$4 sm:$0xff]  }
 0xc23   :  { %11037 = vmatpush1.bf16.msra.mxu1 %v18256_v20  ;;  %v18255_v20 = vld [vmem:[#allocation8 + $0x15d4] ss:$8 sps:$4 sm:$0xff]  }
 0xc24   :  { %10329 = vmatmul.mubr.bf16.vlgmr.msra.gmra.mrb[36].mxu0 %v9865_v34  ;;  %11038 = vmatprep.subr.bf16.mxu1 %v18264_v9  ;;  %v18334_v9 = vld [vmem:[#allocation8 + $0x18b0] ss:$8 sps:$4 sm:$0xff]   ;;  %v18261_v34 = vld [vmem:[#allocation8 + $0x15e4] ss:$8 sps:$4 sm:$0xff]  }
 0xc25   :  { %10771 = vmatpush1.bf16.msra.mxu0 %v18175_v13  ;;  %10802 = vmatprep.mubr.bf16.mxu0 %v10576_v51  ;;  %v18342_v51 = vld [vmem:[#allocation8 + $0x18c4] ss:$8 sps:$4 sm:$0xff]   ;;  %v18253_v13 = vld [vmem:[#allocation8 + $0x15d0] ss:$8 sps:$4 sm:$0xff]  }
 0xc26   :  { %10772 = vmatprep.subr.bf16.mxu0 %v18183_v54  ;;  %v18340_v54 = vld [vmem:[#allocation8 + $0x18c0] ss:$8 sps:$4 sm:$0xff]  }
 0xc27   :  { %11039 = vmatpush1.bf16.msra.mxu1 %v18262_v42  ;;  %v18348_v42 = vld [vmem:[#allocation8 + $0x18d4] ss:$8 sps:$4 sm:$0xff]  }
 0xc28   :  { %11484 = vmatprep.subr.bf16.mxu1 %v18270_v43  ;;  %v18259_v43 = vld [vmem:[#allocation8 + $0x15e0] ss:$8 sps:$4 sm:$0xff]  }
 0xc29   :  { %10773 = vmatpush1.bf16.msra.mxu0 %v18181_v26  ;;  %v18267_v26 = vld [vmem:[#allocation8 + $0x15f4] ss:$8 sps:$4 sm:$0xff]  }
 0xc2a   :  { %10774 = vmatprep.subr.bf16.mxu0 %v18189_v4  ;;  %11041 = vmatmul.mubr.bf16.vlgmr.msra.gmra.mrb[136].mxu1 %v10813_v57  ;;  %v18346_v4 = vld [vmem:[#allocation8 + $0x18d0] ss:$8 sps:$4 sm:$0xff]   ;;  %v20811_v57 = vpop.f32.mrb[128].mxu1 }
 0xc2b   :  { %11485 = vmatpush1.bf16.msra.mxu1 %v18268_v16  ;;  %11516 = vmatprep.mubr.bf16.mxu1 %v11290_v48  ;;  %v18354_v16 = vld [vmem:[#allocation8 + $0x18e4] ss:$8 sps:$4 sm:$0xff]   ;;  %v9860_v48 = vpop.f32.mrb[129].mxu1 }
 0xc2c   :  { %11486 = vmatprep.subr.bf16.mxu1 %v18276_v39  ;;  %v18265_v39 = vld [vmem:[#allocation8 + $0x15f0] ss:$8 sps:$4 sm:$0xff]  }
 0xc2d   :  { %10775 = vmatpush1.bf16.msra.mxu0 %v18187_v25  ;;  %v9862_v25 = vpop.f32.mrb[130].mxu1 }
 0xc2e   :  { %10776 = vmatprep.subr.bf16.mxu0 %v18195_v49  ;;  %v18273_v49 = vld [vmem:[#allocation8 + $0x1704] ss:$8 sps:$4 sm:$0xff]   ;;  %v18343_v25 = vld [vmem:[#allocation8 + $0x17c0] ss:$8 sps:$4 sm:$0xff]  }
 0xc2f   :  { %11487 = vmatpush1.bf16.msra.mxu1 %v18274_v38  ;;  %v9863_v38 = vpop.f32.mrb[131].mxu1 }
 0xc30   :  { %11488 = vmatprep.subr.bf16.mxu1 %v18282_v19  ;;  %v18352_v19 = vld [vmem:[#allocation8 + $0x18e0] ss:$8 sps:$4 sm:$0xff]   ;;  %v18430_v38 = vld [vmem:[#allocation8 + $0x1ab0] ss:$8 sps:$4 sm:$0xff]  }
 0xc31   :  { %10777 = vmatpush1.bf16.msra.mxu0 %v18193_v32  ;;  %v18360_v32 = vld [vmem:[#allocation8 + $0x18f4] ss:$8 sps:$4 sm:$0xff]  }
 0xc32   :  { %10778 = vmatprep.subr.bf16.mxu0 %v18201_v12  ;;  %v11052_v12 = vpack.c.bf16 %v20797_v0, %v20797_v0  ;;  %v18364_v0 = vld [vmem:[#allocation8 + $0x1a00] ss:$8 sps:$4 sm:$0xff]  }
 0xc33   :  { %11489 = vmatpush1.bf16.msra.mxu1 %v18280_v53  ;;  %v18271_v53 = vld [vmem:[#allocation8 + $0x1700] ss:$8 sps:$4 sm:$0xff]  }
 0xc34   :  { %11490 = vmatprep.subr.bf16.mxu1 %v18288_v30  ;;  %v10575_v30 = vpack.c.bf16 %v20789_v27, %v20789_v27  ;;  %v18372_v27 = vld [vmem:[#allocation8 + $0x1a14] ss:$8 sps:$4 sm:$0xff]  }
 0xc35   :  { %10779 = vmatpush1.bf16.msra.mxu0 %v18199_v6  ;;  %v18279_v6 = vld [vmem:[#allocation8 + $0x1714] ss:$8 sps:$4 sm:$0xff]  }
 0xc36   :  { %10780 = vmatprep.subr.bf16.mxu0 %v18207_v62  ;;  %v18358_v62 = vld [vmem:[#allocation8 + $0x18f0] ss:$8 sps:$4 sm:$0xff]  }
 0xc37   :  { %11491 = vmatpush1.bf16.msra.mxu1 %v18286_v37  ;;  %v18366_v37 = vld [vmem:[#allocation8 + $0x1a04] ss:$8 sps:$4 sm:$0xff]  }
 0xc38   :  { %11492 = vmatprep.subr.bf16.mxu1 %v18294_v23  ;;  %v18277_v23 = vld [vmem:[#allocation8 + $0x1710] ss:$8 sps:$4 sm:$0xff]  }
 0xc39   :  { %10781 = vmatpush1.bf16.msra.mxu0 %v18205_v15  ;;  %v18285_v15 = vld [vmem:[#allocation8 + $0x1724] ss:$8 sps:$4 sm:$0xff]  }
 0xc3a   :  { %10782 = vmatprep.subr.bf16.mxu0 %v18213_v44  ;;  %v11289_v44 = vpack.c.bf16 %v20799_v3, %v20799_v3  ;;  %v18376_v3 = vld [vmem:[#allocation8 + $0x1a20] ss:$8 sps:$4 sm:$0xff]  }
 0xc3b   :  { %11493 = vmatpush1.bf16.msra.mxu1 %v18292_v24  ;;  %v11766_v24 = vpack.c.bf16 %v9860_v48, %v9860_v48  ;;  %v18424_v48 = vld [vmem:[#allocation8 + $0x1aa0] ss:$8 sps:$4 sm:$0xff]  }
 0xc3c   :  { %11494 = vmatprep.subr.bf16.mxu1 %v18300_v52  ;;  %v18283_v52 = vld [vmem:[#allocation8 + $0x1720] ss:$8 sps:$4 sm:$0xff]  }
 0xc3d   :  { %10783 = vmatpush1.bf16.msra.mxu0 %v18211_v59  ;;  %v18291_v59 = vld [vmem:[#allocation8 + $0x1734] ss:$8 sps:$4 sm:$0xff]  }
 0xc3e   :  { %10784 = vmatprep.subr.bf16.mxu0 %v18219_v2  ;;  %v18370_v2 = vld [vmem:[#allocation8 + $0x1a10] ss:$8 sps:$4 sm:$0xff]  }
 0xc3f   :  { %11495 = vmatpush1.bf16.msra.mxu1 %v18298_v29  ;;  %v18378_v29 = vld [vmem:[#allocation8 + $0x1a24] ss:$8 sps:$4 sm:$0xff]  }
 0xc40   :  { %11496 = vmatprep.subr.bf16.mxu1 %v18306_v7  ;;  %v18289_v7 = vld [vmem:[#allocation8 + $0x1730] ss:$8 sps:$4 sm:$0xff]  }
 0xc41   :  { %10785 = vmatpush1.bf16.msra.mxu0 %v18217_v33  ;;  %v18297_v33 = vld [vmem:[#allocation8 + $0x1744] ss:$8 sps:$4 sm:$0xff]  }
 0xc42   :  { %10786 = vmatprep.subr.bf16.mxu0 %v18225_v31  ;;  %v18384_v31 = vld [vmem:[#allocation8 + $0x1a34] ss:$8 sps:$4 sm:$0xff]  }
 0xc43   :  { %11497 = vmatpush1.bf16.msra.mxu1 %v18304_v17  ;;  %v18295_v17 = vld [vmem:[#allocation8 + $0x1740] ss:$8 sps:$4 sm:$0xff]  }
 0xc44   :  { %11498 = vmatprep.subr.bf16.mxu1 %v18312_v41  ;;  %v18303_v41 = vld [vmem:[#allocation8 + $0x1754] ss:$8 sps:$4 sm:$0xff]  }
 0xc45   :  { %10787 = vmatpush1.bf16.msra.mxu0 %v18223_v10  ;;  %v18382_v10 = vld [vmem:[#allocation8 + $0x1a30] ss:$8 sps:$4 sm:$0xff]  }
 0xc46   :  { %10788 = vmatprep.subr.bf16.mxu0 %v18231_v21  ;;  %v18390_v21 = vld [vmem:[#allocation8 + $0x1a44] ss:$8 sps:$4 sm:$0xff]  }
 0xc47   :  { %11499 = vmatpush1.bf16.msra.mxu1 %v18310_v60  ;;  %v18301_v60 = vld [vmem:[#allocation8 + $0x1750] ss:$8 sps:$4 sm:$0xff]  }
 0xc48   :  { %11500 = vmatprep.subr.bf16.mxu1 %v18318_v18  ;;  %v18309_v18 = vld [vmem:[#allocation8 + $0x1764] ss:$8 sps:$4 sm:$0xff]  }
 0xc49   :  { %10789 = vmatpush1.bf16.msra.mxu0 %v18229_v40  ;;  %v18388_v40 = vld [vmem:[#allocation8 + $0x1a40] ss:$8 sps:$4 sm:$0xff]  }
 0xc4a   :  { %10790 = vmatprep.subr.bf16.mxu0 %v18237_v63  ;;  %v18396_v63 = vld [vmem:[#allocation8 + $0x1a54] ss:$8 sps:$4 sm:$0xff]  }
 0xc4b   :  { %11501 = vmatpush1.bf16.msra.mxu1 %v18316_v55  ;;  %v18307_v55 = vld [vmem:[#allocation8 + $0x1760] ss:$8 sps:$4 sm:$0xff]  }
 0xc4c   :  { %11502 = vmatprep.subr.bf16.mxu1 %v18324_v5  ;;  %v18315_v5 = vld [vmem:[#allocation8 + $0x1774] ss:$8 sps:$4 sm:$0xff]  }
 0xc4d   :  { %10791 = vmatpush1.bf16.msra.mxu0 %v18235_v61  ;;  %v18394_v61 = vld [vmem:[#allocation8 + $0x1a50] ss:$8 sps:$4 sm:$0xff]  }
 0xc4e   :  { %10792 = vmatprep.subr.bf16.mxu0 %v18243_v1  ;;  %v18402_v1 = vld [vmem:[#allocation8 + $0x1a64] ss:$8 sps:$4 sm:$0xff]  }
 0xc4f   :  { %11503 = vmatpush1.bf16.msra.mxu1 %v18322_v56  ;;  %v18313_v56 = vld [vmem:[#allocation8 + $0x1770] ss:$8 sps:$4 sm:$0xff]  }
 0xc50   :  { %11504 = vmatprep.subr.bf16.mxu1 %v18330_v50  ;;  %v18321_v50 = vld [vmem:[#allocation8 + $0x1784] ss:$8 sps:$4 sm:$0xff]  }
 0xc51   :  { %10793 = vmatpush1.bf16.msra.mxu0 %v18241_v58  ;;  %v18400_v58 = vld [vmem:[#allocation8 + $0x1a60] ss:$8 sps:$4 sm:$0xff]  }
 0xc52   :  { %10794 = vmatprep.subr.bf16.mxu0 %v18249_v35  ;;  %v18408_v35 = vld [vmem:[#allocation8 + $0x1a74] ss:$8 sps:$4 sm:$0xff]  }
 0xc53   :  { %11505 = vmatpush1.bf16.msra.mxu1 %v18328_v22  ;;  %v18319_v22 = vld [vmem:[#allocation8 + $0x1780] ss:$8 sps:$4 sm:$0xff]  }
 0xc54   :  { %11506 = vmatprep.subr.bf16.mxu1 %v18336_v28  ;;  %v18327_v28 = vld [vmem:[#allocation8 + $0x1794] ss:$8 sps:$4 sm:$0xff]  }
 0xc55   :  { %10795 = vmatpush1.bf16.msra.mxu0 %v18247_v8  ;;  %v18406_v8 = vld [vmem:[#allocation8 + $0x1a70] ss:$8 sps:$4 sm:$0xff]  }
 0xc56   :  { %10796 = vmatprep.subr.bf16.mxu0 %v18255_v20  ;;  %v18414_v20 = vld [vmem:[#allocation8 + $0x1a84] ss:$8 sps:$4 sm:$0xff]  }
 0xc57   :  { %11507 = vmatpush1.bf16.msra.mxu1 %v18334_v9  ;;  %v18325_v9 = vld [vmem:[#allocation8 + $0x1790] ss:$8 sps:$4 sm:$0xff]  }
 0xc58   :  { %11508 = vmatprep.subr.bf16.mxu1 %v18342_v51  ;;  %v18333_v51 = vld [vmem:[#allocation8 + $0x17a4] ss:$8 sps:$4 sm:$0xff]  }
 0xc59   :  { %10797 = vmatpush1.bf16.msra.mxu0 %v18253_v13  ;;  %v18412_v13 = vld [vmem:[#allocation8 + $0x1a80] ss:$8 sps:$4 sm:$0xff]  }
 0xc5a   :  { %10798 = vmatprep.subr.bf16.mxu0 %v18261_v34  ;;  %v18420_v34 = vld [vmem:[#allocation8 + $0x1a94] ss:$8 sps:$4 sm:$0xff]  }
 0xc5b   :  { %11509 = vmatpush1.bf16.msra.mxu1 %v18340_v54  ;;  %v18331_v54 = vld [vmem:[#allocation8 + $0x17a0] ss:$8 sps:$4 sm:$0xff]  }
 0xc5c   :  { %11510 = vmatprep.subr.bf16.mxu1 %v18348_v42  ;;  %v18339_v42 = vld [vmem:[#allocation8 + $0x17b4] ss:$8 sps:$4 sm:$0xff]  }
 0xc5d   :  { %10799 = vmatpush1.bf16.msra.mxu0 %v18259_v43  ;;  %v18418_v43 = vld [vmem:[#allocation8 + $0x1a90] ss:$8 sps:$4 sm:$0xff]  }
 0xc5e   :  { %10800 = vmatprep.subr.bf16.mxu0 %v18267_v26  ;;  %v18426_v26 = vld [vmem:[#allocation8 + $0x1aa4] ss:$8 sps:$4 sm:$0xff]  }
 0xc5f   :  { %11511 = vmatpush1.bf16.msra.mxu1 %v18346_v4  ;;  %v18337_v4 = vld [vmem:[#allocation8 + $0x17b0] ss:$8 sps:$4 sm:$0xff]  }
 0xc60   :  { %11512 = vmatprep.subr.bf16.mxu1 %v18354_v16  ;;  %v18345_v16 = vld [vmem:[#allocation8 + $0x17c4] ss:$8 sps:$4 sm:$0xff]  }
 0xc61   :  { %10801 = vmatpush1.bf16.msra.mxu0 %v18265_v39  ;;  %v18432_v39 = vld [vmem:[#allocation8 + $0x1ab4] ss:$8 sps:$4 sm:$0xff]  }
 0xc62   :  { %11246 = vmatprep.subr.bf16.mxu0 %v18273_v49  ;;  %v18351_v49 = vld [vmem:[#allocation8 + $0x17d4] ss:$8 sps:$4 sm:$0xff]  }
 0xc63   :  { %11513 = vmatpush1.bf16.msra.mxu1 %v18352_v19  ;;  %v18438_v19 = vld [vmem:[#allocation8 + $0x1ac4] ss:$8 sps:$4 sm:$0xff]  }
 0xc64   :  { %10803 = vmatmul.mubr.bf16.vlgmr.msra.gmra.mrb[40].mxu0 %v10575_v30  ;;  %11514 = vmatprep.subr.bf16.mxu1 %v18360_v32  ;;  %v18349_v32 = vld [vmem:[#allocation8 + $0x17d0] ss:$8 sps:$4 sm:$0xff]   ;;  %v18444_v30 = vld [vmem:[#allocation8 + $0x1ad4] ss:$8 sps:$4 sm:$0xff]  }
 0xc65   :  { %11247 = vmatpush1.bf16.msra.mxu0 %v18271_v53  ;;  %11278 = vmatprep.mubr.bf16.mxu0 %v11052_v12  ;;  %v18357_v12 = vld [vmem:[#allocation8 + $0x17e4] ss:$8 sps:$4 sm:$0xff]   ;;  %v18436_v53 = vld [vmem:[#allocation8 + $0x1ac0] ss:$8 sps:$4 sm:$0xff]  }
 0xc66   :  { %11248 = vmatprep.subr.bf16.mxu0 %v18279_v6  ;;  %v18355_v6 = vld [vmem:[#allocation8 + $0x17e0] ss:$8 sps:$4 sm:$0xff]  }
 0xc67   :  { %11515 = vmatpush1.bf16.msra.mxu1 %v18358_v62  ;;  %v18363_v62 = vld [vmem:[#allocation8 + $0x17f4] ss:$8 sps:$4 sm:$0xff]  }
 0xc68   :  { %11960 = vmatprep.subr.bf16.mxu1 %v18366_v37  ;;  %v18442_v37 = vld [vmem:[#allocation8 + $0x1ad0] ss:$8 sps:$4 sm:$0xff]  }
 0xc69   :  { %11249 = vmatpush1.bf16.msra.mxu0 %v18277_v23  ;;  %v18450_v23 = vld [vmem:[#allocation8 + $0x1ae4] ss:$8 sps:$4 sm:$0xff]  }
 0xc6a   :  { %11250 = vmatprep.subr.bf16.mxu0 %v18285_v15  ;;  %11517 = vmatmul.mubr.bf16.vlgmr.msra.gmra.mrb[140].mxu1 %v11289_v44  ;;  %v18361_v15 = vld [vmem:[#allocation8 + $0x17f0] ss:$8 sps:$4 sm:$0xff]   ;;  %v18369_v44 = vld [vmem:[#allocation8 + $0x1904] ss:$8 sps:$4 sm:$0xff]  }
 0xc6b   :  { %11961 = vmatpush1.bf16.msra.mxu1 %v18364_v0  ;;  %11992 = vmatprep.mubr.bf16.mxu1 %v11766_v24  ;;  %v18448_v0 = vld [vmem:[#allocation8 + $0x1ae0] ss:$8 sps:$4 sm:$0xff]   ;;  %v18456_v24 = vld [vmem:[#allocation8 + $0x1af4] ss:$8 sps:$4 sm:$0xff]  }
 0xc6c   :  { %11962 = vmatprep.subr.bf16.mxu1 %v18372_v27  ;;  %v11528_v27 = vpack.c.bf16 %v20805_v47, %v20805_v47  ;;  %v18379_v47 = vld [vmem:[#allocation8 + $0x1920] ss:$8 sps:$4 sm:$0xff]  }
 0xc6d   :  { %11251 = vmatpush1.bf16.msra.mxu0 %v18283_v52  ;;  %v18367_v52 = vld [vmem:[#allocation8 + $0x1900] ss:$8 sps:$4 sm:$0xff]  }
 0xc6e   :  { %11252 = vmatprep.subr.bf16.mxu0 %v18291_v59  ;;  %v11051_v59 = vpack.c.bf16 %v20795_v14, %v20795_v14  ;;  %v18385_v14 = vld [vmem:[#allocation8 + $0x1930] ss:$8 sps:$4 sm:$0xff]  }
 0xc6f   :  { %11963 = vmatpush1.bf16.msra.mxu1 %v18370_v2  ;;  %v18375_v2 = vld [vmem:[#allocation8 + $0x1914] ss:$8 sps:$4 sm:$0xff]  }
 0xc70   :  { %11964 = vmatprep.subr.bf16.mxu1 %v18378_v29  ;;  %v18454_v29 = vld [vmem:[#allocation8 + $0x1af0] ss:$8 sps:$4 sm:$0xff]  }
 0xc71   :  { %11253 = vmatpush1.bf16.msra.mxu0 %v18289_v7  ;;  %v18373_v7 = vld [vmem:[#allocation8 + $0x1910] ss:$8 sps:$4 sm:$0xff]  }
 0xc72   :  { %11254 = vmatprep.subr.bf16.mxu0 %v18297_v33  ;;  %v18381_v33 = vld [vmem:[#allocation8 + $0x1924] ss:$8 sps:$4 sm:$0xff]  }
 0xc73   :  { %11965 = vmatpush1.bf16.msra.mxu1 %v18376_v3  ;;  %v11765_v3 = vpack.c.bf16 %v20811_v57, %v20811_v57 }
 0xc74   :  { %11966 = vmatprep.subr.bf16.mxu1 %v18384_v31  ;;  %v18387_v31 = vld [vmem:[#allocation8 + $0x1934] ss:$8 sps:$4 sm:$0xff]  }
 0xc75   :  { %11255 = vmatpush1.bf16.msra.mxu0 %v18295_v17  ;;  %v18393_v17 = vld [vmem:[#allocation8 + $0x1944] ss:$8 sps:$4 sm:$0xff]  }
 0xc76   :  { %11256 = vmatprep.subr.bf16.mxu0 %v18303_v41  ;;  %v18391_v41 = vld [vmem:[#allocation8 + $0x1940] ss:$8 sps:$4 sm:$0xff]  }
 0xc77   :  { %11967 = vmatpush1.bf16.msra.mxu1 %v18382_v10  ;;  %v18399_v10 = vld [vmem:[#allocation8 + $0x1954] ss:$8 sps:$4 sm:$0xff]  }
 0xc78   :  { %11968 = vmatprep.subr.bf16.mxu1 %v18390_v21  ;;  %v18397_v21 = vld [vmem:[#allocation8 + $0x1950] ss:$8 sps:$4 sm:$0xff]  }
 0xc79   :  { %11257 = vmatpush1.bf16.msra.mxu0 %v18301_v60  ;;  %v18405_v60 = vld [vmem:[#allocation8 + $0x1964] ss:$8 sps:$4 sm:$0xff]  }
 0xc7a   :  { %11258 = vmatprep.subr.bf16.mxu0 %v18309_v18 }
 0xc7b   :  { %11969 = vmatpush1.bf16.msra.mxu1 %v18388_v40 }
 0xc7c   :  { %11970 = vmatprep.subr.bf16.mxu1 %v18396_v63  ;;  %v18403_v63 = vld [vmem:[#allocation8 + $0x1960] ss:$8 sps:$4 sm:$0xff]  }
 0xc7d   :  { %11259 = vmatpush1.bf16.msra.mxu0 %v18307_v55 }
 0xc7e   :  { %11260 = vmatprep.subr.bf16.mxu0 %v18315_v5  ;;  %v18411_v5 = vld [vmem:[#allocation8 + $0x1974] ss:$8 sps:$4 sm:$0xff]  }
 0xc7f   :  { %11971 = vmatpush1.bf16.msra.mxu1 %v18394_v61  ;;  %v18409_v61 = vld [vmem:[#allocation8 + $0x1970] ss:$8 sps:$4 sm:$0xff]  }
 0xc80   :  { %11972 = vmatprep.subr.bf16.mxu1 %v18402_v1 }
 0xc81   :  { %11261 = vmatpush1.bf16.msra.mxu0 %v18313_v56  ;;  %v18417_v56 = vld [vmem:[#allocation8 + $0x1984] ss:$8 sps:$4 sm:$0xff]  }
 0xc82   :  { %11262 = vmatprep.subr.bf16.mxu0 %v18321_v50 }
 0xc83   :  { %11973 = vmatpush1.bf16.msra.mxu1 %v18400_v58 }
 0xc84   :  { %11974 = vmatprep.subr.bf16.mxu1 %v18408_v35 }
 0xc85   :  { %11263 = vmatpush1.bf16.msra.mxu0 %v18319_v22  ;;  %v18415_v22 = vld [vmem:[#allocation8 + $0x1980] ss:$8 sps:$4 sm:$0xff]  }
 0xc86   :  { %11264 = vmatprep.subr.bf16.mxu0 %v18327_v28  ;;  %v18423_v28 = vld [vmem:[#allocation8 + $0x1994] ss:$8 sps:$4 sm:$0xff]  }
 0xc87   :  { %11975 = vmatpush1.bf16.msra.mxu1 %v18406_v8  ;;  %v18421_v8 = vld [vmem:[#allocation8 + $0x1990] ss:$8 sps:$4 sm:$0xff]  }
 0xc88   :  { %11976 = vmatprep.subr.bf16.mxu1 %v18414_v20  ;;  %v18429_v20 = vld [vmem:[#allocation8 + $0x19a4] ss:$8 sps:$4 sm:$0xff]  }
 0xc89   :  { %11265 = vmatpush1.bf16.msra.mxu0 %v18325_v9  ;;  %v18427_v9 = vld [vmem:[#allocation8 + $0x19a0] ss:$8 sps:$4 sm:$0xff]  }
 0xc8a   :  { %11266 = vmatprep.subr.bf16.mxu0 %v18333_v51  ;;  %v18435_v51 = vld [vmem:[#allocation8 + $0x19b4] ss:$8 sps:$4 sm:$0xff]  }
 0xc8b   :  { %11977 = vmatpush1.bf16.msra.mxu1 %v18412_v13  ;;  %v18433_v13 = vld [vmem:[#allocation8 + $0x19b0] ss:$8 sps:$4 sm:$0xff]  }
 0xc8c   :  { %11978 = vmatprep.subr.bf16.mxu1 %v18420_v34  ;;  %v18441_v34 = vld [vmem:[#allocation8 + $0x19c4] ss:$8 sps:$4 sm:$0xff]  }
 0xc8d   :  { %11267 = vmatpush1.bf16.msra.mxu0 %v18331_v54  ;;  %v18439_v54 = vld [vmem:[#allocation8 + $0x19c0] ss:$8 sps:$4 sm:$0xff]  }
 0xc8e   :  { %11268 = vmatprep.subr.bf16.mxu0 %v18339_v42  ;;  %v18447_v42 = vld [vmem:[#allocation8 + $0x19d4] ss:$8 sps:$4 sm:$0xff]  }
 0xc8f   :  { %11979 = vmatpush1.bf16.msra.mxu1 %v18418_v43  ;;  %v18445_v43 = vld [vmem:[#allocation8 + $0x19d0] ss:$8 sps:$4 sm:$0xff]  }
 0xc90   :  { %11980 = vmatprep.subr.bf16.mxu1 %v18426_v26  ;;  %v18453_v26 = vld [vmem:[#allocation8 + $0x19e4] ss:$8 sps:$4 sm:$0xff]  }
 0xc91   :  { %11269 = vmatpush1.bf16.msra.mxu0 %v18337_v4  ;;  %v18451_v4 = vld [vmem:[#allocation8 + $0x19e0] ss:$8 sps:$4 sm:$0xff]  }
 0xc92   :  { %11270 = vmatprep.subr.bf16.mxu0 %v18345_v16  ;;  %v18459_v16 = vld [vmem:[#allocation8 + $0x19f4] ss:$8 sps:$4 sm:$0xff]  }
 0xc93   :  { %11981 = vmatpush1.bf16.msra.mxu1 %v18424_v48  ;;  %v18457_v48 = vld [vmem:[#allocation8 + $0x19f0] ss:$8 sps:$4 sm:$0xff]  }
 0xc94   :  { %11982 = vmatprep.subr.bf16.mxu1 %v18432_v39  ;;  %v11527_v39 = vpack.c.bf16 %v20801_v46, %v20801_v46 }
 0xc95   :  { %11271 = vmatpush1.bf16.msra.mxu0 %v18343_v25 }
 0xc96   :  { %11272 = vmatprep.subr.bf16.mxu0 %v18351_v49 }
 0xc97   :  { %11983 = vmatpush1.bf16.msra.mxu1 %v18430_v38 }
 0xc98   :  { %11984 = vmatprep.subr.bf16.mxu1 %v18438_v19 }
 0xc99   :  { %11273 = vmatpush1.bf16.msra.mxu0 %v18349_v32 }
 0xc9a   :  { %11274 = vmatprep.subr.bf16.mxu0 %v18357_v12 }
 0xc9b   :  { %11985 = vmatpush1.bf16.msra.mxu1 %v18436_v53 }
 0xc9c   :  { %11986 = vmatprep.subr.bf16.mxu1 %v18444_v30 }
 0xc9d   :  { %11275 = vmatpush1.bf16.msra.mxu0 %v18355_v6 }
 0xc9e   :  { %11276 = vmatprep.subr.bf16.mxu0 %v18363_v62 }
 0xc9f   :  { %11987 = vmatpush1.bf16.msra.mxu1 %v18442_v37 }
 0xca0   :  { %11988 = vmatprep.subr.bf16.mxu1 %v18450_v23 }
 0xca1   :  { %11277 = vmatpush1.bf16.msra.mxu0 %v18361_v15 }
 0xca2   :  { %11722 = vmatprep.subr.bf16.mxu0 %v18369_v44 }
 0xca3   :  { %11989 = vmatpush1.bf16.msra.mxu1 %v18448_v0 }
 0xca4   :  { %11279 = vmatmul.mubr.bf16.vlgmr.msra.gmra.mrb[44].mxu0 %v11051_v59  ;;  %11990 = vmatprep.subr.bf16.mxu1 %v18456_v24 }
 0xca5   :  { %11723 = vmatpush1.bf16.msra.mxu0 %v18367_v52  ;;  %11754 = vmatprep.mubr.bf16.mxu0 %v11528_v27 }
 0xca6   :  { %11724 = vmatprep.subr.bf16.mxu0 %v18375_v2 }
 0xca7   :  { %11991 = vmatpush1.bf16.msra.mxu1 %v18454_v29 }
 0xca9   :  { %11725 = vmatpush1.bf16.msra.mxu0 %v18373_v7 }
 0xcaa   :  { %11726 = vmatprep.subr.bf16.mxu0 %v18381_v33  ;;  %11993 = vmatmul.mubr.bf16.vlgmr.msra.gmra.mrb[144].mxu1 %v11765_v3  ;;  %v18463_v3 = vld [vmem:[#allocation8 + $0x1b00] ss:$8 sps:$4 sm:$0xff]  }
 0xcad   :  { %11727 = vmatpush1.bf16.msra.mxu0 %v18379_v47  ;;  %v18465_v47 = vld [vmem:[#allocation8 + $0x1b04] ss:$8 sps:$4 sm:$0xff]  }
 0xcae   :  { %11728 = vmatprep.subr.bf16.mxu0 %v18387_v31  ;;  %v18471_v31 = vld [vmem:[#allocation8 + $0x1b14] ss:$8 sps:$4 sm:$0xff]   ;;  %12593 = vmatprep.subr.bf16.mxu1 %v18465_v47 }
 0xcaf   :  { %12594 = vmatpush1.bf16.msra.mxu1 %v18463_v3  ;;  %v18468_v3 = vld [vmem:[#allocation8 + $0x1c04] ss:$8 sps:$4 sm:$0xff]  }
 0xcb0   :  { %12595 = vmatprep.subr.bf16.mxu1 %v18471_v31  ;;  %v18460_v31 = vld [vmem:[%s20917_s4] sm:$0xff]  }
 0xcb1   :  { %11729 = vmatpush1.bf16.msra.mxu0 %v18385_v14  ;;  %v18469_v14 = vld [vmem:[#allocation8 + $0x1b10] ss:$8 sps:$4 sm:$0xff]  }
 0xcb2   :  { %11730 = vmatprep.subr.bf16.mxu0 %v18393_v17  ;;  %v18477_v17 = vld [vmem:[#allocation8 + $0x1b24] ss:$8 sps:$4 sm:$0xff]  }
 0xcb3   :  { %12596 = vmatpush1.bf16.msra.mxu1 %v18469_v14  ;;  %v18466_v14 = vld [vmem:[#allocation8 + $0x1c00] ss:$8 sps:$4 sm:$0xff]  }
 0xcb4   :  { %12597 = vmatprep.subr.bf16.mxu1 %v18477_v17  ;;  %v18474_v17 = vld [vmem:[#allocation8 + $0x1c14] ss:$8 sps:$4 sm:$0xff]  }
 0xcb5   :  { %11731 = vmatpush1.bf16.msra.mxu0 %v18391_v41  ;;  %v18475_v41 = vld [vmem:[#allocation8 + $0x1b20] ss:$8 sps:$4 sm:$0xff]  }
 0xcb6   :  { %11732 = vmatprep.subr.bf16.mxu0 %v18399_v10  ;;  %v18483_v10 = vld [vmem:[#allocation8 + $0x1b34] ss:$8 sps:$4 sm:$0xff]  }
 0xcb7   :  { %v10129_v18 = vpop.f32.mrb[32].mxu0  ;;  %12598 = vmatpush1.bf16.msra.mxu1 %v18475_v41  ;;  %v18472_v41 = vld [vmem:[#allocation8 + $0x1c10] ss:$8 sps:$4 sm:$0xff]  }
 0xcb8   :  { %v10131_v57 = vpop.f32.mrb[33].mxu0  ;;  %12599 = vmatprep.subr.bf16.mxu1 %v18483_v10  ;;  %v18480_v10 = vld [vmem:[#allocation8 + $0x1c24] ss:$8 sps:$4 sm:$0xff]  }
 0xcb9   :  { %11733 = vmatpush1.bf16.msra.mxu0 %v18397_v21  ;;  %v10133_v40 = vpop.f32.mrb[34].mxu0  ;;  %v18481_v21 = vld [vmem:[#allocation8 + $0x1b30] ss:$8 sps:$4 sm:$0xff]  }
 0xcba   :  { %v10134_v55 = vpop.f32.mrb[35].mxu0  ;;  %11734 = vmatprep.subr.bf16.mxu0 %v18405_v60  ;;  %v18489_v60 = vld [vmem:[#allocation8 + $0x1b44] ss:$8 sps:$4 sm:$0xff]   ;;  %v18493_v40 = vld [vmem:[#allocation8 + $0x1b50] ss:$8 sps:$4 sm:$0xff]  }
 0xcbb   :  { %12600 = vmatpush1.bf16.msra.mxu1 %v18481_v21  ;;  %v18499_v55 = vld [vmem:[#allocation8 + $0x1b60] ss:$8 sps:$4 sm:$0xff]   ;;  %v18461_v21 = vld [vmem:[%s20917_s4 + $0x8] sm:$0xff]  }
 0xcbc   :  { %12601 = vmatprep.subr.bf16.mxu1 %v18489_v60  ;;  %v18478_v60 = vld [vmem:[#allocation8 + $0x1c20] ss:$8 sps:$4 sm:$0xff]  }
 0xcbd   :  { %11735 = vmatpush1.bf16.msra.mxu0 %v18403_v63  ;;  %v10566_v1 = vpop.f32.mrb[132].mxu1  ;;  %v18501_v63 = vld [vmem:[#allocation8 + $0x1b64] ss:$8 sps:$4 sm:$0xff]  }
 0xcbe   :  { %11736 = vmatprep.subr.bf16.mxu0 %v18411_v5  ;;  %v10568_v50 = vpop.f32.mrb[133].mxu1  ;;  %v18507_v5 = vld [vmem:[#allocation8 + $0x1b74] ss:$8 sps:$4 sm:$0xff]  }
 0xcbf   :  { %v10570_v58 = vpop.f32.mrb[134].mxu1 }
 0xcc0   :  { %v10571_v35 = vpop.f32.mrb[135].mxu1 }
 0xcc1   :  { %11737 = vmatpush1.bf16.msra.mxu0 %v18409_v61  ;;  %v18505_v61 = vld [vmem:[#allocation8 + $0x1b70] ss:$8 sps:$4 sm:$0xff]  }
 0xcc2   :  { %11738 = vmatprep.subr.bf16.mxu0 %v18417_v56 }
 0xcc5   :  { %11739 = vmatpush1.bf16.msra.mxu0 %v18415_v22  ;;  %v18519_v22 = vld [vmem:[#allocation8 + $0x1b94] ss:$8 sps:$4 sm:$0xff]  }
 0xcc6   :  { %11740 = vmatprep.subr.bf16.mxu0 %v18423_v28 }
 0xcc9   :  { %11741 = vmatpush1.bf16.msra.mxu0 %v18421_v8 }
 0xcca   :  { %11742 = vmatprep.subr.bf16.mxu0 %v18429_v20 }
 0xccd   :  { %11743 = vmatpush1.bf16.msra.mxu0 %v18427_v9 }
 0xcce   :  { %11744 = vmatprep.subr.bf16.mxu0 %v18435_v51 }
 0xcd1   :  { %11745 = vmatpush1.bf16.msra.mxu0 %v18433_v13  ;;  %v18517_v13 = vld [vmem:[#allocation8 + $0x1b90] ss:$8 sps:$4 sm:$0xff]  }
 0xcd2   :  { %11746 = vmatprep.subr.bf16.mxu0 %v18441_v34  ;;  %v18526_v34 = vld [vmem:[#allocation8 + $0x1ba4] ss:$8 sps:$4 sm:$0xff]  }
 0xcd5   :  { %11747 = vmatpush1.bf16.msra.mxu0 %v18439_v54 }
 0xcd6   :  { %11748 = vmatprep.subr.bf16.mxu0 %v18447_v42 }
 0xcd9   :  { %11749 = vmatpush1.bf16.msra.mxu0 %v18445_v43 }
 0xcda   :  { %11750 = vmatprep.subr.bf16.mxu0 %v18453_v26  ;;  %v18524_v26 = vld [vmem:[#allocation8 + $0x1ba0] ss:$8 sps:$4 sm:$0xff]  }
 0xcdd   :  { %11751 = vmatpush1.bf16.msra.mxu0 %v18451_v4 }
 0xcde   :  { %11752 = vmatprep.subr.bf16.mxu0 %v18459_v16  ;;  %v18532_v16 = vld [vmem:[#allocation8 + $0x1bb4] ss:$8 sps:$4 sm:$0xff]  }
 0xce1   :  { %11753 = vmatpush1.bf16.msra.mxu0 %v18457_v48  ;;  %v18530_v48 = vld [vmem:[#allocation8 + $0x1bb0] ss:$8 sps:$4 sm:$0xff]  }
 0xce4   :  { %11755 = vmatmul.mubr.bf16.vlgmr.msra.gmra.mrb[48].mxu0 %v11527_v39  ;;  %v18538_v39 = vld [vmem:[#allocation8 + $0x1bc4] ss:$8 sps:$4 sm:$0xff]  }
 0xce5   :  { %12113 = vmatprep.mubr.bf16.mxu0 %v21038_v45 }
 0xcf7   :  { %v10330_v25 = vpop.f32.mrb[36].mxu0 }
 0xcf8   :  { %v10331_v49 = vadd.f32 %v10330_v25, %v10129_v18  ;;  %v10332_v38 = vpop.f32.mrb[37].mxu0  ;;  %v18487_v18 = vld [vmem:[#allocation8 + $0x1b40] ss:$8 sps:$4 sm:$0xff]  }
 0xcf9   :  { %v10333_v19 = vadd.f32 %v10332_v38, %v10131_v57  ;;  %v10334_v32 = vpop.f32.mrb[38].mxu0  ;;  %v18495_v57 = vld [vmem:[#allocation8 + $0x1b54] ss:$8 sps:$4 sm:$0xff]   ;;  %12602 = vmatpush1.bf16.msra.mxu1 %v18487_v18  ;;  %v18536_v25 = vld [vmem:[#allocation8 + $0x1bc0] ss:$8 sps:$4 sm:$0xff]  }
 0xcfa   :  { %v10335_v12 = vpop.f32.mrb[39].mxu0  ;;  %v10573_v53 = vadd.f32 %v10566_v1, %v10331_v49  ;;  %12603 = vmatprep.subr.bf16.mxu1 %v18495_v57  ;;  %v18513_v1 = vld [vmem:[#allocation8 + $0x1b84] ss:$8 sps:$4 sm:$0xff]   ;;  %v18544_v49 = vld [vmem:[#allocation8 + $0x1bd4] ss:$8 sps:$4 sm:$0xff]  }
 0xcfb   :  { %v10574_v30 = vadd.f32 %v10568_v50, %v10333_v19  ;;  %v18511_v50 = vld [vmem:[#allocation8 + $0x1b80] ss:$8 sps:$4 sm:$0xff]   ;;  %v18542_v38 = vld [vmem:[#allocation8 + $0x1bd0] ss:$8 sps:$4 sm:$0xff]   ;;  %v18551_v19 = vld [vmem:[#allocation8 + $0x1be4] ss:$8 sps:$4 sm:$0xff]  }
 0xcfc   :  { %v18549_v32 = vld [vmem:[#allocation8 + $0x1be0] ss:$8 sps:$4 sm:$0xff]   ;;  %v12004_v12 = vld [vmem:[#allocation10 + $0x4] sm:$0x3]  ;;  %v18486_v18 = vld [vmem:[#allocation8 + $0x1c34] ss:$8 sps:$4 sm:$0xff]  }
 0xcfd   :  { %v11042_v6 = vpop.f32.mrb[136].mxu1  ;;  %12604 = vmatpush1.bf16.msra.mxu1 %v18493_v40  ;;  %v18484_v57 = vld [vmem:[#allocation8 + $0x1c30] ss:$8 sps:$4 sm:$0xff]   ;;  %v18492_v40 = vld [vmem:[#allocation8 + $0x1c44] ss:$8 sps:$4 sm:$0xff]  }
 0xcfe   :  { %v11044_v62 = vpop.f32.mrb[137].mxu1  ;;  %12605 = vmatprep.subr.bf16.mxu1 %v18501_v63  ;;  %v18462_v63 = vld [vmem:[%s20917_s4 + $0x10] sm:$0xff]  }
 0xcff   :  { %v11046_v37 = vpop.f32.mrb[138].mxu1 }
 0xd00   :  { %v11047_v23 = vpop.f32.mrb[139].mxu1 }
 0xd01   :  { %12606 = vmatpush1.bf16.msra.mxu1 %v18499_v55  ;;  %v12013_v23 = vrot.slane %v12004_v12, %v21040_v11  ;;  %v18490_v55 = vld [vmem:[#allocation8 + $0x1c40] ss:$8 sps:$4 sm:$0xff]  }
 0xd02   :  { %12607 = vmatprep.subr.bf16.mxu1 %v18507_v5  ;;  %v18498_v5 = vld [vmem:[#allocation8 + $0x1c54] ss:$8 sps:$4 sm:$0xff]  }
 0xd05   :  { %12608 = vmatpush1.bf16.msra.mxu1 %v18505_v61  ;;  %v18496_v61 = vld [vmem:[#allocation8 + $0x1c50] ss:$8 sps:$4 sm:$0xff]  }
 0xd06   :  { %12609 = vmatprep.subr.bf16.mxu1 %v18513_v1  ;;  %v18504_v1 = vld [vmem:[#allocation8 + $0x1c64] ss:$8 sps:$4 sm:$0xff]  }
 0xd09   :  { %12610 = vmatpush1.bf16.msra.mxu1 %v18511_v50  ;;  %v18502_v50 = vld [vmem:[#allocation8 + $0x1c60] ss:$8 sps:$4 sm:$0xff]  }
 0xd0a   :  { %12611 = vmatprep.subr.bf16.mxu1 %v18519_v22  ;;  %v18516_v22 = vld [vmem:[#allocation8 + $0x1c84] ss:$8 sps:$4 sm:$0xff]  }
 0xd0d   :  { %12612 = vmatpush1.bf16.msra.mxu1 %v18517_v13  ;;  %v18527_v13 = vld [vmem:[#allocation8 + $0x1ca0] ss:$8 sps:$4 sm:$0xff]  }
 0xd0e   :  { %12613 = vmatprep.subr.bf16.mxu1 %v18526_v34  ;;  %v18533_v34 = vld [vmem:[#allocation8 + $0x1cb0] ss:$8 sps:$4 sm:$0xff]  }
 0xd11   :  { %12614 = vmatpush1.bf16.msra.mxu1 %v18524_v26  ;;  %v18545_v26 = vld [vmem:[#allocation8 + $0x1cd0] ss:$8 sps:$4 sm:$0xff]  }
 0xd12   :  { %12615 = vmatprep.subr.bf16.mxu1 %v18532_v16  ;;  %v18552_v16 = vld [vmem:[#allocation8 + $0x1ce0] ss:$8 sps:$4 sm:$0xff]  }
 0xd15   :  { %12616 = vmatpush1.bf16.msra.mxu1 %v18530_v48  ;;  %v18557_v48 = vld [vmem:[#allocation8 + $0x1bf4] ss:$8 sps:$4 sm:$0xff]  }
 0xd16   :  { %12617 = vmatprep.subr.bf16.mxu1 %v18538_v39  ;;  %v18555_v39 = vld [vmem:[#allocation8 + $0x1bf0] ss:$8 sps:$4 sm:$0xff]  }
 0xd19   :  { %12618 = vmatpush1.bf16.msra.mxu1 %v18536_v25  ;;  %v18560_v25 = vld [vmem:[#allocation8 + $0x1cf4] ss:$8 sps:$4 sm:$0xff]  }
 0xd1a   :  { %12619 = vmatprep.subr.bf16.mxu1 %v18544_v49  ;;  %v18558_v49 = vld [vmem:[#allocation8 + $0x1cf0] ss:$8 sps:$4 sm:$0xff]  }
 0xd1d   :  { %12620 = vmatpush1.bf16.msra.mxu1 %v18542_v38  ;;  %v18563_v38 = vld [vmem:[#allocation8 + $0x1e04] ss:$8 sps:$4 sm:$0xff]  }
 0xd1e   :  { %12621 = vmatprep.subr.bf16.mxu1 %v18551_v19  ;;  %v18566_v19 = vld [vmem:[#allocation8 + $0x1d04] ss:$8 sps:$4 sm:$0xff]  }
 0xd21   :  { %12622 = vmatpush1.bf16.msra.mxu1 %v18549_v32 }
 0xd22   :  { %12623 = vmatprep.subr.bf16.mxu1 %v18557_v48  ;;  %v18618_v48 = vld [vmem:[#allocation8 + $0x1d90] ss:$8 sps:$4 sm:$0xff]  }
 0xd25   :  { %12624 = vmatpush1.bf16.msra.mxu1 %v18555_v39  ;;  %v18626_v39 = vld [vmem:[#allocation8 + $0x1da4] ss:$8 sps:$4 sm:$0xff]  }
 0xd26   :  { %13067 = vmatprep.subr.bf16.mxu1 %v18563_v38  ;;  %v18624_v38 = vld [vmem:[#allocation8 + $0x1da0] ss:$8 sps:$4 sm:$0xff]  }
 0xd37   :  { %v10804_v15 = vpop.f32.mrb[40].mxu0 }
 0xd38   :  { %v10811_v44 = vadd.f32 %v10804_v15, %v10573_v53  ;;  %v10806_v0 = vpop.f32.mrb[41].mxu0 }
 0xd39   :  { %v10812_v24 = vadd.f32 %v10806_v0, %v10574_v30  ;;  %v10808_v46 = vpop.f32.mrb[42].mxu0 }
 0xd3a   :  { %v10809_v27 = vpop.f32.mrb[43].mxu0  ;;  %v11049_v52 = vadd.f32 %v11042_v6, %v10811_v44  ;;  %v12009_v6 = vrot.slane %v12004_v12, %v21039_v36 }
 0xd3b   :  { %v11050_v59 = vadd.f32 %v11044_v62, %v10812_v24 }
 0xd3d   :  { %v11518_v2 = vpop.f32.mrb[140].mxu1 }
 0xd3e   :  { %v11520_v29 = vpop.f32.mrb[141].mxu1 }
 0xd3f   :  { %v11522_v7 = vpop.f32.mrb[142].mxu1 }
 0xd40   :  { %v11523_v33 = vpop.f32.mrb[143].mxu1 }
 0xd77   :  { %v11280_v56 = vpop.f32.mrb[44].mxu0 }
 0xd78   :  { %v11287_v58 = vadd.f32 %v11280_v56, %v11049_v52  ;;  %v11282_v35 = vpop.f32.mrb[45].mxu0  ;;  %v18520_v56 = vld [vmem:[%s20917_s4 + $0x18] sm:$0xff]  }
 0xd79   :  { %v11288_v28 = vadd.f32 %v11282_v35, %v11050_v59  ;;  %v11284_v8 = vpop.f32.mrb[46].mxu0  ;;  %v18508_v35 = vld [vmem:[#allocation8 + $0x1c70] ss:$8 sps:$4 sm:$0xff]  }
 0xd7a   :  { %v11285_v20 = vpop.f32.mrb[47].mxu0  ;;  %v11525_v9 = vadd.f32 %v11518_v2, %v11287_v58  ;;  %v18510_v58 = vld [vmem:[#allocation8 + $0x1c74] ss:$8 sps:$4 sm:$0xff]   ;;  %v18514_v8 = vld [vmem:[#allocation8 + $0x1c80] ss:$8 sps:$4 sm:$0xff]  }
 0xd7b   :  { %v11526_v51 = vadd.f32 %v11520_v29, %v11288_v28  ;;  %v18548_v28 = vld [vmem:[%s20917_s4 + $0x20] ss:$0 sps:$4 sm:$0xff]   ;;  %v18523_v20 = vld [vmem:[#allocation8 + $0x1c94] ss:$8 sps:$4 sm:$0xff]  }
 0xd7d   :  { %v11994_v54 = vpop.f32.mrb[144].mxu1 }
 0xd7e   :  { %v11996_v42 = vpop.f32.mrb[145].mxu1 }
 0xd7f   :  { %v11998_v43 = vpop.f32.mrb[146].mxu1 }
 0xd80   :  { %v11999_v4 = vpop.f32.mrb[147].mxu1  ;;  %v18547_v43 = vld [vmem:[#allocation8 + $0x1cd4] ss:$8 sps:$4 sm:$0xff]  }
 0xd81   :  { %v18554_v4 = vld [vmem:[#allocation8 + $0x1ce4] ss:$8 sps:$4 sm:$0xff]  }
 0xdb7   :  { %v11756_v53 = vpop.f32.mrb[48].mxu0 }
 0xdb8   :  { %v11763_v30 = vadd.f32 %v11756_v53, %v11525_v9  ;;  %v11758_v62 = vpop.f32.mrb[49].mxu0  ;;  %v18521_v9 = vld [vmem:[#allocation8 + $0x1c90] ss:$8 sps:$4 sm:$0xff]  }
 0xdb9   :  { %v11764_v37 = vadd.f32 %v11758_v62, %v11526_v51  ;;  %v11760_v15 = vpop.f32.mrb[50].mxu0  ;;  %v18529_v51 = vld [vmem:[#allocation8 + $0x1ca4] ss:$8 sps:$4 sm:$0xff]  }
 0xdba   :  { %v12001_v44 = vadd.f32 %v11994_v54, %v11763_v30  ;;  %v11761_v0 = vpop.f32.mrb[51].mxu0  ;;  %v18541_v54 = vld [vmem:[#allocation8 + $0x1cc4] ss:$8 sps:$4 sm:$0xff]  }
 0xdbb   :  { %v12002_v24 = vadd.f32 %v11996_v42, %v11764_v37  ;;  %v18539_v42 = vld [vmem:[#allocation8 + $0x1cc0] ss:$8 sps:$4 sm:$0xff]  }
 0xdbc   :  { %v12016_v46 = vadd.f32 %v12009_v6, %v12001_v44  ;;  %v18561_v6 = vld [vmem:[#allocation8 + $0x1e00] ss:$8 sps:$4 sm:$0xff]  }
 0xdbd   :  { %v12017_v27 = vadd.f32 %v12013_v23, %v12002_v24  ;;  %v18569_v23 = vld [vmem:[#allocation8 + $0x1e14] ss:$8 sps:$4 sm:$0xff]   ;;  %v18564_v44 = vld [vmem:[#allocation8 + $0x1d00] ss:$8 sps:$4 sm:$0xff]  }
 0xdbe   :  { %v12020_v52 = vmul.f32 0.01, %v12016_v46  ;;  %vm12018_vm9 = vcmp.ge.f32.partialorder %v12016_v46, 0.0  ;;  %v18572_v24 = vld [vmem:[#allocation8 + $0x1d14] ss:$8 sps:$4 sm:$0xff]  }
 0xdbf   :  { %vm12019_vm10 = vcmp.ge.f32.partialorder %v12017_v27, 0.0  ;;  %v12021_v59 = vmul.f32 0.01, %v12017_v27 }
 0xdc0   :  { %v12022_v2 = vsel %vm12018_vm9, %v12016_v46, %v12020_v52  ;;  %v18567_v46 = vld [vmem:[#allocation8 + $0x1e10] ss:$8 sps:$4 sm:$0xff]  }
 0xdc1   :  { %v12023_v29 = vsel %vm12019_vm10, %v12017_v27, %v12021_v59  ;;  %v12024_v7 = vpack.c.bf16 %v12022_v2, %v12022_v2  ;;  %v18575_v27 = vld [vmem:[#allocation8 + $0x1e24] ss:$8 sps:$4 sm:$0xff]   ;;  %v18570_v52 = vld [vmem:[#allocation8 + $0x1d10] ss:$8 sps:$4 sm:$0xff]  }
 0xdc2   :  { %v12025_v33 = vpack.c.bf16 %v12023_v29, %v12023_v29  ;;  %v18578_v2 = vld [vmem:[#allocation8 + $0x1d24] ss:$8 sps:$4 sm:$0xff]  }
 0xdc3   :  { %v12076_v47 = vsel %vm12074_vm11, %v12024_v7, 0  ;;  %v18573_v7 = vld [vmem:[#allocation8 + $0x1e20] ss:$8 sps:$4 sm:$0xff]  }
 0xdc4   :  { %15690 = vmatprep.subr.msk.bf16.mxu0 %vm12074_vm11, %v12025_v33 }
 0xdc5   :  { %12082 = vmatpush1.bf16.msra.mxu0 %v12076_v47  ;;  %v18581_v47 = vld [vmem:[#allocation8 + $0x1e34] ss:$8 sps:$4 sm:$0xff]  }
 0xdc6   :  { %12392 = vmatprep.subr.bf16.mxu0 %v18468_v3 }
 0xdc8   :  { %15691 = vmatmul.mubr.msk.bf16.vlgmr.msra.gmra.mrb[52].mxu0 %vm12058_vm12, %v18460_v31 }
 0xdc9   :  { %12123 = vmatprep.mubr.bf16.mxu0 %v21038_v45  ;;  %12393 = vmatpush1.bf16.msra.mxu0 %v18466_v14  ;;  %v18576_v14 = vld [vmem:[#allocation8 + $0x1d20] ss:$8 sps:$4 sm:$0xff]  }
 0xdca   :  { %12394 = vmatprep.subr.bf16.mxu0 %v18474_v17 }
 0xdcd   :  { %12395 = vmatpush1.bf16.msra.mxu0 %v18472_v41  ;;  %v18584_v41 = vld [vmem:[#allocation8 + $0x1d34] ss:$8 sps:$4 sm:$0xff]  }
 0xdce   :  { %12396 = vmatprep.subr.bf16.mxu0 %v18480_v10  ;;  %v18579_v10 = vld [vmem:[#allocation8 + $0x1e30] ss:$8 sps:$4 sm:$0xff]  }
 0xdd0   :  { %15692 = vmatmul.mubr.msk.bf16.gmra.mrb[56].mxu0 %vm12058_vm12, %v18461_v21  ;;  %v18587_v21 = vld [vmem:[#allocation8 + $0x1e44] ss:$8 sps:$4 sm:$0xff]  }
 0xdd1   :  { %12133 = vmatprep.mubr.bf16.mxu0 %v21038_v45  ;;  %12397 = vmatpush1.bf16.msra.mxu0 %v18478_v60  ;;  %v18582_v60 = vld [vmem:[#allocation8 + $0x1d30] ss:$8 sps:$4 sm:$0xff]  }
 0xdd2   :  { %12398 = vmatprep.subr.bf16.mxu0 %v18486_v18 }
 0xdd5   :  { %12399 = vmatpush1.bf16.msra.mxu0 %v18484_v57  ;;  %v18590_v57 = vld [vmem:[#allocation8 + $0x1d44] ss:$8 sps:$4 sm:$0xff]  }
 0xdd6   :  { %12400 = vmatprep.subr.bf16.mxu0 %v18492_v40 }
 0xdd8   :  { %15693 = vmatmul.mubr.msk.bf16.gmra.mrb[60].mxu0 %vm12058_vm12, %v18462_v63  ;;  %v18585_v63 = vld [vmem:[#allocation8 + $0x1e40] ss:$8 sps:$4 sm:$0xff]  }
 0xdd9   :  { %12401 = vmatpush1.bf16.msra.mxu0 %v18490_v55  ;;  %12143 = vmatprep.mubr.bf16.mxu0 %v21038_v45 }
 0xdda   :  { %12402 = vmatprep.subr.bf16.mxu0 %v18498_v5  ;;  %v18593_v5 = vld [vmem:[#allocation8 + $0x1e54] ss:$8 sps:$4 sm:$0xff]  }
 0xddd   :  { %12403 = vmatpush1.bf16.msra.mxu0 %v18496_v61 }
 0xdde   :  { %12404 = vmatprep.subr.bf16.mxu0 %v18504_v1  ;;  %v18588_v1 = vld [vmem:[#allocation8 + $0x1d40] ss:$8 sps:$4 sm:$0xff]  }
 0xde0   :  { %15694 = vmatmul.mubr.msk.bf16.gmra.mrb[64].mxu0 %vm12058_vm12, %v18520_v56  ;;  %v18596_v56 = vld [vmem:[#allocation8 + $0x1d54] ss:$8 sps:$4 sm:$0xff]  }
 0xde1   :  { %12405 = vmatpush1.bf16.msra.mxu0 %v18502_v50  ;;  %12153 = vmatprep.mubr.bf16.mxu0 %v21038_v45  ;;  %v18535_v45 = vld [vmem:[#allocation8 + $0x1cb4] ss:$8 sps:$4 sm:$0xff]   ;;  %v18591_v50 = vld [vmem:[#allocation8 + $0x1e50] ss:$8 sps:$4 sm:$0xff]  }
 0xde2   :  { %12406 = vmatprep.subr.bf16.mxu0 %v18510_v58  ;;  %v18599_v58 = vld [vmem:[#allocation8 + $0x1e64] ss:$8 sps:$4 sm:$0xff]  }
 0xde5   :  { %12407 = vmatpush1.bf16.msra.mxu0 %v18508_v35  ;;  %v18594_v35 = vld [vmem:[#allocation8 + $0x1d50] ss:$8 sps:$4 sm:$0xff]  }
 0xde6   :  { %12408 = vmatprep.subr.bf16.mxu0 %v18516_v22  ;;  %v18602_v22 = vld [vmem:[#allocation8 + $0x1d64] ss:$8 sps:$4 sm:$0xff]  }
 0xde8   :  { %15695 = vmatmul.mubr.msk.bf16.gmra.mrb[68].mxu0 %vm12058_vm12, %v18548_v28  ;;  %v18597_v28 = vld [vmem:[#allocation8 + $0x1e60] ss:$8 sps:$4 sm:$0xff]  }
 0xde9   :  { %12409 = vmatpush1.bf16.msra.mxu0 %v18514_v8  ;;  %v18605_v8 = vld [vmem:[#allocation8 + $0x1e74] ss:$8 sps:$4 sm:$0xff]  }
 0xdea   :  { %12410 = vmatprep.subr.bf16.mxu0 %v18523_v20  ;;  %v18600_v20 = vld [vmem:[#allocation8 + $0x1d60] ss:$8 sps:$4 sm:$0xff]  }
 0xded   :  { %12411 = vmatpush1.bf16.msra.mxu0 %v18521_v9  ;;  %v18608_v9 = vld [vmem:[#allocation8 + $0x1d74] ss:$8 sps:$4 sm:$0xff]  }
 0xdee   :  { %12412 = vmatprep.subr.bf16.mxu0 %v18529_v51  ;;  %v18603_v51 = vld [vmem:[#allocation8 + $0x1e70] ss:$8 sps:$4 sm:$0xff]  }
 0xdf1   :  { %12413 = vmatpush1.bf16.msra.mxu0 %v18527_v13  ;;  %v18611_v13 = vld [vmem:[#allocation8 + $0x1e84] ss:$8 sps:$4 sm:$0xff]  }
 0xdf2   :  { %12414 = vmatprep.subr.bf16.mxu0 %v18535_v45  ;;  %v18606_v45 = vld [vmem:[#allocation8 + $0x1d70] ss:$8 sps:$4 sm:$0xff]  }
 0xdf5   :  { %12415 = vmatpush1.bf16.msra.mxu0 %v18533_v34  ;;  %v18614_v34 = vld [vmem:[#allocation8 + $0x1d84] ss:$8 sps:$4 sm:$0xff]  }
 0xdf6   :  { %12416 = vmatprep.subr.bf16.mxu0 %v18541_v54  ;;  %v18609_v54 = vld [vmem:[#allocation8 + $0x1e80] ss:$8 sps:$4 sm:$0xff]  }
 0xdf9   :  { %12417 = vmatpush1.bf16.msra.mxu0 %v18539_v42  ;;  %v18617_v42 = vld [vmem:[#allocation8 + $0x1e94] ss:$8 sps:$4 sm:$0xff]  }
 0xdfa   :  { %12418 = vmatprep.subr.bf16.mxu0 %v18547_v43  ;;  %v18612_v43 = vld [vmem:[#allocation8 + $0x1d80] ss:$8 sps:$4 sm:$0xff]  }
 0xdfd   :  { %12419 = vmatpush1.bf16.msra.mxu0 %v18545_v26  ;;  %v18620_v26 = vld [vmem:[#allocation8 + $0x1d94] ss:$8 sps:$4 sm:$0xff]  }
 0xdfe   :  { %12420 = vmatprep.subr.bf16.mxu0 %v18554_v4  ;;  %v18615_v4 = vld [vmem:[#allocation8 + $0x1e90] ss:$8 sps:$4 sm:$0xff]  }
 0xe01   :  { %12421 = vmatpush1.bf16.msra.mxu0 %v18552_v16  ;;  %v18623_v16 = vld [vmem:[#allocation8 + $0x1ea4] ss:$8 sps:$4 sm:$0xff]  }
 0xe02   :  { %12422 = vmatprep.subr.bf16.mxu0 %v18560_v25  ;;  %v18621_v25 = vld [vmem:[#allocation8 + $0x1ea0] ss:$8 sps:$4 sm:$0xff]  }
 0xe05   :  { %12423 = vmatpush1.bf16.msra.mxu0 %v18558_v49  ;;  %v18629_v49 = vld [vmem:[#allocation8 + $0x1eb4] ss:$8 sps:$4 sm:$0xff]  }
 0xe06   :  { %12829 = vmatprep.subr.bf16.mxu0 %v18566_v19  ;;  %v18632_v19 = vld [vmem:[#allocation8 + $0x1db4] ss:$8 sps:$4 sm:$0xff]  }
 0xe9b   :  { %v12115_v32 = vpop.f32.mrb[52].mxu0 }
 0xe9c   :  { %v12117_v12 = vpop.f32.mrb[53].mxu0  ;;  %v12162_v62 = vpack.c.bf16 %v12115_v32, %v12115_v32  ;;  %v18627_v32 = vld [vmem:[#allocation8 + $0x1eb0] ss:$8 sps:$4 sm:$0xff]  }
 0xe9d   :  { %v12163_v53 = vpack.c.bf16 %v12117_v12, %v12117_v12  ;;  %v12119_v30 = vpop.f32.mrb[54].mxu0  ;;  %v18635_v12 = vld [vmem:[#allocation8 + $0x1ec4] ss:$8 sps:$4 sm:$0xff]  }
 0xe9e   :  { %v12121_v37 = vpop.f32.mrb[55].mxu0  ;;  %v12197_v0 = vpack.c.bf16 %v12119_v30, %v12119_v30  ;;  %v18638_v30 = vld [vmem:[#allocation8 + $0x1dc4] ss:$8 sps:$4 sm:$0xff]  }
 0xe9f   :  { %v12198_v15 = vpack.c.bf16 %v12121_v37, %v12121_v37  ;;  %12625 = vmatprep.mubr.bf16.mxu1 %v12163_v53  ;;  %v18630_v53 = vld [vmem:[#allocation8 + $0x1db0] ss:$8 sps:$4 sm:$0xff]   ;;  %v18636_v37 = vld [vmem:[#allocation8 + $0x1dc0] ss:$8 sps:$4 sm:$0xff]  }
 0xea0   :  { %12626 = vmatmul.mubr.bf16.vlgmr.msra.gmra.mrb[148].mxu1 %v12162_v62  ;;  %v18641_v62 = vld [vmem:[#allocation8 + $0x1ed4] ss:$8 sps:$4 sm:$0xff]  }
 0xea1   :  { %13068 = vmatpush1.bf16.msra.mxu1 %v18561_v6  ;;  %12424 = vmatprep.mubr.bf16.mxu0 %v12198_v15  ;;  %v18633_v6 = vld [vmem:[#allocation8 + $0x1ec0] ss:$8 sps:$4 sm:$0xff]   ;;  %v18639_v15 = vld [vmem:[#allocation8 + $0x1ed0] ss:$8 sps:$4 sm:$0xff]  }
 0xea2   :  { %12425 = vmatmul.mubr.bf16.vlgmr.msra.gmra.mrb[72].mxu0 %v12197_v0  ;;  %13069 = vmatprep.subr.bf16.mxu1 %v18569_v23  ;;  %v18644_v23 = vld [vmem:[#allocation8 + $0x1dd4] ss:$8 sps:$4 sm:$0xff]   ;;  %v18642_v0 = vld [vmem:[#allocation8 + $0x1dd0] ss:$8 sps:$4 sm:$0xff]  }
 0xea3   :  { %12830 = vmatpush1.bf16.msra.mxu0 %v18564_v44  ;;  %v20854_v59 = vpop.f32.mrb[56].mxu0  ;;  %v18647_v44 = vld [vmem:[#allocation8 + $0x1ee4] ss:$8 sps:$4 sm:$0xff]  }
 0xea4   :  { %12831 = vmatprep.subr.bf16.mxu0 %v18572_v24  ;;  %v12127_v29 = vpop.f32.mrb[57].mxu0  ;;  %v18650_v24 = vld [vmem:[#allocation8 + $0x1de4] ss:$8 sps:$4 sm:$0xff]  }
 0xea5   :  { %13070 = vmatpush1.bf16.msra.mxu1 %v18567_v46  ;;  %v12635_v33 = vpack.c.bf16 %v12127_v29, %v12127_v29  ;;  %v20856_v3 = vpop.f32.mrb[58].mxu0  ;;  %v18645_v46 = vld [vmem:[#allocation8 + $0x1ee0] ss:$8 sps:$4 sm:$0xff]   ;;  %v18656_v29 = vld [vmem:[#allocation8 + $0x1df4] ss:$8 sps:$4 sm:$0xff]  }
 0xea6   :  { %13071 = vmatprep.subr.bf16.mxu1 %v18575_v27  ;;  %v12131_v31 = vpop.f32.mrb[59].mxu0  ;;  %v18653_v27 = vld [vmem:[#allocation8 + $0x1ef4] ss:$8 sps:$4 sm:$0xff]  }
 0xea7   :  { %12832 = vmatpush1.bf16.msra.mxu0 %v18570_v52  ;;  %v12873_v17 = vpack.c.bf16 %v12131_v31, %v12131_v31  ;;  %12861 = vmatprep.mubr.bf16.mxu0 %v12635_v33  ;;  %v18648_v52 = vld [vmem:[#allocation8 + $0x1de0] ss:$8 sps:$4 sm:$0xff]  }
 0xea8   :  { %12833 = vmatprep.subr.bf16.mxu0 %v18578_v2 }
 0xea9   :  { %13072 = vmatpush1.bf16.msra.mxu1 %v18573_v7  ;;  %13099 = vmatprep.mubr.bf16.mxu1 %v12873_v17  ;;  %v18651_v7 = vld [vmem:[#allocation8 + $0x1ef0] ss:$8 sps:$4 sm:$0xff]  }
 0xeaa   :  { %13073 = vmatprep.subr.bf16.mxu1 %v18581_v47  ;;  %v18659_v47 = vld [vmem:[#allocation8 + $0x2004] ss:$8 sps:$4 sm:$0xff]  }
 0xeab   :  { %12834 = vmatpush1.bf16.msra.mxu0 %v18576_v14  ;;  %v20858_v18 = vpop.f32.mrb[60].mxu0  ;;  %v18654_v14 = vld [vmem:[#allocation8 + $0x1df0] ss:$8 sps:$4 sm:$0xff]  }
 0xeac   :  { %12835 = vmatprep.subr.bf16.mxu0 %v18584_v41  ;;  %v20860_v40 = vpop.f32.mrb[61].mxu0  ;;  %v12872_v41 = vpack.c.bf16 %v20856_v3, %v20856_v3  ;;  %v18668_v3 = vld [vmem:[#allocation8 + $0x1f14] ss:$8 sps:$4 sm:$0xff]  }
 0xead   :  { %13074 = vmatpush1.bf16.msra.mxu1 %v18579_v10  ;;  %v20862_v55 = vpop.f32.mrb[62].mxu0  ;;  %v18662_v10 = vld [vmem:[#allocation8 + $0x1f04] ss:$8 sps:$4 sm:$0xff]  }
 0xeae   :  { %13075 = vmatprep.subr.bf16.mxu1 %v18587_v21  ;;  %v20864_v61 = vpop.f32.mrb[63].mxu0  ;;  %v18657_v21 = vld [vmem:[#allocation8 + $0x2000] ss:$8 sps:$4 sm:$0xff]  }
 0xeaf   :  { %12836 = vmatpush1.bf16.msra.mxu0 %v18582_v60  ;;  %v13349_v60 = vpack.c.bf16 %v20864_v61, %v20864_v61  ;;  %v18666_v61 = vld [vmem:[#allocation8 + $0x1f10] ss:$8 sps:$4 sm:$0xff]  }
 0xeb0   :  { %12837 = vmatprep.subr.bf16.mxu0 %v18590_v57  ;;  %v12634_v57 = vpack.c.bf16 %v20854_v59, %v20854_v59  ;;  %v18674_v59 = vld [vmem:[#allocation8 + $0x1f24] ss:$8 sps:$4 sm:$0xff]  }
 0xeb1   :  { %13076 = vmatpush1.bf16.msra.mxu1 %v18585_v63  ;;  %v18665_v63 = vld [vmem:[#allocation8 + $0x2014] ss:$8 sps:$4 sm:$0xff]  }
 0xeb2   :  { %13077 = vmatprep.subr.bf16.mxu1 %v18593_v5  ;;  %v18660_v5 = vld [vmem:[#allocation8 + $0x1f00] ss:$8 sps:$4 sm:$0xff]  }
 0xeb3   :  { %12838 = vmatpush1.bf16.msra.mxu0 %v18588_v1  ;;  %v20866_v2 = vpop.f32.mrb[64].mxu0  ;;  %v13111_v1 = vpack.c.bf16 %v20860_v40, %v20860_v40  ;;  %v18672_v40 = vld [vmem:[#allocation8 + $0x1f20] ss:$8 sps:$4 sm:$0xff]  }
 0xeb4   :  { %12839 = vmatprep.subr.bf16.mxu0 %v18596_v56  ;;  %v20868_v33 = vpop.f32.mrb[65].mxu0  ;;  %v18663_v56 = vld [vmem:[#allocation8 + $0x2010] ss:$8 sps:$4 sm:$0xff]  }
 0xeb5   :  { %13078 = vmatpush1.bf16.msra.mxu1 %v18591_v50  ;;  %v20870_v31 = vpop.f32.mrb[66].mxu0  ;;  %v18671_v50 = vld [vmem:[#allocation8 + $0x2024] ss:$8 sps:$4 sm:$0xff]  }
 0xeb6   :  { %13079 = vmatprep.subr.bf16.mxu1 %v18599_v58  ;;  %v20872_v17 = vpop.f32.mrb[67].mxu0  ;;  %v18669_v58 = vld [vmem:[#allocation8 + $0x2020] ss:$8 sps:$4 sm:$0xff]  }
 0xeb7   :  { %12840 = vmatpush1.bf16.msra.mxu0 %v18594_v35  ;;  %v18677_v35 = vld [vmem:[#allocation8 + $0x2034] ss:$8 sps:$4 sm:$0xff]  }
 0xeb8   :  { %12841 = vmatprep.subr.bf16.mxu0 %v18602_v22  ;;  %v18680_v22 = vld [vmem:[#allocation8 + $0x1f34] ss:$8 sps:$4 sm:$0xff]  }
 0xeb9   :  { %13080 = vmatpush1.bf16.msra.mxu1 %v18597_v28 }
 0xeba   :  { %13081 = vmatprep.subr.bf16.mxu1 %v18605_v8  ;;  %v18675_v8 = vld [vmem:[#allocation8 + $0x2030] ss:$8 sps:$4 sm:$0xff]  }
 0xebb   :  { %12842 = vmatpush1.bf16.msra.mxu0 %v18600_v20  ;;  %v20882_v28 = vpop.f32.mrb[68].mxu0  ;;  %v18683_v20 = vld [vmem:[#allocation8 + $0x2044] ss:$8 sps:$4 sm:$0xff]  }
 0xebc   :  { %12843 = vmatprep.subr.bf16.mxu0 %v18608_v9  ;;  %v18678_v9 = vld [vmem:[#allocation8 + $0x1f30] ss:$8 sps:$4 sm:$0xff]  }
 0xebd   :  { %13082 = vmatpush1.bf16.msra.mxu1 %v18603_v51  ;;  %v20884_v51 = vpop.f32.mrb[69].mxu0 }
 0xebe   :  { %13083 = vmatprep.subr.bf16.mxu1 %v18611_v13  ;;  %v18686_v13 = vld [vmem:[#allocation8 + $0x1f44] ss:$8 sps:$4 sm:$0xff]  }
 0xebf   :  { %12844 = vmatpush1.bf16.msra.mxu0 %v18606_v45  ;;  %v12159_v45 = vpop.f32.mrb[70].mxu0 }
 0xec0   :  { %12845 = vmatprep.subr.bf16.mxu0 %v18614_v34  ;;  %v18681_v34 = vld [vmem:[#allocation8 + $0x2040] ss:$8 sps:$4 sm:$0xff]   ;;  %v18761_v45 = vld [vmem:[#allocation8 + $0x2214] ss:$8 sps:$4 sm:$0xff]  }
 0xec1   :  { %13084 = vmatpush1.bf16.msra.mxu1 %v18609_v54  ;;  %v12160_v54 = vpop.f32.mrb[71].mxu0 }
 0xec2   :  { %13085 = vmatprep.subr.bf16.mxu1 %v18617_v42  ;;  %v18689_v42 = vld [vmem:[#allocation8 + $0x2054] ss:$8 sps:$4 sm:$0xff]   ;;  %v13587_v54 = vpack.c.bf16 %v20868_v33, %v20868_v33  ;;  %v18768_v33 = vld [vmem:[#allocation8 + $0x2120] ss:$8 sps:$4 sm:$0xff]  }
 0xec3   :  { %12846 = vmatpush1.bf16.msra.mxu0 %v18612_v43  ;;  %v18684_v43 = vld [vmem:[#allocation8 + $0x1f40] ss:$8 sps:$4 sm:$0xff]  }
 0xec4   :  { %12847 = vmatprep.subr.bf16.mxu0 %v18620_v26  ;;  %v18692_v26 = vld [vmem:[#allocation8 + $0x1f54] ss:$8 sps:$4 sm:$0xff]  }
 0xec5   :  { %13086 = vmatpush1.bf16.msra.mxu1 %v18615_v4  ;;  %v18687_v4 = vld [vmem:[#allocation8 + $0x2050] ss:$8 sps:$4 sm:$0xff]  }
 0xec6   :  { %13087 = vmatprep.subr.bf16.mxu1 %v18623_v16  ;;  %v18695_v16 = vld [vmem:[#allocation8 + $0x2064] ss:$8 sps:$4 sm:$0xff]  }
 0xec7   :  { %12848 = vmatpush1.bf16.msra.mxu0 %v18618_v48  ;;  %v18690_v48 = vld [vmem:[#allocation8 + $0x1f50] ss:$8 sps:$4 sm:$0xff]  }
 0xec8   :  { %12849 = vmatprep.subr.bf16.mxu0 %v18626_v39  ;;  %v18698_v39 = vld [vmem:[#allocation8 + $0x1f64] ss:$8 sps:$4 sm:$0xff]  }
 0xec9   :  { %13088 = vmatpush1.bf16.msra.mxu1 %v18621_v25  ;;  %v18693_v25 = vld [vmem:[#allocation8 + $0x2060] ss:$8 sps:$4 sm:$0xff]  }
 0xeca   :  { %13089 = vmatprep.subr.bf16.mxu1 %v18629_v49  ;;  %v18701_v49 = vld [vmem:[#allocation8 + $0x2074] ss:$8 sps:$4 sm:$0xff]  }
 0xecb   :  { %12850 = vmatpush1.bf16.msra.mxu0 %v18624_v38  ;;  %v18696_v38 = vld [vmem:[#allocation8 + $0x1f60] ss:$8 sps:$4 sm:$0xff]  }
 0xecc   :  { %12851 = vmatprep.subr.bf16.mxu0 %v18632_v19  ;;  %v18704_v19 = vld [vmem:[#allocation8 + $0x1f74] ss:$8 sps:$4 sm:$0xff]  }
 0xecd   :  { %13090 = vmatpush1.bf16.msra.mxu1 %v18627_v32  ;;  %v18699_v32 = vld [vmem:[#allocation8 + $0x2070] ss:$8 sps:$4 sm:$0xff]  }
 0xece   :  { %13091 = vmatprep.subr.bf16.mxu1 %v18635_v12  ;;  %v18707_v12 = vld [vmem:[#allocation8 + $0x2084] ss:$8 sps:$4 sm:$0xff]  }
 0xecf   :  { %12852 = vmatpush1.bf16.msra.mxu0 %v18630_v53  ;;  %v18702_v53 = vld [vmem:[#allocation8 + $0x1f70] ss:$8 sps:$4 sm:$0xff]  }
 0xed0   :  { %12853 = vmatprep.subr.bf16.mxu0 %v18638_v30  ;;  %v18710_v30 = vld [vmem:[#allocation8 + $0x1f84] ss:$8 sps:$4 sm:$0xff]  }
 0xed1   :  { %13092 = vmatpush1.bf16.msra.mxu1 %v18633_v6  ;;  %v18705_v6 = vld [vmem:[#allocation8 + $0x2080] ss:$8 sps:$4 sm:$0xff]  }
 0xed2   :  { %13093 = vmatprep.subr.bf16.mxu1 %v18641_v62  ;;  %v18713_v62 = vld [vmem:[#allocation8 + $0x2094] ss:$8 sps:$4 sm:$0xff]  }
 0xed3   :  { %12854 = vmatpush1.bf16.msra.mxu0 %v18636_v37  ;;  %v18708_v37 = vld [vmem:[#allocation8 + $0x1f80] ss:$8 sps:$4 sm:$0xff]  }
 0xed4   :  { %12855 = vmatprep.subr.bf16.mxu0 %v18644_v23  ;;  %v18716_v23 = vld [vmem:[#allocation8 + $0x1f94] ss:$8 sps:$4 sm:$0xff]  }
 0xed5   :  { %13094 = vmatpush1.bf16.msra.mxu1 %v18639_v15  ;;  %v18711_v15 = vld [vmem:[#allocation8 + $0x2090] ss:$8 sps:$4 sm:$0xff]  }
 0xed6   :  { %13095 = vmatprep.subr.bf16.mxu1 %v18647_v44  ;;  %v18719_v44 = vld [vmem:[#allocation8 + $0x20a4] ss:$8 sps:$4 sm:$0xff]  }
 0xed7   :  { %12856 = vmatpush1.bf16.msra.mxu0 %v18642_v0  ;;  %v18714_v0 = vld [vmem:[#allocation8 + $0x1f90] ss:$8 sps:$4 sm:$0xff]  }
 0xed8   :  { %12857 = vmatprep.subr.bf16.mxu0 %v18650_v24  ;;  %v18722_v24 = vld [vmem:[#allocation8 + $0x1fa4] ss:$8 sps:$4 sm:$0xff]  }
 0xed9   :  { %13096 = vmatpush1.bf16.msra.mxu1 %v18645_v46  ;;  %v18717_v46 = vld [vmem:[#allocation8 + $0x20a0] ss:$8 sps:$4 sm:$0xff]  }
 0xeda   :  { %13097 = vmatprep.subr.bf16.mxu1 %v18653_v27  ;;  %v18725_v27 = vld [vmem:[#allocation8 + $0x20b4] ss:$8 sps:$4 sm:$0xff]  }
 0xedb   :  { %12858 = vmatpush1.bf16.msra.mxu0 %v18648_v52  ;;  %v18720_v52 = vld [vmem:[#allocation8 + $0x1fa0] ss:$8 sps:$4 sm:$0xff]  }
 0xedc   :  { %12859 = vmatprep.subr.bf16.mxu0 %v18656_v29  ;;  %v18728_v29 = vld [vmem:[#allocation8 + $0x1fb4] ss:$8 sps:$4 sm:$0xff]  }
 0xedd   :  { %13098 = vmatpush1.bf16.msra.mxu1 %v18651_v7  ;;  %v18723_v7 = vld [vmem:[#allocation8 + $0x20b0] ss:$8 sps:$4 sm:$0xff]  }
 0xede   :  { %13543 = vmatprep.subr.bf16.mxu1 %v18659_v47  ;;  %v18731_v47 = vld [vmem:[#allocation8 + $0x20c4] ss:$8 sps:$4 sm:$0xff]  }
 0xedf   :  { %12860 = vmatpush1.bf16.msra.mxu0 %v18654_v14  ;;  %v18726_v14 = vld [vmem:[#allocation8 + $0x1fb0] ss:$8 sps:$4 sm:$0xff]  }
 0xee0   :  { %13100 = vmatmul.mubr.bf16.vlgmr.msra.gmra.mrb[152].mxu1 %v12872_v41  ;;  %13305 = vmatprep.subr.bf16.mxu0 %v18662_v10  ;;  %v18734_v41 = vld [vmem:[#allocation8 + $0x1fc4] ss:$8 sps:$4 sm:$0xff]   ;;  %v18729_v10 = vld [vmem:[#allocation8 + $0x20c0] ss:$8 sps:$4 sm:$0xff]  }
 0xee1   :  { %13544 = vmatpush1.bf16.msra.mxu1 %v18657_v21  ;;  %13575 = vmatprep.mubr.bf16.mxu1 %v13349_v60  ;;  %v18737_v21 = vld [vmem:[#allocation8 + $0x20d4] ss:$8 sps:$4 sm:$0xff]   ;;  %v18732_v60 = vld [vmem:[#allocation8 + $0x1fc0] ss:$8 sps:$4 sm:$0xff]  }
 0xee2   :  { %12862 = vmatmul.mubr.bf16.vlgmr.msra.gmra.mrb[76].mxu0 %v12634_v57  ;;  %13545 = vmatprep.subr.bf16.mxu1 %v18665_v63  ;;  %v18740_v57 = vld [vmem:[#allocation8 + $0x1fd4] ss:$8 sps:$4 sm:$0xff]   ;;  %v18735_v63 = vld [vmem:[#allocation8 + $0x20d0] ss:$8 sps:$4 sm:$0xff]  }
 0xee3   :  { %13306 = vmatpush1.bf16.msra.mxu0 %v18660_v5  ;;  %13337 = vmatprep.mubr.bf16.mxu0 %v13111_v1  ;;  %v18743_v5 = vld [vmem:[#allocation8 + $0x20e4] ss:$8 sps:$4 sm:$0xff]   ;;  %v18738_v1 = vld [vmem:[#allocation8 + $0x1fd0] ss:$8 sps:$4 sm:$0xff]  }
 0xee4   :  { %13307 = vmatprep.subr.bf16.mxu0 %v18668_v3  ;;  %v18746_v3 = vld [vmem:[#allocation8 + $0x1fe4] ss:$8 sps:$4 sm:$0xff]  }
 0xee5   :  { %13546 = vmatpush1.bf16.msra.mxu1 %v18663_v56  ;;  %v18741_v56 = vld [vmem:[#allocation8 + $0x20e0] ss:$8 sps:$4 sm:$0xff]  }
 0xee6   :  { %13547 = vmatprep.subr.bf16.mxu1 %v18671_v50  ;;  %v18749_v50 = vld [vmem:[#allocation8 + $0x20f4] ss:$8 sps:$4 sm:$0xff]  }
 0xee7   :  { %13308 = vmatpush1.bf16.msra.mxu0 %v18666_v61  ;;  %v18744_v61 = vld [vmem:[#allocation8 + $0x1fe0] ss:$8 sps:$4 sm:$0xff]  }
 0xee8   :  { %13309 = vmatprep.subr.bf16.mxu0 %v18674_v59  ;;  %v18752_v59 = vld [vmem:[#allocation8 + $0x1ff4] ss:$8 sps:$4 sm:$0xff]  }
 0xee9   :  { %13548 = vmatpush1.bf16.msra.mxu1 %v18669_v58  ;;  %v18747_v58 = vld [vmem:[#allocation8 + $0x20f0] ss:$8 sps:$4 sm:$0xff]  }
 0xeea   :  { %13549 = vmatprep.subr.bf16.mxu1 %v18677_v35  ;;  %v18755_v35 = vld [vmem:[#allocation8 + $0x2204] ss:$8 sps:$4 sm:$0xff]  }
 0xeeb   :  { %13310 = vmatpush1.bf16.msra.mxu0 %v18672_v40  ;;  %v18750_v40 = vld [vmem:[#allocation8 + $0x1ff0] ss:$8 sps:$4 sm:$0xff]  }
 0xeec   :  { %13311 = vmatprep.subr.bf16.mxu0 %v18680_v22  ;;  %v13348_v22 = vpack.c.bf16 %v20862_v55, %v20862_v55  ;;  %v18764_v55 = vld [vmem:[#allocation8 + $0x2114] ss:$8 sps:$4 sm:$0xff]  }
 0xeed   :  { %13550 = vmatpush1.bf16.msra.mxu1 %v18675_v8  ;;  %v18758_v8 = vld [vmem:[#allocation8 + $0x2104] ss:$8 sps:$4 sm:$0xff]  }
 0xeee   :  { %13551 = vmatprep.subr.bf16.mxu1 %v18683_v20  ;;  %v18753_v20 = vld [vmem:[#allocation8 + $0x2200] ss:$8 sps:$4 sm:$0xff]  }
 0xeef   :  { %13312 = vmatpush1.bf16.msra.mxu0 %v18678_v9  ;;  %v13825_v9 = vpack.c.bf16 %v20872_v17, %v20872_v17  ;;  %v18762_v17 = vld [vmem:[#allocation8 + $0x2110] ss:$8 sps:$4 sm:$0xff]  }
 0xef0   :  { %13313 = vmatprep.subr.bf16.mxu0 %v18686_v13  ;;  %v13110_v13 = vpack.c.bf16 %v20858_v18, %v20858_v18  ;;  %v18770_v18 = vld [vmem:[#allocation8 + $0x2124] ss:$8 sps:$4 sm:$0xff]  }
 0xef1   :  { %13552 = vmatpush1.bf16.msra.mxu1 %v18681_v34  ;;  %v18756_v34 = vld [vmem:[#allocation8 + $0x2100] ss:$8 sps:$4 sm:$0xff]  }
 0xef2   :  { %13553 = vmatprep.subr.bf16.mxu1 %v18689_v42  ;;  %v18759_v42 = vld [vmem:[#allocation8 + $0x2210] ss:$8 sps:$4 sm:$0xff]  }
 0xef3   :  { %13314 = vmatpush1.bf16.msra.mxu0 %v18684_v43  ;;  %v18767_v43 = vld [vmem:[#allocation8 + $0x2224] ss:$8 sps:$4 sm:$0xff]  }
 0xef4   :  { %13315 = vmatprep.subr.bf16.mxu0 %v18692_v26  ;;  %v18765_v26 = vld [vmem:[#allocation8 + $0x2220] ss:$8 sps:$4 sm:$0xff]  }
 0xef5   :  { %13554 = vmatpush1.bf16.msra.mxu1 %v18687_v4  ;;  %v18773_v4 = vld [vmem:[#allocation8 + $0x2234] ss:$8 sps:$4 sm:$0xff]  }
 0xef6   :  { %13555 = vmatprep.subr.bf16.mxu1 %v18695_v16  ;;  %v18776_v16 = vld [vmem:[#allocation8 + $0x2134] ss:$8 sps:$4 sm:$0xff]  }
 0xef7   :  { %13316 = vmatpush1.bf16.msra.mxu0 %v18690_v48  ;;  %v18771_v48 = vld [vmem:[#allocation8 + $0x2230] ss:$8 sps:$4 sm:$0xff]  }
 0xef8   :  { %13317 = vmatprep.subr.bf16.mxu0 %v18698_v39  ;;  %v18779_v39 = vld [vmem:[#allocation8 + $0x2244] ss:$8 sps:$4 sm:$0xff]  }
 0xef9   :  { %13556 = vmatpush1.bf16.msra.mxu1 %v18693_v25  ;;  %v18774_v25 = vld [vmem:[#allocation8 + $0x2130] ss:$8 sps:$4 sm:$0xff]  }
 0xefa   :  { %13557 = vmatprep.subr.bf16.mxu1 %v18701_v49  ;;  %v18782_v49 = vld [vmem:[#allocation8 + $0x2144] ss:$8 sps:$4 sm:$0xff]  }
 0xefb   :  { %13318 = vmatpush1.bf16.msra.mxu0 %v18696_v38  ;;  %v18777_v38 = vld [vmem:[#allocation8 + $0x2240] ss:$8 sps:$4 sm:$0xff]  }
 0xefc   :  { %13319 = vmatprep.subr.bf16.mxu0 %v18704_v19  ;;  %v18785_v19 = vld [vmem:[#allocation8 + $0x2254] ss:$8 sps:$4 sm:$0xff]  }
 0xefd   :  { %13558 = vmatpush1.bf16.msra.mxu1 %v18699_v32  ;;  %v18780_v32 = vld [vmem:[#allocation8 + $0x2140] ss:$8 sps:$4 sm:$0xff]  }
 0xefe   :  { %13559 = vmatprep.subr.bf16.mxu1 %v18707_v12  ;;  %v18788_v12 = vld [vmem:[#allocation8 + $0x2154] ss:$8 sps:$4 sm:$0xff]  }
 0xeff   :  { %13320 = vmatpush1.bf16.msra.mxu0 %v18702_v53  ;;  %v18783_v53 = vld [vmem:[#allocation8 + $0x2250] ss:$8 sps:$4 sm:$0xff]  }
 0xf00   :  { %13321 = vmatprep.subr.bf16.mxu0 %v18710_v30  ;;  %v18791_v30 = vld [vmem:[#allocation8 + $0x2264] ss:$8 sps:$4 sm:$0xff]  }
 0xf01   :  { %13560 = vmatpush1.bf16.msra.mxu1 %v18705_v6  ;;  %v18786_v6 = vld [vmem:[#allocation8 + $0x2150] ss:$8 sps:$4 sm:$0xff]  }
 0xf02   :  { %13561 = vmatprep.subr.bf16.mxu1 %v18713_v62  ;;  %v18794_v62 = vld [vmem:[#allocation8 + $0x2164] ss:$8 sps:$4 sm:$0xff]  }
 0xf03   :  { %13322 = vmatpush1.bf16.msra.mxu0 %v18708_v37  ;;  %v18789_v37 = vld [vmem:[#allocation8 + $0x2260] ss:$8 sps:$4 sm:$0xff]  }
 0xf04   :  { %13323 = vmatprep.subr.bf16.mxu0 %v18716_v23  ;;  %v18797_v23 = vld [vmem:[#allocation8 + $0x2274] ss:$8 sps:$4 sm:$0xff]  }
 0xf05   :  { %13562 = vmatpush1.bf16.msra.mxu1 %v18711_v15  ;;  %v18792_v15 = vld [vmem:[#allocation8 + $0x2160] ss:$8 sps:$4 sm:$0xff]  }
 0xf06   :  { %13563 = vmatprep.subr.bf16.mxu1 %v18719_v44  ;;  %v18800_v44 = vld [vmem:[#allocation8 + $0x2174] ss:$8 sps:$4 sm:$0xff]  }
 0xf07   :  { %13324 = vmatpush1.bf16.msra.mxu0 %v18714_v0  ;;  %v18795_v0 = vld [vmem:[#allocation8 + $0x2270] ss:$8 sps:$4 sm:$0xff]  }
 0xf08   :  { %13325 = vmatprep.subr.bf16.mxu0 %v18722_v24  ;;  %v18803_v24 = vld [vmem:[#allocation8 + $0x2284] ss:$8 sps:$4 sm:$0xff]  }
 0xf09   :  { %13564 = vmatpush1.bf16.msra.mxu1 %v18717_v46  ;;  %v18798_v46 = vld [vmem:[#allocation8 + $0x2170] ss:$8 sps:$4 sm:$0xff]  }
 0xf0a   :  { %13565 = vmatprep.subr.bf16.mxu1 %v18725_v27  ;;  %v18806_v27 = vld [vmem:[#allocation8 + $0x2184] ss:$8 sps:$4 sm:$0xff]  }
 0xf0b   :  { %13326 = vmatpush1.bf16.msra.mxu0 %v18720_v52  ;;  %v18801_v52 = vld [vmem:[#allocation8 + $0x2280] ss:$8 sps:$4 sm:$0xff]  }
 0xf0c   :  { %13327 = vmatprep.subr.bf16.mxu0 %v18728_v29  ;;  %v18809_v29 = vld [vmem:[#allocation8 + $0x2294] ss:$8 sps:$4 sm:$0xff]  }
 0xf0d   :  { %13566 = vmatpush1.bf16.msra.mxu1 %v18723_v7  ;;  %v18804_v7 = vld [vmem:[#allocation8 + $0x2180] ss:$8 sps:$4 sm:$0xff]  }
 0xf0e   :  { %13567 = vmatprep.subr.bf16.mxu1 %v18731_v47  ;;  %v18812_v47 = vld [vmem:[#allocation8 + $0x2194] ss:$8 sps:$4 sm:$0xff]  }
 0xf0f   :  { %13328 = vmatpush1.bf16.msra.mxu0 %v18726_v14  ;;  %v18807_v14 = vld [vmem:[#allocation8 + $0x2290] ss:$8 sps:$4 sm:$0xff]  }
 0xf10   :  { %13329 = vmatprep.subr.bf16.mxu0 %v18734_v41  ;;  %v18815_v41 = vld [vmem:[#allocation8 + $0x22a4] ss:$8 sps:$4 sm:$0xff]  }
 0xf11   :  { %13568 = vmatpush1.bf16.msra.mxu1 %v18729_v10  ;;  %v18810_v10 = vld [vmem:[#allocation8 + $0x2190] ss:$8 sps:$4 sm:$0xff]  }
 0xf12   :  { %13569 = vmatprep.subr.bf16.mxu1 %v18737_v21  ;;  %v18818_v21 = vld [vmem:[#allocation8 + $0x21a4] ss:$8 sps:$4 sm:$0xff]  }
 0xf13   :  { %13330 = vmatpush1.bf16.msra.mxu0 %v18732_v60  ;;  %v18813_v60 = vld [vmem:[#allocation8 + $0x22a0] ss:$8 sps:$4 sm:$0xff]  }
 0xf14   :  { %13331 = vmatprep.subr.bf16.mxu0 %v18740_v57  ;;  %v18821_v57 = vld [vmem:[#allocation8 + $0x22b4] ss:$8 sps:$4 sm:$0xff]  }
 0xf15   :  { %13570 = vmatpush1.bf16.msra.mxu1 %v18735_v63  ;;  %v18816_v63 = vld [vmem:[#allocation8 + $0x21a0] ss:$8 sps:$4 sm:$0xff]  }
 0xf16   :  { %13571 = vmatprep.subr.bf16.mxu1 %v18743_v5  ;;  %v18824_v5 = vld [vmem:[#allocation8 + $0x21b4] ss:$8 sps:$4 sm:$0xff]  }
 0xf17   :  { %13332 = vmatpush1.bf16.msra.mxu0 %v18738_v1  ;;  %v18819_v1 = vld [vmem:[#allocation8 + $0x22b0] ss:$8 sps:$4 sm:$0xff]  }
 0xf18   :  { %13333 = vmatprep.subr.bf16.mxu0 %v18746_v3  ;;  %v18827_v3 = vld [vmem:[#allocation8 + $0x22c4] ss:$8 sps:$4 sm:$0xff]  }
 0xf19   :  { %13572 = vmatpush1.bf16.msra.mxu1 %v18741_v56  ;;  %v18822_v56 = vld [vmem:[#allocation8 + $0x21b0] ss:$8 sps:$4 sm:$0xff]  }
 0xf1a   :  { %13573 = vmatprep.subr.bf16.mxu1 %v18749_v50  ;;  %v18830_v50 = vld [vmem:[#allocation8 + $0x21c4] ss:$8 sps:$4 sm:$0xff]  }
 0xf1b   :  { %13334 = vmatpush1.bf16.msra.mxu0 %v18744_v61  ;;  %v18825_v61 = vld [vmem:[#allocation8 + $0x22c0] ss:$8 sps:$4 sm:$0xff]  }
 0xf1c   :  { %13335 = vmatprep.subr.bf16.mxu0 %v18752_v59  ;;  %v18833_v59 = vld [vmem:[#allocation8 + $0x22d4] ss:$8 sps:$4 sm:$0xff]  }
 0xf1d   :  { %13574 = vmatpush1.bf16.msra.mxu1 %v18747_v58  ;;  %v18828_v58 = vld [vmem:[#allocation8 + $0x21c0] ss:$8 sps:$4 sm:$0xff]  }
 0xf1e   :  { %14019 = vmatprep.subr.bf16.mxu1 %v18755_v35  ;;  %v18836_v35 = vld [vmem:[#allocation8 + $0x21d4] ss:$8 sps:$4 sm:$0xff]  }
 0xf1f   :  { %13336 = vmatpush1.bf16.msra.mxu0 %v18750_v40  ;;  %v18831_v40 = vld [vmem:[#allocation8 + $0x22d0] ss:$8 sps:$4 sm:$0xff]  }
 0xf20   :  { %13576 = vmatmul.mubr.bf16.vlgmr.msra.gmra.mrb[156].mxu1 %v13348_v22  ;;  %13781 = vmatprep.subr.bf16.mxu0 %v18758_v8  ;;  %v18839_v22 = vld [vmem:[#allocation8 + $0x22e4] ss:$8 sps:$4 sm:$0xff]   ;;  %v18834_v8 = vld [vmem:[#allocation8 + $0x21d0] ss:$8 sps:$4 sm:$0xff]  }
 0xf21   :  { %14020 = vmatpush1.bf16.msra.mxu1 %v18753_v20  ;;  %14051 = vmatprep.mubr.bf16.mxu1 %v13825_v9  ;;  %v18842_v20 = vld [vmem:[#allocation8 + $0x21e4] ss:$8 sps:$4 sm:$0xff]   ;;  %v18837_v9 = vld [vmem:[#allocation8 + $0x22e0] ss:$8 sps:$4 sm:$0xff]  }
 0xf22   :  { %13338 = vmatmul.mubr.bf16.vlgmr.msra.gmra.mrb[80].mxu0 %v13110_v13  ;;  %14021 = vmatprep.subr.bf16.mxu1 %v18761_v45  ;;  %v18845_v13 = vld [vmem:[#allocation8 + $0x22f4] ss:$8 sps:$4 sm:$0xff]   ;;  %v18840_v45 = vld [vmem:[#allocation8 + $0x21e0] ss:$8 sps:$4 sm:$0xff]  }
 0xf23   :  { %13782 = vmatpush1.bf16.msra.mxu0 %v18756_v34  ;;  %13813 = vmatprep.mubr.bf16.mxu0 %v13587_v54  ;;  %v18848_v34 = vld [vmem:[#allocation8 + $0x21f4] ss:$8 sps:$4 sm:$0xff]   ;;  %v18843_v54 = vld [vmem:[#allocation8 + $0x22f0] ss:$8 sps:$4 sm:$0xff]  }
 0xf24   :  { %13783 = vmatprep.subr.bf16.mxu0 %v18764_v55  ;;  %v18846_v55 = vld [vmem:[#allocation8 + $0x21f0] ss:$8 sps:$4 sm:$0xff]  }
 0xf25   :  { %14022 = vmatpush1.bf16.msra.mxu1 %v18759_v42  ;;  %v13824_v42 = vpack.c.bf16 %v20870_v31, %v20870_v31  ;;  %v18857_v31 = vld [vmem:[#allocation8 + $0x2324] ss:$8 sps:$4 sm:$0xff]  }
 0xf26   :  { %14023 = vmatprep.subr.bf16.mxu1 %v18767_v43  ;;  %v18851_v43 = vld [vmem:[#allocation8 + $0x2304] ss:$8 sps:$4 sm:$0xff]  }
 0xf27   :  { %13784 = vmatpush1.bf16.msra.mxu0 %v18762_v17  ;;  %v13586_v17 = vpack.c.bf16 %v20866_v2, %v20866_v2  ;;  %v18858_v2 = vld [vmem:[#allocation8 + $0x2330] ss:$8 sps:$4 sm:$0xff]  }
 0xf28   :  { %13785 = vmatprep.subr.bf16.mxu0 %v18770_v18  ;;  %v18849_v18 = vld [vmem:[#allocation8 + $0x2300] ss:$8 sps:$4 sm:$0xff]  }
 0xf29   :  { %14024 = vmatpush1.bf16.msra.mxu1 %v18765_v26  ;;  %v14063_v26 = vpack.c.bf16 %v20884_v51, %v20884_v51  ;;  %v18866_v51 = vld [vmem:[#allocation8 + $0x2354] ss:$8 sps:$4 sm:$0xff]  }
 0xf2a   :  { %14025 = vmatprep.subr.bf16.mxu1 %v18773_v4  ;;  %v18854_v4 = vld [vmem:[#allocation8 + $0x2314] ss:$8 sps:$4 sm:$0xff]  }
 0xf2b   :  { %13786 = vmatpush1.bf16.msra.mxu0 %v18768_v33  ;;  %v18852_v33 = vld [vmem:[#allocation8 + $0x2310] ss:$8 sps:$4 sm:$0xff]  }
 0xf2c   :  { %13787 = vmatprep.subr.bf16.mxu0 %v18776_v16  ;;  %v18855_v16 = vld [vmem:[#allocation8 + $0x2320] ss:$8 sps:$4 sm:$0xff]  }
 0xf2d   :  { %14026 = vmatpush1.bf16.msra.mxu1 %v18771_v48  ;;  %v18860_v48 = vld [vmem:[#allocation8 + $0x2334] ss:$8 sps:$4 sm:$0xff]  }
 0xf2e   :  { %14027 = vmatprep.subr.bf16.mxu1 %v18779_v39  ;;  %v18863_v39 = vld [vmem:[#allocation8 + $0x2344] ss:$8 sps:$4 sm:$0xff]  }
 0xf2f   :  { %13788 = vmatpush1.bf16.msra.mxu0 %v18774_v25  ;;  %v18861_v25 = vld [vmem:[#allocation8 + $0x2340] ss:$8 sps:$4 sm:$0xff]  }
 0xf30   :  { %13789 = vmatprep.subr.bf16.mxu0 %v18782_v49 }
 0xf31   :  { %14028 = vmatpush1.bf16.msra.mxu1 %v18777_v38  ;;  %v18864_v38 = vld [vmem:[#allocation8 + $0x2350] ss:$8 sps:$4 sm:$0xff]  }
 0xf32   :  { %14029 = vmatprep.subr.bf16.mxu1 %v18785_v19 }
 0xf33   :  { %13790 = vmatpush1.bf16.msra.mxu0 %v18780_v32  ;;  %v18869_v32 = vld [vmem:[#allocation8 + $0x2364] ss:$8 sps:$4 sm:$0xff]  }
 0xf34   :  { %13791 = vmatprep.subr.bf16.mxu0 %v18788_v12 }
 0xf35   :  { %14030 = vmatpush1.bf16.msra.mxu1 %v18783_v53 }
 0xf36   :  { %14031 = vmatprep.subr.bf16.mxu1 %v18791_v30 }
 0xf37   :  { %13792 = vmatpush1.bf16.msra.mxu0 %v18786_v6 }
 0xf38   :  { %13793 = vmatprep.subr.bf16.mxu0 %v18794_v62 }
 0xf39   :  { %14032 = vmatpush1.bf16.msra.mxu1 %v18789_v37 }
 0xf3a   :  { %14033 = vmatprep.subr.bf16.mxu1 %v18797_v23 }
 0xf3b   :  { %13794 = vmatpush1.bf16.msra.mxu0 %v18792_v15  ;;  %v18867_v15 = vld [vmem:[#allocation8 + $0x2360] ss:$8 sps:$4 sm:$0xff]  }
 0xf3c   :  { %13795 = vmatprep.subr.bf16.mxu0 %v18800_v44 }
 0xf3d   :  { %14034 = vmatpush1.bf16.msra.mxu1 %v18795_v0  ;;  %v18872_v0 = vld [vmem:[#allocation8 + $0x2374] ss:$8 sps:$4 sm:$0xff]  }
 0xf3e   :  { %14035 = vmatprep.subr.bf16.mxu1 %v18803_v24  ;;  %v18870_v24 = vld [vmem:[#allocation8 + $0x2370] ss:$8 sps:$4 sm:$0xff]  }
 0xf3f   :  { %13796 = vmatpush1.bf16.msra.mxu0 %v18798_v46  ;;  %v18875_v46 = vld [vmem:[#allocation8 + $0x2384] ss:$8 sps:$4 sm:$0xff]  }
 0xf40   :  { %13797 = vmatprep.subr.bf16.mxu0 %v18806_v27  ;;  %v18873_v27 = vld [vmem:[#allocation8 + $0x2380] ss:$8 sps:$4 sm:$0xff]  }
 0xf41   :  { %14036 = vmatpush1.bf16.msra.mxu1 %v18801_v52  ;;  %v18878_v52 = vld [vmem:[#allocation8 + $0x2394] ss:$8 sps:$4 sm:$0xff]  }
 0xf42   :  { %14037 = vmatprep.subr.bf16.mxu1 %v18809_v29  ;;  %v18876_v29 = vld [vmem:[#allocation8 + $0x2390] ss:$8 sps:$4 sm:$0xff]  }
 0xf43   :  { %13798 = vmatpush1.bf16.msra.mxu0 %v18804_v7  ;;  %v18881_v7 = vld [vmem:[#allocation8 + $0x23a4] ss:$8 sps:$4 sm:$0xff]  }
 0xf44   :  { %13799 = vmatprep.subr.bf16.mxu0 %v18812_v47  ;;  %v18879_v47 = vld [vmem:[#allocation8 + $0x23a0] ss:$8 sps:$4 sm:$0xff]  }
 0xf45   :  { %14038 = vmatpush1.bf16.msra.mxu1 %v18807_v14  ;;  %v18884_v14 = vld [vmem:[#allocation8 + $0x23b4] ss:$8 sps:$4 sm:$0xff]  }
 0xf46   :  { %14039 = vmatprep.subr.bf16.mxu1 %v18815_v41  ;;  %v18882_v41 = vld [vmem:[#allocation8 + $0x23b0] ss:$8 sps:$4 sm:$0xff]  }
 0xf47   :  { %13800 = vmatpush1.bf16.msra.mxu0 %v18810_v10  ;;  %v18887_v10 = vld [vmem:[#allocation8 + $0x23c4] ss:$8 sps:$4 sm:$0xff]  }
 0xf48   :  { %13801 = vmatprep.subr.bf16.mxu0 %v18818_v21  ;;  %v18885_v21 = vld [vmem:[#allocation8 + $0x23c0] ss:$8 sps:$4 sm:$0xff]  }
 0xf49   :  { %14040 = vmatpush1.bf16.msra.mxu1 %v18813_v60  ;;  %v18890_v60 = vld [vmem:[#allocation8 + $0x23d4] ss:$8 sps:$4 sm:$0xff]  }
 0xf4a   :  { %14041 = vmatprep.subr.bf16.mxu1 %v18821_v57  ;;  %v18888_v57 = vld [vmem:[#allocation8 + $0x23d0] ss:$8 sps:$4 sm:$0xff]  }
 0xf4b   :  { %13802 = vmatpush1.bf16.msra.mxu0 %v18816_v63  ;;  %v18893_v63 = vld [vmem:[#allocation8 + $0x23e4] ss:$8 sps:$4 sm:$0xff]  }
 0xf4c   :  { %13803 = vmatprep.subr.bf16.mxu0 %v18824_v5  ;;  %v18891_v5 = vld [vmem:[#allocation8 + $0x23e0] ss:$8 sps:$4 sm:$0xff]  }
 0xf4d   :  { %14042 = vmatpush1.bf16.msra.mxu1 %v18819_v1  ;;  %v18896_v1 = vld [vmem:[#allocation8 + $0x23f4] ss:$8 sps:$4 sm:$0xff]  }
 0xf4e   :  { %14043 = vmatprep.subr.bf16.mxu1 %v18827_v3  ;;  %v18894_v3 = vld [vmem:[#allocation8 + $0x23f0] ss:$8 sps:$4 sm:$0xff]  }
 0xf4f   :  { %13804 = vmatpush1.bf16.msra.mxu0 %v18822_v56  ;;  %v14062_v56 = vpack.c.bf16 %v20882_v28, %v20882_v28 }
 0xf50   :  { %13805 = vmatprep.subr.bf16.mxu0 %v18830_v50 }
 0xf51   :  { %14044 = vmatpush1.bf16.msra.mxu1 %v18825_v61 }
 0xf52   :  { %14045 = vmatprep.subr.bf16.mxu1 %v18833_v59 }
 0xf53   :  { %13806 = vmatpush1.bf16.msra.mxu0 %v18828_v58 }
 0xf54   :  { %13807 = vmatprep.subr.bf16.mxu0 %v18836_v35 }
 0xf55   :  { %14046 = vmatpush1.bf16.msra.mxu1 %v18831_v40 }
 0xf56   :  { %14047 = vmatprep.subr.bf16.mxu1 %v18839_v22 }
 0xf57   :  { %13808 = vmatpush1.bf16.msra.mxu0 %v18834_v8 }
 0xf58   :  { %13809 = vmatprep.subr.bf16.mxu0 %v18842_v20 }
 0xf59   :  { %14048 = vmatpush1.bf16.msra.mxu1 %v18837_v9 }
 0xf5a   :  { %14049 = vmatprep.subr.bf16.mxu1 %v18845_v13 }
 0xf5b   :  { %13810 = vmatpush1.bf16.msra.mxu0 %v18840_v45 }
 0xf5c   :  { %13811 = vmatprep.subr.bf16.mxu0 %v18848_v34 }
 0xf5d   :  { %14050 = vmatpush1.bf16.msra.mxu1 %v18843_v54 }
 0xf5f   :  { %13812 = vmatpush1.bf16.msra.mxu0 %v18846_v55 }
 0xf60   :  { %14052 = vmatmul.mubr.bf16.vlgmr.msra.gmra.mrb[160].mxu1 %v13824_v42  ;;  %14257 = vmatprep.subr.bf16.mxu0 %v18851_v43 }
 0xf62   :  { %13814 = vmatmul.mubr.bf16.vlgmr.msra.gmra.mrb[84].mxu0 %v13586_v17 }
 0xf63   :  { %14258 = vmatpush1.bf16.msra.mxu0 %v18849_v18  ;;  %14289 = vmatprep.mubr.bf16.mxu0 %v14063_v26 }
 0xf64   :  { %14259 = vmatprep.subr.bf16.mxu0 %v18854_v4 }
 0xf67   :  { %14260 = vmatpush1.bf16.msra.mxu0 %v18852_v33 }
 0xf68   :  { %14261 = vmatprep.subr.bf16.mxu0 %v18857_v31 }
 0xf6b   :  { %14262 = vmatpush1.bf16.msra.mxu0 %v18855_v16  ;;  %v19075_v16 = vmov 0.0  }
 0xf6c   :  { %14263 = vmatprep.subr.bf16.mxu0 %v18860_v48 }
 0xf6f   :  { %14264 = vmatpush1.bf16.msra.mxu0 %v18858_v2 }
 0xf70   :  { %14265 = vmatprep.subr.bf16.mxu0 %v18863_v39 }
 0xf73   :  { %14266 = vmatpush1.bf16.msra.mxu0 %v18861_v25  ;;  %v12627_v49 = vpop.f32.mrb[148].mxu1 }
 0xf74   :  { %v12629_v19 = vpop.f32.mrb[149].mxu1  ;;  %14267 = vmatprep.subr.bf16.mxu0 %v18866_v51 }
 0xf75   :  { %v12426_v12 = vpop.f32.mrb[72].mxu0  ;;  %v12631_v53 = vpop.f32.mrb[150].mxu1 }
 0xf76   :  { %v12628_v30 = vadd.f32 %v12627_v49, %v12426_v12  ;;  %v12428_v6 = vpop.f32.mrb[73].mxu0  ;;  %v12632_v62 = vpop.f32.mrb[151].mxu1 }
 0xf77   :  { %v12630_v37 = vadd.f32 %v12629_v19, %v12428_v6  ;;  %14268 = vmatpush1.bf16.msra.mxu0 %v18864_v38  ;;  %v12430_v23 = vpop.f32.mrb[74].mxu0  ;;  %v14301_v6 = vld [vmem:[#allocation10 + $0x6] sm:$0x3] }
 0xf78   :  { %v12431_v44 = vpop.f32.mrb[75].mxu0  ;;  %14269 = vmatprep.subr.bf16.mxu0 %v18869_v32  ;;  %v14306_v62 = vrot.slane %v14301_v6, %v21039_v36  ;;  %v14310_v23 = vrot.slane %v14301_v6, %v21040_v11 }
 0xf7b   :  { %14270 = vmatpush1.bf16.msra.mxu0 %v18867_v15 }
 0xf7c   :  { %14271 = vmatprep.subr.bf16.mxu0 %v18872_v0 }
 0xf7f   :  { %14272 = vmatpush1.bf16.msra.mxu0 %v18870_v24 }
 0xf80   :  { %14273 = vmatprep.subr.bf16.mxu0 %v18875_v46 }
 0xf83   :  { %14274 = vmatpush1.bf16.msra.mxu0 %v18873_v27 }
 0xf84   :  { %14275 = vmatprep.subr.bf16.mxu0 %v18878_v52 }
 0xf87   :  { %14276 = vmatpush1.bf16.msra.mxu0 %v18876_v29 }
 0xf88   :  { %14277 = vmatprep.subr.bf16.mxu0 %v18881_v7 }
 0xf8b   :  { %14278 = vmatpush1.bf16.msra.mxu0 %v18879_v47 }
 0xf8c   :  { %14279 = vmatprep.subr.bf16.mxu0 %v18884_v14  ;;  %v14321_v14 = vld [vmem:[#allocation11] sm:$0x3] }
 0xf8f   :  { %14280 = vmatpush1.bf16.msra.mxu0 %v18882_v41 }
 0xf90   :  { %14281 = vmatprep.subr.bf16.mxu0 %v18887_v10  ;;  %v14404_v10 = vld [vmem:[#allocation13] sm:$0x3] }
 0xf93   :  { %14282 = vmatpush1.bf16.msra.mxu0 %v18885_v21  ;;  %v14409_v21 = vrot.slane %v14404_v10, %v21039_v36 }
 0xf94   :  { %14283 = vmatprep.subr.bf16.mxu0 %v18890_v60  ;;  %v14413_v60 = vrot.slane %v14404_v10, %v21040_v11 }
 0xf97   :  { %14284 = vmatpush1.bf16.msra.mxu0 %v18888_v57 }
 0xf98   :  { %14285 = vmatprep.subr.bf16.mxu0 %v18893_v63 }
 0xf9b   :  { %14286 = vmatpush1.bf16.msra.mxu0 %v18891_v5 }
 0xf9c   :  { %14287 = vmatprep.subr.bf16.mxu0 %v18896_v1 }
 0xf9f   :  { %14288 = vmatpush1.bf16.msra.mxu0 %v18894_v3 }
 0xfa2   :  { %14290 = vmatmul.mubr.bf16.vlgmr.msra.gmra.mrb[88].mxu0 %v14062_v56 }
 0xfa3   :  { %14397 = vmatprep.mubr.f32.mxu0 %v19075_v16 }
 0xfb3   :  { %v13101_v50 = vpop.f32.mrb[152].mxu1 }
 0xfb4   :  { %v13103_v61 = vpop.f32.mrb[153].mxu1 }
 0xfb5   :  { %v12863_v59 = vpop.f32.mrb[76].mxu0  ;;  %v13105_v58 = vpop.f32.mrb[154].mxu1 }
 0xfb6   :  { %v12870_v35 = vadd.f32 %v12863_v59, %v12628_v30  ;;  %v12865_v40 = vpop.f32.mrb[77].mxu0  ;;  %v13106_v22 = vpop.f32.mrb[155].mxu1 }
 0xfb7   :  { %v12871_v8 = vadd.f32 %v12865_v40, %v12630_v37  ;;  %v12867_v20 = vpop.f32.mrb[78].mxu0 }
 0xfb8   :  { %v12868_v9 = vpop.f32.mrb[79].mxu0  ;;  %v13108_v13 = vadd.f32 %v13101_v50, %v12870_v35 }
 0xfb9   :  { %v13109_v45 = vadd.f32 %v13103_v61, %v12871_v8  ;;  %v15987_v61 = vld [vmem:[#allocation2] ss:$0 sm:$0xff] }
 0xff3   :  { %v13577_v34 = vpop.f32.mrb[156].mxu1 }
 0xff4   :  { %v13579_v54 = vpop.f32.mrb[157].mxu1 }
 0xff5   :  { %v13339_v55 = vpop.f32.mrb[80].mxu0  ;;  %v13581_v42 = vpop.f32.mrb[158].mxu1 }
 0xff6   :  { %v13346_v43 = vadd.f32 %v13339_v55, %v13108_v13  ;;  %v13341_v17 = vpop.f32.mrb[81].mxu0  ;;  %v13582_v28 = vpop.f32.mrb[159].mxu1 }
 0xff7   :  { %v13347_v18 = vadd.f32 %v13341_v17, %v13109_v45  ;;  %v13343_v26 = vpop.f32.mrb[82].mxu0 }
 0xff8   :  { %v13344_v4 = vpop.f32.mrb[83].mxu0  ;;  %v13584_v33 = vadd.f32 %v13577_v34, %v13346_v43 }
 0xff9   :  { %v13585_v31 = vadd.f32 %v13579_v54, %v13347_v18 }
0x1033   :  { %v14053_v48 = vpop.f32.mrb[160].mxu1 }
0x1034   :  { %v14055_v2 = vpop.f32.mrb[161].mxu1 }
0x1035   :  { %v13815_v39 = vpop.f32.mrb[84].mxu0  ;;  %v14057_v25 = vpop.f32.mrb[162].mxu1 }
0x1036   :  { %v13822_v51 = vadd.f32 %v13815_v39, %v13584_v33  ;;  %v13817_v49 = vpop.f32.mrb[85].mxu0  ;;  %v14058_v38 = vpop.f32.mrb[163].mxu1 }
0x1037   :  { %v13823_v19 = vadd.f32 %v13817_v49, %v13585_v31  ;;  %v13819_v32 = vpop.f32.mrb[86].mxu0 }
0x1038   :  { %v13820_v12 = vpop.f32.mrb[87].mxu0  ;;  %v14060_v53 = vadd.f32 %v14053_v48, %v13822_v51 }
0x1039   :  { %v14061_v30 = vadd.f32 %v14055_v2, %v13823_v19 }
0x1075   :  { %v14291_v37 = vpop.f32.mrb[88].mxu0 }
0x1076   :  { %v14298_v15 = vadd.f32 %v14291_v37, %v14060_v53  ;;  %v14293_v44 = vpop.f32.mrb[89].mxu0 }
0x1077   :  { %v14299_v0 = vadd.f32 %v14293_v44, %v14061_v30  ;;  %v14295_v24 = vpop.f32.mrb[90].mxu0 }
0x1078   :  { %v14313_v46 = vadd.f32 %v14306_v62, %v14298_v15  ;;  %v14296_v27 = vpop.f32.mrb[91].mxu0 }
0x1079   :  { %v14314_v52 = vadd.f32 %v14310_v23, %v14299_v0 }
0x107a   :  { %v14317_v29 = vmul.f32 0.01, %v14313_v46  ;;  %vm14315_vm13 = vcmp.ge.f32.partialorder %v14313_v46, 0.0 }
0x107b   :  { %v14318_v7 = vmul.f32 0.01, %v14314_v52  ;;  %vm14316_vm14 = vcmp.ge.f32.partialorder %v14314_v52, 0.0 }
0x107c   :  { %v14319_v41 = vsel %vm14315_vm13, %v14313_v46, %v14317_v29 }
0x107d   :  { %v14320_v47 = vsel %vm14316_vm14, %v14314_v52, %v14318_v7 }
0x107e   :  { %15984 = vmatprep.subr.msk.mxu0 %vm14326_vm15, %v14320_v47 }
0x107f   :  { %15985 = vmatpush1.msk.msra.mxu0 %vm14326_vm15, %v14319_v41 }
0x1080   :  { %15986 = vmatmul.mubr.msk.f32.vlgmr.msra.gmra.mrb[92].mxu0 %vm14322_vm0, %v14321_v14 }
0x1153   :  { %v14399_v57 = vpop.f32.mrb[92].mxu0 }
0x1154   :  { %v14416_v63 = vmul.f32 %v14409_v21, %v14399_v57  ;;  %v14401_v5 = vpop.f32.mrb[93].mxu0 }
0x1155   :  { %v14417_v1 = vmul.f32 %v14413_v60, %v14401_v5 }
0x1156   :  { %v14418_v3 = vsel %vm14326_vm15, %v14416_v63, 0.0 }
0x1157   :  { %v14419_v56 = vsel %vm14326_vm15, %v14417_v1, 0.0 }
0x1158   :  { %v14420_v50 = vadd.f32 %v14419_v56, %v14418_v3 }
0x115a   :  { %14421 = vadd.xlane.f32.xlu0 %v14420_v50 }
0x11e7   :  { %v14422_v59 = vpop.xlane.xlu0 %14421 }
0x11e8   :  { %v14430_v58 = vadd.f32 %v15987_v61, %v14422_v59 }
0x11ea   :  { %14432 = vst.msk [vmem:[%s20923_s10] sm:$0x3] %vm14431_vm1, %v14430_v58 }
0x11eb   :  { %14437 = vsyncpa [#allocation4], 1 }
0x11ec   :  { %14438 = vsyncpa [#allocation6], 1 }
0x11ed   :  { %14439 = vsyncpa [#allocation9], 1 }
0x11ee   :  { %14440 = vsyncpa [#allocation12], 1 }

</bundles_post_ra>
